<compile_context>
chip_gen: v6e
topology: v6e:2x2x1
jax: 0.10.0
libtpu: 0.0.40
codegen_flags: <defaults>
</compile_context>

<pallas_src>
import functools

import jax
import jax.numpy as jnp
from jax import lax
from jax.experimental import pallas as pl
from jax.experimental.pallas import tpu as pltpu

SELU_ALPHA = 1.6732632423543772
SELU_SCALE = 1.0507009873554805

# --- efficient-kan KANLinear defaults (kan2) --------------------------------
GRID_SIZE = 5
SPLINE_ORDER = 3
GRID_RANGE = (-1.0, 1.0)
GRID_H = (GRID_RANGE[1] - GRID_RANGE[0]) / GRID_SIZE            # 0.4
GRID_LO = GRID_RANGE[0] - SPLINE_ORDER * GRID_H                 # first knot = -2.2
N_BASIS = GRID_SIZE + SPLINE_ORDER                              # 8 cubic bases / feature
N_INTERVALS = GRID_SIZE + 2 * SPLINE_ORDER                      # 11 knot intervals


def _pick_tile(m, cap):
    """Largest tile <= cap (multiple of 16) that divides m."""
    if m <= cap:
        return m
    t = cap - (cap % 16)
    while t > 16 and m % t:
        t -= 16
    return t


# =============================================================================
# Fused conv3x3 (pad 1) + bias + 2x2 maxpool + SELU.
# Patch rows arrive grouped by pooling-window position: one tall MXU dot over
# all 4 groups, then the pool is an elementwise max of 4 tile-aligned slices.
# =============================================================================
def _conv_pool_selu_kernel(p_ref, w_ref, b_ref, o_ref):
    _, tm, k = p_ref.shape
    p = p_ref[...].reshape(4 * tm, k)            # merge leading dim (tm % 8 == 0: free)
    z = jnp.dot(p, w_ref[...], preferred_element_type=jnp.float32)   # one MXU push
    # 2x2 maxpool == elementwise max over the 4 pool-position row groups.
    z = jnp.maximum(jnp.maximum(z[:tm], z[tm:2 * tm]),
                    jnp.maximum(z[2 * tm:3 * tm], z[3 * tm:]))
    # SELU is strictly increasing and the bias is per-channel, so
    # selu(maxpool(conv + b)) == maxpool(selu(conv + b)) exactly.
    z = z + b_ref[...]
    neg = SELU_ALPHA * (jnp.exp(jnp.minimum(z, 0.0)) - 1.0)   # overflow-safe exp
    o_ref[...] = (SELU_SCALE * jnp.where(z > 0.0, z, neg)).astype(o_ref.dtype)


def conv3x3_selu_pool(x_nhwc, w_fused, bias_row, *, tile_cap=2048):
    """x_nhwc: [B,H,W,Cin] bf16; w_fused: [9*Cin, Cout] bf16 (channel-major
    (cin,kh,kw) row order); bias_row: [1, Cout] f32.
    Returns SELU(maxpool2(conv3x3(x))) as NHWC [B, H//2, W//2, Cout] bf16."""
    B, H, W, Cin = x_nhwc.shape
    Cout = w_fused.shape[1]
    assert H % 2 == 0 and W % 2 == 0
    Ho, Wo = H // 2, W // 2
    M, K = B * Ho * Wo, 9 * Cin
    assert w_fused.shape[0] == K

    # One XLA op builds all 3x3 patches.  Feature order is channel-major
    # (cin, kh, kw); prepare_params lays the conv weight out to match.
    patches = lax.conv_general_dilated_patches(
        x_nhwc, filter_shape=(3, 3), window_strides=(1, 1),
        padding=((1, 1), (1, 1)),
        dimension_numbers=("NHWC", "HWIO", "NHWC"))            # (B, H, W, 9*Cin)
    # Group rows by 2x2 pooling-window position -> (4, M, 9*Cin).
    p = patches.reshape(B, Ho, 2, Wo, 2, K)
    p = jnp.transpose(p, (2, 4, 0, 1, 3, 5)).reshape(4, M, K)
    # TODO(synk): fold this grouping + the patches op into the kernel with a
    # halo'd NHWC input block to also remove the small patch-slab round trip.

    tm = _pick_tile(M, tile_cap)                 # single block at B=2
    assert M % tm == 0, f"conv tile {tm} must divide M={M}"

    y = pl.pallas_call(
        _conv_pool_selu_kernel,
        out_shape=jax.ShapeDtypeStruct((M, Cout), jnp.bfloat16),
        grid_spec=pltpu.PrefetchScalarGridSpec(
            num_scalar_prefetch=0,
            grid=(M // tm,),
            in_specs=[
                pl.BlockSpec((4, tm, K), lambda i: (0, i, 0)),
                pl.BlockSpec((K, Cout), lambda i: (0, 0)),
                pl.BlockSpec((1, Cout), lambda i: (0, 0)),
            ],
            out_specs=pl.BlockSpec((tm, Cout), lambda i: (i, 0)),
        ),
        compiler_params=pltpu.CompilerParams(
            dimension_semantics=("parallel",)),
    )(p, w_fused, bias_row)
    return y.reshape(B, Ho, Wo, Cout)


# =============================================================================
# Fused head: kan1 (plain Linear 4096->256) + kan2 (KANLinear 256->classes).
# Single pallas_call, no grid: both bf16 weights (2 MB + 0.6 MB) live in VMEM,
# kan1's result stays in registers/VMEM and feeds the SiLU + B-spline basis
# and the second MXU dot directly.  Output padded to a lane-dense 128.
# =============================================================================
def _kan_head_kernel(x_ref, w1_ref, b1_ref, w2_ref, o_ref):
    # kan1: bf16 weight stream, f32 accumulation.
    h = jnp.dot(x_ref[...], w1_ref[...],
                preferred_element_type=jnp.float32) + b1_ref[...]       # (B, 256)

    # kan2 base branch.
    silu = h * jax.nn.sigmoid(h)

    # Closed-form uniform-knot cubic B-spline bases (== Cox-de Boor on the
    # uniform extended grid).  u is clamped so off-span lanes stay bounded.
    t = (h - GRID_LO) * (1.0 / GRID_H)
    in_span = (t >= 0.0) & (t < float(N_INTERVALS))
    tc = jnp.clip(t, 0.0, float(N_INTERVALS))
    m = jnp.minimum(jnp.floor(tc), float(N_INTERVALS - 1))
    u = tc - m                                   # in [0, 1]
    m_i = m.astype(jnp.int32)
    u2 = u * u
    u3 = u2 * u
    omu = 1.0 - u
    sixth = 1.0 / 6.0
    pieces = (
        omu * omu * omu * sixth,                           # basis j = m-3
        (3.0 * u3 - 6.0 * u2 + 4.0) * sixth,               # basis j = m-2
        (-3.0 * u3 + 3.0 * u2 + 3.0 * u + 1.0) * sixth,    # basis j = m-1
        u3 * sixth,                                        # basis j = m
    )

    feats = [silu]
    for j in range(N_BASIS):
        bj = jnp.zeros_like(h)
        for r in range(4):
            bj = bj + jnp.where((m_i == j + 3 - r) & in_span, pieces[r], 0.0)
        feats.append(bj)

    a = jnp.concatenate(feats, axis=1).astype(jnp.bfloat16)    # (B, 9*256)
    o_ref[...] = jnp.dot(a, w2_ref[...], preferred_element_type=jnp.float32)


def kan_head(x_bf16, w1, b1, w2):
    B = x_bf16.shape[0]
    out_pad = w2.shape[1]
    return pl.pallas_call(
        _kan_head_kernel,
        out_shape=jax.ShapeDtypeStruct((B, out_pad), jnp.float32),
    )(x_bf16, w1, b1, w2)


# =============================================================================
# Parameters: PyTorch-native layouts, then one-time pre-layout.
# =============================================================================
def init_torch_params(key, num_classes):
    ks = jax.random.split(key, 9)
    p = {}
    p["conv1_w"] = 0.10 * jax.random.normal(ks[0], (32, 3, 3, 3), jnp.float32)   # OIHW
    p["conv1_b"] = 0.10 * jax.random.normal(ks[1], (32,), jnp.float32)
    p["conv2_w"] = 0.05 * jax.random.normal(ks[2], (64, 32, 3, 3), jnp.float32)
    p["conv2_b"] = 0.10 * jax.random.normal(ks[3], (64,), jnp.float32)
    in1 = 64 * 8 * 8
    p["kan1_w"] = 0.02 * jax.random.normal(ks[4], (256, in1), jnp.float32)        # nn.Linear
    p["kan1_b"] = 0.02 * jax.random.normal(ks[5], (256,), jnp.float32)
    p["kan2_base_w"] = 0.05 * jax.random.normal(ks[6], (num_classes, 256), jnp.float32)
    p["kan2_spline_w"] = 0.05 * jax.random.normal(
        ks[7], (num_classes, 256, N_BASIS), jnp.float32)
    p["kan2_spline_scaler"] = 1.0 + 0.01 * jax.random.normal(
        ks[8], (num_classes, 256), jnp.float32)
    return p


def prepare_params(p, num_classes):
    """One-time weight pre-layout (outside the jitted forward).
    NOTE: weights/activations are streamed as bf16; expect ~1e-2 relative
    difference vs an f32 PyTorch reference (tolerance-test, don't bit-compare)."""
    q = {}
    # Conv weights: OIHW -> (Cin, KH, KW, Cout) -> [9*Cin, Cout] bf16, matching
    # conv_general_dilated_patches' channel-major (cin, kh, kw) feature order.
    q["conv1_w"] = jnp.transpose(p["conv1_w"], (1, 2, 3, 0)).reshape(9 * 3, 32).astype(jnp.bfloat16)
    q["conv1_b"] = p["conv1_b"].reshape(1, 32)
    q["conv2_w"] = jnp.transpose(p["conv2_w"], (1, 2, 3, 0)).reshape(9 * 32, 64).astype(jnp.bfloat16)
    q["conv2_b"] = p["conv2_b"].reshape(1, 64)

    # kan1 (plain Linear): fold the NCHW flatten permutation into the weight
    # columns (activations stay NHWC), transpose to [IN, OUT], bf16.
    c2, hp, wp, out1 = 64, 8, 8, 256
    w1 = p["kan1_w"].reshape(out1, c2, hp, wp)
    w1 = jnp.transpose(w1, (0, 2, 3, 1)).reshape(out1, c2 * hp * wp)   # NHWC columns
    q["kan1_w"] = jnp.transpose(w1).astype(jnp.bfloat16)               # [4096, 256]
    q["kan1_b"] = p["kan1_b"].reshape(1, out1)
    # TODO(synk): optional int8 (v5e/v6e) / fp8 (v7x) kan1 weight quantization
    # would halve the dominant weight stream; needs accuracy validation.

    # kan2 (KANLinear): fold scaler, fuse base + 8 spline slices into one
    # [9*IN, OUT_pad] bf16 operand, pad OUT to a lane-dense 128.
    out_pad = max(128, ((num_classes + 127) // 128) * 128)
    scaled = p["kan2_spline_w"] * p["kan2_spline_scaler"][..., None]   # [OUT, IN, 8]
    blocks = [jnp.transpose(p["kan2_base_w"])]                         # [IN, OUT]
    blocks += [jnp.transpose(scaled[:, :, j]) for j in range(N_BASIS)]
    w2 = jnp.concatenate(blocks, axis=0)                               # [9*IN, OUT]
    w2 = jnp.pad(w2, ((0, 0), (0, out_pad - num_classes)))
    q["kan2_w"] = w2.astype(jnp.bfloat16)                              # [2304, out_pad]
    return q


# =============================================================================
# Full forward
# =============================================================================
@functools.partial(jax.jit, static_argnames=("num_classes",))
def cnnkan_forward(x_nchw, params, *, num_classes):
    x = jnp.transpose(x_nchw, (0, 2, 3, 1)).astype(jnp.bfloat16)        # NCHW -> NHWC
    x = conv3x3_selu_pool(x, params["conv1_w"], params["conv1_b"])      # SELU(conv1)+pool1
    x = conv3x3_selu_pool(x, params["conv2_w"], params["conv2_b"])      # SELU(conv2)+pool2
    b = x.shape[0]
    x = x.reshape(b, -1)              # NHWC flatten; NCHW permutation folded into kan1_w
    y = kan_head(x, params["kan1_w"], params["kan1_b"], params["kan2_w"])   # kan1+kan2 fused
    return y[:, :num_classes]
    # TODO(synk): the module's host-side time.time() instrumentation
    # (cumulative_time1/2, reset_timers) has no on-device equivalent and is omitted.


if __name__ == "__main__":
    num_classes = 10
    key = jax.random.PRNGKey(0)
    pkey, xkey = jax.random.split(key)

    torch_params = init_torch_params(pkey, num_classes)
    params = prepare_params(torch_params, num_classes)      # one-time pre-layout

    x = jax.random.normal(xkey, (2, 3, 32, 32), jnp.float32)    # NCHW, like PyTorch
    logits = cnnkan_forward(x, params, num_classes=num_classes)
    jax.block_until_ready(logits)

    assert logits.shape == (2, num_classes), logits.shape
    assert bool(jnp.all(jnp.isfinite(logits)))
    print("KERNEL_OK")
</pallas_src>

<mosaic_0001>
module attributes {stable_mosaic.version = 11 : i64} {
  func.func @_conv_pool_selu_kernel(%arg0: i32, %arg1: memref<4x512x27xbf16, #tpu.memory_space<vmem>>, %arg2: memref<27x32xbf16, #tpu.memory_space<vmem>>, %arg3: memref<1x32xf32, #tpu.memory_space<vmem>>, %arg4: memref<512x32xbf16, #tpu.memory_space<vmem>>) attributes {dimension_semantics = [#tpu.dimension_semantics<parallel>], iteration_bounds = array<i64: 1>, scalar_prefetch = 0 : i64, scratch_operands = 0 : i64, tpu.core_type = #tpu.core_type<tc>, window_params = [{transform_indices = @transform_0, window_bounds = array<i64: 4, 512, 27>}, {pipeline_mode = #tpu.pipeline_mode<synchronous>, transform_indices = @transform_1, window_bounds = array<i64: 27, 32>}, {pipeline_mode = #tpu.pipeline_mode<synchronous>, transform_indices = @transform_2, window_bounds = array<i64: 1, 32>}, {transform_indices = @transform_3, window_bounds = array<i64: 512, 32>}]} {
    %c0 = arith.constant 0 : index
    %c0_0 = arith.constant 0 : index
    %c0_1 = arith.constant 0 : index
    %0 = vector.load %arg1[%c0, %c0_0, %c0_1] : memref<4x512x27xbf16, #tpu.memory_space<vmem>>, vector<4x512x27xbf16>
    %1 = vector.shape_cast %0 : vector<4x512x27xbf16> to vector<2048x27xbf16>
    %c0_2 = arith.constant 0 : index
    %c0_3 = arith.constant 0 : index
    %2 = vector.load %arg2[%c0_2, %c0_3] : memref<27x32xbf16, #tpu.memory_space<vmem>>, vector<27x32xbf16>
    %cst = arith.constant dense<0.000000e+00> : vector<2048x32xf32>
    %3 = tpu.matmul %1, %2, %cst {dimension_numbers = #tpu.dot_dimension_numbers<[1], [0], [0], [1], [0, 0, 1, 1], [], []>} : vector<2048x27xbf16>, vector<27x32xbf16>, vector<2048x32xf32> -> vector<2048x32xf32>
    %4 = vector.extract_strided_slice %3 {offsets = [0, 0], sizes = [512, 32], strides = [1, 1]} : vector<2048x32xf32> to vector<512x32xf32>
    %5 = vector.extract_strided_slice %3 {offsets = [512, 0], sizes = [512, 32], strides = [1, 1]} : vector<2048x32xf32> to vector<512x32xf32>
    %6 = arith.maximumf %4, %5 : vector<512x32xf32>
    %7 = vector.extract_strided_slice %3 {offsets = [1024, 0], sizes = [512, 32], strides = [1, 1]} : vector<2048x32xf32> to vector<512x32xf32>
    %8 = vector.extract_strided_slice %3 {offsets = [1536, 0], sizes = [512, 32], strides = [1, 1]} : vector<2048x32xf32> to vector<512x32xf32>
    %9 = arith.maximumf %7, %8 : vector<512x32xf32>
    %10 = arith.maximumf %6, %9 : vector<512x32xf32>
    %c0_4 = arith.constant 0 : index
    %c0_5 = arith.constant 0 : index
    %11 = vector.load %arg3[%c0_4, %c0_5] : memref<1x32xf32, #tpu.memory_space<vmem>>, vector<1x32xf32>
    %12 = vector.broadcast %11 : vector<1x32xf32> to vector<512x32xf32>
    %13 = arith.addf %10, %12 : vector<512x32xf32>
    %cst_6 = arith.constant 0.000000e+00 : f32
    %14 = vector.broadcast %cst_6 : f32 to vector<512x32xf32>
    %15 = arith.minimumf %13, %14 : vector<512x32xf32>
    %16 = math.exp %15 : vector<512x32xf32>
    %cst_7 = arith.constant 1.000000e+00 : f32
    %17 = vector.broadcast %cst_7 : f32 to vector<512x32xf32>
    %18 = arith.subf %16, %17 : vector<512x32xf32>
    %cst_8 = arith.constant 1.67326319 : f32
    %19 = vector.broadcast %cst_8 : f32 to vector<512x32xf32>
    %20 = arith.mulf %19, %18 : vector<512x32xf32>
    %cst_9 = arith.constant 0.000000e+00 : f32
    %21 = vector.broadcast %cst_9 : f32 to vector<512x32xf32>
    %22 = arith.cmpf ogt, %13, %21 : vector<512x32xf32>
    %23 = arith.select %22, %13, %20 : vector<512x32xi1>, vector<512x32xf32>
    %cst_10 = arith.constant 1.05070102 : f32
    %24 = vector.broadcast %cst_10 : f32 to vector<512x32xf32>
    %25 = arith.mulf %24, %23 : vector<512x32xf32>
    %26 = arith.truncf %25 : vector<512x32xf32> to vector<512x32xbf16>
    %c0_11 = arith.constant 0 : index
    %c0_12 = arith.constant 0 : index
    %27 = vector.load %arg4[%c0_11, %c0_12] : memref<512x32xbf16, #tpu.memory_space<vmem>>, vector<512x32xbf16>
    tpu.vector_store %arg4[%c0_11, %c0_12], %26 {strides = array<i32>} : memref<512x32xbf16, #tpu.memory_space<vmem>>, vector<512x32xbf16>,
    return
  }
  func.func @transform_0(%arg0: i32) -> (i32, i32, i32) {
    %c0_i32 = arith.constant 0 : i32
    %c0_i32_0 = arith.constant 0 : i32
    %c0_i32_1 = arith.constant 0 : i32
    return %c0_i32, %arg0, %c0_i32_0 : i32, i32, i32
  }
  func.func @transform_1(%arg0: i32) -> (i32, i32) {
    %c0_i32 = arith.constant 0 : i32
    %c0_i32_0 = arith.constant 0 : i32
    %c0_i32_1 = arith.constant 0 : i32
    return %c0_i32, %c0_i32_0 : i32, i32
  }
  func.func @transform_2(%arg0: i32) -> (i32, i32) {
    %c0_i32 = arith.constant 0 : i32
    %c0_i32_0 = arith.constant 0 : i32
    %c0_i32_1 = arith.constant 0 : i32
    return %c0_i32, %c0_i32_0 : i32, i32
  }
  func.func @transform_3(%arg0: i32) -> (i32, i32) {
    %c0_i32 = arith.constant 0 : i32
    %c0_i32_0 = arith.constant 0 : i32
    return %arg0, %c0_i32 : i32, i32
  }
}

module attributes {stable_mosaic.version = 11 : i64} {
  func.func @_conv_pool_selu_kernel(%arg0: i32, %arg1: memref<4x128x288xbf16, #tpu.memory_space<vmem>>, %arg2: memref<288x64xbf16, #tpu.memory_space<vmem>>, %arg3: memref<1x64xf32, #tpu.memory_space<vmem>>, %arg4: memref<128x64xbf16, #tpu.memory_space<vmem>>) attributes {dimension_semantics = [#tpu.dimension_semantics<parallel>], iteration_bounds = array<i64: 1>, scalar_prefetch = 0 : i64, scratch_operands = 0 : i64, tpu.core_type = #tpu.core_type<tc>, window_params = [{transform_indices = @transform_0, window_bounds = array<i64: 4, 128, 288>}, {pipeline_mode = #tpu.pipeline_mode<synchronous>, transform_indices = @transform_1, window_bounds = array<i64: 288, 64>}, {pipeline_mode = #tpu.pipeline_mode<synchronous>, transform_indices = @transform_2, window_bounds = array<i64: 1, 64>}, {transform_indices = @transform_3, window_bounds = array<i64: 128, 64>}]} {
    %c0 = arith.constant 0 : index
    %c0_0 = arith.constant 0 : index
    %c0_1 = arith.constant 0 : index
    %0 = vector.load %arg1[%c0, %c0_0, %c0_1] : memref<4x128x288xbf16, #tpu.memory_space<vmem>>, vector<4x128x288xbf16>
    %1 = vector.shape_cast %0 : vector<4x128x288xbf16> to vector<512x288xbf16>
    %c0_2 = arith.constant 0 : index
    %c0_3 = arith.constant 0 : index
    %2 = vector.load %arg2[%c0_2, %c0_3] : memref<288x64xbf16, #tpu.memory_space<vmem>>, vector<288x64xbf16>
    %cst = arith.constant dense<0.000000e+00> : vector<512x64xf32>
    %3 = tpu.matmul %1, %2, %cst {dimension_numbers = #tpu.dot_dimension_numbers<[1], [0], [0], [1], [0, 0, 1, 1], [], []>} : vector<512x288xbf16>, vector<288x64xbf16>, vector<512x64xf32> -> vector<512x64xf32>
    %4 = vector.extract_strided_slice %3 {offsets = [0, 0], sizes = [128, 64], strides = [1, 1]} : vector<512x64xf32> to vector<128x64xf32>
    %5 = vector.extract_strided_slice %3 {offsets = [128, 0], sizes = [128, 64], strides = [1, 1]} : vector<512x64xf32> to vector<128x64xf32>
    %6 = arith.maximumf %4, %5 : vector<128x64xf32>
    %7 = vector.extract_strided_slice %3 {offsets = [256, 0], sizes = [128, 64], strides = [1, 1]} : vector<512x64xf32> to vector<128x64xf32>
    %8 = vector.extract_strided_slice %3 {offsets = [384, 0], sizes = [128, 64], strides = [1, 1]} : vector<512x64xf32> to vector<128x64xf32>
    %9 = arith.maximumf %7, %8 : vector<128x64xf32>
    %10 = arith.maximumf %6, %9 : vector<128x64xf32>
    %c0_4 = arith.constant 0 : index
    %c0_5 = arith.constant 0 : index
    %11 = vector.load %arg3[%c0_4, %c0_5] : memref<1x64xf32, #tpu.memory_space<vmem>>, vector<1x64xf32>
    %12 = vector.broadcast %11 : vector<1x64xf32> to vector<128x64xf32>
    %13 = arith.addf %10, %12 : vector<128x64xf32>
    %cst_6 = arith.constant 0.000000e+00 : f32
    %14 = vector.broadcast %cst_6 : f32 to vector<128x64xf32>
    %15 = arith.minimumf %13, %14 : vector<128x64xf32>
    %16 = math.exp %15 : vector<128x64xf32>
    %cst_7 = arith.constant 1.000000e+00 : f32
    %17 = vector.broadcast %cst_7 : f32 to vector<128x64xf32>
    %18 = arith.subf %16, %17 : vector<128x64xf32>
    %cst_8 = arith.constant 1.67326319 : f32
    %19 = vector.broadcast %cst_8 : f32 to vector<128x64xf32>
    %20 = arith.mulf %19, %18 : vector<128x64xf32>
    %cst_9 = arith.constant 0.000000e+00 : f32
    %21 = vector.broadcast %cst_9 : f32 to vector<128x64xf32>
    %22 = arith.cmpf ogt, %13, %21 : vector<128x64xf32>
    %23 = arith.select %22, %13, %20 : vector<128x64xi1>, vector<128x64xf32>
    %cst_10 = arith.constant 1.05070102 : f32
    %24 = vector.broadcast %cst_10 : f32 to vector<128x64xf32>
    %25 = arith.mulf %24, %23 : vector<128x64xf32>
    %26 = arith.truncf %25 : vector<128x64xf32> to vector<128x64xbf16>
    %c0_11 = arith.constant 0 : index
    %c0_12 = arith.constant 0 : index
    %27 = vector.load %arg4[%c0_11, %c0_12] : memref<128x64xbf16, #tpu.memory_space<vmem>>, vector<128x64xbf16>
    tpu.vector_store %arg4[%c0_11, %c0_12], %26 {strides = array<i32>} : memref<128x64xbf16, #tpu.memory_space<vmem>>, vector<128x64xbf16>,
    return
  }
  func.func @transform_0(%arg0: i32) -> (i32, i32, i32) {
    %c0_i32 = arith.constant 0 : i32
    %c0_i32_0 = arith.constant 0 : i32
    %c0_i32_1 = arith.constant 0 : i32
    return %c0_i32, %arg0, %c0_i32_0 : i32, i32, i32
  }
  func.func @transform_1(%arg0: i32) -> (i32, i32) {
    %c0_i32 = arith.constant 0 : i32
    %c0_i32_0 = arith.constant 0 : i32
    %c0_i32_1 = arith.constant 0 : i32
    return %c0_i32, %c0_i32_0 : i32, i32
  }
  func.func @transform_2(%arg0: i32) -> (i32, i32) {
    %c0_i32 = arith.constant 0 : i32
    %c0_i32_0 = arith.constant 0 : i32
    %c0_i32_1 = arith.constant 0 : i32
    return %c0_i32, %c0_i32_0 : i32, i32
  }
  func.func @transform_3(%arg0: i32) -> (i32, i32) {
    %c0_i32 = arith.constant 0 : i32
    %c0_i32_0 = arith.constant 0 : i32
    return %arg0, %c0_i32 : i32, i32
  }
}

module attributes {stable_mosaic.version = 11 : i64} {
  func.func @_kan_head_kernel(%arg0: memref<2x4096xbf16, #tpu.memory_space<vmem>>, %arg1: memref<4096x256xbf16, #tpu.memory_space<vmem>>, %arg2: memref<1x256xf32, #tpu.memory_space<vmem>>, %arg3: memref<2304x128xbf16, #tpu.memory_space<vmem>>, %arg4: memref<2x128xf32, #tpu.memory_space<vmem>>) attributes {dimension_semantics = [], scalar_prefetch = 0 : i64, scratch_operands = 0 : i64, tpu.core_type = #tpu.core_type<tc>} {
    %c0 = arith.constant 0 : index
    %c0_0 = arith.constant 0 : index
    %0 = vector.load %arg0[%c0, %c0_0] : memref<2x4096xbf16, #tpu.memory_space<vmem>>, vector<2x4096xbf16>
    %c0_1 = arith.constant 0 : index
    %c0_2 = arith.constant 0 : index
    %1 = vector.load %arg1[%c0_1, %c0_2] : memref<4096x256xbf16, #tpu.memory_space<vmem>>, vector<4096x256xbf16>
    %cst = arith.constant dense<0.000000e+00> : vector<2x256xf32>
    %2 = tpu.matmul %0, %1, %cst {dimension_numbers = #tpu.dot_dimension_numbers<[1], [0], [0], [1], [0, 0, 1, 1], [], []>} : vector<2x4096xbf16>, vector<4096x256xbf16>, vector<2x256xf32> -> vector<2x256xf32>
    %c0_3 = arith.constant 0 : index
    %c0_4 = arith.constant 0 : index
    %3 = vector.load %arg2[%c0_3, %c0_4] : memref<1x256xf32, #tpu.memory_space<vmem>>, vector<1x256xf32>
    %4 = vector.broadcast %3 : vector<1x256xf32> to vector<2x256xf32>
    %5 = arith.addf %2, %4 : vector<2x256xf32>
    %6 = arith.negf %5 : vector<2x256xf32>
    %7 = math.exp %6 : vector<2x256xf32>
    %cst_5 = arith.constant 1.000000e+00 : f32
    %8 = vector.broadcast %cst_5 : f32 to vector<2x256xf32>
    %9 = arith.addf %8, %7 : vector<2x256xf32>
    %10 = arith.divf %8, %9 : vector<2x256xf32>
    %11 = arith.mulf %5, %10 : vector<2x256xf32>
    %cst_6 = arith.constant -2.200000e+00 : f32
    %12 = vector.broadcast %cst_6 : f32 to vector<2x256xf32>
    %13 = arith.subf %5, %12 : vector<2x256xf32>
    %cst_7 = arith.constant 2.500000e+00 : f32
    %14 = vector.broadcast %cst_7 : f32 to vector<2x256xf32>
    %15 = arith.mulf %13, %14 : vector<2x256xf32>
    %cst_8 = arith.constant 0.000000e+00 : f32
    %16 = vector.broadcast %cst_8 : f32 to vector<2x256xf32>
    %17 = arith.cmpf oge, %15, %16 : vector<2x256xf32>
    %cst_9 = arith.constant 1.100000e+01 : f32
    %18 = vector.broadcast %cst_9 : f32 to vector<2x256xf32>
    %19 = arith.cmpf olt, %15, %18 : vector<2x256xf32>
    %20 = arith.andi %17, %19 : vector<2x256xi1>
    %cst_10 = arith.constant 0.000000e+00 : f32
    %cst_11 = arith.constant 1.100000e+01 : f32
    %21 = vector.broadcast %cst_10 : f32 to vector<2x256xf32>
    %22 = arith.maximumf %21, %15 : vector<2x256xf32>
    %23 = vector.broadcast %cst_11 : f32 to vector<2x256xf32>
    %24 = arith.minimumf %23, %22 : vector<2x256xf32>
    %25 = math.floor %24 : vector<2x256xf32>
    %cst_12 = arith.constant 1.000000e+01 : f32
    %26 = vector.broadcast %cst_12 : f32 to vector<2x256xf32>
    %27 = arith.minimumf %25, %26 : vector<2x256xf32>
    %28 = arith.subf %24, %27 : vector<2x256xf32>
    %29 = arith.fptosi %27 : vector<2x256xf32> to vector<2x256xi32>
    %30 = arith.mulf %28, %28 : vector<2x256xf32>
    %31 = arith.mulf %30, %28 : vector<2x256xf32>
    %cst_13 = arith.constant 1.000000e+00 : f32
    %32 = vector.broadcast %cst_13 : f32 to vector<2x256xf32>
    %33 = arith.subf %32, %28 : vector<2x256xf32>
    %34 = arith.mulf %33, %33 : vector<2x256xf32>
    %35 = arith.mulf %34, %33 : vector<2x256xf32>
    %cst_14 = arith.constant 0.166666672 : f32
    %36 = vector.broadcast %cst_14 : f32 to vector<2x256xf32>
    %37 = arith.mulf %35, %36 : vector<2x256xf32>
    %cst_15 = arith.constant 3.000000e+00 : f32
    %38 = vector.broadcast %cst_15 : f32 to vector<2x256xf32>
    %39 = arith.mulf %38, %31 : vector<2x256xf32>
    %cst_16 = arith.constant 6.000000e+00 : f32
    %40 = vector.broadcast %cst_16 : f32 to vector<2x256xf32>
    %41 = arith.mulf %40, %30 : vector<2x256xf32>
    %42 = arith.subf %39, %41 : vector<2x256xf32>
    %cst_17 = arith.constant 4.000000e+00 : f32
    %43 = vector.broadcast %cst_17 : f32 to vector<2x256xf32>
    %44 = arith.addf %42, %43 : vector<2x256xf32>
    %cst_18 = arith.constant 0.166666672 : f32
    %45 = vector.broadcast %cst_18 : f32 to vector<2x256xf32>
    %46 = arith.mulf %44, %45 : vector<2x256xf32>
    %cst_19 = arith.constant -3.000000e+00 : f32
    %47 = vector.broadcast %cst_19 : f32 to vector<2x256xf32>
    %48 = arith.mulf %47, %31 : vector<2x256xf32>
    %cst_20 = arith.constant 3.000000e+00 : f32
    %49 = vector.broadcast %cst_20 : f32 to vector<2x256xf32>
    %50 = arith.mulf %49, %30 : vector<2x256xf32>
    %51 = arith.addf %48, %50 : vector<2x256xf32>
    %cst_21 = arith.constant 3.000000e+00 : f32
    %52 = vector.broadcast %cst_21 : f32 to vector<2x256xf32>
    %53 = arith.mulf %52, %28 : vector<2x256xf32>
    %54 = arith.addf %51, %53 : vector<2x256xf32>
    %cst_22 = arith.constant 1.000000e+00 : f32
    %55 = vector.broadcast %cst_22 : f32 to vector<2x256xf32>
    %56 = arith.addf %54, %55 : vector<2x256xf32>
    %cst_23 = arith.constant 0.166666672 : f32
    %57 = vector.broadcast %cst_23 : f32 to vector<2x256xf32>
    %58 = arith.mulf %56, %57 : vector<2x256xf32>
    %cst_24 = arith.constant 0.166666672 : f32
    %59 = vector.broadcast %cst_24 : f32 to vector<2x256xf32>
    %60 = arith.mulf %31, %59 : vector<2x256xf32>
    %cst_25 = arith.constant 0.000000e+00 : f32
    %61 = vector.broadcast %cst_25 : f32 to vector<2x256xf32>
    %c3_i32 = arith.constant 3 : i32
    %62 = vector.broadcast %c3_i32 : i32 to vector<2x256xi32>
    %63 = arith.cmpi eq, %29, %62 : vector<2x256xi32>
    %64 = arith.andi %63, %20 : vector<2x256xi1>
    %cst_26 = arith.constant 0.000000e+00 : f32
    %65 = vector.broadcast %cst_26 : f32 to vector<2x256xf32>
    %66 = arith.select %64, %37, %65 : vector<2x256xi1>, vector<2x256xf32>
    %67 = arith.addf %61, %66 : vector<2x256xf32>
    %c2_i32 = arith.constant 2 : i32
    %68 = vector.broadcast %c2_i32 : i32 to vector<2x256xi32>
    %69 = arith.cmpi eq, %29, %68 : vector<2x256xi32>
    %70 = arith.andi %69, %20 : vector<2x256xi1>
    %cst_27 = arith.constant 0.000000e+00 : f32
    %71 = vector.broadcast %cst_27 : f32 to vector<2x256xf32>
    %72 = arith.select %70, %46, %71 : vector<2x256xi1>, vector<2x256xf32>
    %73 = arith.addf %67, %72 : vector<2x256xf32>
    %c1_i32 = arith.constant 1 : i32
    %74 = vector.broadcast %c1_i32 : i32 to vector<2x256xi32>
    %75 = arith.cmpi eq, %29, %74 : vector<2x256xi32>
    %76 = arith.andi %75, %20 : vector<2x256xi1>
    %cst_28 = arith.constant 0.000000e+00 : f32
    %77 = vector.broadcast %cst_28 : f32 to vector<2x256xf32>
    %78 = arith.select %76, %58, %77 : vector<2x256xi1>, vector<2x256xf32>
    %79 = arith.addf %73, %78 : vector<2x256xf32>
    %c0_i32 = arith.constant 0 : i32
    %80 = vector.broadcast %c0_i32 : i32 to vector<2x256xi32>
    %81 = arith.cmpi eq, %29, %80 : vector<2x256xi32>
    %82 = arith.andi %81, %20 : vector<2x256xi1>
    %cst_29 = arith.constant 0.000000e+00 : f32
    %83 = vector.broadcast %cst_29 : f32 to vector<2x256xf32>
    %84 = arith.select %82, %60, %83 : vector<2x256xi1>, vector<2x256xf32>
    %85 = arith.addf %79, %84 : vector<2x256xf32>
    %cst_30 = arith.constant 0.000000e+00 : f32
    %86 = vector.broadcast %cst_30 : f32 to vector<2x256xf32>
    %c4_i32 = arith.constant 4 : i32
    %87 = vector.broadcast %c4_i32 : i32 to vector<2x256xi32>
    %88 = arith.cmpi eq, %29, %87 : vector<2x256xi32>
    %89 = arith.andi %88, %20 : vector<2x256xi1>
    %cst_31 = arith.constant 0.000000e+00 : f32
    %90 = vector.broadcast %cst_31 : f32 to vector<2x256xf32>
    %91 = arith.select %89, %37, %90 : vector<2x256xi1>, vector<2x256xf32>
    %92 = arith.addf %86, %91 : vector<2x256xf32>
    %c3_i32_32 = arith.constant 3 : i32
    %93 = vector.broadcast %c3_i32_32 : i32 to vector<2x256xi32>
    %94 = arith.cmpi eq, %29, %93 : vector<2x256xi32>
    %95 = arith.andi %94, %20 : vector<2x256xi1>
    %cst_33 = arith.constant 0.000000e+00 : f32
    %96 = vector.broadcast %cst_33 : f32 to vector<2x256xf32>
    %97 = arith.select %95, %46, %96 : vector<2x256xi1>, vector<2x256xf32>
    %98 = arith.addf %92, %97 : vector<2x256xf32>
    %c2_i32_34 = arith.constant 2 : i32
    %99 = vector.broadcast %c2_i32_34 : i32 to vector<2x256xi32>
    %100 = arith.cmpi eq, %29, %99 : vector<2x256xi32>
    %101 = arith.andi %100, %20 : vector<2x256xi1>
    %cst_35 = arith.constant 0.000000e+00 : f32
    %102 = vector.broadcast %cst_35 : f32 to vector<2x256xf32>
    %103 = arith.select %101, %58, %102 : vector<2x256xi1>, vector<2x256xf32>
    %104 = arith.addf %98, %103 : vector<2x256xf32>
    %c1_i32_36 = arith.constant 1 : i32
    %105 = vector.broadcast %c1_i32_36 : i32 to vector<2x256xi32>
    %106 = arith.cmpi eq, %29, %105 : vector<2x256xi32>
    %107 = arith.andi %106, %20 : vector<2x256xi1>
    %cst_37 = arith.constant 0.000000e+00 : f32
    %108 = vector.broadcast %cst_37 : f32 to vector<2x256xf32>
    %109 = arith.select %107, %60, %108 : vector<2x256xi1>, vector<2x256xf32>
    %110 = arith.addf %104, %109 : vector<2x256xf32>
    %cst_38 = arith.constant 0.000000e+00 : f32
    %111 = vector.broadcast %cst_38 : f32 to vector<2x256xf32>
    %c5_i32 = arith.constant 5 : i32
    %112 = vector.broadcast %c5_i32 : i32 to vector<2x256xi32>
    %113 = arith.cmpi eq, %29, %112 : vector<2x256xi32>
    %114 = arith.andi %113, %20 : vector<2x256xi1>
    %cst_39 = arith.constant 0.000000e+00 : f32
    %115 = vector.broadcast %cst_39 : f32 to vector<2x256xf32>
    %116 = arith.select %114, %37, %115 : vector<2x256xi1>, vector<2x256xf32>
    %117 = arith.addf %111, %116 : vector<2x256xf32>
    %c4_i32_40 = arith.constant 4 : i32
    %118 = vector.broadcast %c4_i32_40 : i32 to vector<2x256xi32>
    %119 = arith.cmpi eq, %29, %118 : vector<2x256xi32>
    %120 = arith.andi %119, %20 : vector<2x256xi1>
    %cst_41 = arith.constant 0.000000e+00 : f32
    %121 = vector.broadcast %cst_41 : f32 to vector<2x256xf32>
    %122 = arith.select %120, %46, %121 : vector<2x256xi1>, vector<2x256xf32>
    %123 = arith.addf %117, %122 : vector<2x256xf32>
    %c3_i32_42 = arith.constant 3 : i32
    %124 = vector.broadcast %c3_i32_42 : i32 to vector<2x256xi32>
    %125 = arith.cmpi eq, %29, %124 : vector<2x256xi32>
    %126 = arith.andi %125, %20 : vector<2x256xi1>
    %cst_43 = arith.constant 0.000000e+00 : f32
    %127 = vector.broadcast %cst_43 : f32 to vector<2x256xf32>
    %128 = arith.select %126, %58, %127 : vector<2x256xi1>, vector<2x256xf32>
    %129 = arith.addf %123, %128 : vector<2x256xf32>
    %c2_i32_44 = arith.constant 2 : i32
    %130 = vector.broadcast %c2_i32_44 : i32 to vector<2x256xi32>
    %131 = arith.cmpi eq, %29, %130 : vector<2x256xi32>
    %132 = arith.andi %131, %20 : vector<2x256xi1>
    %cst_45 = arith.constant 0.000000e+00 : f32
    %133 = vector.broadcast %cst_45 : f32 to vector<2x256xf32>
    %134 = arith.select %132, %60, %133 : vector<2x256xi1>, vector<2x256xf32>
    %135 = arith.addf %129, %134 : vector<2x256xf32>
    %cst_46 = arith.constant 0.000000e+00 : f32
    %136 = vector.broadcast %cst_46 : f32 to vector<2x256xf32>
    %c6_i32 = arith.constant 6 : i32
    %137 = vector.broadcast %c6_i32 : i32 to vector<2x256xi32>
    %138 = arith.cmpi eq, %29, %137 : vector<2x256xi32>
    %139 = arith.andi %138, %20 : vector<2x256xi1>
    %cst_47 = arith.constant 0.000000e+00 : f32
    %140 = vector.broadcast %cst_47 : f32 to vector<2x256xf32>
    %141 = arith.select %139, %37, %140 : vector<2x256xi1>, vector<2x256xf32>
    %142 = arith.addf %136, %141 : vector<2x256xf32>
    %c5_i32_48 = arith.constant 5 : i32
    %143 = vector.broadcast %c5_i32_48 : i32 to vector<2x256xi32>
    %144 = arith.cmpi eq, %29, %143 : vector<2x256xi32>
    %145 = arith.andi %144, %20 : vector<2x256xi1>
    %cst_49 = arith.constant 0.000000e+00 : f32
    %146 = vector.broadcast %cst_49 : f32 to vector<2x256xf32>
    %147 = arith.select %145, %46, %146 : vector<2x256xi1>, vector<2x256xf32>
    %148 = arith.addf %142, %147 : vector<2x256xf32>
    %c4_i32_50 = arith.constant 4 : i32
    %149 = vector.broadcast %c4_i32_50 : i32 to vector<2x256xi32>
    %150 = arith.cmpi eq, %29, %149 : vector<2x256xi32>
    %151 = arith.andi %150, %20 : vector<2x256xi1>
    %cst_51 = arith.constant 0.000000e+00 : f32
    %152 = vector.broadcast %cst_51 : f32 to vector<2x256xf32>
    %153 = arith.select %151, %58, %152 : vector<2x256xi1>, vector<2x256xf32>
    %154 = arith.addf %148, %153 : vector<2x256xf32>
    %c3_i32_52 = arith.constant 3 : i32
    %155 = vector.broadcast %c3_i32_52 : i32 to vector<2x256xi32>
    %156 = arith.cmpi eq, %29, %155 : vector<2x256xi32>
    %157 = arith.andi %156, %20 : vector<2x256xi1>
    %cst_53 = arith.constant 0.000000e+00 : f32
    %158 = vector.broadcast %cst_53 : f32 to vector<2x256xf32>
    %159 = arith.select %157, %60, %158 : vector<2x256xi1>, vector<2x256xf32>
    %160 = arith.addf %154, %159 : vector<2x256xf32>
    %cst_54 = arith.constant 0.000000e+00 : f32
    %161 = vector.broadcast %cst_54 : f32 to vector<2x256xf32>
    %c7_i32 = arith.constant 7 : i32
    %162 = vector.broadcast %c7_i32 : i32 to vector<2x256xi32>
    %163 = arith.cmpi eq, %29, %162 : vector<2x256xi32>
    %164 = arith.andi %163, %20 : vector<2x256xi1>
    %cst_55 = arith.constant 0.000000e+00 : f32
    %165 = vector.broadcast %cst_55 : f32 to vector<2x256xf32>
    %166 = arith.select %164, %37, %165 : vector<2x256xi1>, vector<2x256xf32>
    %167 = arith.addf %161, %166 : vector<2x256xf32>
    %c6_i32_56 = arith.constant 6 : i32
    %168 = vector.broadcast %c6_i32_56 : i32 to vector<2x256xi32>
    %169 = arith.cmpi eq, %29, %168 : vector<2x256xi32>
    %170 = arith.andi %169, %20 : vector<2x256xi1>
    %cst_57 = arith.constant 0.000000e+00 : f32
    %171 = vector.broadcast %cst_57 : f32 to vector<2x256xf32>
    %172 = arith.select %170, %46, %171 : vector<2x256xi1>, vector<2x256xf32>
    %173 = arith.addf %167, %172 : vector<2x256xf32>
    %c5_i32_58 = arith.constant 5 : i32
    %174 = vector.broadcast %c5_i32_58 : i32 to vector<2x256xi32>
    %175 = arith.cmpi eq, %29, %174 : vector<2x256xi32>
    %176 = arith.andi %175, %20 : vector<2x256xi1>
    %cst_59 = arith.constant 0.000000e+00 : f32
    %177 = vector.broadcast %cst_59 : f32 to vector<2x256xf32>
    %178 = arith.select %176, %58, %177 : vector<2x256xi1>, vector<2x256xf32>
    %179 = arith.addf %173, %178 : vector<2x256xf32>
    %c4_i32_60 = arith.constant 4 : i32
    %180 = vector.broadcast %c4_i32_60 : i32 to vector<2x256xi32>
    %181 = arith.cmpi eq, %29, %180 : vector<2x256xi32>
    %182 = arith.andi %181, %20 : vector<2x256xi1>
    %cst_61 = arith.constant 0.000000e+00 : f32
    %183 = vector.broadcast %cst_61 : f32 to vector<2x256xf32>
    %184 = arith.select %182, %60, %183 : vector<2x256xi1>, vector<2x256xf32>
    %185 = arith.addf %179, %184 : vector<2x256xf32>
    %cst_62 = arith.constant 0.000000e+00 : f32
    %186 = vector.broadcast %cst_62 : f32 to vector<2x256xf32>
    %c8_i32 = arith.constant 8 : i32
    %187 = vector.broadcast %c8_i32 : i32 to vector<2x256xi32>
    %188 = arith.cmpi eq, %29, %187 : vector<2x256xi32>
    %189 = arith.andi %188, %20 : vector<2x256xi1>
    %cst_63 = arith.constant 0.000000e+00 : f32
    %190 = vector.broadcast %cst_63 : f32 to vector<2x256xf32>
    %191 = arith.select %189, %37, %190 : vector<2x256xi1>, vector<2x256xf32>
    %192 = arith.addf %186, %191 : vector<2x256xf32>
    %c7_i32_64 = arith.constant 7 : i32
    %193 = vector.broadcast %c7_i32_64 : i32 to vector<2x256xi32>
    %194 = arith.cmpi eq, %29, %193 : vector<2x256xi32>
    %195 = arith.andi %194, %20 : vector<2x256xi1>
    %cst_65 = arith.constant 0.000000e+00 : f32
    %196 = vector.broadcast %cst_65 : f32 to vector<2x256xf32>
    %197 = arith.select %195, %46, %196 : vector<2x256xi1>, vector<2x256xf32>
    %198 = arith.addf %192, %197 : vector<2x256xf32>
    %c6_i32_66 = arith.constant 6 : i32
    %199 = vector.broadcast %c6_i32_66 : i32 to vector<2x256xi32>
    %200 = arith.cmpi eq, %29, %199 : vector<2x256xi32>
    %201 = arith.andi %200, %20 : vector<2x256xi1>
    %cst_67 = arith.constant 0.000000e+00 : f32
    %202 = vector.broadcast %cst_67 : f32 to vector<2x256xf32>
    %203 = arith.select %201, %58, %202 : vector<2x256xi1>, vector<2x256xf32>
    %204 = arith.addf %198, %203 : vector<2x256xf32>
    %c5_i32_68 = arith.constant 5 : i32
    %205 = vector.broadcast %c5_i32_68 : i32 to vector<2x256xi32>
    %206 = arith.cmpi eq, %29, %205 : vector<2x256xi32>
    %207 = arith.andi %206, %20 : vector<2x256xi1>
    %cst_69 = arith.constant 0.000000e+00 : f32
    %208 = vector.broadcast %cst_69 : f32 to vector<2x256xf32>
    %209 = arith.select %207, %60, %208 : vector<2x256xi1>, vector<2x256xf32>
    %210 = arith.addf %204, %209 : vector<2x256xf32>
    %cst_70 = arith.constant 0.000000e+00 : f32
    %211 = vector.broadcast %cst_70 : f32 to vector<2x256xf32>
    %c9_i32 = arith.constant 9 : i32
    %212 = vector.broadcast %c9_i32 : i32 to vector<2x256xi32>
    %213 = arith.cmpi eq, %29, %212 : vector<2x256xi32>
    %214 = arith.andi %213, %20 : vector<2x256xi1>
    %cst_71 = arith.constant 0.000000e+00 : f32
    %215 = vector.broadcast %cst_71 : f32 to vector<2x256xf32>
    %216 = arith.select %214, %37, %215 : vector<2x256xi1>, vector<2x256xf32>
    %217 = arith.addf %211, %216 : vector<2x256xf32>
    %c8_i32_72 = arith.constant 8 : i32
    %218 = vector.broadcast %c8_i32_72 : i32 to vector<2x256xi32>
    %219 = arith.cmpi eq, %29, %218 : vector<2x256xi32>
    %220 = arith.andi %219, %20 : vector<2x256xi1>
    %cst_73 = arith.constant 0.000000e+00 : f32
    %221 = vector.broadcast %cst_73 : f32 to vector<2x256xf32>
    %222 = arith.select %220, %46, %221 : vector<2x256xi1>, vector<2x256xf32>
    %223 = arith.addf %217, %222 : vector<2x256xf32>
    %c7_i32_74 = arith.constant 7 : i32
    %224 = vector.broadcast %c7_i32_74 : i32 to vector<2x256xi32>
    %225 = arith.cmpi eq, %29, %224 : vector<2x256xi32>
    %226 = arith.andi %225, %20 : vector<2x256xi1>
    %cst_75 = arith.constant 0.000000e+00 : f32
    %227 = vector.broadcast %cst_75 : f32 to vector<2x256xf32>
    %228 = arith.select %226, %58, %227 : vector<2x256xi1>, vector<2x256xf32>
    %229 = arith.addf %223, %228 : vector<2x256xf32>
    %c6_i32_76 = arith.constant 6 : i32
    %230 = vector.broadcast %c6_i32_76 : i32 to vector<2x256xi32>
    %231 = arith.cmpi eq, %29, %230 : vector<2x256xi32>
    %232 = arith.andi %231, %20 : vector<2x256xi1>
    %cst_77 = arith.constant 0.000000e+00 : f32
    %233 = vector.broadcast %cst_77 : f32 to vector<2x256xf32>
    %234 = arith.select %232, %60, %233 : vector<2x256xi1>, vector<2x256xf32>
    %235 = arith.addf %229, %234 : vector<2x256xf32>
    %cst_78 = arith.constant 0.000000e+00 : f32
    %236 = vector.broadcast %cst_78 : f32 to vector<2x256xf32>
    %c10_i32 = arith.constant 10 : i32
    %237 = vector.broadcast %c10_i32 : i32 to vector<2x256xi32>
    %238 = arith.cmpi eq, %29, %237 : vector<2x256xi32>
    %239 = arith.andi %238, %20 : vector<2x256xi1>
    %cst_79 = arith.constant 0.000000e+00 : f32
    %240 = vector.broadcast %cst_79 : f32 to vector<2x256xf32>
    %241 = arith.select %239, %37, %240 : vector<2x256xi1>, vector<2x256xf32>
    %242 = arith.addf %236, %241 : vector<2x256xf32>
    %c9_i32_80 = arith.constant 9 : i32
    %243 = vector.broadcast %c9_i32_80 : i32 to vector<2x256xi32>
    %244 = arith.cmpi eq, %29, %243 : vector<2x256xi32>
    %245 = arith.andi %244, %20 : vector<2x256xi1>
    %cst_81 = arith.constant 0.000000e+00 : f32
    %246 = vector.broadcast %cst_81 : f32 to vector<2x256xf32>
    %247 = arith.select %245, %46, %246 : vector<2x256xi1>, vector<2x256xf32>
    %248 = arith.addf %242, %247 : vector<2x256xf32>
    %c8_i32_82 = arith.constant 8 : i32
    %249 = vector.broadcast %c8_i32_82 : i32 to vector<2x256xi32>
    %250 = arith.cmpi eq, %29, %249 : vector<2x256xi32>
    %251 = arith.andi %250, %20 : vector<2x256xi1>
    %cst_83 = arith.constant 0.000000e+00 : f32
    %252 = vector.broadcast %cst_83 : f32 to vector<2x256xf32>
    %253 = arith.select %251, %58, %252 : vector<2x256xi1>, vector<2x256xf32>
    %254 = arith.addf %248, %253 : vector<2x256xf32>
    %c7_i32_84 = arith.constant 7 : i32
    %255 = vector.broadcast %c7_i32_84 : i32 to vector<2x256xi32>
    %256 = arith.cmpi eq, %29, %255 : vector<2x256xi32>
    %257 = arith.andi %256, %20 : vector<2x256xi1>
    %cst_85 = arith.constant 0.000000e+00 : f32
    %258 = vector.broadcast %cst_85 : f32 to vector<2x256xf32>
    %259 = arith.select %257, %60, %258 : vector<2x256xi1>, vector<2x256xf32>
    %260 = arith.addf %254, %259 : vector<2x256xf32>
    %261 = tpu.concatenate %11, %85, %110, %135, %160, %185, %210, %235, %260 in 1 : vector<2x256xf32>, vector<2x256xf32>, vector<2x256xf32>, vector<2x256xf32>, vector<2x256xf32>, vector<2x256xf32>, vector<2x256xf32>, vector<2x256xf32>, vector<2x256xf32> -> vector<2x2304xf32>
    %262 = arith.truncf %261 : vector<2x2304xf32> to vector<2x2304xbf16>
    %c0_86 = arith.constant 0 : index
    %c0_87 = arith.constant 0 : index
    %263 = vector.load %arg3[%c0_86, %c0_87] : memref<2304x128xbf16, #tpu.memory_space<vmem>>, vector<2304x128xbf16>
    %cst_88 = arith.constant dense<0.000000e+00> : vector<2x128xf32>
    %264 = tpu.matmul %262, %263, %cst_88 {dimension_numbers = #tpu.dot_dimension_numbers<[1], [0], [0], [1], [0, 0, 1, 1], [], []>} : vector<2x2304xbf16>, vector<2304x128xbf16>, vector<2x128xf32> -> vector<2x128xf32>
    %c0_89 = arith.constant 0 : index
    %c0_90 = arith.constant 0 : index
    %265 = vector.load %arg4[%c0_89, %c0_90] : memref<2x128xf32, #tpu.memory_space<vmem>>, vector<2x128xf32>
    tpu.vector_store %arg4[%c0_89, %c0_90], %264 {strides = array<i32>} : memref<2x128xf32, #tpu.memory_space<vmem>>, vector<2x128xf32>,
    return
  }
}

</mosaic_0001>

<bundles_post_ra>
// kernel: cnnkan_forward.3
= control target key start
LH: loop header
LB: loop body
LE: loop exit
PB: predicated region body
PF: predicated region fallthrough
CT: control target
= control target key end

     0   :  { %vm1311_vm0 = vcmask 1044480   ;;  %vm1312_vm1 = vcmask 1045504   ;;  %v4580_v1 = vmov 65535   ;;  %vm926_vm2 = vcmask 220160   ;;  %s6491_s1 = inlined_call_operand.vmem [shape: bf16[27,32], index: 1, kind: input, shape index: {}]   ;;  %s6492_s0 = inlined_call_operand.vmem [shape: bf16[4,512,27], index: 0, kind: input, shape index: {}]   ;;  %s6493_s2 = inlined_call_operand.vmem [shape: f32[1,32], index: 2, kind: input, shape index: {}]   ;;  %s6494_s3 = inlined_call_operand.vmem [shape: bf16[512,32], index: 3, kind: output, shape index: {}]  }
   0x1   :  { %v4321_v0 = vld [vmem:[%s6491_s1 + $0x8] sm:$0x3f]   ;;  %v1313_v2 = vsel %vm1311_vm0, 4294967295, %v4580_v1  ;;  %v4323_v4 = vld [vmem:[%s6492_s0] sm:$0xff]   ;;  %v4327_v10 = vld [vmem:[%s6492_s0 + $0x10] sm:$0xff]   ;;  %vm3406_vm4 = vcmask 257024  }
   0x2   :  { %v1314_v3 = vsel %vm1312_vm1, %v1313_v2, 0  ;;  %v4322_v6 = vld [vmem:[%s6491_s1] sm:$0xff]   ;;  %4060 = vmatprep.mubr.msk.bf16.mxu0 %vm926_vm2, %v4323_v4  ;;  %v4325_v8 = vld [vmem:[%s6492_s0 + $0x8] sm:$0xff]   ;;  %v4328_v11 = vld [vmem:[%s6492_s0 + $0x210] sm:$0xff]  }
   0x3   :  { %v1316_v5 = vand.u32 %v4321_v0, %v1314_v3  ;;  %v4324_v7 = vld [vmem:[%s6492_s0 + $0x200] sm:$0xff]   ;;  %v4326_v9 = vld [vmem:[%s6492_s0 + $0x208] sm:$0xff]   ;;  %v4329_v12 = vld [vmem:[%s6492_s0 + $0x18] sm:$0xff]  }
   0x4   :  { %4188 = vmatprep.mubr.msk.bf16.mxu1 %vm926_vm2, %v4324_v7  ;;  %v4330_v13 = vld [vmem:[%s6492_s0 + $0x218] sm:$0xff]   ;;  %v4331_v14 = vld [vmem:[%s6492_s0 + $0x20] sm:$0xff]   ;;  %v4333_v16 = vld [vmem:[%s6492_s0 + $0x28] sm:$0xff]  }
   0x5   :  { %4056 = vmatprep.subr.bf16.mxu0 %v1316_v5  ;;  %4316 = vmatprep.subr.bf16.mxu1 %v1316_v5  ;;  %v4332_v15 = vld [vmem:[%s6492_s0 + $0x220] sm:$0xff]   ;;  %v4334_v17 = vld [vmem:[%s6492_s0 + $0x228] sm:$0xff]   ;;  %v4335_v18 = vld [vmem:[%s6492_s0 + $0x30] sm:$0xff]  }
   0x6   :  { %4057 = vmatpush3.bf16.msra.mxu0 %v1316_v5  ;;  %4318 = vmatpush3.bf16.msra.mxu1 %v1316_v5  ;;  %v4336_v19 = vld [vmem:[%s6492_s0 + $0x230] sm:$0xff]   ;;  %v4337_v20 = vld [vmem:[%s6492_s0 + $0x38] sm:$0xff]   ;;  %v4339_v22 = vld [vmem:[%s6492_s0 + $0x40] sm:$0xff]  }
   0x7   :  { %4058 = vmatprep.subr.bf16.mxu0 %v4322_v6  ;;  %4317 = vmatprep.subr.bf16.mxu1 %v4322_v6  ;;  %v4338_v21 = vld [vmem:[%s6492_s0 + $0x238] sm:$0xff]   ;;  %v4340_v23 = vld [vmem:[%s6492_s0 + $0x240] sm:$0xff]   ;;  %v4341_v24 = vld [vmem:[%s6492_s0 + $0x48] sm:$0xff]  }
   0x8   :  { %v4342_v25 = vld [vmem:[%s6492_s0 + $0x248] sm:$0xff]   ;;  %v4343_v26 = vld [vmem:[%s6492_s0 + $0x50] sm:$0xff]   ;;  %v4345_v28 = vld [vmem:[%s6492_s0 + $0x58] sm:$0xff]  }
   0x9   :  { %v4344_v27 = vld [vmem:[%s6492_s0 + $0x250] sm:$0xff]   ;;  %v4346_v29 = vld [vmem:[%s6492_s0 + $0x258] sm:$0xff]   ;;  %v4347_v30 = vld [vmem:[%s6492_s0 + $0x60] sm:$0xff]  }
   0xa   :  { %4059 = vmatpush3.bf16.msra.mxu0 %v4322_v6  ;;  %4319 = vmatpush3.bf16.msra.mxu1 %v4322_v6  ;;  %v4348_v31 = vld [vmem:[%s6492_s0 + $0x260] sm:$0xff]   ;;  %v4349_v32 = vld [vmem:[%s6492_s0 + $0x68] sm:$0xff]   ;;  %v4351_v34 = vld [vmem:[%s6492_s0 + $0x70] sm:$0xff]  }
   0xb   :  { %v4350_v33 = vld [vmem:[%s6492_s0 + $0x268] sm:$0xff]   ;;  %v4352_v35 = vld [vmem:[%s6492_s0 + $0x270] sm:$0xff]   ;;  %v4353_v36 = vld [vmem:[%s6492_s0 + $0x78] sm:$0xff]  }
   0xc   :  { %v4354_v37 = vld [vmem:[%s6492_s0 + $0x278] sm:$0xff]   ;;  %v4355_v38 = vld [vmem:[%s6492_s0 + $0x80] sm:$0xff]   ;;  %v4357_v40 = vld [vmem:[%s6492_s0 + $0x88] sm:$0xff]  }
   0xd   :  { %4061 = vmatmul.mubr.msk.bf16.vlgmr.msra.gmra.mxu0 %vm926_vm2, %v4325_v8  ;;  %4189 = vmatmul.mubr.msk.bf16.vlgmr.msra.gmra.mxu1 %vm926_vm2, %v4326_v9  ;;  %v4356_v39 = vld [vmem:[%s6492_s0 + $0x280] sm:$0xff]   ;;  %v4358_v41 = vld [vmem:[%s6492_s0 + $0x288] sm:$0xff]   ;;  %v4359_v42 = vld [vmem:[%s6492_s0 + $0x90] sm:$0xff]  }
   0xe   :  { %4064 = vmatprep.mubr.msk.bf16.mxu0 %vm926_vm2, %v4327_v10  ;;  %4192 = vmatprep.mubr.msk.bf16.mxu1 %vm926_vm2, %v4328_v11  ;;  %v4360_v43 = vld [vmem:[%s6492_s0 + $0x290] sm:$0xff]   ;;  %v4361_v44 = vld [vmem:[%s6492_s0 + $0x98] sm:$0xff]   ;;  %v4363_v46 = vld [vmem:[%s6492_s0 + $0xa0] sm:$0xff]  }
   0xf   :  { %v4362_v45 = vld [vmem:[%s6492_s0 + $0x298] sm:$0xff]   ;;  %v4364_v47 = vld [vmem:[%s6492_s0 + $0x2a0] sm:$0xff]   ;;  %v4365_v48 = vld [vmem:[%s6492_s0 + $0xa8] sm:$0xff]  }
  0x10   :  { %v4366_v49 = vld [vmem:[%s6492_s0 + $0x2a8] sm:$0xff]   ;;  %v4367_v50 = vld [vmem:[%s6492_s0 + $0xb0] sm:$0xff]   ;;  %v4369_v52 = vld [vmem:[%s6492_s0 + $0xb8] sm:$0xff]  }
  0x11   :  { %v4368_v51 = vld [vmem:[%s6492_s0 + $0x2b0] sm:$0xff]   ;;  %v4370_v53 = vld [vmem:[%s6492_s0 + $0x2b8] sm:$0xff]   ;;  %v4371_v54 = vld [vmem:[%s6492_s0 + $0xc0] sm:$0xff]  }
  0x12   :  { %v4372_v55 = vld [vmem:[%s6492_s0 + $0x2c0] sm:$0xff]   ;;  %v4373_v56 = vld [vmem:[%s6492_s0 + $0xc8] sm:$0xff]   ;;  %v4375_v58 = vld [vmem:[%s6492_s0 + $0xd0] sm:$0xff]  }
  0x13   :  { %v4374_v57 = vld [vmem:[%s6492_s0 + $0x2c8] sm:$0xff]   ;;  %v4376_v59 = vld [vmem:[%s6492_s0 + $0x2d0] sm:$0xff]   ;;  %v4377_v60 = vld [vmem:[%s6492_s0 + $0xd8] sm:$0xff]  }
  0x14   :  { %v4378_v61 = vld [vmem:[%s6492_s0 + $0x2d8] sm:$0xff]   ;;  %v4379_v62 = vld [vmem:[%s6492_s0 + $0xe0] sm:$0xff]   ;;  %v4381_v0 = vld [vmem:[%s6492_s0 + $0xe8] sm:$0xff]  }
  0x15   :  { %4065 = vmatmul.mubr.msk.bf16.gmra.mxu0 %vm926_vm2, %v4329_v12  ;;  %4193 = vmatmul.mubr.msk.bf16.gmra.mxu1 %vm926_vm2, %v4330_v13  ;;  %v4380_v63 = vld [vmem:[%s6492_s0 + $0x2e0] sm:$0xff]   ;;  %v4382_v1 = vld [vmem:[%s6492_s0 + $0x2e8] sm:$0xff]   ;;  %v4383_v2 = vld [vmem:[%s6492_s0 + $0xf0] sm:$0xff]  }
  0x16   :  { %4068 = vmatprep.mubr.msk.bf16.mxu0 %vm926_vm2, %v4331_v14  ;;  %4196 = vmatprep.mubr.msk.bf16.mxu1 %vm926_vm2, %v4332_v15  ;;  %v4384_v3 = vld [vmem:[%s6492_s0 + $0x2f0] sm:$0xff]   ;;  %v4385_v4 = vld [vmem:[%s6492_s0 + $0xf8] sm:$0xff]   ;;  %v4387_v6 = vld [vmem:[%s6492_s0 + $0x100] sm:$0xff]  }
  0x17   :  { %v4386_v5 = vld [vmem:[%s6492_s0 + $0x2f8] sm:$0xff]   ;;  %v4388_v7 = vld [vmem:[%s6492_s0 + $0x300] sm:$0xff]   ;;  %v4389_v8 = vld [vmem:[%s6492_s0 + $0x108] sm:$0xff]  }
  0x18   :  { %v4390_v9 = vld [vmem:[%s6492_s0 + $0x308] sm:$0xff]   ;;  %v4391_v10 = vld [vmem:[%s6492_s0 + $0x110] sm:$0xff]   ;;  %v4393_v12 = vld [vmem:[%s6492_s0 + $0x118] sm:$0xff]  }
  0x19   :  { %v4392_v11 = vld [vmem:[%s6492_s0 + $0x310] sm:$0xff]   ;;  %v4394_v13 = vld [vmem:[%s6492_s0 + $0x318] sm:$0xff]   ;;  %v4395_v14 = vld [vmem:[%s6492_s0 + $0x120] sm:$0xff]  }
  0x1a   :  { %v4396_v15 = vld [vmem:[%s6492_s0 + $0x320] sm:$0xff]  }
  0x1d   :  { %4069 = vmatmul.mubr.msk.bf16.gmra.mxu0 %vm926_vm2, %v4333_v16  ;;  %4197 = vmatmul.mubr.msk.bf16.gmra.mxu1 %vm926_vm2, %v4334_v17  ;;  %v4397_v16 = vld [vmem:[%s6492_s0 + $0x128] sm:$0xff]  }
  0x1e   :  { %4072 = vmatprep.mubr.msk.bf16.mxu0 %vm926_vm2, %v4335_v18  ;;  %4200 = vmatprep.mubr.msk.bf16.mxu1 %vm926_vm2, %v4336_v19  ;;  %v4398_v17 = vld [vmem:[%s6492_s0 + $0x328] sm:$0xff]   ;;  %v4399_v18 = vld [vmem:[%s6492_s0 + $0x130] sm:$0xff]  }
  0x1f   :  { %v4400_v19 = vld [vmem:[%s6492_s0 + $0x330] sm:$0xff]  }
  0x25   :  { %4073 = vmatmul.mubr.msk.bf16.gmra.mxu0 %vm926_vm2, %v4337_v20  ;;  %4201 = vmatmul.mubr.msk.bf16.gmra.mxu1 %vm926_vm2, %v4338_v21  ;;  %v4401_v20 = vld [vmem:[%s6492_s0 + $0x138] sm:$0xff]  }
  0x26   :  { %4076 = vmatprep.mubr.msk.bf16.mxu0 %vm926_vm2, %v4339_v22  ;;  %4204 = vmatprep.mubr.msk.bf16.mxu1 %vm926_vm2, %v4340_v23  ;;  %v4402_v21 = vld [vmem:[%s6492_s0 + $0x338] sm:$0xff]   ;;  %v4403_v22 = vld [vmem:[%s6492_s0 + $0x140] sm:$0xff]  }
  0x27   :  { %v4404_v23 = vld [vmem:[%s6492_s0 + $0x340] sm:$0xff]  }
  0x2d   :  { %4077 = vmatmul.mubr.msk.bf16.gmra.mxu0 %vm926_vm2, %v4341_v24  ;;  %4205 = vmatmul.mubr.msk.bf16.gmra.mxu1 %vm926_vm2, %v4342_v25  ;;  %v4405_v24 = vld [vmem:[%s6492_s0 + $0x148] sm:$0xff]  }
  0x2e   :  { %4080 = vmatprep.mubr.msk.bf16.mxu0 %vm926_vm2, %v4343_v26  ;;  %4208 = vmatprep.mubr.msk.bf16.mxu1 %vm926_vm2, %v4344_v27  ;;  %v4406_v25 = vld [vmem:[%s6492_s0 + $0x348] sm:$0xff]   ;;  %v4407_v26 = vld [vmem:[%s6492_s0 + $0x150] sm:$0xff]  }
  0x2f   :  { %v4408_v27 = vld [vmem:[%s6492_s0 + $0x350] sm:$0xff]  }
  0x35   :  { %4081 = vmatmul.mubr.msk.bf16.gmra.mxu0 %vm926_vm2, %v4345_v28  ;;  %4209 = vmatmul.mubr.msk.bf16.gmra.mxu1 %vm926_vm2, %v4346_v29  ;;  %v4409_v28 = vld [vmem:[%s6492_s0 + $0x158] sm:$0xff]  }
  0x36   :  { %4084 = vmatprep.mubr.msk.bf16.mxu0 %vm926_vm2, %v4347_v30  ;;  %4212 = vmatprep.mubr.msk.bf16.mxu1 %vm926_vm2, %v4348_v31  ;;  %v4410_v29 = vld [vmem:[%s6492_s0 + $0x358] sm:$0xff]   ;;  %v4411_v30 = vld [vmem:[%s6492_s0 + $0x160] sm:$0xff]  }
  0x37   :  { %v4412_v31 = vld [vmem:[%s6492_s0 + $0x360] sm:$0xff]  }
  0x3d   :  { %4085 = vmatmul.mubr.msk.bf16.gmra.mxu0 %vm926_vm2, %v4349_v32  ;;  %4213 = vmatmul.mubr.msk.bf16.gmra.mxu1 %vm926_vm2, %v4350_v33  ;;  %v4413_v32 = vld [vmem:[%s6492_s0 + $0x168] sm:$0xff]  }
  0x3e   :  { %4088 = vmatprep.mubr.msk.bf16.mxu0 %vm926_vm2, %v4351_v34  ;;  %4216 = vmatprep.mubr.msk.bf16.mxu1 %vm926_vm2, %v4352_v35  ;;  %v4414_v33 = vld [vmem:[%s6492_s0 + $0x368] sm:$0xff]   ;;  %v4415_v34 = vld [vmem:[%s6492_s0 + $0x170] sm:$0xff]  }
  0x3f   :  { %v4416_v35 = vld [vmem:[%s6492_s0 + $0x370] sm:$0xff]  }
  0x45   :  { %4089 = vmatmul.mubr.msk.bf16.gmra.mxu0 %vm926_vm2, %v4353_v36  ;;  %4217 = vmatmul.mubr.msk.bf16.gmra.mxu1 %vm926_vm2, %v4354_v37  ;;  %v4417_v36 = vld [vmem:[%s6492_s0 + $0x178] sm:$0xff]  }
  0x46   :  { %4092 = vmatprep.mubr.msk.bf16.mxu0 %vm926_vm2, %v4355_v38  ;;  %4220 = vmatprep.mubr.msk.bf16.mxu1 %vm926_vm2, %v4356_v39  ;;  %v4418_v37 = vld [vmem:[%s6492_s0 + $0x378] sm:$0xff]   ;;  %v4419_v38 = vld [vmem:[%s6492_s0 + $0x180] sm:$0xff]  }
  0x47   :  { %v4420_v39 = vld [vmem:[%s6492_s0 + $0x380] sm:$0xff]  }
  0x4d   :  { %4093 = vmatmul.mubr.msk.bf16.gmra.mxu0 %vm926_vm2, %v4357_v40  ;;  %4221 = vmatmul.mubr.msk.bf16.gmra.mxu1 %vm926_vm2, %v4358_v41  ;;  %v4421_v40 = vld [vmem:[%s6492_s0 + $0x188] sm:$0xff]  }
  0x4e   :  { %4096 = vmatprep.mubr.msk.bf16.mxu0 %vm926_vm2, %v4359_v42  ;;  %4224 = vmatprep.mubr.msk.bf16.mxu1 %vm926_vm2, %v4360_v43  ;;  %v4422_v41 = vld [vmem:[%s6492_s0 + $0x388] sm:$0xff]   ;;  %v4423_v42 = vld [vmem:[%s6492_s0 + $0x190] sm:$0xff]  }
  0x4f   :  { %v4424_v43 = vld [vmem:[%s6492_s0 + $0x390] sm:$0xff]  }
  0x55   :  { %4097 = vmatmul.mubr.msk.bf16.gmra.mxu0 %vm926_vm2, %v4361_v44  ;;  %4225 = vmatmul.mubr.msk.bf16.gmra.mxu1 %vm926_vm2, %v4362_v45 }
  0x56   :  { %4100 = vmatprep.mubr.msk.bf16.mxu0 %vm926_vm2, %v4363_v46  ;;  %4228 = vmatprep.mubr.msk.bf16.mxu1 %vm926_vm2, %v4364_v47 }
  0x5d   :  { %4101 = vmatmul.mubr.msk.bf16.gmra.mxu0 %vm926_vm2, %v4365_v48  ;;  %4229 = vmatmul.mubr.msk.bf16.gmra.mxu1 %vm926_vm2, %v4366_v49 }
  0x5e   :  { %4104 = vmatprep.mubr.msk.bf16.mxu0 %vm926_vm2, %v4367_v50  ;;  %4232 = vmatprep.mubr.msk.bf16.mxu1 %vm926_vm2, %v4368_v51  ;;  %v4425_v50 = vld [vmem:[%s6492_s0 + $0x198] sm:$0xff]  }
  0x5f   :  { %v4426_v51 = vld [vmem:[%s6492_s0 + $0x398] sm:$0xff]  }
  0x65   :  { %4105 = vmatmul.mubr.msk.bf16.gmra.mxu0 %vm926_vm2, %v4369_v52  ;;  %4233 = vmatmul.mubr.msk.bf16.gmra.mxu1 %vm926_vm2, %v4370_v53  ;;  %v4427_v52 = vld [vmem:[%s6492_s0 + $0x1a0] sm:$0xff]  }
  0x66   :  { %4108 = vmatprep.mubr.msk.bf16.mxu0 %vm926_vm2, %v4371_v54  ;;  %4236 = vmatprep.mubr.msk.bf16.mxu1 %vm926_vm2, %v4372_v55  ;;  %v4428_v53 = vld [vmem:[%s6492_s0 + $0x3a0] sm:$0xff]  }
  0x6d   :  { %4109 = vmatmul.mubr.msk.bf16.gmra.mxu0 %vm926_vm2, %v4373_v56  ;;  %4237 = vmatmul.mubr.msk.bf16.gmra.mxu1 %vm926_vm2, %v4374_v57 }
  0x6e   :  { %4112 = vmatprep.mubr.msk.bf16.mxu0 %vm926_vm2, %v4375_v58  ;;  %4240 = vmatprep.mubr.msk.bf16.mxu1 %vm926_vm2, %v4376_v59 }
  0x75   :  { %4113 = vmatmul.mubr.msk.bf16.gmra.mxu0 %vm926_vm2, %v4377_v60  ;;  %4241 = vmatmul.mubr.msk.bf16.gmra.mxu1 %vm926_vm2, %v4378_v61 }
  0x76   :  { %4116 = vmatprep.mubr.msk.bf16.mxu0 %vm926_vm2, %v4379_v62  ;;  %4244 = vmatprep.mubr.msk.bf16.mxu1 %vm926_vm2, %v4380_v63  ;;  %v4429_v62 = vld [vmem:[%s6492_s0 + $0x1a8] sm:$0xff]  }
  0x77   :  { %v4430_v63 = vld [vmem:[%s6492_s0 + $0x3a8] sm:$0xff]  }
  0x7d   :  { %4117 = vmatmul.mubr.msk.bf16.gmra.mxu0 %vm926_vm2, %v4381_v0  ;;  %4245 = vmatmul.mubr.msk.bf16.gmra.mxu1 %vm926_vm2, %v4382_v1  ;;  %v4431_v0 = vld [vmem:[%s6492_s0 + $0x1b0] sm:$0xff]  }
  0x7e   :  { %4120 = vmatprep.mubr.msk.bf16.mxu0 %vm926_vm2, %v4383_v2  ;;  %4248 = vmatprep.mubr.msk.bf16.mxu1 %vm926_vm2, %v4384_v3  ;;  %v4432_v1 = vld [vmem:[%s6492_s0 + $0x3b0] sm:$0xff]  }
  0x85   :  { %4121 = vmatmul.mubr.msk.bf16.gmra.mxu0 %vm926_vm2, %v4385_v4  ;;  %4249 = vmatmul.mubr.msk.bf16.gmra.mxu1 %vm926_vm2, %v4386_v5 }
  0x86   :  { %4124 = vmatprep.mubr.msk.bf16.mxu0 %vm926_vm2, %v4387_v6  ;;  %4252 = vmatprep.mubr.msk.bf16.mxu1 %vm926_vm2, %v4388_v7 }
  0x8d   :  { %4125 = vmatmul.mubr.msk.bf16.gmra.mxu0 %vm926_vm2, %v4389_v8  ;;  %4253 = vmatmul.mubr.msk.bf16.gmra.mxu1 %vm926_vm2, %v4390_v9 }
  0x8e   :  { %4128 = vmatprep.mubr.msk.bf16.mxu0 %vm926_vm2, %v4391_v10  ;;  %4256 = vmatprep.mubr.msk.bf16.mxu1 %vm926_vm2, %v4392_v11  ;;  %v4433_v10 = vld [vmem:[%s6492_s0 + $0x1b8] sm:$0xff]  }
  0x8f   :  { %v4434_v11 = vld [vmem:[%s6492_s0 + $0x3b8] sm:$0xff]  }
  0x95   :  { %4129 = vmatmul.mubr.msk.bf16.gmra.mxu0 %vm926_vm2, %v4393_v12  ;;  %4257 = vmatmul.mubr.msk.bf16.gmra.mxu1 %vm926_vm2, %v4394_v13  ;;  %v4435_v12 = vld [vmem:[%s6492_s0 + $0x1c0] sm:$0xff]  }
  0x96   :  { %4132 = vmatprep.mubr.msk.bf16.mxu0 %vm926_vm2, %v4395_v14  ;;  %4260 = vmatprep.mubr.msk.bf16.mxu1 %vm926_vm2, %v4396_v15  ;;  %v4436_v13 = vld [vmem:[%s6492_s0 + $0x3c0] sm:$0xff]  }
  0x9d   :  { %4133 = vmatmul.mubr.msk.bf16.gmra.mxu0 %vm926_vm2, %v4397_v16  ;;  %4261 = vmatmul.mubr.msk.bf16.gmra.mxu1 %vm926_vm2, %v4398_v17 }
  0x9e   :  { %4136 = vmatprep.mubr.msk.bf16.mxu0 %vm926_vm2, %v4399_v18  ;;  %4264 = vmatprep.mubr.msk.bf16.mxu1 %vm926_vm2, %v4400_v19 }
  0xa5   :  { %4137 = vmatmul.mubr.msk.bf16.gmra.mxu0 %vm926_vm2, %v4401_v20  ;;  %4265 = vmatmul.mubr.msk.bf16.gmra.mxu1 %vm926_vm2, %v4402_v21 }
  0xa6   :  { %4140 = vmatprep.mubr.msk.bf16.mxu0 %vm926_vm2, %v4403_v22  ;;  %4268 = vmatprep.mubr.msk.bf16.mxu1 %vm926_vm2, %v4404_v23  ;;  %v4437_v22 = vld [vmem:[%s6492_s0 + $0x1c8] sm:$0xff]  }
  0xa7   :  { %v4438_v23 = vld [vmem:[%s6492_s0 + $0x3c8] sm:$0xff]  }
  0xad   :  { %4141 = vmatmul.mubr.msk.bf16.gmra.mxu0 %vm926_vm2, %v4405_v24  ;;  %4269 = vmatmul.mubr.msk.bf16.gmra.mxu1 %vm926_vm2, %v4406_v25  ;;  %v4439_v24 = vld [vmem:[%s6492_s0 + $0x1d0] sm:$0xff]  }
  0xae   :  { %4144 = vmatprep.mubr.msk.bf16.mxu0 %vm926_vm2, %v4407_v26  ;;  %4272 = vmatprep.mubr.msk.bf16.mxu1 %vm926_vm2, %v4408_v27  ;;  %v4440_v25 = vld [vmem:[%s6492_s0 + $0x3d0] sm:$0xff]  }
  0xb5   :  { %4145 = vmatmul.mubr.msk.bf16.gmra.mxu0 %vm926_vm2, %v4409_v28  ;;  %4273 = vmatmul.mubr.msk.bf16.gmra.mxu1 %vm926_vm2, %v4410_v29 }
  0xb6   :  { %4148 = vmatprep.mubr.msk.bf16.mxu0 %vm926_vm2, %v4411_v30  ;;  %4276 = vmatprep.mubr.msk.bf16.mxu1 %vm926_vm2, %v4412_v31 }
  0xbd   :  { %4149 = vmatmul.mubr.msk.bf16.gmra.mxu0 %vm926_vm2, %v4413_v32  ;;  %4277 = vmatmul.mubr.msk.bf16.gmra.mxu1 %vm926_vm2, %v4414_v33 }
  0xbe   :  { %4152 = vmatprep.mubr.msk.bf16.mxu0 %vm926_vm2, %v4415_v34  ;;  %4280 = vmatprep.mubr.msk.bf16.mxu1 %vm926_vm2, %v4416_v35  ;;  %v4441_v34 = vld [vmem:[%s6492_s0 + $0x1d8] sm:$0xff]  }
  0xbf   :  { %v4442_v35 = vld [vmem:[%s6492_s0 + $0x3d8] sm:$0xff]  }
  0xc5   :  { %4153 = vmatmul.mubr.msk.bf16.gmra.mxu0 %vm926_vm2, %v4417_v36  ;;  %4281 = vmatmul.mubr.msk.bf16.gmra.mxu1 %vm926_vm2, %v4418_v37  ;;  %v4443_v36 = vld [vmem:[%s6492_s0 + $0x1e0] sm:$0xff]  }
  0xc6   :  { %4156 = vmatprep.mubr.msk.bf16.mxu0 %vm926_vm2, %v4419_v38  ;;  %4284 = vmatprep.mubr.msk.bf16.mxu1 %vm926_vm2, %v4420_v39  ;;  %v4444_v37 = vld [vmem:[%s6492_s0 + $0x3e0] sm:$0xff]  }
  0xcd   :  { %v5011_v44 = vpop.f32.mrf.mxu0  ;;  %4157 = vmatmul.mubr.msk.bf16.gmra.mxu0 %vm926_vm2, %v4421_v40  ;;  %v5014_v45 = vpop.f32.mrf.mxu1  ;;  %4285 = vmatmul.mubr.msk.bf16.gmra.mxu1 %vm926_vm2, %v4422_v41 }
  0xce   :  { %4160 = vmatprep.mubr.msk.bf16.mxu0 %vm926_vm2, %v4423_v42  ;;  %4288 = vmatprep.mubr.msk.bf16.mxu1 %vm926_vm2, %v4424_v43 }
  0xcf   :  { %v5019_v46 = vpop.f32.mrf.mxu0  ;;  %v5021_v47 = vpop.f32.mrf.mxu1 }
  0xd1   :  { %v5023_v48 = vpop.f32.mrf.mxu0  ;;  %v5025_v49 = vpop.f32.mrf.mxu1 }
  0xd3   :  { %v5039_v54 = vpop.f32.mrf.mxu0  ;;  %v5041_v55 = vpop.f32.mrf.mxu1 }
  0xd5   :  { %v5043_v56 = vpop.f32.mrf.mxu0  ;;  %4161 = vmatmul.mubr.msk.bf16.gmra.mxu0 %vm926_vm2, %v4425_v50  ;;  %v5046_v57 = vpop.f32.mrf.mxu1  ;;  %4289 = vmatmul.mubr.msk.bf16.gmra.mxu1 %vm926_vm2, %v4426_v51 }
  0xd6   :  { %4164 = vmatprep.mubr.msk.bf16.mxu0 %vm926_vm2, %v4427_v52  ;;  %4292 = vmatprep.mubr.msk.bf16.mxu1 %vm926_vm2, %v4428_v53  ;;  %v4445_v52 = vld [vmem:[%s6492_s0 + $0x1e8] sm:$0xff]  }
  0xd7   :  { %v5051_v58 = vpop.f32.mrf.mxu0  ;;  %v5053_v59 = vpop.f32.mrf.mxu1  ;;  %v4446_v53 = vld [vmem:[%s6492_s0 + $0x3e8] sm:$0xff]  }
  0xd9   :  { %v5055_v60 = vpop.f32.mrf.mxu0  ;;  %v5057_v61 = vpop.f32.mrf.mxu1 }
  0xdb   :  { %v5071_v2 = vpop.f32.mrf.mxu0  ;;  %v5073_v3 = vpop.f32.mrf.mxu1 }
  0xdd   :  { %v5075_v4 = vpop.f32.mrf.mxu0  ;;  %4165 = vmatmul.mubr.msk.bf16.gmra.mxu0 %vm926_vm2, %v4429_v62  ;;  %v5078_v5 = vpop.f32.mrf.mxu1  ;;  %4293 = vmatmul.mubr.msk.bf16.gmra.mxu1 %vm926_vm2, %v4430_v63  ;;  %v4447_v62 = vld [vmem:[%s6492_s0 + $0x1f0] sm:$0xff]  }
  0xde   :  { %4168 = vmatprep.mubr.msk.bf16.mxu0 %vm926_vm2, %v4431_v0  ;;  %4296 = vmatprep.mubr.msk.bf16.mxu1 %vm926_vm2, %v4432_v1  ;;  %v4448_v63 = vld [vmem:[%s6492_s0 + $0x3f0] sm:$0xff]  }
  0xdf   :  { %v5083_v6 = vpop.f32.mrf.mxu0  ;;  %v5085_v7 = vpop.f32.mrf.mxu1 }
  0xe1   :  { %v5087_v8 = vpop.f32.mrf.mxu0  ;;  %v5089_v9 = vpop.f32.mrf.mxu1 }
  0xe3   :  { %v5103_v14 = vpop.f32.mrf.mxu0  ;;  %v5105_v15 = vpop.f32.mrf.mxu1 }
  0xe5   :  { %v5107_v16 = vpop.f32.mrf.mxu0  ;;  %4169 = vmatmul.mubr.msk.bf16.gmra.mxu0 %vm926_vm2, %v4433_v10  ;;  %v5110_v17 = vpop.f32.mrf.mxu1  ;;  %4297 = vmatmul.mubr.msk.bf16.gmra.mxu1 %vm926_vm2, %v4434_v11 }
  0xe6   :  { %4172 = vmatprep.mubr.msk.bf16.mxu0 %vm926_vm2, %v4435_v12  ;;  %4300 = vmatprep.mubr.msk.bf16.mxu1 %vm926_vm2, %v4436_v13 }
  0xe7   :  { %v5115_v18 = vpop.f32.mrf.mxu0  ;;  %v5117_v19 = vpop.f32.mrf.mxu1 }
  0xe9   :  { %v5119_v20 = vpop.f32.mrf.mxu0  ;;  %v5121_v21 = vpop.f32.mrf.mxu1 }
  0xeb   :  { %v5135_v26 = vpop.f32.mrf.mxu0  ;;  %v5137_v27 = vpop.f32.mrf.mxu1 }
  0xed   :  { %v5139_v28 = vpop.f32.mrf.mxu0  ;;  %4173 = vmatmul.mubr.msk.bf16.gmra.mxu0 %vm926_vm2, %v4437_v22  ;;  %v5142_v29 = vpop.f32.mrf.mxu1  ;;  %4301 = vmatmul.mubr.msk.bf16.gmra.mxu1 %vm926_vm2, %v4438_v23 }
  0xee   :  { %4176 = vmatprep.mubr.msk.bf16.mxu0 %vm926_vm2, %v4439_v24  ;;  %4304 = vmatprep.mubr.msk.bf16.mxu1 %vm926_vm2, %v4440_v25  ;;  %v4449_v24 = vld [vmem:[%s6492_s0 + $0x1f8] sm:$0xff]  }
  0xef   :  { %v5147_v30 = vpop.f32.mrf.mxu0  ;;  %v5149_v31 = vpop.f32.mrf.mxu1  ;;  %v4450_v25 = vld [vmem:[%s6492_s0 + $0x3f8] sm:$0xff]  }
  0xf1   :  { %v5151_v32 = vpop.f32.mrf.mxu0  ;;  %v5153_v33 = vpop.f32.mrf.mxu1 }
  0xf3   :  { %v5167_v38 = vpop.f32.mrf.mxu0  ;;  %v5169_v39 = vpop.f32.mrf.mxu1 }
  0xf5   :  { %v5171_v40 = vpop.f32.mrf.mxu0  ;;  %4177 = vmatmul.mubr.msk.bf16.gmra.mxu0 %vm926_vm2, %v4441_v34  ;;  %v5174_v41 = vpop.f32.mrf.mxu1  ;;  %4305 = vmatmul.mubr.msk.bf16.gmra.mxu1 %vm926_vm2, %v4442_v35 }
  0xf6   :  { %4180 = vmatprep.mubr.msk.bf16.mxu0 %vm926_vm2, %v4443_v36  ;;  %4308 = vmatprep.mubr.msk.bf16.mxu1 %vm926_vm2, %v4444_v37 }
  0xf7   :  { %v5179_v42 = vpop.f32.mrf.mxu0  ;;  %v5181_v43 = vpop.f32.mrf.mxu1 }
  0xf9   :  { %v5183_v50 = vpop.f32.mrf.mxu0  ;;  %v5185_v51 = vpop.f32.mrf.mxu1 }
  0xfb   :  { %v5199_v0 = vpop.f32.mrf.mxu0  ;;  %v5201_v1 = vpop.f32.mrf.mxu1 }
  0xfd   :  { %v5203_v10 = vpop.f32.mrf.mxu0  ;;  %4181 = vmatmul.mubr.msk.bf16.gmra.mxu0 %vm926_vm2, %v4445_v52  ;;  %v5206_v11 = vpop.f32.mrf.mxu1  ;;  %4309 = vmatmul.mubr.msk.bf16.gmra.mxu1 %vm926_vm2, %v4446_v53 }
  0xfe   :  { %6495 = vst [vmem:[#allocation2_spill] sm:$0xff] %v5206_v11  ;;  %4184 = vmatprep.mubr.msk.bf16.mxu0 %vm926_vm2, %v4447_v62  ;;  %4312 = vmatprep.mubr.msk.bf16.mxu1 %vm926_vm2, %v4448_v63 }
  0xff   :  { %v5211_v12 = vpop.f32.mrf.mxu0  ;;  %v5213_v13 = vpop.f32.mrf.mxu1 }
 0x100   :  { %6496 = vst [vmem:[#allocation3_spill] sm:$0xff] %v5211_v12  ;;  %6497 = vst [vmem:[#allocation4_spill] sm:$0xff] %v5213_v13 }
 0x101   :  { %v5215_v22 = vpop.f32.mrf.mxu0  ;;  %v5217_v23 = vpop.f32.mrf.mxu1 }
 0x102   :  { %6498 = vst [vmem:[#allocation5_spill] sm:$0xff] %v5215_v22  ;;  %6499 = vst [vmem:[#allocation6_spill] sm:$0xff] %v5217_v23 }
 0x103   :  { %v5225_v34 = vpop.f32.mrf.mxu0  ;;  %v5227_v35 = vpop.f32.mrf.mxu1 }
 0x104   :  { %6500 = vst [vmem:[#allocation7_spill] sm:$0xff] %v5225_v34  ;;  %6501 = vst [vmem:[#allocation8_spill] sm:$0xff] %v5227_v35 }
 0x105   :  { %v5229_v36 = vpop.f32.mrf.mxu0  ;;  %4185 = vmatmul.mubr.msk.bf16.gmra.mxu0 %vm926_vm2, %v4449_v24  ;;  %v5232_v37 = vpop.f32.mrf.mxu1  ;;  %4313 = vmatmul.mubr.msk.bf16.gmra.mxu1 %vm926_vm2, %v4450_v25 }
 0x106   :  { %6502 = vst [vmem:[#allocation9_spill] sm:$0xff] %v5229_v36  ;;  %6503 = vst [vmem:[#allocation10_spill] sm:$0xff] %v5232_v37 }
 0x107   :  { %v5235_v52 = vpop.f32.mrf.mxu0  ;;  %v5237_v53 = vpop.f32.mrf.mxu1 }
 0x108   :  { %6504 = vst [vmem:[#allocation11_spill] sm:$0xff] %v5235_v52  ;;  %6505 = vst [vmem:[#allocation12_spill] sm:$0xff] %v5237_v53 }
 0x109   :  { %v5239_v62 = vpop.f32.mrf.mxu0  ;;  %v5241_v63 = vpop.f32.mrf.mxu1 }
 0x10a   :  { %6506 = vst [vmem:[#allocation13_spill] sm:$0xff] %v5239_v62  ;;  %6507 = vst [vmem:[#allocation14_spill] sm:$0xff] %v5241_v63 }
 0x10b   :  { %v5243_v23 = vpop.f32.mrf.mxu0  ;;  %v5245_v34 = vpop.f32.mrf.mxu1 }
 0x10c   :  { %6508 = vst [vmem:[#allocation15_spill] sm:$0xff] %v5243_v23  ;;  %6509 = vst [vmem:[#allocation16_spill] sm:$0xff] %v5245_v34 }
 0x10d   :  { %v5247_v35 = vpop.f32.mrf.mxu0  ;;  %v5249_v36 = vpop.f32.mrf.mxu1 }
 0x10e   :  { %6510 = vst [vmem:[#allocation17_spill] sm:$0xff] %v5247_v35  ;;  %6511 = vst [vmem:[#allocation18_spill] sm:$0xff] %v5249_v36 }
 0x10f   :  { %v5251_v24 = vpop.f32.mrf.mxu0  ;;  %v5253_v37 = vpop.f32.mrf.mxu1 }
 0x110   :  { %6512 = vst [vmem:[#allocation19_spill] sm:$0xff] %v5251_v24  ;;  %6513 = vst [vmem:[#allocation20_spill] sm:$0xff] %v5253_v37 }
 0x111   :  { %v5255_v25 = vpop.f32.mrf.mxu0  ;;  %v5257_v52 = vpop.f32.mrf.mxu1 }
 0x112   :  { %6514 = vst [vmem:[#allocation21_spill] sm:$0xff] %v5255_v25  ;;  %6515 = vst [vmem:[#allocation22_spill] sm:$0xff] %v5257_v52 }
 0x113   :  { %v5259_v53 = vpop.f32.mrf.mxu0  ;;  %v5261_v62 = vpop.f32.mrf.mxu1 }
 0x114   :  { %6516 = vst [vmem:[#allocation23_spill] sm:$0xff] %v5259_v53  ;;  %6517 = vst [vmem:[#allocation24_spill] sm:$0xff] %v5261_v62 }
 0x115   :  { %v5263_v63 = vpop.f32.mrf.mxu0  ;;  %v5265_v23 = vpop.f32.mrf.mxu1 }
 0x116   :  { %6518 = vst [vmem:[#allocation25_spill] sm:$0xff] %v5263_v63  ;;  %6519 = vst [vmem:[#allocation26_spill] sm:$0xff] %v5265_v23 }
 0x117   :  { %v5267_v34 = vpop.f32.mrf.mxu0  ;;  %v5269_v35 = vpop.f32.mrf.mxu1 }
 0x118   :  { %6520 = vst [vmem:[#allocation27_spill] sm:$0xff] %v5267_v34  ;;  %6521 = vst [vmem:[#allocation28_spill] sm:$0xff] %v5269_v35 }
 0x119   :  { %v5271_v36 = vpop.f32.mrf.mxu0  ;;  %v5273_v24 = vpop.f32.mrf.mxu1 }
 0x11a   :  { %6522 = vst [vmem:[#allocation29_spill] sm:$0xff] %v5271_v36  ;;  %6523 = vst [vmem:[#allocation30_spill] sm:$0xff] %v5273_v24 }
 0x11b   :  { %v5275_v37 = vpop.f32.mrf.mxu0  ;;  %v5277_v25 = vpop.f32.mrf.mxu1 }
 0x11c   :  { %6524 = vst [vmem:[#allocation31_spill] sm:$0xff] %v5275_v37  ;;  %6525 = vst [vmem:[#allocation32_spill] sm:$0xff] %v5277_v25 }
 0x11d   :  { %v5279_v52 = vpop.f32.mrf.mxu0  ;;  %v5281_v53 = vpop.f32.mrf.mxu1 }
 0x11e   :  { %6526 = vst [vmem:[#allocation33_spill] sm:$0xff] %v5279_v52  ;;  %6527 = vst [vmem:[#allocation34_spill] sm:$0xff] %v5281_v53 }
 0x11f   :  { %v5283_v62 = vpop.f32.mrf.mxu0  ;;  %v5285_v63 = vpop.f32.mrf.mxu1 }
 0x120   :  { %6528 = vst [vmem:[#allocation35_spill] sm:$0xff] %v5283_v62  ;;  %6529 = vst [vmem:[#allocation36_spill] sm:$0xff] %v5285_v63 }
 0x121   :  { %v5287_v23 = vpop.f32.mrf.mxu0  ;;  %v5289_v34 = vpop.f32.mrf.mxu1 }
 0x122   :  { %6530 = vst [vmem:[#allocation37_spill] sm:$0xff] %v5287_v23  ;;  %6531 = vst [vmem:[#allocation38_spill] sm:$0xff] %v5289_v34 }
 0x123   :  { %v5291_v35 = vpop.f32.mrf.mxu0  ;;  %v5293_v36 = vpop.f32.mrf.mxu1 }
 0x124   :  { %6532 = vst [vmem:[#allocation39_spill] sm:$0xff] %v5291_v35  ;;  %6533 = vst [vmem:[#allocation40_spill] sm:$0xff] %v5293_v36 }
 0x125   :  { %v5295_v24 = vpop.f32.mrf.mxu0  ;;  %v5297_v37 = vpop.f32.mrf.mxu1 }
 0x126   :  { %6534 = vst [vmem:[#allocation41_spill] sm:$0xff] %v5295_v24  ;;  %6535 = vst [vmem:[#allocation42_spill] sm:$0xff] %v5297_v37 }
 0x127   :  { %v5299_v25 = vpop.f32.mrf.mxu0  ;;  %v5301_v52 = vpop.f32.mrf.mxu1 }
 0x128   :  { %6536 = vst [vmem:[#allocation43_spill] sm:$0xff] %v5299_v25  ;;  %6537 = vst [vmem:[#allocation44_spill] sm:$0xff] %v5301_v52 }
 0x129   :  { %v5303_v53 = vpop.f32.mrf.mxu0  ;;  %v5305_v62 = vpop.f32.mrf.mxu1 }
 0x12a   :  { %6538 = vst [vmem:[#allocation45_spill] sm:$0xff] %v5303_v53  ;;  %6539 = vst [vmem:[#allocation46_spill] sm:$0xff] %v5305_v62 }
 0x12b   :  { %v5307_v63 = vpop.f32.mrf.mxu0  ;;  %v5309_v23 = vpop.f32.mrf.mxu1 }
 0x12c   :  { %6540 = vst [vmem:[#allocation47_spill] sm:$0xff] %v5307_v63  ;;  %6541 = vst [vmem:[#allocation48_spill] sm:$0xff] %v5309_v23 }
 0x12d   :  { %v5311_v34 = vpop.f32.mrf.mxu0  ;;  %v5313_v35 = vpop.f32.mrf.mxu1 }
 0x12e   :  { %6542 = vst [vmem:[#allocation49_spill] sm:$0xff] %v5311_v34  ;;  %6543 = vst [vmem:[#allocation50_spill] sm:$0xff] %v5313_v35 }
 0x12f   :  { %v5315_v36 = vpop.f32.mrf.mxu0  ;;  %v5317_v24 = vpop.f32.mrf.mxu1 }
 0x130   :  { %6544 = vst [vmem:[#allocation51_spill] sm:$0xff] %v5315_v36  ;;  %6545 = vst [vmem:[#allocation52_spill] sm:$0xff] %v5317_v24 }
 0x131   :  { %v5319_v37 = vpop.f32.mrf.mxu0  ;;  %v5321_v25 = vpop.f32.mrf.mxu1 }
 0x132   :  { %6546 = vst [vmem:[#allocation53_spill] sm:$0xff] %v5319_v37  ;;  %6547 = vst [vmem:[#allocation54_spill] sm:$0xff] %v5321_v25 }
 0x133   :  { %v5323_v52 = vpop.f32.mrf.mxu0  ;;  %v5325_v53 = vpop.f32.mrf.mxu1 }
 0x134   :  { %6548 = vst [vmem:[#allocation55_spill] sm:$0xff] %v5323_v52  ;;  %6549 = vst [vmem:[#allocation56_spill] sm:$0xff] %v5325_v53 }
 0x135   :  { %v5327_v62 = vpop.f32.mrf.mxu0  ;;  %v5329_v63 = vpop.f32.mrf.mxu1 }
 0x136   :  { %6550 = vst [vmem:[#allocation57_spill] sm:$0xff] %v5327_v62  ;;  %6551 = vst [vmem:[#allocation58_spill] sm:$0xff] %v5329_v63 }
 0x137   :  { %v5331_v23 = vpop.f32.mrf.mxu0  ;;  %v5333_v34 = vpop.f32.mrf.mxu1 }
 0x138   :  { %6552 = vst [vmem:[#allocation59_spill] sm:$0xff] %v5331_v23  ;;  %6553 = vst [vmem:[#allocation60_spill] sm:$0xff] %v5333_v34 }
 0x139   :  { %v5335_v35 = vpop.f32.mrf.mxu0  ;;  %v5337_v36 = vpop.f32.mrf.mxu1 }
 0x13a   :  { %6554 = vst [vmem:[#allocation61_spill] sm:$0xff] %v5335_v35  ;;  %6555 = vst [vmem:[#allocation62_spill] sm:$0xff] %v5337_v36 }
 0x13b   :  { %v5339_v24 = vpop.f32.mrf.mxu0  ;;  %v5341_v37 = vpop.f32.mrf.mxu1 }
 0x13c   :  { %6556 = vst [vmem:[#allocation63_spill] sm:$0xff] %v5339_v24  ;;  %6557 = vst [vmem:[#allocation64_spill] sm:$0xff] %v5341_v37 }
 0x13d   :  { %v5343_v25 = vpop.f32.mrf.mxu0  ;;  %v5345_v52 = vpop.f32.mrf.mxu1 }
 0x13e   :  { %6558 = vst [vmem:[#allocation65_spill] sm:$0xff] %v5343_v25  ;;  %6559 = vst [vmem:[#allocation66_spill] sm:$0xff] %v5345_v52 }
 0x13f   :  { %v5347_v53 = vpop.f32.mrf.mxu0  ;;  %v5349_v62 = vpop.f32.mrf.mxu1 }
 0x140   :  { %6560 = vst [vmem:[#allocation67_spill] sm:$0xff] %v5347_v53  ;;  %6561 = vst [vmem:[#allocation68_spill] sm:$0xff] %v5349_v62 }
 0x141   :  { %v5351_v63 = vpop.f32.mrf.mxu0  ;;  %v5353_v23 = vpop.f32.mrf.mxu1 }
 0x142   :  { %6562 = vst [vmem:[#allocation69_spill] sm:$0xff] %v5351_v63  ;;  %6563 = vst [vmem:[#allocation70_spill] sm:$0xff] %v5353_v23 }
 0x143   :  { %v5355_v34 = vpop.f32.mrf.mxu0  ;;  %v5357_v35 = vpop.f32.mrf.mxu1 }
 0x144   :  { %6564 = vst [vmem:[#allocation71_spill] sm:$0xff] %v5355_v34  ;;  %6565 = vst [vmem:[#allocation72_spill] sm:$0xff] %v5357_v35 }
 0x145   :  { %v5359_v36 = vpop.f32.mrf.mxu0  ;;  %v5361_v24 = vpop.f32.mrf.mxu1 }
 0x146   :  { %6566 = vst [vmem:[#allocation73_spill] sm:$0xff] %v5359_v36  ;;  %6567 = vst [vmem:[#allocation74_spill] sm:$0xff] %v5361_v24 }
 0x147   :  { %v5363_v37 = vpop.f32.mrf.mxu0  ;;  %v5365_v25 = vpop.f32.mrf.mxu1 }
 0x148   :  { %6568 = vst [vmem:[#allocation75_spill] sm:$0xff] %v5363_v37  ;;  %6569 = vst [vmem:[#allocation76_spill] sm:$0xff] %v5365_v25  ;;  %v5380_v37 = vld [vmem:[%s6493_s2] ss:$0 sm:$0xff] }
 0x149   :  { %v5367_v52 = vpop.f32.mrf.mxu0  ;;  %v5369_v53 = vpop.f32.mrf.mxu1 }
 0x14a   :  { %6570 = vst [vmem:[#allocation77_spill] sm:$0xff] %v5367_v52  ;;  %6571 = vst [vmem:[#allocation78_spill] sm:$0xff] %v5369_v53 }
 0x14b   :  { %v5371_v62 = vpop.f32.mrf.mxu0  ;;  %v5373_v63 = vpop.f32.mrf.mxu1 }
 0x14c   :  { %6572 = vst [vmem:[#allocation79_spill] sm:$0xff] %v5371_v62  ;;  %6573 = vst [vmem:[#allocation80_spill] sm:$0xff] %v5373_v63 }
 0x14d   :  { %v4126_v23 = vpop.f32.mrf.mxu0  ;;  %v4254_v34 = vpop.f32.mrf.mxu1 }
 0x14e   :  { %v2377_v35 = vmax.f32 %v5011_v44, %v4126_v23  ;;  %v2441_v36 = vmax.f32 %v5014_v45, %v4254_v34 }
 0x14f   :  { %v1608_v25 = vpop.f32.mrf.mxu0  ;;  %v2120_v24 = vpop.f32.mrf.mxu1 }
 0x150   :  { %v2505_v52 = vmax.f32 %v2377_v35, %v2441_v36  ;;  %v2375_v53 = vmax.f32 %v5019_v46, %v1608_v25  ;;  %v2439_v62 = vmax.f32 %v5021_v47, %v2120_v24 }
 0x151   :  { %v4127_v22 = vpop.f32.mrf.mxu0  ;;  %v4255_v63 = vpop.f32.mrf.mxu1 }
 0x152   :  { %v5385_v13 = vadd.f32 %v5380_v37, %v2505_v52  ;;  %v2503_v44 = vmax.f32 %v2375_v53, %v2439_v62  ;;  %v2378_v45 = vmax.f32 %v5023_v48, %v4127_v22  ;;  %v2442_v23 = vmax.f32 %v5025_v49, %v4255_v63 }
 0x153   :  { %v1611_v34 = vpop.f32.mrf.mxu0  ;;  %v2123_v12 = vpop.f32.mrf.mxu1 }
 0x154   :  { %v2640_v11 = vmin.f32 %v5385_v13, 0.0  ;;  %v5391_v35 = vadd.f32 %v5380_v37, %v2503_v44  ;;  %v2506_v46 = vmax.f32 %v2378_v45, %v2442_v23  ;;  %v2376_v47 = vmax.f32 %v5039_v54, %v1611_v34 }
 0x155   :  { %v2440_v36 = vmax.f32 %v5041_v55, %v2123_v12  ;;  %v4130_v24 = vpop.f32.mrf.mxu0  ;;  %v4258_v52 = vpop.f32.mrf.mxu1  ;;  %vm2960_vm3 = vcmp.gt.f32.partialorder %v5385_v13, 0.0 }
 0x156   :  { %v2706_v25 = vmul.f32 1.442695, %v2640_v11  ;;  %v2638_v53 = vmin.f32 %v5391_v35, 0.0  ;;  %v5397_v48 = vadd.f32 %v5380_v37, %v2506_v46  ;;  %v2381_v22 = vmax.f32 %v5043_v56, %v4130_v24 }
 0x157   :  { %v2504_v49 = vmax.f32 %v2376_v47, %v2440_v36  ;;  %v2445_v62 = vmax.f32 %v5046_v57, %v4258_v52  ;;  %v1624_v63 = vpop.f32.mrf.mxu0  ;;  %v2136_v44 = vpop.f32.mrf.mxu1  ;;  %vm2958_vm5 = vcmp.gt.f32.partialorder %v5391_v35, 0.0 }
 0x158   :  { %4451 = vpow2.f32 %v2706_v25  ;;  %v2702_v45 = vmul.f32 1.442695, %v2638_v53  ;;  %v2641_v54 = vmin.f32 %v5397_v48, 0.0  ;;  %v2379_v12 = vmax.f32 %v5051_v58, %v1624_v63 }
 0x159   :  { %v5403_v55 = vadd.f32 %v5380_v37, %v2504_v49  ;;  %v2509_v11 = vmax.f32 %v2381_v22, %v2445_v62  ;;  %v2443_v23 = vmax.f32 %v5053_v59, %v2136_v44  ;;  %v4131_v34 = vpop.f32.mrf.mxu0  ;;  %v4259_v46 = vpop.f32.mrf.mxu1  ;;  %vm2961_vm6 = vcmp.gt.f32.partialorder %v5397_v48, 0.0 }
 0x15a   :  { %4453 = vpow2.f32 %v2702_v45  ;;  %v2708_v56 = vmul.f32 1.442695, %v2641_v54  ;;  %v2382_v57 = vmax.f32 %v5055_v60, %v4131_v34  ;;  %v2446_v47 = vmax.f32 %v5057_v61, %v4259_v46 }
 0x15b   :  { %v2639_v36 = vmin.f32 %v5403_v55, 0.0  ;;  %v5411_v24 = vadd.f32 %v5380_v37, %v2509_v11  ;;  %v2507_v52 = vmax.f32 %v2379_v12, %v2443_v23  ;;  %v1627_v25 = vpop.f32.mrf.mxu0  ;;  %v2139_v53 = vpop.f32.mrf.mxu1  ;;  %vm2959_vm7 = vcmp.gt.f32.partialorder %v5403_v55, 0.0 }
 0x15c   :  { %4455 = vpow2.f32 %v2708_v56  ;;  %v2510_v58 = vmax.f32 %v2382_v57, %v2446_v47  ;;  %v2380_v59 = vmax.f32 %v5071_v2, %v1627_v25  ;;  %v2444_v49 = vmax.f32 %v5073_v3, %v2139_v53 }
 0x15d   :  { %v2704_v22 = vmul.f32 1.442695, %v2639_v36  ;;  %v2644_v62 = vmin.f32 %v5411_v24, 0.0  ;;  %v5417_v60 = vadd.f32 %v5380_v37, %v2507_v52  ;;  %v4134_v61 = vpop.f32.mrf.mxu0  ;;  %v4262_v63 = vpop.f32.mrf.mxu1  ;;  %vm2964_vm8 = vcmp.gt.f32.partialorder %v5411_v24, 0.0 }
 0x15e   :  { %v5420_v44 = vadd.f32 %v5380_v37, %v2510_v58  ;;  %v2508_v45 = vmax.f32 %v2380_v59, %v2444_v49  ;;  %v2385_v54 = vmax.f32 %v5075_v4, %v4134_v61  ;;  %v2449_v11 = vmax.f32 %v5078_v5, %v4262_v63 }
 0x15f   :  { %4457 = vpow2.f32 %v2704_v22  ;;  %v2714_v2 = vmul.f32 1.442695, %v2644_v62  ;;  %v2642_v3 = vmin.f32 %v5417_v60, 0.0  ;;  %v1640_v12 = vpop.f32.mrf.mxu0  ;;  %v2152_v23 = vpop.f32.mrf.mxu1  ;;  %vm2962_vm9 = vcmp.gt.f32.partialorder %v5417_v60, 0.0 }
 0x160   :  { %v2645_v34 = vmin.f32 %v5420_v44, 0.0  ;;  %v5427_v46 = vadd.f32 %v5380_v37, %v2508_v45  ;;  %v2513_v56 = vmax.f32 %v2385_v54, %v2449_v11  ;;  %v2383_v47 = vmax.f32 %v5083_v6, %v1640_v12 }
 0x161   :  { %4459 = vpow2.f32 %v2714_v2  ;;  %v2710_v57 = vmul.f32 1.442695, %v2642_v3  ;;  %v2447_v4 = vmax.f32 %v5085_v7, %v2152_v23  ;;  %v4135_v36 = vpop.f32.mrf.mxu0  ;;  %v4263_v5 = vpop.f32.mrf.mxu1  ;;  %vm2965_vm10 = vcmp.gt.f32.partialorder %v5420_v44, 0.0 }
 0x162   :  { %v2716_v52 = vmul.f32 1.442695, %v2645_v34  ;;  %v2643_v25 = vmin.f32 %v5427_v46, 0.0  ;;  %v5434_v53 = vadd.f32 %v5380_v37, %v2513_v56  ;;  %v2386_v59 = vmax.f32 %v5087_v8, %v4135_v36 }
 0x163   :  { %4461 = vpow2.f32 %v2710_v57  ;;  %v2511_v58 = vmax.f32 %v2383_v47, %v2447_v4  ;;  %v2450_v49 = vmax.f32 %v5089_v9, %v4263_v5  ;;  %v1643_v22 = vpop.f32.mrf.mxu0  ;;  %v2155_v6 = vpop.f32.mrf.mxu1  ;;  %vm2963_vm11 = vcmp.gt.f32.partialorder %v5427_v46, 0.0 }
 0x164   :  { %4463 = vpow2.f32 %v2716_v52  ;;  %v2712_v7 = vmul.f32 1.442695, %v2643_v25  ;;  %v2648_v62 = vmin.f32 %v5434_v53, 0.0  ;;  %v2384_v54 = vmax.f32 %v5103_v14, %v1643_v22 }
 0x165   :  { %v4452_v61 = vpop.eup %4451  ;;  %v5441_v63 = vadd.f32 %v5380_v37, %v2511_v58  ;;  %v2514_v45 = vmax.f32 %v2386_v59, %v2450_v49  ;;  %v2448_v8 = vmax.f32 %v5105_v15, %v2155_v6  ;;  %v4138_v11 = vpop.f32.mrf.mxu0  ;;  %vm2968_vm12 = vcmp.gt.f32.partialorder %v5434_v53, 0.0 }
 0x166   :  { %v4266_v9 = vpop.f32.mrf.mxu1  ;;  %v3736_v2 = vadd.f32 -1.0, %v4452_v61  ;;  %4465 = vpow2.f32 %v2712_v7  ;;  %v2722_v3 = vmul.f32 1.442695, %v2648_v62  ;;  %v2389_v12 = vmax.f32 %v5107_v16, %v4138_v11 }
 0x167   :  { %v4454_v23 = vpop.eup %4453  ;;  %v2646_v34 = vmin.f32 %v5441_v63, 0.0  ;;  %v5449_v56 = vadd.f32 %v5380_v37, %v2514_v45  ;;  %v2512_v57 = vmax.f32 %v2384_v54, %v2448_v8  ;;  %v5451_v47 = vpop.f32.mrf.mxu0  ;;  %v2453_v36 = vmax.f32 %v5110_v17, %v4266_v9 }
 0x168   :  { %v5453_v14 = vpop.f32.mrf.mxu1  ;;  %v2896_v15 = vmul.f32 1.6732632, %v3736_v2  ;;  %v3734_v4 = vadd.f32 -1.0, %v4454_v23  ;;  %4467 = vpow2.f32 %v2722_v3  ;;  %vm2966_vm13 = vcmp.gt.f32.partialorder %v5441_v63, 0.0 }
 0x169   :  { %v4456_v5 = vpop.eup %4455  ;;  %v2718_v16 = vmul.f32 1.442695, %v2646_v34  ;;  %v2649_v52 = vmin.f32 %v5449_v56, 0.0  ;;  %v5459_v25 = vadd.f32 %v5380_v37, %v2512_v57  ;;  %v5461_v58 = vpop.f32.mrf.mxu0  ;;  %v2517_v17 = vmax.f32 %v2389_v12, %v2453_v36 }
 0x16a   :  { %v5463_v59 = vpop.f32.mrf.mxu1  ;;  %v3024_v49 = vsel %vm2960_vm3, %v5385_v13, %v2896_v15  ;;  %v2894_v22 = vmul.f32 1.6732632, %v3734_v4  ;;  %v3737_v6 = vadd.f32 -1.0, %v4456_v5  ;;  %vm2969_vm14 = vcmp.gt.f32.partialorder %v5449_v56, 0.0 }
 0x16b   :  { %v3088_v7 = vmul.f32 1.050701, %v3024_v49  ;;  %4469 = vpow2.f32 %v2718_v16  ;;  %v2724_v62 = vmul.f32 1.442695, %v2649_v52  ;;  %v2647_v61 = vmin.f32 %v5459_v25, 0.0  ;;  %v5470_v45 = vpop.f32.mrf.mxu0 }
 0x16c   :  { %v5472_v54 = vpop.f32.mrf.mxu1  ;;  %v4458_v8 = vpop.eup %4457  ;;  %v3022_v11 = vsel %vm2958_vm5, %v5391_v35, %v2894_v22  ;;  %v2897_v13 = vmul.f32 1.6732632, %v3737_v6  ;;  %v5479_v9 = vadd.f32 %v5380_v37, %v2517_v17  ;;  %v2387_v17 = vmax.f32 %v5115_v18, %v5451_v47 }
 0x16d   :  { %v3864_v2 = vpack.c.bf16 %v3088_v7, %v3088_v7  ;;  %v3086_v3 = vmul.f32 1.050701, %v3022_v11  ;;  %v3735_v12 = vadd.f32 -1.0, %v4458_v8  ;;  %4471 = vpow2.f32 %v2724_v62  ;;  %v5481_v23 = vpop.f32.mrf.mxu0 }
 0x16e   :  { %v5483_v34 = vpop.f32.mrf.mxu1  ;;  %v4460_v57 = vpop.eup %4459  ;;  %v3025_v15 = vsel %vm2961_vm6, %v5397_v48, %v2897_v13  ;;  %v2720_v35 = vmul.f32 1.442695, %v2647_v61  ;;  %v2652_v4 = vmin.f32 %v5479_v9, 0.0  ;;  %v2451_v7 = vmax.f32 %v5117_v19, %v5453_v14 }
 0x16f   :  { %3409 = vst.msk [vmem:[%s6494_s3 + $0x8] sm:$0xf] %vm3406_vm4, %v3864_v2  ;;  %v3862_v36 = vpack.c.bf16 %v3086_v3, %v3086_v3  ;;  %v3089_v5 = vmul.f32 1.050701, %v3025_v15  ;;  %v2895_v16 = vmul.f32 1.6732632, %v3735_v12  ;;  %v5495_v49 = vpop.f32.mrf.mxu0  ;;  %v2454_v15 = vmax.f32 %v5121_v21, %v5463_v59 }
 0x170   :  { %v3740_v52 = vadd.f32 -1.0, %v4460_v57  ;;  %v5497_v22 = vpop.f32.mrf.mxu1  ;;  %v4462_v48 = vpop.eup %4461  ;;  %4473 = vpow2.f32 %v2720_v35  ;;  %v2730_v6 = vmul.f32 1.442695, %v2652_v4  ;;  %v2515_v19 = vmax.f32 %v2387_v17, %v2451_v7 }
 0x171   :  { %v4464_v62 = vpop.eup %4463  ;;  %3407 = vst.msk [vmem:[%s6494_s3] sm:$0xf] %vm3406_vm4, %v3862_v36  ;;  %v3865_v61 = vpack.c.bf16 %v3089_v5, %v3089_v5  ;;  %v3023_v8 = vsel %vm2959_vm7, %v5403_v55, %v2895_v16  ;;  %v3738_v13 = vadd.f32 -1.0, %v4462_v48  ;;  %v5510_v2 = vpop.f32.mrf.mxu0  ;;  %v2390_v57 = vmax.f32 %v5119_v20, %v5461_v58 }
 0x172   :  { %v2900_v11 = vmul.f32 1.6732632, %v3740_v52  ;;  %v5512_v3 = vpop.f32.mrf.mxu1  ;;  %v3087_v18 = vmul.f32 1.050701, %v3023_v8  ;;  %v3741_v47 = vadd.f32 -1.0, %v4464_v62  ;;  %4475 = vpow2.f32 %v2730_v6 }
 0x173   :  { %v4466_v14 = vpop.eup %4465  ;;  %3410 = vst.msk [vmem:[%s6494_s3 + $0xc] sm:$0xf] %vm3406_vm4, %v3865_v61  ;;  %v2898_v12 = vmul.f32 1.6732632, %v3738_v13  ;;  %v5526_v35 = vpop.f32.mrf.mxu0  ;;  %v5534_v6 = vadd.f32 %v5380_v37, %v2515_v19  ;;  %v2518_v20 = vmax.f32 %v2390_v57, %v2454_v15  ;;  %v2388_v21 = vmax.f32 %v5135_v26, %v5470_v45 }
 0x174   :  { %v3028_v55 = vsel %vm2964_vm8, %v5411_v24, %v2900_v11  ;;  %v5528_v4 = vpop.f32.mrf.mxu1  ;;  %v3863_v36 = vpack.c.bf16 %v3087_v18, %v3087_v18  ;;  %v2901_v16 = vmul.f32 1.6732632, %v3741_v47  ;;  %v3739_v52 = vadd.f32 -1.0, %v4466_v14 }
 0x175   :  { %v3092_v5 = vmul.f32 1.050701, %v3028_v55  ;;  %v4468_v48 = vpop.eup %4467  ;;  %v3026_v24 = vsel %vm2962_vm9, %v5417_v60, %v2898_v12  ;;  %v5538_v58 = vpop.f32.mrf.mxu0  ;;  %v2650_v26 = vmin.f32 %v5534_v6, 0.0  ;;  %v5563_v47 = vadd.f32 %v5380_v37, %v2518_v20 }
 0x176   :  { %v5540_v59 = vpop.f32.mrf.mxu1  ;;  %3408 = vst.msk [vmem:[%s6494_s3 + $0x4] sm:$0xf] %vm3406_vm4, %v3863_v36  ;;  %v3090_v7 = vmul.f32 1.050701, %v3026_v24  ;;  %v3029_v60 = vsel %vm2965_vm10, %v5420_v44, %v2901_v16  ;;  %v2899_v62 = vmul.f32 1.6732632, %v3739_v52  ;;  %v2452_v19 = vmax.f32 %v5137_v27, %v5472_v54 }
 0x177   :  { %v3868_v17 = vpack.c.bf16 %v3092_v5, %v3092_v5  ;;  %v3093_v61 = vmul.f32 1.050701, %v3029_v60  ;;  %v3744_v8 = vadd.f32 -1.0, %v4468_v48  ;;  %v5551_v45 = vpop.f32.mrf.mxu0  ;;  %v2653_v16 = vmin.f32 %v5563_v47, 0.0 }
 0x178   :  { %v5553_v11 = vpop.f32.mrf.mxu1  ;;  %v4470_v13 = vpop.eup %4469  ;;  %v3866_v18 = vpack.c.bf16 %v3090_v7, %v3090_v7  ;;  %v3027_v44 = vsel %vm2963_vm11, %v5427_v46, %v2899_v62  ;;  %v2726_v46 = vmul.f32 1.442695, %v2650_v26  ;;  %v2516_v27 = vmax.f32 %v2388_v21, %v2452_v19 }
 0x179   :  { %3413 = vst.msk [vmem:[%s6494_s3 + $0x18] sm:$0xf] %vm3406_vm4, %v3868_v17  ;;  %v3869_v14 = vpack.c.bf16 %v3093_v61, %v3093_v61  ;;  %v3091_v55 = vmul.f32 1.050701, %v3027_v44  ;;  %v2904_v12 = vmul.f32 1.6732632, %v3744_v8  ;;  %v5567_v15 = vpop.f32.mrf.mxu0  ;;  %v2393_v8 = vmax.f32 %v5139_v28, %v5481_v23 }
 0x17a   :  { %v3742_v57 = vadd.f32 -1.0, %v4470_v13  ;;  %v5569_v36 = vpop.f32.mrf.mxu1  ;;  %v4472_v5 = vpop.eup %4471  ;;  %3411 = vst.msk [vmem:[%s6494_s3 + $0x10] sm:$0xf] %vm3406_vm4, %v3866_v18  ;;  %4477 = vpow2.f32 %v2726_v46  ;;  %v2732_v60 = vmul.f32 1.442695, %v2653_v16  ;;  %v5589_v21 = vadd.f32 %v5380_v37, %v2516_v27 }
 0x17b   :  { %3414 = vst.msk [vmem:[%s6494_s3 + $0x1c] sm:$0xf] %vm3406_vm4, %v3869_v14  ;;  %v3867_v54 = vpack.c.bf16 %v3091_v55, %v3091_v55  ;;  %v3032_v52 = vsel %vm2968_vm12, %v5434_v53, %v2904_v12  ;;  %v3745_v24 = vadd.f32 -1.0, %v4472_v5  ;;  %v5584_v20 = vpop.f32.mrf.mxu0  ;;  %v2457_v26 = vmax.f32 %v5142_v29, %v5483_v34 }
 0x17c   :  { %v2902_v48 = vmul.f32 1.6732632, %v3742_v57  ;;  %v5586_v17 = vpop.f32.mrf.mxu1  ;;  %v3096_v7 = vmul.f32 1.050701, %v3032_v52  ;;  %4479 = vpow2.f32 %v2732_v60  ;;  %vm2967_vm15 = vcmp.gt.f32.partialorder %v5459_v25, 0.0 }
 0x17d   :  { %v4474_v62 = vpop.eup %4473  ;;  %3412 = vst.msk [vmem:[%s6494_s3 + $0x14] sm:$0xf] %vm3406_vm4, %v3867_v54  ;;  %v2905_v61 = vmul.f32 1.6732632, %v3745_v24  ;;  %v5602_v13 = vpop.f32.mrf.mxu0  ;;  %v2651_v28 = vmin.f32 %v5589_v21, 0.0  ;;  %v2521_v23 = vmax.f32 %v2393_v8, %v2457_v26  ;;  %v2391_v27 = vmax.f32 %v5147_v30, %v5495_v49 }
 0x17e   :  { %v3030_v53 = vsel %vm2966_vm13, %v5441_v63, %v2902_v48  ;;  %v5604_v18 = vpop.f32.mrf.mxu1  ;;  %v3872_v44 = vpack.c.bf16 %v3096_v7, %v3096_v7  ;;  %v3743_v14 = vadd.f32 -1.0, %v4474_v62  ;;  %v2455_v54 = vmax.f32 %v5149_v31, %v5497_v22 }
 0x17f   :  { %v3094_v19 = vmul.f32 1.050701, %v3030_v53  ;;  %v4476_v55 = vpop.eup %4475  ;;  %v3033_v63 = vsel %vm2969_vm14, %v5449_v56, %v2905_v61  ;;  %v5611_v12 = vpop.f32.mrf.mxu0  ;;  %v2728_v16 = vmul.f32 1.442695, %v2651_v28  ;;  %v5620_v56 = vadd.f32 %v5380_v37, %v2521_v23 }
 0x180   :  { %v5613_v29 = vpop.f32.mrf.mxu1  ;;  %3417 = vst.msk [vmem:[%s6494_s3 + $0x28] sm:$0xf] %vm3406_vm4, %v3872_v44  ;;  %v3097_v57 = vmul.f32 1.050701, %v3033_v63  ;;  %v2903_v5 = vmul.f32 1.6732632, %v3743_v14  ;;  %v2394_v30 = vmax.f32 %v5151_v32, %v5510_v2  ;;  %v2519_v53 = vmax.f32 %v2391_v27, %v2455_v54 }
 0x181   :  { %v3870_v34 = vpack.c.bf16 %v3094_v19, %v3094_v19  ;;  %v3748_v46 = vadd.f32 -1.0, %v4476_v55  ;;  %v5626_v52 = vpop.f32.mrf.mxu0  ;;  %vm2972_vm0 = vcmp.gt.f32.partialorder %v5479_v9, 0.0  ;;  %4481 = vpow2.f32 %v2728_v16 }
 0x182   :  { %v5628_v48 = vpop.f32.mrf.mxu1  ;;  %v3873_v24 = vpack.c.bf16 %v3097_v57, %v3097_v57  ;;  %v3031_v7 = vsel %vm2967_vm15, %v5459_v25, %v2903_v5  ;;  %v2656_v31 = vmin.f32 %v5620_v56, 0.0  ;;  %v2458_v32 = vmax.f32 %v5153_v33, %v5512_v3 }
 0x183   :  { %3415 = vst.msk [vmem:[%s6494_s3 + $0x20] sm:$0xf] %vm3406_vm4, %v3870_v34  ;;  %v2908_v60 = vmul.f32 1.6732632, %v3748_v46  ;;  %v3095_v49 = vmul.f32 1.050701, %v3031_v7  ;;  %v5641_v22 = vpop.f32.mrf.mxu0  ;;  %v2392_v2 = vmax.f32 %v5167_v38, %v5526_v35  ;;  %v2456_v44 = vmax.f32 %v5169_v39, %v5528_v4 }
 0x184   :  { %v5643_v62 = vpop.f32.mrf.mxu1  ;;  %3418 = vst.msk [vmem:[%s6494_s3 + $0x2c] sm:$0xf] %vm3406_vm4, %v3873_v24  ;;  %v2738_v26 = vmul.f32 1.442695, %v2656_v31  ;;  %v5661_v55 = vadd.f32 %v5380_v37, %v2519_v53  ;;  %v2397_v33 = vmax.f32 %v5171_v40, %v5538_v58  ;;  %v2461_v38 = vmax.f32 %v5174_v41, %v5540_v59 }
 0x185   :  { %v3036_v25 = vsel %vm2972_vm0, %v5479_v9, %v2908_v60  ;;  %v3871_v61 = vpack.c.bf16 %v3095_v49, %v3095_v49  ;;  %v5656_v19 = vpop.f32.mrf.mxu0  ;;  %v2522_v9 = vmax.f32 %v2394_v30, %v2458_v32  ;;  %v2520_v3 = vmax.f32 %v2392_v2, %v2456_v44 }
 0x186   :  { %v3100_v8 = vmul.f32 1.050701, %v3036_v25  ;;  %v5658_v14 = vpop.f32.mrf.mxu1  ;;  %4483 = vpow2.f32 %v2738_v26  ;;  %v2395_v35 = vmax.f32 %v5179_v42, %v5551_v45  ;;  %v2654_v40 = vmin.f32 %v5661_v55, 0.0 }
 0x187   :  { %3416 = vst.msk [vmem:[%s6494_s3 + $0x24] sm:$0xf] %vm3406_vm4, %v3871_v61  ;;  %v5673_v4 = vpop.f32.mrf.mxu0  ;;  %v5679_v58 = vadd.f32 %v5380_v37, %v2522_v9  ;;  %v2525_v41 = vmax.f32 %v2397_v33, %v2461_v38  ;;  %v4478_v59 = vpop.eup %4477  ;;  %v5686_v28 = vadd.f32 %v5380_v37, %v2520_v3  ;;  %v2459_v42 = vmax.f32 %v5181_v43, %v5553_v11 }
 0x188   :  { %v3876_v39 = vpack.c.bf16 %v3100_v8, %v3100_v8  ;;  %v5675_v63 = vpop.f32.mrf.mxu1  ;;  %v2398_v45 = vmax.f32 %v5183_v50, %v5567_v15  ;;  %v3746_v23 = vadd.f32 -1.0, %v4478_v59  ;;  %v2734_v34 = vmul.f32 1.442695, %v2654_v40  ;;  %v6574_v40 = vld [vmem:[#allocation2_spill] sm:$0xff] }
 0x189   :  { %v2657_v57 = vmin.f32 %v5679_v58, 0.0  ;;  %v2462_v5 = vmax.f32 %v5185_v51, %v5569_v36  ;;  %v5695_v46 = vpop.f32.mrf.mxu0  ;;  %v4480_v16 = vpop.eup %4479  ;;  %vm2970_vm1 = vcmp.gt.f32.partialorder %v5534_v6, 0.0  ;;  %v2655_v27 = vmin.f32 %v5686_v28, 0.0 }
 0x18a   :  { %3421 = vst.msk [vmem:[%s6494_s3 + $0x38] sm:$0xf] %vm3406_vm4, %v3876_v39  ;;  %v5700_v54 = vadd.f32 %v5380_v37, %v2525_v41  ;;  %v2523_v43 = vmax.f32 %v2395_v35, %v2459_v42  ;;  %v5702_v11 = vpop.f32.mrf.mxu1  ;;  %v2906_v50 = vmul.f32 1.6732632, %v3746_v23  ;;  %v3749_v15 = vadd.f32 -1.0, %v4480_v16  ;;  %v6577_v16 = vld [vmem:[#allocation5_spill] sm:$0xff] }
 0x18b   :  { %4485 = vpow2.f32 %v2734_v34  ;;  %v2740_v24 = vmul.f32 1.442695, %v2657_v57  ;;  %vm2973_vm2 = vcmp.gt.f32.partialorder %v5563_v47, 0.0  ;;  %v2736_v51 = vmul.f32 1.442695, %v2655_v27  ;;  %v5710_v31 = vpop.f32.mrf.mxu0  ;;  %v6576_v34 = vld [vmem:[#allocation4_spill] sm:$0xff] }
 0x18c   :  { %v2660_v36 = vmin.f32 %v5700_v54, 0.0  ;;  %v5707_v7 = vadd.f32 %v5380_v37, %v2523_v43  ;;  %v3034_v60 = vsel %vm2970_vm1, %v5534_v6, %v2906_v50  ;;  %v2909_v30 = vmul.f32 1.6732632, %v3749_v15  ;;  %v5713_v2 = vpop.f32.mrf.mxu1 }
 0x18d   :  { %4487 = vpow2.f32 %v2740_v24  ;;  %v2526_v49 = vmax.f32 %v2398_v45, %v2462_v5  ;;  %v3098_v25 = vmul.f32 1.050701, %v3034_v60  ;;  %vm2971_vm3 = vcmp.gt.f32.partialorder %v5589_v21, 0.0  ;;  %v5726_v3 = vpop.f32.mrf.mxu0  ;;  %v6575_v45 = vld [vmem:[#allocation3_spill] sm:$0xff]  ;;  %v6578_v24 = vld [vmem:[#allocation6_spill] sm:$0xff] }
 0x18e   :  { %4489 = vpow2.f32 %v2736_v51  ;;  %v2746_v53 = vmul.f32 1.442695, %v2660_v36  ;;  %v2658_v32 = vmin.f32 %v5707_v7, 0.0  ;;  %v4482_v61 = vpop.eup %4481  ;;  %v3037_v8 = vsel %vm2973_vm2, %v5563_v47, %v2909_v30  ;;  %v5736_v59 = vpop.f32.mrf.mxu1 }
 0x18f   :  { %v5718_v26 = vadd.f32 %v5380_v37, %v2526_v49  ;;  %v2396_v6 = vmax.f32 %v5199_v0, %v5584_v20  ;;  %v3874_v44 = vpack.c.bf16 %v3098_v25, %v3098_v25  ;;  %v3101_v9 = vmul.f32 1.050701, %v3037_v8  ;;  %v5755_v43 = vpop.f32.mrf.mxu0 }
 0x190   :  { %v3747_v33 = vadd.f32 -1.0, %v4482_v61  ;;  %4491 = vpow2.f32 %v2746_v53  ;;  %vm2976_vm5 = vcmp.gt.f32.partialorder %v5620_v56, 0.0  ;;  %v2742_v38 = vmul.f32 1.442695, %v2658_v32  ;;  %v5762_v36 = vpop.f32.mrf.mxu1 }
 0x191   :  { %v2661_v39 = vmin.f32 %v5718_v26, 0.0  ;;  %v2460_v47 = vmax.f32 %v5201_v1, %v5586_v17  ;;  %3419 = vst.msk [vmem:[%s6494_s3 + $0x30] sm:$0xf] %vm3406_vm4, %v3874_v44  ;;  %v3877_v0 = vpack.c.bf16 %v3101_v9, %v3101_v9  ;;  %v2401_v35 = vmax.f32 %v5203_v10, %v5602_v13  ;;  %v5780_v44 = vpop.f32.mrf.mxu0 }
 0x192   :  { %v2907_v20 = vmul.f32 1.6732632, %v3747_v33  ;;  %v2465_v41 = vmax.f32 %v6574_v40, %v5604_v18  ;;  %4493 = vpow2.f32 %v2742_v38  ;;  %v2399_v23 = vmax.f32 %v6575_v45, %v5611_v12  ;;  %v6580_v38 = vld [vmem:[#allocation8_spill] sm:$0xff] }
 0x193   :  { %v4484_v42 = vpop.eup %4483  ;;  %v2748_v1 = vmul.f32 1.442695, %v2661_v39  ;;  %v2524_v17 = vmax.f32 %v2396_v6, %v2460_v47  ;;  %3422 = vst.msk [vmem:[%s6494_s3 + $0x3c] sm:$0xf] %vm3406_vm4, %v3877_v0  ;;  %vm2974_vm6 = vcmp.gt.f32.partialorder %v5661_v55, 0.0  ;;  %v2463_v57 = vmax.f32 %v6576_v34, %v5613_v29  ;;  %v5786_v39 = vpop.f32.mrf.mxu1 }
 0x194   :  { %v3035_v10 = vsel %vm2971_vm3, %v5589_v21, %v2907_v20  ;;  %v3752_v13 = vadd.f32 -1.0, %v4484_v42  ;;  %v2529_v18 = vmax.f32 %v2401_v35, %v2465_v41  ;;  %v2402_v27 = vmax.f32 %v6577_v16, %v5626_v52  ;;  %v6581_v16 = vld [vmem:[#allocation9_spill] sm:$0xff] }
 0x195   :  { %v3099_v5 = vmul.f32 1.050701, %v3035_v10  ;;  %4495 = vpow2.f32 %v2748_v1  ;;  %v5751_v12 = vadd.f32 %v5380_v37, %v2524_v17  ;;  %v2527_v15 = vmax.f32 %v2399_v23, %v2463_v57  ;;  %v5799_v23 = vpop.f32.mrf.mxu0  ;;  %v5801_v34 = vpop.f32.mrf.mxu1 }
 0x196   :  { %v2912_v50 = vmul.f32 1.6732632, %v3752_v13  ;;  %v5758_v21 = vadd.f32 %v5380_v37, %v2529_v18  ;;  %v2466_v51 = vmax.f32 %v6578_v24, %v5628_v48  ;;  %vm2977_vm7 = vcmp.gt.f32.partialorder %v5679_v58, 0.0  ;;  %v6579_v48 = vld [vmem:[#allocation7_spill] sm:$0xff] }
 0x197   :  { %v3875_v29 = vpack.c.bf16 %v3099_v5, %v3099_v5  ;;  %vm2975_vm8 = vcmp.gt.f32.partialorder %v5686_v28, 0.0  ;;  %v2659_v60 = vmin.f32 %v5751_v12, 0.0  ;;  %v5772_v25 = vadd.f32 %v5380_v37, %v2527_v15 }
 0x198   :  { %v4486_v52 = vpop.eup %4485  ;;  %v3040_v30 = vsel %vm2976_vm5, %v5620_v56, %v2912_v50  ;;  %v2664_v49 = vmin.f32 %v5758_v21, 0.0  ;;  %v2400_v53 = vmax.f32 %v6579_v48, %v5641_v22  ;;  %v2530_v6 = vmax.f32 %v2402_v27, %v2466_v51 }
 0x199   :  { %3420 = vst.msk [vmem:[%s6494_s3 + $0x34] sm:$0xf] %vm3406_vm4, %v3875_v29  ;;  %v3104_v32 = vmul.f32 1.050701, %v3040_v30  ;;  %v3750_v61 = vadd.f32 -1.0, %v4486_v52  ;;  %vm2980_vm9 = vcmp.gt.f32.partialorder %v5700_v54, 0.0  ;;  %v2464_v22 = vmax.f32 %v6580_v38, %v5643_v62 }
 0x19a   :  { %v2744_v8 = vmul.f32 1.442695, %v2659_v60  ;;  %v4488_v56 = vpop.eup %4487  ;;  %v2754_v9 = vmul.f32 1.442695, %v2664_v49  ;;  %v2662_v33 = vmin.f32 %v5772_v25, 0.0  ;;  %v5789_v42 = vadd.f32 %v5380_v37, %v2530_v6  ;;  %v5816_v49 = vpop.f32.mrf.mxu0 }
 0x19b   :  { %v4490_v47 = vpop.eup %4489  ;;  %v3880_v0 = vpack.c.bf16 %v3104_v32, %v3104_v32  ;;  %v2910_v20 = vmul.f32 1.6732632, %v3750_v61  ;;  %v3753_v35 = vadd.f32 -1.0, %v4488_v56  ;;  %vm2978_vm10 = vcmp.gt.f32.partialorder %v5707_v7, 0.0  ;;  %v5828_v61 = vpop.f32.mrf.mxu1 }
 0x19c   :  { %4497 = vpow2.f32 %v2744_v8  ;;  %v3751_v40 = vadd.f32 -1.0, %v4490_v47  ;;  %v2750_v41 = vmul.f32 1.442695, %v2662_v33  ;;  %v2528_v45 = vmax.f32 %v2400_v53, %v2464_v22 }
 0x19d   :  { %4499 = vpow2.f32 %v2754_v9  ;;  %v4492_v1 = vpop.eup %4491  ;;  %3425 = vst.msk [vmem:[%s6494_s3 + $0x48] sm:$0xf] %vm3406_vm4, %v3880_v0  ;;  %v3038_v62 = vsel %vm2974_vm6, %v5661_v55, %v2910_v20  ;;  %v2913_v17 = vmul.f32 1.6732632, %v3753_v35  ;;  %v2665_v5 = vmin.f32 %v5789_v42, 0.0  ;;  %v6584_v20 = vld [vmem:[#allocation12_spill] sm:$0xff] }
 0x19e   :  { %v3102_v10 = vmul.f32 1.050701, %v3038_v62  ;;  %v2911_v13 = vmul.f32 1.6732632, %v3751_v40  ;;  %v3756_v18 = vadd.f32 -1.0, %v4492_v1  ;;  %4501 = vpow2.f32 %v2750_v41  ;;  %v5845_v40 = vpop.f32.mrf.mxu0  ;;  %v6585_v1 = vld [vmem:[#allocation13_spill] sm:$0xff] }
 0x19f   :  { %v3041_v57 = vsel %vm2977_vm7, %v5679_v58, %v2913_v17  ;;  %v5808_v55 = vadd.f32 %v5380_v37, %v2528_v45  ;;  %v2405_v27 = vmax.f32 %v6581_v16, %v5656_v19  ;;  %v4494_v50 = vpop.eup %4493  ;;  %v2756_v30 = vmul.f32 1.442695, %v2665_v5  ;;  %v5852_v17 = vpop.f32.mrf.mxu1  ;;  %v6586_v45 = vld [vmem:[#allocation14_spill] sm:$0xff]  ;;  %v6587_v5 = vld [vmem:[#allocation15_spill] sm:$0xff] }
 0x1a0   :  { %v3878_v15 = vpack.c.bf16 %v3102_v10, %v3102_v10  ;;  %v3105_v24 = vmul.f32 1.050701, %v3041_v57  ;;  %v3039_v51 = vsel %vm2975_vm8, %v5686_v28, %v2911_v13  ;;  %v2916_v29 = vmul.f32 1.6732632, %v3756_v18  ;;  %v6582_v28 = vld [vmem:[#allocation10_spill] sm:$0xff] }
 0x1a1   :  { %v3103_v60 = vmul.f32 1.050701, %v3039_v51  ;;  %v3754_v52 = vadd.f32 -1.0, %v4494_v50  ;;  %v2663_v58 = vmin.f32 %v5808_v55, 0.0  ;;  %vm2981_vm11 = vcmp.gt.f32.partialorder %v5718_v26, 0.0 }
 0x1a2   :  { %v4496_v48 = vpop.eup %4495  ;;  %3423 = vst.msk [vmem:[%s6494_s3 + $0x40] sm:$0xf] %vm3406_vm4, %v3878_v15  ;;  %v3881_v19 = vpack.c.bf16 %v3105_v24, %v3105_v24  ;;  %v3044_v53 = vsel %vm2980_vm9, %v5700_v54, %v2916_v29  ;;  %v2469_v32 = vmax.f32 %v6582_v28, %v5658_v14  ;;  %4503 = vpow2.f32 %v2756_v30  ;;  %v6583_v54 = vld [vmem:[#allocation11_spill] sm:$0xff]  ;;  %v6588_v24 = vld [vmem:[#allocation16_spill] sm:$0xff]  ;;  %v5872_v29 = vpop.f32.mrf.mxu0 }
 0x1a3   :  { %v3879_v8 = vpack.c.bf16 %v3103_v60, %v3103_v60  ;;  %v3108_v6 = vmul.f32 1.050701, %v3044_v53  ;;  %v2914_v56 = vmul.f32 1.6732632, %v3754_v52  ;;  %v3757_v9 = vadd.f32 -1.0, %v4496_v48  ;;  %v5879_v52 = vpop.f32.mrf.mxu1 }
 0x1a4   :  { %3426 = vst.msk [vmem:[%s6494_s3 + $0x4c] sm:$0xf] %vm3406_vm4, %v3881_v19  ;;  %v2752_v33 = vmul.f32 1.442695, %v2663_v58  ;;  %v2533_v38 = vmax.f32 %v2405_v27, %v2469_v32  ;;  %v2403_v22 = vmax.f32 %v6583_v54, %v5673_v4  ;;  %v2467_v35 = vmax.f32 %v6584_v20, %v5675_v63  ;;  %v6590_v20 = vld [vmem:[#allocation18_spill] sm:$0xff] }
 0x1a5   :  { %3424 = vst.msk [vmem:[%s6494_s3 + $0x44] sm:$0xf] %vm3406_vm4, %v3879_v8  ;;  %v3884_v14 = vpack.c.bf16 %v3108_v6, %v3108_v6  ;;  %v3042_v47 = vsel %vm2978_vm10, %v5707_v7, %v2914_v56  ;;  %v2917_v0 = vmul.f32 1.6732632, %v3757_v9  ;;  %v2406_v62 = vmax.f32 %v6585_v1, %v5695_v46  ;;  %v6589_v56 = vld [vmem:[#allocation17_spill] sm:$0xff] }
 0x1a6   :  { %v3106_v41 = vmul.f32 1.050701, %v3042_v47  ;;  %4505 = vpow2.f32 %v2752_v33  ;;  %v5848_v4 = vadd.f32 %v5380_v37, %v2533_v38  ;;  %vm2979_vm12 = vcmp.gt.f32.partialorder %v5751_v12, 0.0  ;;  %v5896_v33 = vpop.f32.mrf.mxu0  ;;  %v5904_v47 = vpop.f32.mrf.mxu1 }
 0x1a7   :  { %3429 = vst.msk [vmem:[%s6494_s3 + $0x58] sm:$0xf] %vm3406_vm4, %v3884_v14  ;;  %v3045_v63 = vsel %vm2981_vm11, %v5718_v26, %v2917_v0  ;;  %v2531_v7 = vmax.f32 %v2403_v22, %v2467_v35  ;;  %v2470_v10 = vmax.f32 %v6586_v45, %v5702_v11  ;;  %v2404_v16 = vmax.f32 %v6587_v5, %v5710_v31 }
 0x1a8   :  { %v3882_v18 = vpack.c.bf16 %v3106_v41, %v3106_v41  ;;  %v3109_v46 = vmul.f32 1.050701, %v3045_v63  ;;  %v2668_v57 = vmin.f32 %v5848_v4, 0.0  ;;  %v2468_v51 = vmax.f32 %v6588_v24, %v5713_v2 }
 0x1a9   :  { %v4498_v13 = vpop.eup %4497  ;;  %v5868_v15 = vadd.f32 %v5380_v37, %v2531_v7  ;;  %v2534_v26 = vmax.f32 %v2406_v62, %v2470_v10  ;;  %vm2984_vm13 = vcmp.gt.f32.partialorder %v5758_v21, 0.0  ;;  %vm2982_vm14 = vcmp.gt.f32.partialorder %v5772_v25, 0.0  ;;  %v5913_v7 = vpop.f32.mrf.mxu0 }
 0x1aa   :  { %v4500_v27 = vpop.eup %4499  ;;  %v3755_v50 = vadd.f32 -1.0, %v4498_v13  ;;  %3427 = vst.msk [vmem:[%s6494_s3 + $0x50] sm:$0xf] %vm3406_vm4, %v3882_v18  ;;  %v3885_v11 = vpack.c.bf16 %v3109_v46, %v3109_v46  ;;  %v2762_v31 = vmul.f32 1.442695, %v2668_v57  ;;  %v2532_v28 = vmax.f32 %v2404_v16, %v2468_v51  ;;  %v6592_v13 = vld [vmem:[#allocation20_spill] sm:$0xff]  ;;  %v5923_v46 = vpop.f32.mrf.mxu1 }
 0x1ab   :  { %v3760_v60 = vadd.f32 -1.0, %v4500_v27  ;;  %v4502_v30 = vpop.eup %4501  ;;  %v2666_v2 = vmin.f32 %v5868_v15, 0.0  ;;  %v5884_v48 = vadd.f32 %v5380_v37, %v2534_v26  ;;  %v2409_v9 = vmax.f32 %v6589_v56, %v5726_v3  ;;  %v5932_v16 = vld [vmem:[%s6493_s2] ss:$0 sm:$0xff] }
 0x1ac   :  { %v2915_v58 = vmul.f32 1.6732632, %v3755_v50  ;;  %3430 = vst.msk [vmem:[%s6494_s3 + $0x5c] sm:$0xf] %vm3406_vm4, %v3885_v11  ;;  %v3758_v53 = vadd.f32 -1.0, %v4502_v30  ;;  %4507 = vpow2.f32 %v2762_v31  ;;  %v5902_v14 = vadd.f32 %v5380_v37, %v2532_v28  ;;  %v6594_v50 = vld [vmem:[#allocation22_spill] sm:$0xff] }
 0x1ad   :  { %v2920_v19 = vmul.f32 1.6732632, %v3760_v60  ;;  %v2758_v8 = vmul.f32 1.442695, %v2666_v2  ;;  %v2669_v6 = vmin.f32 %v5884_v48, 0.0  ;;  %v2473_v35 = vmax.f32 %v6590_v20, %v5736_v59  ;;  %v6595_v30 = vld [vmem:[#allocation23_spill] sm:$0xff] }
 0x1ae   :  { %v3043_v32 = vsel %vm2979_vm12, %v5751_v12, %v2915_v58  ;;  %v2918_v22 = vmul.f32 1.6732632, %v3758_v53  ;;  %vm2985_vm15 = vcmp.gt.f32.partialorder %v5789_v42, 0.0  ;;  %v2471_v18 = vmax.f32 %v6592_v13, %v5762_v36  ;;  %v5949_v58 = vpop.f32.mrf.mxu0  ;;  %v6596_v53 = vld [vmem:[#allocation24_spill] sm:$0xff] }
 0x1af   :  { %v3107_v38 = vmul.f32 1.050701, %v3043_v32  ;;  %v3048_v54 = vsel %vm2984_vm13, %v5758_v21, %v2920_v19  ;;  %4509 = vpow2.f32 %v2758_v8  ;;  %v2764_v0 = vmul.f32 1.442695, %v2669_v6  ;;  %v4504_v1 = vpop.eup %4503  ;;  %v5959_v32 = vpop.f32.mrf.mxu1 }
 0x1b0   :  { %v3112_v12 = vmul.f32 1.050701, %v3048_v54  ;;  %v3046_v41 = vsel %vm2982_vm14, %v5772_v25, %v2918_v22  ;;  %v2667_v21 = vmin.f32 %v5902_v14, 0.0  ;;  %v2537_v63 = vmax.f32 %v2409_v9, %v2473_v35  ;;  %v6591_v25 = vld [vmem:[#allocation19_spill] sm:$0xff]  ;;  %v5970_v20 = vpop.f32.mrf.mxu0 }
 0x1b1   :  { %v3883_v3 = vpack.c.bf16 %v3107_v38, %v3107_v38  ;;  %v3110_v62 = vmul.f32 1.050701, %v3046_v41  ;;  %4511 = vpow2.f32 %v2764_v0  ;;  %v3761_v59 = vadd.f32 -1.0, %v4504_v1  ;;  %v6597_v38 = vld [vmem:[#allocation25_spill] sm:$0xff]  ;;  %v5976_v41 = vpop.f32.mrf.mxu1  ;;  %v6598_v1 = vld [vmem:[#allocation26_spill] sm:$0xff] }
 0x1b2   :  { %v3888_v37 = vpack.c.bf16 %v3112_v12, %v3112_v12  ;;  %v2760_v45 = vmul.f32 1.442695, %v2667_v21  ;;  %v2407_v10 = vmax.f32 %v6591_v25, %v5755_v43  ;;  %v5935_v27 = vadd.f32 %v5932_v16, %v2537_v63  ;;  %v6593_v43 = vld [vmem:[#allocation21_spill] sm:$0xff] }
 0x1b3   :  { %3428 = vst.msk [vmem:[%s6494_s3 + $0x54] sm:$0xf] %vm3406_vm4, %v3883_v3  ;;  %v4506_v57 = vpop.eup %4505  ;;  %v3886_v5 = vpack.c.bf16 %v3110_v62, %v3110_v62  ;;  %v2410_v36 = vmax.f32 %v6593_v43, %v5780_v44  ;;  %v2474_v26 = vmax.f32 %v6594_v50, %v5786_v39  ;;  %v2921_v24 = vmul.f32 1.6732632, %v3761_v59 }
 0x1b4   :  { %3433 = vst.msk [vmem:[%s6494_s3 + $0x68] sm:$0xf] %vm3406_vm4, %v3888_v37  ;;  %v3759_v51 = vadd.f32 -1.0, %v4506_v57  ;;  %4513 = vpow2.f32 %v2760_v45  ;;  %v2535_v11 = vmax.f32 %v2407_v10, %v2471_v18  ;;  %vm2983_vm0 = vcmp.gt.f32.partialorder %v5808_v55, 0.0  ;;  %v6599_v45 = vld [vmem:[#allocation27_spill] sm:$0xff]  ;;  %v6600_v18 = vld [vmem:[#allocation28_spill] sm:$0xff] }
 0x1b5   :  { %3431 = vst.msk [vmem:[%s6494_s3 + $0x60] sm:$0xf] %vm3406_vm4, %v3886_v5  ;;  %v2672_v60 = vmin.f32 %v5935_v27, 0.0  ;;  %v2538_v31 = vmax.f32 %v2410_v36, %v2474_v26  ;;  %v2408_v44 = vmax.f32 %v6595_v30, %v5799_v23  ;;  %v3049_v39 = vsel %vm2985_vm15, %v5789_v42, %v2921_v24  ;;  %v6602_v26 = vld [vmem:[#allocation30_spill] sm:$0xff] }
 0x1b6   :  { %v2919_v2 = vmul.f32 1.6732632, %v3759_v51  ;;  %v5955_v19 = vadd.f32 %v5932_v16, %v2535_v11  ;;  %v2472_v28 = vmax.f32 %v6596_v53, %v5801_v34  ;;  %v3113_v8 = vmul.f32 1.050701, %v3049_v39  ;;  %v6003_v51 = vpop.f32.mrf.mxu1 }
 0x1b7   :  { %vm2988_vm1 = vcmp.gt.f32.partialorder %v5848_v4, 0.0  ;;  %v2770_v6 = vmul.f32 1.442695, %v2672_v60  ;;  %v5963_v23 = vadd.f32 %v5932_v16, %v2538_v31  ;;  %v2413_v54 = vmax.f32 %v6597_v38, %v5816_v49 }
 0x1b8   :  { %v3047_v56 = vsel %vm2983_vm0, %v5808_v55, %v2919_v2  ;;  %v2670_v42 = vmin.f32 %v5955_v19, 0.0  ;;  %v2536_v9 = vmax.f32 %v2408_v44, %v2472_v28  ;;  %v3889_v12 = vpack.c.bf16 %v3113_v8, %v3113_v8 }
 0x1b9   :  { %v4508_v22 = vpop.eup %4507  ;;  %v3111_v34 = vmul.f32 1.050701, %v3047_v56  ;;  %4515 = vpow2.f32 %v2770_v6  ;;  %v2673_v0 = vmin.f32 %v5963_v23, 0.0  ;;  %vm2986_vm2 = vcmp.gt.f32.partialorder %v5868_v15, 0.0  ;;  %v6603_v56 = vld [vmem:[#allocation31_spill] sm:$0xff] }
 0x1ba   :  { %v3764_v35 = vadd.f32 -1.0, %v4508_v22  ;;  %v2766_v3 = vmul.f32 1.442695, %v2670_v42  ;;  %v5974_v55 = vadd.f32 %v5932_v16, %v2536_v9  ;;  %3434 = vst.msk [vmem:[%s6494_s3 + $0x6c] sm:$0xf] %vm3406_vm4, %v3889_v12  ;;  %vm2989_vm3 = vcmp.gt.f32.partialorder %v5884_v48, 0.0  ;;  %v6020_v9 = vpop.f32.mrf.mxu1 }
 0x1bb   :  { %v3887_v49 = vpack.c.bf16 %v3111_v34, %v3111_v34  ;;  %v2772_v21 = vmul.f32 1.442695, %v2673_v0  ;;  %v2477_v37 = vmax.f32 %v6598_v1, %v5828_v61  ;;  %v2411_v25 = vmax.f32 %v6599_v45, %v5845_v40  ;;  %v5994_v61 = vpop.f32.mrf.mxu0  ;;  %v6601_v40 = vld [vmem:[#allocation29_spill] sm:$0xff]  ;;  %v6604_v22 = vld [vmem:[#allocation32_spill] sm:$0xff] }
 0x1bc   :  { %v4510_v62 = vpop.eup %4509  ;;  %v2924_v63 = vmul.f32 1.6732632, %v3764_v35  ;;  %4517 = vpow2.f32 %v2766_v3  ;;  %v2671_v59 = vmin.f32 %v5974_v55, 0.0  ;;  %v2475_v57 = vmax.f32 %v6600_v18, %v5852_v17 }
 0x1bd   :  { %3432 = vst.msk [vmem:[%s6494_s3 + $0x64] sm:$0xf] %vm3406_vm4, %v3887_v49  ;;  %v3762_v10 = vadd.f32 -1.0, %v4510_v62  ;;  %4519 = vpow2.f32 %v2772_v21  ;;  %v2541_v13 = vmax.f32 %v2413_v54, %v2477_v37  ;;  %v2414_v50 = vmax.f32 %v6601_v40, %v5872_v29  ;;  %v6013_v53 = vpop.f32.mrf.mxu0  ;;  %v6047_v62 = vpop.f32.mrf.mxu1 }
 0x1be   :  { %v4512_v5 = vpop.eup %4511  ;;  %v3052_v43 = vsel %vm2988_vm1, %v5848_v4, %v2924_v63  ;;  %v2768_v36 = vmul.f32 1.442695, %v2671_v59  ;;  %v2478_v24 = vmax.f32 %v6602_v26, %v5879_v52  ;;  %vm2987_vm5 = vcmp.gt.f32.partialorder %v5902_v14, 0.0 }
 0x1bf   :  { %v3116_v11 = vmul.f32 1.050701, %v3052_v43  ;;  %v2922_v60 = vmul.f32 1.6732632, %v3762_v10  ;;  %v3765_v31 = vadd.f32 -1.0, %v4512_v5  ;;  %v6006_v17 = vadd.f32 %v5932_v16, %v2541_v13 }
 0x1c0   :  { %4521 = vpow2.f32 %v2768_v36  ;;  %v2539_v30 = vmax.f32 %v2411_v25, %v2475_v57  ;;  %v2542_v4 = vmax.f32 %v2414_v50, %v2478_v24  ;;  %v2412_v42 = vmax.f32 %v6603_v56, %v5896_v33  ;;  %v6605_v25 = vld [vmem:[#allocation33_spill] sm:$0xff]  ;;  %v6607_v57 = vld [vmem:[#allocation35_spill] sm:$0xff] }
 0x1c1   :  { %v4514_v44 = vpop.eup %4513  ;;  %v3892_v39 = vpack.c.bf16 %v3116_v11, %v3116_v11  ;;  %v3050_v29 = vsel %vm2986_vm2, %v5868_v15, %v2922_v60  ;;  %v2925_v52 = vmul.f32 1.6732632, %v3765_v31  ;;  %v2676_v2 = vmin.f32 %v6006_v17, 0.0 }
 0x1c2   :  { %v3114_v28 = vmul.f32 1.050701, %v3050_v29  ;;  %v3763_v8 = vadd.f32 -1.0, %v4514_v44  ;;  %v6016_v6 = vadd.f32 %v5932_v16, %v2539_v30  ;;  %v6030_v54 = vadd.f32 %v5932_v16, %v2542_v4 }
 0x1c3   :  { %3437 = vst.msk [vmem:[%s6494_s3 + $0x78] sm:$0xf] %vm3406_vm4, %v3892_v39  ;;  %v3053_v15 = vsel %vm2989_vm3, %v5884_v48, %v2925_v52  ;;  %v2778_v38 = vmul.f32 1.442695, %v2676_v2  ;;  %v2476_v12 = vmax.f32 %v6604_v22, %v5904_v47  ;;  %vm2992_vm6 = vcmp.gt.f32.partialorder %v5935_v27, 0.0  ;;  %v6038_v48 = vpop.f32.mrf.mxu0 }
 0x1c4   :  { %v3890_v34 = vpack.c.bf16 %v3114_v28, %v3114_v28  ;;  %v3117_v33 = vmul.f32 1.050701, %v3053_v15  ;;  %v2923_v0 = vmul.f32 1.6732632, %v3763_v8  ;;  %v2674_v35 = vmin.f32 %v6016_v6, 0.0  ;;  %v6609_v8 = vld [vmem:[#allocation37_spill] sm:$0xff] }
 0x1c5   :  { %vm2990_vm7 = vcmp.gt.f32.partialorder %v5955_v19, 0.0  ;;  %4523 = vpow2.f32 %v2778_v38  ;;  %v2677_v3 = vmin.f32 %v6030_v54, 0.0  ;;  %v2540_v37 = vmax.f32 %v2412_v42, %v2476_v12  ;;  %v6064_v26 = vpop.f32.mrf.mxu0 }
 0x1c6   :  { %v4516_v49 = vpop.eup %4515  ;;  %3435 = vst.msk [vmem:[%s6494_s3 + $0x70] sm:$0xf] %vm3406_vm4, %v3890_v34  ;;  %v3893_v47 = vpack.c.bf16 %v3117_v33, %v3117_v33  ;;  %v3051_v21 = vsel %vm2987_vm5, %v5902_v14, %v2923_v0  ;;  %v2774_v1 = vmul.f32 1.442695, %v2674_v35  ;;  %v2417_v10 = vmax.f32 %v6605_v25, %v5913_v7  ;;  %v6606_v14 = vld [vmem:[#allocation34_spill] sm:$0xff]  ;;  %v6608_v7 = vld [vmem:[#allocation36_spill] sm:$0xff] }
 0x1c7   :  { %v3115_v63 = vmul.f32 1.050701, %v3051_v21  ;;  %v3768_v59 = vadd.f32 -1.0, %v4516_v49  ;;  %v2780_v45 = vmul.f32 1.442695, %v2677_v3  ;;  %v6056_v13 = vadd.f32 %v5932_v16, %v2540_v37  ;;  %v6088_v15 = vpop.f32.mrf.mxu0  ;;  %v6611_v3 = vld [vmem:[#allocation39_spill] sm:$0xff] }
 0x1c8   :  { %3438 = vst.msk [vmem:[%s6494_s3 + $0x7c] sm:$0xf] %vm3406_vm4, %v3893_v47  ;;  %4525 = vpow2.f32 %v2774_v1  ;;  %v2481_v18 = vmax.f32 %v6606_v14, %v5923_v46  ;;  %v2415_v5 = vmax.f32 %v6607_v57, %v5949_v58  ;;  %v2479_v50 = vmax.f32 %v6608_v7, %v5959_v32  ;;  %v6068_v46 = vpop.f32.mrf.mxu1  ;;  %v6613_v14 = vld [vmem:[#allocation41_spill] sm:$0xff] }
 0x1c9   :  { %v4518_v43 = vpop.eup %4517  ;;  %v3891_v36 = vpack.c.bf16 %v3115_v63, %v3115_v63  ;;  %v2928_v40 = vmul.f32 1.6732632, %v3768_v59  ;;  %4527 = vpow2.f32 %v2780_v45  ;;  %vm2993_vm8 = vcmp.gt.f32.partialorder %v5963_v23, 0.0  ;;  %v6109_v63 = vpop.f32.mrf.mxu0 }
 0x1ca   :  { %v4520_v24 = vpop.eup %4519  ;;  %v3766_v11 = vadd.f32 -1.0, %v4518_v43  ;;  %v2675_v60 = vmin.f32 %v6056_v13, 0.0  ;;  %v2545_v31 = vmax.f32 %v2417_v10, %v2481_v18  ;;  %vm2991_vm9 = vcmp.gt.f32.partialorder %v5974_v55, 0.0  ;;  %v6093_v34 = vpop.f32.mrf.mxu1 }
 0x1cb   :  { %3436 = vst.msk [vmem:[%s6494_s3 + $0x74] sm:$0xf] %vm3406_vm4, %v3891_v36  ;;  %v3056_v58 = vsel %vm2992_vm6, %v5935_v27, %v2928_v40  ;;  %v3769_v32 = vadd.f32 -1.0, %v4520_v24  ;;  %v2543_v30 = vmax.f32 %v2415_v5, %v2479_v50  ;;  %v2418_v56 = vmax.f32 %v6609_v8, %v5970_v20  ;;  %v6610_v27 = vld [vmem:[#allocation38_spill] sm:$0xff]  ;;  %v6615_v24 = vld [vmem:[#allocation43_spill] sm:$0xff] }
 0x1cc   :  { %v3120_v4 = vmul.f32 1.050701, %v3056_v58  ;;  %v2926_v44 = vmul.f32 1.6732632, %v3766_v11  ;;  %v2776_v39 = vmul.f32 1.442695, %v2675_v60  ;;  %v6079_v29 = vadd.f32 %v5932_v16, %v2545_v31  ;;  %v6116_v57 = vpop.f32.mrf.mxu1  ;;  %v6135_v60 = vpop.f32.mrf.mxu0 }
 0x1cd   :  { %v4522_v52 = vpop.eup %4521  ;;  %v2929_v2 = vmul.f32 1.6732632, %v3769_v32  ;;  %v6082_v28 = vadd.f32 %v5932_v16, %v2543_v30  ;;  %v2482_v42 = vmax.f32 %v6610_v27, %v5976_v41  ;;  %vm2996_vm10 = vcmp.gt.f32.partialorder %v6006_v17, 0.0 }
 0x1ce   :  { %v3896_v38 = vpack.c.bf16 %v3120_v4, %v3120_v4  ;;  %v3054_v22 = vsel %vm2990_vm7, %v5955_v19, %v2926_v44  ;;  %v3767_v12 = vadd.f32 -1.0, %v4522_v52  ;;  %4529 = vpow2.f32 %v2776_v39  ;;  %v6616_v4 = vld [vmem:[#allocation44_spill] sm:$0xff] }
 0x1cf   :  { %v3118_v33 = vmul.f32 1.050701, %v3054_v22  ;;  %v3057_v0 = vsel %vm2993_vm8, %v5963_v23, %v2929_v2  ;;  %v2680_v20 = vmin.f32 %v6079_v29, 0.0  ;;  %v2678_v35 = vmin.f32 %v6082_v28, 0.0  ;;  %v6612_v23 = vld [vmem:[#allocation40_spill] sm:$0xff] }
 0x1d0   :  { %3441 = vst.msk [vmem:[%s6494_s3 + $0x88] sm:$0xf] %vm3406_vm4, %v3896_v38  ;;  %v3121_v41 = vmul.f32 1.050701, %v3057_v0  ;;  %v2927_v19 = vmul.f32 1.6732632, %v3767_v12  ;;  %v2416_v49 = vmax.f32 %v6611_v3, %v5994_v61  ;;  %v2546_v1 = vmax.f32 %v2418_v56, %v2482_v42  ;;  %v6158_v12 = vpop.f32.mrf.mxu0 }
 0x1d1   :  { %v3894_v47 = vpack.c.bf16 %v3118_v33, %v3118_v33  ;;  %v2786_v21 = vmul.f32 1.442695, %v2680_v20  ;;  %v2480_v37 = vmax.f32 %v6612_v23, %v6003_v51  ;;  %v2782_v10 = vmul.f32 1.442695, %v2678_v35  ;;  %v6618_v20 = vld [vmem:[#allocation46_spill] sm:$0xff] }
 0x1d2   :  { %v4524_v59 = vpop.eup %4523  ;;  %v3897_v45 = vpack.c.bf16 %v3121_v41, %v3121_v41  ;;  %v3055_v25 = vsel %vm2991_vm9, %v5974_v55, %v2927_v19  ;;  %v2421_v18 = vmax.f32 %v6613_v14, %v6013_v53  ;;  %v6123_v5 = vadd.f32 %v5932_v16, %v2546_v1  ;;  %v6614_v53 = vld [vmem:[#allocation42_spill] sm:$0xff]  ;;  %v6180_v23 = vpop.f32.mrf.mxu0 }
 0x1d3   :  { %3439 = vst.msk [vmem:[%s6494_s3 + $0x80] sm:$0xf] %vm3406_vm4, %v3894_v47  ;;  %v3119_v61 = vmul.f32 1.050701, %v3055_v25  ;;  %v3772_v51 = vadd.f32 -1.0, %v4524_v59  ;;  %4531 = vpow2.f32 %v2786_v21  ;;  %vm2994_vm11 = vcmp.gt.f32.partialorder %v6016_v6, 0.0 }
 0x1d4   :  { %3442 = vst.msk [vmem:[%s6494_s3 + $0x8c] sm:$0xf] %vm3406_vm4, %v3897_v45  ;;  %4533 = vpow2.f32 %v2782_v10  ;;  %v2544_v55 = vmax.f32 %v2416_v49, %v2480_v37  ;;  %v2485_v43 = vmax.f32 %v6614_v53, %v6020_v9  ;;  %v2681_v50 = vmin.f32 %v6123_v5, 0.0  ;;  %v6142_v9 = vpop.f32.mrf.mxu1  ;;  %v6619_v25 = vld [vmem:[#allocation47_spill] sm:$0xff] }
 0x1d5   :  { %v4526_v36 = vpop.eup %4525  ;;  %v3895_v40 = vpack.c.bf16 %v3119_v61, %v3119_v61  ;;  %v2932_v7 = vmul.f32 1.6732632, %v3772_v51  ;;  %v2419_v11 = vmax.f32 %v6615_v24, %v6038_v48  ;;  %v2483_v44 = vmax.f32 %v6616_v4, %v6047_v62  ;;  %v6617_v62 = vld [vmem:[#allocation45_spill] sm:$0xff]  ;;  %v6620_v61 = vld [vmem:[#allocation48_spill] sm:$0xff] }
 0x1d6   :  { %v4528_v31 = vpop.eup %4527  ;;  %v3770_v58 = vadd.f32 -1.0, %v4526_v36  ;;  %v6138_v32 = vadd.f32 %v5932_v16, %v2544_v55  ;;  %v2549_v30 = vmax.f32 %v2421_v18, %v2485_v43  ;;  %vm2997_vm12 = vcmp.gt.f32.partialorder %v6030_v54, 0.0  ;;  %v6165_v19 = vpop.f32.mrf.mxu1  ;;  %v6621_v55 = vld [vmem:[#allocation49_spill] sm:$0xff] }
 0x1d7   :  { %3440 = vst.msk [vmem:[%s6494_s3 + $0x84] sm:$0xf] %vm3406_vm4, %v3895_v40  ;;  %v3060_v48 = vsel %vm2996_vm10, %v6006_v17, %v2932_v7  ;;  %v3773_v39 = vadd.f32 -1.0, %v4528_v31  ;;  %v2788_v52 = vmul.f32 1.442695, %v2681_v50  ;;  %v2422_v27 = vmax.f32 %v6617_v62, %v6064_v26  ;;  %v6622_v40 = vld [vmem:[#allocation50_spill] sm:$0xff] }
 0x1d8   :  { %v3124_v2 = vmul.f32 1.050701, %v3060_v48  ;;  %v2930_v8 = vmul.f32 1.6732632, %v3770_v58  ;;  %v2679_v56 = vmin.f32 %v6138_v32, 0.0  ;;  %v6156_v38 = vadd.f32 %v5932_v16, %v2549_v30  ;;  %v6185_v14 = vpop.f32.mrf.mxu1  ;;  %v6211_v58 = vpop.f32.mrf.mxu0  ;;  %v6625_v62 = vld [vmem:[#allocation53_spill] sm:$0xff] }
 0x1d9   :  { %v2933_v42 = vmul.f32 1.6732632, %v3773_v39  ;;  %4535 = vpow2.f32 %v2788_v52  ;;  %v2547_v22 = vmax.f32 %v2419_v11, %v2483_v44  ;;  %v2486_v41 = vmax.f32 %v6618_v20, %v6068_v46  ;;  %v6623_v11 = vld [vmem:[#allocation51_spill] sm:$0xff] }
 0x1da   :  { %v3900_v17 = vpack.c.bf16 %v3124_v2, %v3124_v2  ;;  %v3058_v33 = vsel %vm2994_vm11, %v6016_v6, %v2930_v8  ;;  %v2784_v0 = vmul.f32 1.442695, %v2679_v56  ;;  %vm2995_vm13 = vcmp.gt.f32.partialorder %v6056_v13, 0.0  ;;  %v6213_v44 = vpop.f32.mrf.mxu1 }
 0x1db   :  { %v4530_v26 = vpop.eup %4529  ;;  %v3122_v35 = vmul.f32 1.050701, %v3058_v33  ;;  %v3061_v3 = vsel %vm2997_vm12, %v6030_v54, %v2933_v42  ;;  %v2684_v49 = vmin.f32 %v6156_v38, 0.0  ;;  %v6177_v46 = vadd.f32 %v5932_v16, %v2547_v22  ;;  %v6626_v22 = vld [vmem:[#allocation54_spill] sm:$0xff]  ;;  %v6234_v33 = vpop.f32.mrf.mxu0 }
 0x1dc   :  { %3445 = vst.msk [vmem:[%s6494_s3 + $0x98] sm:$0xf] %vm3406_vm4, %v3900_v17  ;;  %v3125_v6 = vmul.f32 1.050701, %v3061_v3  ;;  %v3771_v47 = vadd.f32 -1.0, %v4530_v26  ;;  %4537 = vpow2.f32 %v2784_v0  ;;  %vm3000_vm14 = vcmp.gt.f32.partialorder %v6079_v29, 0.0  ;;  %v6240_v26 = vpop.f32.mrf.mxu1 }
 0x1dd   :  { %v3898_v21 = vpack.c.bf16 %v3122_v35, %v3122_v35  ;;  %v2794_v1 = vmul.f32 1.442695, %v2684_v49  ;;  %v2550_v54 = vmax.f32 %v2422_v27, %v2486_v41  ;;  %v2682_v45 = vmin.f32 %v6177_v46, 0.0 }
 0x1de   :  { %v3901_v37 = vpack.c.bf16 %v3125_v6, %v3125_v6  ;;  %v2931_v59 = vmul.f32 1.6732632, %v3771_v47  ;;  %v2420_v10 = vmax.f32 %v6619_v25, %v6088_v15  ;;  %v2484_v51 = vmax.f32 %v6620_v61, %v6093_v34  ;;  %v6257_v61 = vpop.f32.mrf.mxu1 }
 0x1df   :  { %3443 = vst.msk [vmem:[%s6494_s3 + $0x90] sm:$0xf] %vm3406_vm4, %v3898_v21  ;;  %4539 = vpow2.f32 %v2794_v1  ;;  %v6192_v18 = vadd.f32 %v5932_v16, %v2550_v54  ;;  %v2425_v53 = vmax.f32 %v6621_v55, %v6109_v63  ;;  %vm2998_vm15 = vcmp.gt.f32.partialorder %v6082_v28, 0.0  ;;  %v6628_v55 = vld [vmem:[#allocation56_spill] sm:$0xff] }
 0x1e0   :  { %v4532_v43 = vpop.eup %4531  ;;  %3446 = vst.msk [vmem:[%s6494_s3 + $0x9c] sm:$0xf] %vm3406_vm4, %v3901_v37  ;;  %v3059_v15 = vsel %vm2995_vm13, %v6056_v13, %v2931_v59  ;;  %v2790_v36 = vmul.f32 1.442695, %v2682_v45  ;;  %v2489_v7 = vmax.f32 %v6622_v40, %v6116_v57  ;;  %v2423_v31 = vmax.f32 %v6623_v11, %v6135_v60  ;;  %v6624_v57 = vld [vmem:[#allocation52_spill] sm:$0xff]  ;;  %v6627_v37 = vld [vmem:[#allocation55_spill] sm:$0xff]  ;;  %v6249_v45 = vpop.f32.mrf.mxu0 }
 0x1e1   :  { %v4534_v34 = vpop.eup %4533  ;;  %v3123_v50 = vmul.f32 1.050701, %v3059_v15  ;;  %v3776_v24 = vadd.f32 -1.0, %v4532_v43  ;;  %v2685_v63 = vmin.f32 %v6192_v18, 0.0  ;;  %v2548_v4 = vmax.f32 %v2420_v10, %v2484_v51 }
 0x1e2   :  { %v3774_v30 = vadd.f32 -1.0, %v4534_v34  ;;  %4541 = vpow2.f32 %v2790_v36  ;;  %v2553_v13 = vmax.f32 %v2425_v53, %v2489_v7  ;;  %v2487_v2 = vmax.f32 %v6624_v57, %v6142_v9  ;;  %v6629_v7 = vld [vmem:[#allocation57_spill] sm:$0xff] }
 0x1e3   :  { %v3899_v48 = vpack.c.bf16 %v3123_v50, %v3123_v50  ;;  %v2936_v39 = vmul.f32 1.6732632, %v3776_v24  ;;  %v2796_v52 = vmul.f32 1.442695, %v2685_v63  ;;  %v6218_v56 = vadd.f32 %v5932_v16, %v2548_v4  ;;  %v1819_v63 = vpop.f32.mrf.mxu0  ;;  %v2331_v4 = vpop.f32.mrf.mxu1 }
 0x1e4   :  { %v2934_v8 = vmul.f32 1.6732632, %v3774_v30  ;;  %v6221_v60 = vadd.f32 %v5932_v16, %v2553_v13  ;;  %v2426_v27 = vmax.f32 %v6625_v62, %v6158_v12  ;;  %v2551_v9 = vmax.f32 %v2423_v31, %v2487_v2 }
 0x1e5   :  { %3444 = vst.msk [vmem:[%s6494_s3 + $0x94] sm:$0xf] %vm3406_vm4, %v3899_v48  ;;  %v3064_v42 = vsel %vm3000_vm14, %v6079_v29, %v2936_v39  ;;  %4543 = vpow2.f32 %v2796_v52  ;;  %v2490_v17 = vmax.f32 %v6626_v22, %v6165_v19  ;;  %v2683_v41 = vmin.f32 %v6218_v56, 0.0  ;;  %v6295_v22 = vpop.f32.mrf.mxu0 }
 0x1e6   :  { %v4536_v0 = vpop.eup %4535  ;;  %v3128_v20 = vmul.f32 1.050701, %v3064_v42  ;;  %v3062_v12 = vsel %vm2998_vm15, %v6082_v28, %v2934_v8  ;;  %vm3001_vm0 = vcmp.gt.f32.partialorder %v6123_v5, 0.0  ;;  %v2688_v29 = vmin.f32 %v6221_v60, 0.0 }
 0x1e7   :  { %v3126_v35 = vmul.f32 1.050701, %v3062_v12  ;;  %v3777_v3 = vadd.f32 -1.0, %v4536_v0  ;;  %v2792_v19 = vmul.f32 1.442695, %v2683_v41  ;;  %v6245_v6 = vadd.f32 %v5932_v16, %v2551_v9  ;;  %v4310_v12 = vpop.f32.mrf.mxu1 }
 0x1e8   :  { %v3904_v49 = vpack.c.bf16 %v3128_v20, %v3128_v20  ;;  %v2554_v47 = vmax.f32 %v2426_v27, %v2490_v17  ;;  %v2802_v28 = vmul.f32 1.442695, %v2688_v29  ;;  %v2424_v59 = vmax.f32 %v6627_v37, %v6180_v23 }
 0x1e9   :  { %v4538_v21 = vpop.eup %4537  ;;  %v3902_v1 = vpack.c.bf16 %v3126_v35, %v3126_v35  ;;  %v2937_v54 = vmul.f32 1.6732632, %v3777_v3  ;;  %vm2999_vm1 = vcmp.gt.f32.partialorder %v6138_v32, 0.0  ;;  %4545 = vpow2.f32 %v2792_v19 }
 0x1ea   :  { %3449 = vst.msk [vmem:[%s6494_s3 + $0xa8] sm:$0xf] %vm3406_vm4, %v3904_v49  ;;  %v3775_v25 = vadd.f32 -1.0, %v4538_v21  ;;  %v2686_v10 = vmin.f32 %v6245_v6, 0.0  ;;  %4547 = vpow2.f32 %v2802_v28  ;;  %v6267_v51 = vadd.f32 %v5932_v16, %v2554_v47  ;;  %v6633_v49 = vld [vmem:[#allocation61_spill] sm:$0xff] }
 0x1eb   :  { %3447 = vst.msk [vmem:[%s6494_s3 + $0xa0] sm:$0xf] %vm3406_vm4, %v3902_v1  ;;  %v3065_v23 = vsel %vm3001_vm0, %v6123_v5, %v2937_v54  ;;  %v2488_v53 = vmax.f32 %v6628_v55, %v6185_v14  ;;  %v2429_v34 = vmax.f32 %v6629_v7, %v6211_v58  ;;  %vm3004_vm2 = vcmp.gt.f32.partialorder %v6156_v38, 0.0  ;;  %v6630_v14 = vld [vmem:[#allocation58_spill] sm:$0xff]  ;;  %v1832_v54 = vpop.f32.mrf.mxu0 }
 0x1ec   :  { %v4540_v43 = vpop.eup %4539  ;;  %v3129_v15 = vmul.f32 1.050701, %v3065_v23  ;;  %v2935_v36 = vmul.f32 1.6732632, %v3775_v25  ;;  %v2798_v40 = vmul.f32 1.442695, %v2686_v10  ;;  %v2493_v30 = vmax.f32 %v6630_v14, %v6213_v44  ;;  %v2344_v23 = vpop.f32.mrf.mxu1 }
 0x1ed   :  { %v3780_v50 = vadd.f32 -1.0, %v4540_v43  ;;  %v2689_v24 = vmin.f32 %v6267_v51, 0.0  ;;  %v2552_v5 = vmax.f32 %v2424_v59, %v2488_v53  ;;  %v6632_v44 = vld [vmem:[#allocation60_spill] sm:$0xff]  ;;  %vm3002_vm3 = vcmp.gt.f32.partialorder %v6177_v46, 0.0  ;;  %v6635_v59 = vld [vmem:[#allocation63_spill] sm:$0xff] }
 0x1ee   :  { %v3905_v11 = vpack.c.bf16 %v3129_v15, %v3129_v15  ;;  %v3063_v31 = vsel %vm2999_vm1, %v6138_v32, %v2935_v36  ;;  %4549 = vpow2.f32 %v2798_v40  ;;  %v2557_v2 = vmax.f32 %v2429_v34, %v2493_v30  ;;  %v6631_v32 = vld [vmem:[#allocation59_spill] sm:$0xff]  ;;  %v6636_v10 = vld [vmem:[#allocation64_spill] sm:$0xff]  ;;  %v6638_v30 = vld [vmem:[#allocation66_spill] sm:$0xff] }
 0x1ef   :  { %v4542_v13 = vpop.eup %4541  ;;  %v3127_v48 = vmul.f32 1.050701, %v3063_v31  ;;  %v2940_v58 = vmul.f32 1.6732632, %v3780_v50  ;;  %v2804_v39 = vmul.f32 1.442695, %v2689_v24  ;;  %v6281_v52 = vadd.f32 %v5932_v16, %v2552_v5 }
 0x1f0   :  { %3450 = vst.msk [vmem:[%s6494_s3 + $0xac] sm:$0xf] %vm3406_vm4, %v3905_v11  ;;  %v3778_v57 = vadd.f32 -1.0, %v4542_v13  ;;  %v2427_v8 = vmax.f32 %v6631_v32, %v6234_v33  ;;  %v2491_v62 = vmax.f32 %v6632_v44, %v6240_v26  ;;  %v6299_v33 = vadd.f32 %v5932_v16, %v2557_v2  ;;  %v6637_v5 = vld [vmem:[#allocation65_spill] sm:$0xff]  ;;  %v4311_v13 = vpop.f32.mrf.mxu1 }
 0x1f1   :  { %v3903_v27 = vpack.c.bf16 %v3127_v48, %v3127_v48  ;;  %v3068_v42 = vsel %vm3004_vm2, %v6156_v38, %v2940_v58  ;;  %4551 = vpow2.f32 %v2804_v39  ;;  %v2687_v9 = vmin.f32 %v6281_v52, 0.0 }
 0x1f2   :  { %v4544_v17 = vpop.eup %4543  ;;  %v3132_v0 = vmul.f32 1.050701, %v3068_v42  ;;  %v2938_v20 = vmul.f32 1.6732632, %v3778_v57  ;;  %vm3005_vm5 = vcmp.gt.f32.partialorder %v6192_v18, 0.0  ;;  %v2555_v26 = vmax.f32 %v2427_v8, %v2491_v62 }
 0x1f3   :  { %3448 = vst.msk [vmem:[%s6494_s3 + $0xa4] sm:$0xf] %vm3406_vm4, %v3903_v27  ;;  %v3781_v38 = vadd.f32 -1.0, %v4544_v17  ;;  %v2800_v41 = vmul.f32 1.442695, %v2687_v9  ;;  %v2692_v29 = vmin.f32 %v6299_v33, 0.0  ;;  %v2430_v19 = vmax.f32 %v6633_v49, %v6249_v45 }
 0x1f4   :  { %v3908_v35 = vpack.c.bf16 %v3132_v0, %v3132_v0  ;;  %v3066_v3 = vsel %vm3002_vm3, %v6177_v46, %v2938_v20  ;;  %v6311_v1 = vadd.f32 %v5932_v16, %v2555_v26  ;;  %v6634_v46 = vld [vmem:[#allocation62_spill] sm:$0xff]  ;;  %v2428_v25 = vmax.f32 %v6635_v59, %v1819_v63  ;;  %v4183_v63 = vpop.f32.mrf.mxu0  ;;  %v6639_v27 = vld [vmem:[#allocation67_spill] sm:$0xff] }
 0x1f5   :  { %v3130_v47 = vmul.f32 1.050701, %v3066_v3  ;;  %v2941_v21 = vmul.f32 1.6732632, %v3781_v38  ;;  %4553 = vpow2.f32 %v2800_v41  ;;  %v2810_v28 = vmul.f32 1.442695, %v2692_v29  ;;  %v2347_v38 = vpop.f32.mrf.mxu1 }
 0x1f6   :  { %3453 = vst.msk [vmem:[%s6494_s3 + $0xb8] sm:$0xf] %vm3406_vm4, %v3908_v35  ;;  %v2494_v37 = vmax.f32 %v6634_v46, %v6257_v61  ;;  %v2492_v45 = vmax.f32 %v6636_v10, %v2331_v4  ;;  %v4546_v55 = vpop.eup %4545  ;;  %vm3003_vm6 = vcmp.gt.f32.partialorder %v6218_v56, 0.0  ;;  %v2690_v15 = vmin.f32 %v6311_v1, 0.0  ;;  %v1835_v9 = vpop.f32.mrf.mxu0  ;;  %v6640_v35 = vld [vmem:[#allocation68_spill] sm:$0xff]  ;;  %v6641_v46 = vld [vmem:[#allocation69_spill] sm:$0xff] }
 0x1f7   :  { %v3906_v53 = vpack.c.bf16 %v3130_v47, %v3130_v47  ;;  %v3069_v43 = vsel %vm3005_vm5, %v6192_v18, %v2941_v21  ;;  %v4548_v36 = vpop.eup %4547  ;;  %v3779_v7 = vadd.f32 -1.0, %v4546_v55  ;;  %4555 = vpow2.f32 %v2810_v28  ;;  %v6642_v59 = vld [vmem:[#allocation70_spill] sm:$0xff]  ;;  %v4314_v10 = vpop.f32.mrf.mxu1 }
 0x1f8   :  { %v3133_v40 = vmul.f32 1.050701, %v3069_v43  ;;  %v2558_v61 = vmax.f32 %v2430_v19, %v2494_v37  ;;  %v3784_v34 = vadd.f32 -1.0, %v4548_v36  ;;  %v2806_v50 = vmul.f32 1.442695, %v2690_v15 }
 0x1f9   :  { %3451 = vst.msk [vmem:[%s6494_s3 + $0xb0] sm:$0xf] %vm3406_vm4, %v3906_v53  ;;  %v2556_v24 = vmax.f32 %v2428_v25, %v2492_v45  ;;  %v2433_v18 = vmax.f32 %v6637_v5, %v6295_v22  ;;  %v2939_v31 = vmul.f32 1.6732632, %v3779_v7  ;;  %v2497_v4 = vmax.f32 %v6638_v30, %v4310_v12 }
 0x1fa   :  { %v3909_v11 = vpack.c.bf16 %v3133_v40, %v3133_v40  ;;  %v6333_v14 = vadd.f32 %v5932_v16, %v2558_v61  ;;  %v2944_v58 = vmul.f32 1.6732632, %v3784_v34  ;;  %vm3008_vm7 = vcmp.gt.f32.partialorder %v6221_v60, 0.0  ;;  %v6643_v40 = vld [vmem:[#allocation71_spill] sm:$0xff] }
 0x1fb   :  { %v4550_v48 = vpop.eup %4549  ;;  %4557 = vpow2.f32 %v2806_v50  ;;  %v6338_v39 = vadd.f32 %v5932_v16, %v2556_v24  ;;  %v3067_v57 = vsel %vm3003_vm6, %v6218_v56, %v2939_v31  ;;  %vm3006_vm8 = vcmp.gt.f32.partialorder %v6245_v6, 0.0  ;;  %v6644_v50 = vld [vmem:[#allocation72_spill] sm:$0xff]  ;;  %v2360_v31 = vpop.f32.mrf.mxu1 }
 0x1fc   :  { %3454 = vst.msk [vmem:[%s6494_s3 + $0xbc] sm:$0xf] %vm3406_vm4, %v3909_v11  ;;  %v3782_v2 = vadd.f32 -1.0, %v4550_v48  ;;  %v2693_v32 = vmin.f32 %v6333_v14, 0.0  ;;  %v3131_v8 = vmul.f32 1.050701, %v3067_v57  ;;  %v3072_v44 = vsel %vm3008_vm7, %v6221_v60, %v2944_v58 }
 0x1fd   :  { %v2691_v62 = vmin.f32 %v6338_v39, 0.0  ;;  %v2431_v42 = vmax.f32 %v6639_v27, %v1832_v54  ;;  %v3136_v17 = vmul.f32 1.050701, %v3072_v44  ;;  %v2561_v12 = vmax.f32 %v2433_v18, %v2497_v4  ;;  %v4186_v54 = vpop.f32.mrf.mxu0 }
 0x1fe   :  { %v4552_v22 = vpop.eup %4551  ;;  %v2942_v0 = vmul.f32 1.6732632, %v3782_v2  ;;  %v2812_v20 = vmul.f32 1.442695, %v2693_v32  ;;  %v3907_v56 = vpack.c.bf16 %v3131_v8, %v3131_v8  ;;  %v2495_v3 = vmax.f32 %v6640_v35, %v2344_v23  ;;  %v6645_v32 = vld [vmem:[#allocation73_spill] sm:$0xff]  ;;  %v6648_v35 = vld [vmem:[#allocation76_spill] sm:$0xff] }
 0x1ff   :  { %v3785_v41 = vadd.f32 -1.0, %v4552_v22  ;;  %v2808_v26 = vmul.f32 1.442695, %v2691_v62  ;;  %v3912_v29 = vpack.c.bf16 %v3136_v17, %v3136_v17  ;;  %v6357_v49 = vadd.f32 %v5932_v16, %v2561_v12  ;;  %v1848_v5 = vpop.f32.mrf.mxu0  ;;  %v6646_v62 = vld [vmem:[#allocation74_spill] sm:$0xff]  ;;  %v4315_v12 = vpop.f32.mrf.mxu1 }
 0x200   :  { %v3070_v60 = vsel %vm3006_vm8, %v6245_v6, %v2942_v0  ;;  %4559 = vpow2.f32 %v2812_v20  ;;  %3452 = vst.msk [vmem:[%s6494_s3 + $0xb4] sm:$0xf] %vm3406_vm4, %v3907_v56  ;;  %v2559_v21 = vmax.f32 %v2431_v42, %v2495_v3  ;;  %vm3009_vm9 = vcmp.gt.f32.partialorder %v6267_v51, 0.0  ;;  %v6647_v0 = vld [vmem:[#allocation75_spill] sm:$0xff] }
 0x201   :  { %v3134_v19 = vmul.f32 1.050701, %v3070_v60  ;;  %v2945_v47 = vmul.f32 1.6732632, %v3785_v41  ;;  %4561 = vpow2.f32 %v2808_v26  ;;  %3457 = vst.msk [vmem:[%s6494_s3 + $0xc8] sm:$0xf] %vm3406_vm4, %v3912_v29  ;;  %v2434_v37 = vmax.f32 %v6641_v46, %v4183_v63  ;;  %v4187_v42 = vpop.f32.mrf.mxu0 }
 0x202   :  { %v4554_v28 = vpop.eup %4553  ;;  %v2696_v6 = vmin.f32 %v6357_v49, 0.0  ;;  %v2498_v25 = vmax.f32 %v6642_v59, %v4311_v13  ;;  %v6373_v53 = vadd.f32 %v5932_v16, %v2559_v21  ;;  %v2432_v7 = vmax.f32 %v6643_v40, %v1835_v9 }
 0x203   :  { %v3910_v45 = vpack.c.bf16 %v3134_v19, %v3134_v19  ;;  %v3073_v23 = vsel %vm3009_vm9, %v6267_v51, %v2945_v47  ;;  %v3783_v55 = vadd.f32 -1.0, %v4554_v28  ;;  %vm3007_vm10 = vcmp.gt.f32.partialorder %v6281_v52, 0.0 }
 0x204   :  { %v3137_v43 = vmul.f32 1.050701, %v3073_v23  ;;  %v2818_v15 = vmul.f32 1.442695, %v2696_v6  ;;  %v2562_v36 = vmax.f32 %v2434_v37, %v2498_v25  ;;  %v4556_v61 = vpop.eup %4555  ;;  %v2694_v51 = vmin.f32 %v6373_v53, 0.0  ;;  %v1851_v6 = vpop.f32.mrf.mxu0 }
 0x205   :  { %3455 = vst.msk [vmem:[%s6494_s3 + $0xc0] sm:$0xf] %vm3406_vm4, %v3910_v45  ;;  %v2943_v34 = vmul.f32 1.6732632, %v3783_v55  ;;  %v2496_v24 = vmax.f32 %v6644_v50, %v2347_v38  ;;  %v3788_v63 = vadd.f32 -1.0, %v4556_v61  ;;  %vm3012_vm11 = vcmp.gt.f32.partialorder %v6299_v33, 0.0  ;;  %v2363_v45 = vpop.f32.mrf.mxu1 }
 0x206   :  { %v3913_v18 = vpack.c.bf16 %v3137_v43, %v3137_v43  ;;  %4563 = vpow2.f32 %v2818_v15  ;;  %v6384_v11 = vadd.f32 %v5932_v16, %v2562_v36  ;;  %v2814_v4 = vmul.f32 1.442695, %v2694_v51  ;;  %v6651_v36 = vld [vmem:[#allocation79_spill] sm:$0xff]  ;;  %v6652_v51 = vld [vmem:[#allocation80_spill] sm:$0xff] }
 0x207   :  { %v3071_v30 = vsel %vm3007_vm10, %v6281_v52, %v2943_v34  ;;  %v2560_v13 = vmax.f32 %v2432_v7, %v2496_v24  ;;  %v2948_v57 = vmul.f32 1.6732632, %v3788_v63  ;;  %v2437_v8 = vmax.f32 %v6645_v32, %v4186_v54  ;;  %v6650_v54 = vld [vmem:[#allocation78_spill] sm:$0xff] }
 0x208   :  { %v4558_v48 = vpop.eup %4557  ;;  %3458 = vst.msk [vmem:[%s6494_s3 + $0xcc] sm:$0xf] %vm3406_vm4, %v3913_v18  ;;  %v3135_v58 = vmul.f32 1.050701, %v3071_v30  ;;  %v2697_v2 = vmin.f32 %v6384_v11, 0.0  ;;  %4565 = vpow2.f32 %v2814_v4  ;;  %v2501_v27 = vmax.f32 %v6646_v62, %v4314_v10 }
 0x209   :  { %v3786_v44 = vadd.f32 -1.0, %v4558_v48  ;;  %v6395_v52 = vadd.f32 %v5932_v16, %v2560_v13  ;;  %v3076_v22 = vsel %vm3012_vm11, %v6299_v33, %v2948_v57  ;;  %v2435_v20 = vmax.f32 %v6647_v0, %v1848_v5  ;;  %v6649_v33 = vld [vmem:[#allocation77_spill] sm:$0xff] }
 0x20a   :  { %v3911_v9 = vpack.c.bf16 %v3135_v58, %v3135_v58  ;;  %v2820_v17 = vmul.f32 1.442695, %v2697_v2  ;;  %v3140_v38 = vmul.f32 1.050701, %v3076_v22  ;;  %vm3010_vm12 = vcmp.gt.f32.partialorder %v6311_v1, 0.0 }
 0x20b   :  { %v2946_v56 = vmul.f32 1.6732632, %v3786_v44  ;;  %v2695_v41 = vmin.f32 %v6395_v52, 0.0  ;;  %v2565_v26 = vmax.f32 %v2437_v8, %v2501_v27  ;;  %v2499_v3 = vmax.f32 %v6648_v35, %v2360_v31 }
 0x20c   :  { %3456 = vst.msk [vmem:[%s6494_s3 + $0xc4] sm:$0xf] %vm3406_vm4, %v3911_v9  ;;  %4567 = vpow2.f32 %v2820_v17  ;;  %v2438_v29 = vmax.f32 %v6649_v33, %v4187_v42  ;;  %v3916_v19 = vpack.c.bf16 %v3140_v38, %v3140_v38  ;;  %v2502_v28 = vmax.f32 %v6650_v54, %v4315_v12 }
 0x20d   :  { %v4560_v60 = vpop.eup %4559  ;;  %v3074_v47 = vsel %vm3010_vm12, %v6311_v1, %v2946_v56  ;;  %v2816_v21 = vmul.f32 1.442695, %v2695_v41  ;;  %v6411_v25 = vadd.f32 %v5932_v16, %v2565_v26  ;;  %v2563_v10 = vmax.f32 %v2435_v20, %v2499_v3 }
 0x20e   :  { %v4562_v46 = vpop.eup %4561  ;;  %v3138_v37 = vmul.f32 1.050701, %v3074_v47  ;;  %v3789_v59 = vadd.f32 -1.0, %v4560_v60  ;;  %3461 = vst.msk [vmem:[%s6494_s3 + $0xd8] sm:$0xf] %vm3406_vm4, %v3916_v19  ;;  %vm3013_vm13 = vcmp.gt.f32.partialorder %v6333_v14, 0.0  ;;  %v2566_v23 = vmax.f32 %v2438_v29, %v2502_v28 }
 0x20f   :  { %v3787_v1 = vadd.f32 -1.0, %v4562_v46  ;;  %4569 = vpow2.f32 %v2816_v21  ;;  %v2700_v15 = vmin.f32 %v6411_v25, 0.0  ;;  %v2436_v40 = vmax.f32 %v6651_v36, %v1851_v6 }
 0x210   :  { %v3914_v55 = vpack.c.bf16 %v3138_v37, %v3138_v37  ;;  %v2949_v43 = vmul.f32 1.6732632, %v3789_v59  ;;  %v6421_v61 = vadd.f32 %v5932_v16, %v2563_v10  ;;  %v6424_v34 = vadd.f32 %v5932_v16, %v2566_v23 }
 0x211   :  { %v2947_v7 = vmul.f32 1.6732632, %v3787_v1  ;;  %v2500_v50 = vmax.f32 %v6652_v51, %v2363_v45  ;;  %vm3011_vm14 = vcmp.gt.f32.partialorder %v6338_v39, 0.0  ;;  %v2826_v5 = vmul.f32 1.442695, %v2700_v15 }
 0x212   :  { %3459 = vst.msk [vmem:[%s6494_s3 + $0xd0] sm:$0xf] %vm3406_vm4, %v3914_v55  ;;  %v3077_v24 = vsel %vm3013_vm13, %v6333_v14, %v2949_v43  ;;  %v2698_v30 = vmin.f32 %v6421_v61, 0.0  ;;  %v2701_v48 = vmin.f32 %v6424_v34, 0.0  ;;  %vm3016_vm15 = vcmp.gt.f32.partialorder %v6357_v49, 0.0 }
 0x213   :  { %v4564_v18 = vpop.eup %4563  ;;  %v3141_v63 = vmul.f32 1.050701, %v3077_v24  ;;  %v3075_v31 = vsel %vm3011_vm14, %v6338_v39, %v2947_v7  ;;  %4571 = vpow2.f32 %v2826_v5  ;;  %v2564_v2 = vmax.f32 %v2436_v40, %v2500_v50 }
 0x214   :  { %v3139_v4 = vmul.f32 1.050701, %v3075_v31  ;;  %v3792_v13 = vadd.f32 -1.0, %v4564_v18  ;;  %v2822_v57 = vmul.f32 1.442695, %v2698_v30  ;;  %vm3014_vm0 = vcmp.gt.f32.partialorder %v6373_v53, 0.0 }
 0x215   :  { %v3917_v58 = vpack.c.bf16 %v3141_v63, %v3141_v63  ;;  %v4566_v32 = vpop.eup %4565  ;;  %v2828_v44 = vmul.f32 1.442695, %v2701_v48  ;;  %v2635_v62 = vadd.f32 %v5932_v16, %v2564_v2  ;;  %vm3017_vm1 = vcmp.gt.f32.partialorder %v6384_v11, 0.0 }
 0x216   :  { %v3915_v8 = vpack.c.bf16 %v3139_v4, %v3139_v4  ;;  %v2952_v14 = vmul.f32 1.6732632, %v3792_v13  ;;  %v3790_v39 = vadd.f32 -1.0, %v4566_v32  ;;  %4573 = vpow2.f32 %v2822_v57 }
 0x217   :  { %3462 = vst.msk [vmem:[%s6494_s3 + $0xdc] sm:$0xf] %vm3406_vm4, %v3917_v58  ;;  %4575 = vpow2.f32 %v2828_v44  ;;  %v2699_v17 = vmin.f32 %v2635_v62, 0.0  ;;  %vm3015_vm2 = vcmp.gt.f32.partialorder %v6395_v52, 0.0  ;;  %vm3020_vm3 = vcmp.gt.f32.partialorder %v6411_v25, 0.0 }
 0x218   :  { %3460 = vst.msk [vmem:[%s6494_s3 + $0xd4] sm:$0xf] %vm3406_vm4, %v3915_v8  ;;  %v3080_v27 = vsel %vm3016_vm15, %v6357_v49, %v2952_v14  ;;  %v2950_v22 = vmul.f32 1.6732632, %v3790_v39  ;;  %vm3018_vm5 = vcmp.gt.f32.partialorder %v6421_v61, 0.0  ;;  %vm3021_vm6 = vcmp.gt.f32.partialorder %v6424_v34, 0.0 }
 0x219   :  { %v4568_v42 = vpop.eup %4567  ;;  %v3144_v9 = vmul.f32 1.050701, %v3080_v27  ;;  %v2824_v38 = vmul.f32 1.442695, %v2699_v17  ;;  %vm3019_vm7 = vcmp.gt.f32.partialorder %v2635_v62, 0.0 }
 0x21a   :  { %v3793_v0 = vadd.f32 -1.0, %v4568_v42  ;;  %v3078_v12 = vsel %vm3014_vm0, %v6373_v53, %v2950_v22 }
 0x21b   :  { %v3920_v20 = vpack.c.bf16 %v3144_v9, %v3144_v9  ;;  %v3142_v56 = vmul.f32 1.050701, %v3078_v12  ;;  %4577 = vpow2.f32 %v2824_v38 }
 0x21c   :  { %v4570_v16 = vpop.eup %4569  ;;  %v2953_v41 = vmul.f32 1.6732632, %v3793_v0 }
 0x21d   :  { %3465 = vst.msk [vmem:[%s6494_s3 + $0xe8] sm:$0xf] %vm3406_vm4, %v3920_v20  ;;  %v3791_v49 = vadd.f32 -1.0, %v4570_v16  ;;  %v3918_v26 = vpack.c.bf16 %v3142_v56, %v3142_v56 }
 0x21e   :  { %v3081_v35 = vsel %vm3017_vm1, %v6384_v11, %v2953_v41 }
 0x21f   :  { %v3145_v3 = vmul.f32 1.050701, %v3081_v35  ;;  %v2951_v33 = vmul.f32 1.6732632, %v3791_v49  ;;  %3463 = vst.msk [vmem:[%s6494_s3 + $0xe0] sm:$0xf] %vm3406_vm4, %v3918_v26 }
 0x220   :  { %v4572_v53 = vpop.eup %4571 }
 0x221   :  { %v3921_v29 = vpack.c.bf16 %v3145_v3, %v3145_v3  ;;  %v3079_v60 = vsel %vm3015_vm2, %v6395_v52, %v2951_v33  ;;  %v3796_v47 = vadd.f32 -1.0, %v4572_v53 }
 0x222   :  { %v3143_v19 = vmul.f32 1.050701, %v3079_v60 }
 0x223   :  { %3466 = vst.msk [vmem:[%s6494_s3 + $0xec] sm:$0xf] %vm3406_vm4, %v3921_v29  ;;  %v4574_v11 = vpop.eup %4573  ;;  %v2956_v54 = vmul.f32 1.6732632, %v3796_v47 }
 0x224   :  { %v3919_v21 = vpack.c.bf16 %v3143_v19, %v3143_v19  ;;  %v4576_v28 = vpop.eup %4575  ;;  %v3794_v6 = vadd.f32 -1.0, %v4574_v11 }
 0x225   :  { %v3084_v52 = vsel %vm3020_vm3, %v6411_v25, %v2956_v54  ;;  %v3797_v46 = vadd.f32 -1.0, %v4576_v28 }
 0x226   :  { %3464 = vst.msk [vmem:[%s6494_s3 + $0xe4] sm:$0xf] %vm3406_vm4, %v3919_v21  ;;  %v3148_v37 = vmul.f32 1.050701, %v3084_v52  ;;  %v2954_v59 = vmul.f32 1.6732632, %v3794_v6 }
 0x227   :  { %v2957_v10 = vmul.f32 1.6732632, %v3797_v46 }
 0x228   :  { %v3924_v45 = vpack.c.bf16 %v3148_v37, %v3148_v37  ;;  %v3082_v1 = vsel %vm3018_vm5, %v6421_v61, %v2954_v59  ;;  %v4578_v23 = vpop.eup %4577 }
 0x229   :  { %v3146_v55 = vmul.f32 1.050701, %v3082_v1  ;;  %v3085_v43 = vsel %vm3021_vm6, %v6424_v34, %v2957_v10  ;;  %v3795_v15 = vadd.f32 -1.0, %v4578_v23 }
 0x22a   :  { %3469 = vst.msk [vmem:[%s6494_s3 + $0xf8] sm:$0xf] %vm3406_vm4, %v3924_v45  ;;  %v3149_v25 = vmul.f32 1.050701, %v3085_v43 }
 0x22b   :  { %v3922_v36 = vpack.c.bf16 %v3146_v55, %v3146_v55  ;;  %v2955_v7 = vmul.f32 1.6732632, %v3795_v15 }
 0x22c   :  { %v3925_v40 = vpack.c.bf16 %v3149_v25, %v3149_v25 }
 0x22d   :  { %3467 = vst.msk [vmem:[%s6494_s3 + $0xf0] sm:$0xf] %vm3406_vm4, %v3922_v36  ;;  %v3083_v61 = vsel %vm3019_vm7, %v2635_v62, %v2955_v7 }
 0x22e   :  { %3470 = vst.msk [vmem:[%s6494_s3 + $0xfc] sm:$0xf] %vm3406_vm4, %v3925_v40  ;;  %v3147_v34 = vmul.f32 1.050701, %v3083_v61 }
 0x230   :  { %v3923_v51 = vpack.c.bf16 %v3147_v34, %v3147_v34 }
 0x232   :  { %3468 = vst.msk [vmem:[%s6494_s3 + $0xf4] sm:$0xf] %vm3406_vm4, %v3923_v51 }

// kernel: cnnkan_forward.4
= control target key start
LH: loop header
LB: loop body
LE: loop exit
PB: predicated region body
PF: predicated region fallthrough
CT: control target
= control target key end

     0   :  { %v2234_v0 = vmov 0   ;;  %vm767_vm0 = vcmask 261120   ;;  %vm1705_vm2 = vcmask 519168   ;;  %s3073_s1 = inlined_call_operand.vmem [shape: bf16[288,64], index: 1, kind: input, shape index: {}]   ;;  %s3074_s0 = inlined_call_operand.vmem [shape: bf16[4,128,288], index: 0, kind: input, shape index: {}]   ;;  %s3075_s2 = inlined_call_operand.vmem [shape: f32[1,64], index: 2, kind: input, shape index: {}]   ;;  %s3076_s3 = inlined_call_operand.vmem [shape: bf16[128,64], index: 3, kind: output, shape index: {}]  }
   0x1   :  { %864 = vmatprep.subr.bf16.mxu0 %v2234_v0  ;;  %2023 = vmatprep.subr.bf16.mxu1 %v2234_v0  ;;  %v2056_v1 = vld [vmem:[%s3073_s1 + $0x38] sm:$0xff]   ;;  %v2057_v2 = vld [vmem:[%s3073_s1 + $0x30] sm:$0xff]   ;;  %v2058_v3 = vld [vmem:[%s3073_s1 + $0x28] sm:$0xff]  }
   0x2   :  { %865 = vmatpush1.bf16.msra.mxu0 %v2056_v1  ;;  %2039 = vmatpush1.bf16.msra.mxu1 %v2056_v1  ;;  %v2059_v4 = vld [vmem:[%s3073_s1 + $0x20] sm:$0xff]   ;;  %v2060_v5 = vld [vmem:[%s3073_s1 + $0x18] sm:$0xff]   ;;  %v2061_v7 = vld [vmem:[%s3073_s1 + $0x10] sm:$0xff]  }
   0x3   :  { %866 = vmatprep.subr.bf16.mxu0 %v2234_v0  ;;  %2024 = vmatprep.subr.bf16.mxu1 %v2234_v0  ;;  %v2074_v6 = vld [vmem:[%s3074_s0 + $0x4] ss:$12 sps:$4 sm:$0xff]   ;;  %v2062_v9 = vld [vmem:[%s3073_s1 + $0x8] sm:$0xff]   ;;  %v2064_v11 = vld [vmem:[%s3073_s1 + $0x78] sm:$0xff]  }
   0x4   :  { %v2077_v8 = vld [vmem:[%s3074_s0 + $0x244] ss:$12 sps:$4 sm:$0xff]   ;;  %896 = vmatprep.mubr.bf16.mxu0 %v2074_v6  ;;  %v2066_v13 = vld [vmem:[%s3073_s1 + $0x68] sm:$0xff]   ;;  %v2068_v15 = vld [vmem:[%s3073_s1 + $0x58] sm:$0xff]  }
   0x5   :  { %1088 = vmatprep.mubr.bf16.mxu1 %v2077_v8  ;;  %v2063_v10 = vld [vmem:[%s3073_s1] sm:$0xff]   ;;  %v2065_v12 = vld [vmem:[%s3073_s1 + $0x70] sm:$0xff]   ;;  %v2070_v17 = vld [vmem:[%s3073_s1 + $0x48] sm:$0xff]  }
   0x6   :  { %867 = vmatpush1.bf16.msra.mxu0 %v2057_v2  ;;  %2040 = vmatpush1.bf16.msra.mxu1 %v2057_v2  ;;  %v2067_v14 = vld [vmem:[%s3073_s1 + $0x60] sm:$0xff]   ;;  %v2069_v16 = vld [vmem:[%s3073_s1 + $0x50] sm:$0xff]   ;;  %v2078_v19 = vld [vmem:[%s3073_s1 + $0x88] sm:$0xff]  }
   0x7   :  { %868 = vmatprep.subr.bf16.mxu0 %v2234_v0  ;;  %2025 = vmatprep.subr.bf16.mxu1 %v2234_v0  ;;  %v2071_v18 = vld [vmem:[%s3073_s1 + $0x40] sm:$0xff]   ;;  %v2079_v22 = vld [vmem:[%s3074_s0 + $0x1c] ss:$12 sps:$4 sm:$0xff]   ;;  %v2091_v31 = vld [vmem:[%s3074_s0 + $0x4c] ss:$12 sps:$4 sm:$0xff]  }
   0x8   :  { %v2072_v20 = vld [vmem:[%s3074_s0] ss:$12 sps:$4 sm:$0xff]   ;;  %v2081_v23 = vld [vmem:[%s3074_s0 + $0x25c] ss:$12 sps:$4 sm:$0xff]   ;;  %v2083_v25 = vld [vmem:[%s3074_s0 + $0x18] ss:$12 sps:$4 sm:$0xff]  }
   0x9   :  { %v2075_v21 = vld [vmem:[%s3074_s0 + $0x240] ss:$12 sps:$4 sm:$0xff]   ;;  %v2084_v26 = vld [vmem:[%s3074_s0 + $0x258] ss:$12 sps:$4 sm:$0xff]   ;;  %v2089_v29 = vld [vmem:[%s3074_s0 + $0x30] ss:$12 sps:$4 sm:$0xff]  }
   0xa   :  { %869 = vmatpush1.bf16.msra.mxu0 %v2058_v3  ;;  %2041 = vmatpush1.bf16.msra.mxu1 %v2058_v3  ;;  %v2103_v24 = vld [vmem:[%s3073_s1 + $0x80] sm:$0xff]   ;;  %v2090_v30 = vld [vmem:[%s3074_s0 + $0x270] ss:$12 sps:$4 sm:$0xff]   ;;  %v2093_v32 = vld [vmem:[%s3074_s0 + $0x28c] ss:$12 sps:$4 sm:$0xff]  }
   0xb   :  { %870 = vmatprep.subr.bf16.mxu0 %v2234_v0  ;;  %2026 = vmatprep.subr.bf16.mxu1 %v2234_v0  ;;  %v2085_v27 = vld [vmem:[%s3074_s0 + $0x34] ss:$12 sps:$4 sm:$0xff]   ;;  %v2097_v35 = vld [vmem:[%s3074_s0 + $0x64] ss:$12 sps:$4 sm:$0xff]   ;;  %v2104_v39 = vld [vmem:[%s3074_s0 + $0x7c] ss:$12 sps:$4 sm:$0xff]  }
   0xc   :  { %v2087_v28 = vld [vmem:[%s3074_s0 + $0x274] ss:$12 sps:$4 sm:$0xff]   ;;  %v2099_v36 = vld [vmem:[%s3074_s0 + $0x2a4] ss:$12 sps:$4 sm:$0xff]   ;;  %v2106_v40 = vld [vmem:[%s3074_s0 + $0x2bc] ss:$12 sps:$4 sm:$0xff]  }
   0xd   :  { %v2095_v33 = vld [vmem:[%s3074_s0 + $0x48] ss:$12 sps:$4 sm:$0xff]   ;;  %v2101_v37 = vld [vmem:[%s3074_s0 + $0x60] ss:$12 sps:$4 sm:$0xff]   ;;  %v2108_v41 = vld [vmem:[%s3074_s0 + $0x78] ss:$12 sps:$4 sm:$0xff]  }
   0xe   :  { %871 = vmatpush1.bf16.msra.mxu0 %v2059_v4  ;;  %2042 = vmatpush1.bf16.msra.mxu1 %v2059_v4  ;;  %v2096_v34 = vld [vmem:[%s3074_s0 + $0x288] ss:$12 sps:$4 sm:$0xff]   ;;  %v2102_v38 = vld [vmem:[%s3074_s0 + $0x2a0] ss:$12 sps:$4 sm:$0xff]   ;;  %v2109_v42 = vld [vmem:[%s3074_s0 + $0x2b8] ss:$12 sps:$4 sm:$0xff]  }
   0xf   :  { %872 = vmatprep.subr.bf16.mxu0 %v2234_v0  ;;  %2027 = vmatprep.subr.bf16.mxu1 %v2234_v0  ;;  %v2110_v43 = vld [vmem:[%s3074_s0 + $0x94] ss:$12 sps:$4 sm:$0xff]   ;;  %v2114_v45 = vld [vmem:[%s3074_s0 + $0x90] ss:$12 sps:$4 sm:$0xff]   ;;  %v2116_v47 = vld [vmem:[%s3074_s0 + $0xac] ss:$12 sps:$4 sm:$0xff]  }
  0x10   :  { %v2112_v44 = vld [vmem:[%s3074_s0 + $0x2d4] ss:$12 sps:$4 sm:$0xff]   ;;  %v2115_v46 = vld [vmem:[%s3074_s0 + $0x2d0] ss:$12 sps:$4 sm:$0xff]   ;;  %v2118_v48 = vld [vmem:[%s3074_s0 + $0x2ec] ss:$12 sps:$4 sm:$0xff]  }
  0x11   :  { %v2120_v49 = vld [vmem:[%s3074_s0 + $0xa8] ss:$12 sps:$4 sm:$0xff]   ;;  %v2122_v51 = vld [vmem:[%s3074_s0 + $0xc4] ss:$12 sps:$4 sm:$0xff]   ;;  %v2125_v53 = vld [vmem:[%s3074_s0 + $0xc0] ss:$12 sps:$4 sm:$0xff]  }
  0x12   :  { %873 = vmatpush1.bf16.msra.mxu0 %v2060_v5  ;;  %2043 = vmatpush1.bf16.msra.mxu1 %v2060_v5  ;;  %v2121_v50 = vld [vmem:[%s3074_s0 + $0x2e8] ss:$12 sps:$4 sm:$0xff]   ;;  %v2126_v54 = vld [vmem:[%s3074_s0 + $0x20] ss:$12 sps:$4 sm:$0xff]   ;;  %v2129_v56 = vld [vmem:[%s3074_s0 + $0x38] ss:$12 sps:$4 sm:$0xff]  }
  0x13   :  { %874 = vmatprep.subr.bf16.mxu0 %v2234_v0  ;;  %2028 = vmatprep.subr.bf16.mxu1 %v2234_v0  ;;  %v2124_v52 = vld [vmem:[%s3074_s0 + $0x8] ss:$12 sps:$4 sm:$0xff]   ;;  %v2130_v57 = vld [vmem:[%s3074_s0 + $0xd8] ss:$12 sps:$4 sm:$0xff]   ;;  %v2131_v58 = vld [vmem:[%s3074_s0 + $0x50] ss:$12 sps:$4 sm:$0xff]  }
  0x14   :  { %v2127_v55 = vld [vmem:[%s3074_s0 + $0xdc] ss:$12 sps:$4 sm:$0xff]   ;;  %v2132_v59 = vld [vmem:[%s3074_s0 + $0xf4] ss:$12 sps:$4 sm:$0xff]   ;;  %v2137_v63 = vld [vmem:[%s3074_s0 + $0x10c] ss:$12 sps:$4 sm:$0xff]  }
  0x15   :  { %v2134_v60 = vld [vmem:[%s3074_s0 + $0x68] ss:$12 sps:$4 sm:$0xff]   ;;  %v2135_v61 = vld [vmem:[%s3074_s0 + $0xf0] ss:$12 sps:$4 sm:$0xff]   ;;  %v2136_v62 = vld [vmem:[%s3074_s0 + $0x80] ss:$12 sps:$4 sm:$0xff]  }
  0x16   :  { %875 = vmatpush1.bf16.msra.mxu0 %v2061_v7  ;;  %2044 = vmatpush1.bf16.msra.mxu1 %v2061_v7  ;;  %v2140_v1 = vld [vmem:[%s3074_s0 + $0x108] ss:$12 sps:$4 sm:$0xff]   ;;  %v2141_v2 = vld [vmem:[%s3074_s0 + $0xb0] ss:$12 sps:$4 sm:$0xff]   ;;  %v2145_v5 = vld [vmem:[%s3074_s0 + $0x120] ss:$12 sps:$4 sm:$0xff]  }
  0x17   :  { %876 = vmatprep.subr.bf16.mxu0 %v2234_v0  ;;  %2029 = vmatprep.subr.bf16.mxu1 %v2234_v0  ;;  %v2142_v3 = vld [vmem:[%s3074_s0 + $0x124] ss:$12 sps:$4 sm:$0xff]   ;;  %v2144_v4 = vld [vmem:[%s3074_s0 + $0xc8] ss:$12 sps:$4 sm:$0xff]   ;;  %v2146_v6 = vld [vmem:[%s3074_s0 + $0xe0] ss:$12 sps:$4 sm:$0xff]  }
  0x18   :  { %v2147_v7 = vld [vmem:[%s3074_s0 + $0x13c] ss:$12 sps:$4 sm:$0xff]   ;;  %v2149_v8 = vld [vmem:[%s3074_s0 + $0xf8] ss:$12 sps:$4 sm:$0xff]  }
  0x1a   :  { %877 = vmatpush1.bf16.msra.mxu0 %v2062_v9  ;;  %2045 = vmatpush1.bf16.msra.mxu1 %v2062_v9  ;;  %v2150_v9 = vld [vmem:[%s3074_s0 + $0x138] ss:$12 sps:$4 sm:$0xff]  }
  0x1b   :  { %878 = vmatprep.subr.bf16.mxu0 %v2234_v0  ;;  %2030 = vmatprep.subr.bf16.mxu1 %v2234_v0 }
  0x1e   :  { %879 = vmatpush1.bf16.msra.mxu0 %v2063_v10  ;;  %2046 = vmatpush1.bf16.msra.mxu1 %v2063_v10  ;;  %v2151_v10 = vld [vmem:[%s3074_s0 + $0x110] ss:$12 sps:$4 sm:$0xff]  }
  0x1f   :  { %880 = vmatprep.subr.bf16.mxu0 %v2234_v0  ;;  %2031 = vmatprep.subr.bf16.mxu1 %v2234_v0 }
  0x22   :  { %881 = vmatpush2.bf16.msra.mxu0 %v2064_v11  ;;  %2047 = vmatpush2.bf16.msra.mxu1 %v2064_v11  ;;  %v2152_v11 = vld [vmem:[%s3074_s0 + $0x154] ss:$12 sps:$4 sm:$0xff]  }
  0x23   :  { %882 = vmatprep.subr.bf16.mxu0 %v2234_v0  ;;  %2032 = vmatprep.subr.bf16.mxu1 %v2234_v0 }
  0x26   :  { %883 = vmatpush2.bf16.msra.mxu0 %v2065_v12  ;;  %2048 = vmatpush2.bf16.msra.mxu1 %v2065_v12  ;;  %v2154_v12 = vld [vmem:[%s3074_s0 + $0x128] ss:$12 sps:$4 sm:$0xff]  }
  0x27   :  { %884 = vmatprep.subr.bf16.mxu0 %v2234_v0  ;;  %2033 = vmatprep.subr.bf16.mxu1 %v2234_v0 }
  0x2a   :  { %885 = vmatpush2.bf16.msra.mxu0 %v2066_v13  ;;  %2049 = vmatpush2.bf16.msra.mxu1 %v2066_v13  ;;  %v2155_v13 = vld [vmem:[%s3074_s0 + $0x150] ss:$12 sps:$4 sm:$0xff]  }
  0x2b   :  { %886 = vmatprep.subr.bf16.mxu0 %v2234_v0  ;;  %2034 = vmatprep.subr.bf16.mxu1 %v2234_v0 }
  0x2e   :  { %887 = vmatpush2.bf16.msra.mxu0 %v2067_v14  ;;  %2050 = vmatpush2.bf16.msra.mxu1 %v2067_v14  ;;  %v2156_v14 = vld [vmem:[%s3074_s0 + $0x140] ss:$12 sps:$4 sm:$0xff]  }
  0x2f   :  { %888 = vmatprep.subr.bf16.mxu0 %v2234_v0  ;;  %2035 = vmatprep.subr.bf16.mxu1 %v2234_v0 }
  0x32   :  { %889 = vmatpush2.bf16.msra.mxu0 %v2068_v15  ;;  %2051 = vmatpush2.bf16.msra.mxu1 %v2068_v15  ;;  %v2157_v15 = vld [vmem:[%s3074_s0 + $0x16c] ss:$12 sps:$4 sm:$0xff]  }
  0x33   :  { %890 = vmatprep.subr.bf16.mxu0 %v2234_v0  ;;  %2036 = vmatprep.subr.bf16.mxu1 %v2234_v0 }
  0x36   :  { %891 = vmatpush2.bf16.msra.mxu0 %v2069_v16  ;;  %2052 = vmatpush2.bf16.msra.mxu1 %v2069_v16  ;;  %v2159_v16 = vld [vmem:[%s3074_s0 + $0x158] ss:$12 sps:$4 sm:$0xff]  }
  0x37   :  { %892 = vmatprep.subr.bf16.mxu0 %v2234_v0  ;;  %2037 = vmatprep.subr.bf16.mxu1 %v2234_v0 }
  0x3a   :  { %893 = vmatpush2.bf16.msra.mxu0 %v2070_v17  ;;  %2053 = vmatpush2.bf16.msra.mxu1 %v2070_v17  ;;  %v2160_v17 = vld [vmem:[%s3074_s0 + $0x168] ss:$12 sps:$4 sm:$0xff]  }
  0x3b   :  { %894 = vmatprep.subr.bf16.mxu0 %v2234_v0  ;;  %2038 = vmatprep.subr.bf16.mxu1 %v2234_v0  ;;  %v2139_v0 = vld [vmem:[%s3074_s0 + $0x98] ss:$12 sps:$4 sm:$0xff]  }
  0x3e   :  { %895 = vmatpush2.bf16.msra.mxu0 %v2071_v18  ;;  %2054 = vmatpush2.bf16.msra.mxu1 %v2071_v18  ;;  %v2161_v18 = vld [vmem:[%s3074_s0 + $0x170] ss:$12 sps:$4 sm:$0xff]  }
  0x3f   :  { %1955 = vmatprep.subr.bf16.mxu1 %v2078_v19 }
  0x41   :  { %897 = vmatmul.mubr.bf16.vlgmr.msra.gmra.mxu0 %v2072_v20  ;;  %1089 = vmatmul.mubr.bf16.vlgmr.msra.gmra.mxu1 %v2075_v21  ;;  %v2164_v20 = vld [vmem:[%s3074_s0 + $0x188] ss:$12 sps:$4 sm:$0xff]   ;;  %v2165_v21 = vld [vmem:[%s3074_s0 + $0x180] ss:$12 sps:$4 sm:$0xff]  }
  0x42   :  { %1956 = vmatpush3.bf16.msra.mxu1 %v2078_v19  ;;  %904 = vmatprep.mubr.bf16.mxu0 %v2079_v22  ;;  %v2162_v19 = vld [vmem:[%s3074_s0 + $0x184] ss:$12 sps:$4 sm:$0xff]   ;;  %v2166_v22 = vld [vmem:[%s3074_s0 + $0x1a0] ss:$12 sps:$4 sm:$0xff]  }
  0x43   :  { %1096 = vmatprep.mubr.bf16.mxu1 %v2081_v23  ;;  %1957 = vmatprep.subr.bf16.mxu1 %v2103_v24  ;;  %v2167_v23 = vld [vmem:[%s3074_s0 + $0x19c] ss:$12 sps:$4 sm:$0xff]  }
  0x46   :  { %1958 = vmatpush3.bf16.msra.mxu1 %v2103_v24  ;;  %v2169_v24 = vld [vmem:[%s3074_s0 + $0x1b8] ss:$12 sps:$4 sm:$0xff]  }
  0x49   :  { %905 = vmatmul.mubr.bf16.gmra.mxu0 %v2083_v25  ;;  %1097 = vmatmul.mubr.bf16.gmra.mxu1 %v2084_v26  ;;  %v2170_v25 = vld [vmem:[%s3074_s0 + $0x198] ss:$12 sps:$4 sm:$0xff]   ;;  %v2171_v26 = vld [vmem:[%s3074_s0 + $0x1d0] ss:$12 sps:$4 sm:$0xff]  }
  0x4a   :  { %912 = vmatprep.mubr.bf16.mxu0 %v2085_v27  ;;  %1104 = vmatprep.mubr.bf16.mxu1 %v2087_v28  ;;  %v2172_v27 = vld [vmem:[%s3074_s0 + $0x1b4] ss:$12 sps:$4 sm:$0xff]  }
  0x4b   :  { %v2174_v28 = vld [vmem:[%s3074_s0 + $0x1e8] ss:$12 sps:$4 sm:$0xff]  }
  0x51   :  { %913 = vmatmul.mubr.bf16.gmra.mxu0 %v2089_v29  ;;  %1105 = vmatmul.mubr.bf16.gmra.mxu1 %v2090_v30  ;;  %v2175_v29 = vld [vmem:[%s3074_s0 + $0x1b0] ss:$12 sps:$4 sm:$0xff]   ;;  %v2176_v30 = vld [vmem:[%s3074_s0 + $0x200] ss:$12 sps:$4 sm:$0xff]  }
  0x52   :  { %920 = vmatprep.mubr.bf16.mxu0 %v2091_v31  ;;  %1112 = vmatprep.mubr.bf16.mxu1 %v2093_v32  ;;  %v2177_v31 = vld [vmem:[%s3074_s0 + $0x1cc] ss:$12 sps:$4 sm:$0xff]  }
  0x53   :  { %v2179_v32 = vld [vmem:[%s3074_s0 + $0x218] ss:$12 sps:$4 sm:$0xff]  }
  0x59   :  { %921 = vmatmul.mubr.bf16.gmra.mxu0 %v2095_v33  ;;  %1113 = vmatmul.mubr.bf16.gmra.mxu1 %v2096_v34  ;;  %v2180_v33 = vld [vmem:[%s3074_s0 + $0x1c8] ss:$12 sps:$4 sm:$0xff]   ;;  %v2181_v34 = vld [vmem:[%s3074_s0 + $0x230] ss:$12 sps:$4 sm:$0xff]  }
  0x5a   :  { %928 = vmatprep.mubr.bf16.mxu0 %v2097_v35  ;;  %1120 = vmatprep.mubr.bf16.mxu1 %v2099_v36  ;;  %v2182_v35 = vld [vmem:[%s3074_s0 + $0x1e4] ss:$12 sps:$4 sm:$0xff]   ;;  %v2184_v36 = vld [vmem:[%s3074_s0 + $0x248] ss:$12 sps:$4 sm:$0xff]  }
  0x61   :  { %929 = vmatmul.mubr.bf16.gmra.mxu0 %v2101_v37  ;;  %1121 = vmatmul.mubr.bf16.gmra.mxu1 %v2102_v38  ;;  %v2185_v37 = vld [vmem:[%s3074_s0 + $0x1e0] ss:$12 sps:$4 sm:$0xff]  }
  0x62   :  { %936 = vmatprep.mubr.bf16.mxu0 %v2104_v39  ;;  %1128 = vmatprep.mubr.bf16.mxu1 %v2106_v40  ;;  %v2186_v38 = vld [vmem:[%s3074_s0 + $0x260] ss:$12 sps:$4 sm:$0xff]   ;;  %v2187_v39 = vld [vmem:[%s3074_s0 + $0x1fc] ss:$12 sps:$4 sm:$0xff]   ;;  %v2189_v40 = vld [vmem:[%s3074_s0 + $0x278] ss:$12 sps:$4 sm:$0xff]  }
  0x69   :  { %937 = vmatmul.mubr.bf16.gmra.mxu0 %v2108_v41  ;;  %1129 = vmatmul.mubr.bf16.gmra.mxu1 %v2109_v42  ;;  %v2190_v41 = vld [vmem:[%s3074_s0 + $0x1f8] ss:$12 sps:$4 sm:$0xff]   ;;  %v2191_v42 = vld [vmem:[%s3074_s0 + $0x290] ss:$12 sps:$4 sm:$0xff]  }
  0x6a   :  { %944 = vmatprep.mubr.bf16.mxu0 %v2110_v43  ;;  %1136 = vmatprep.mubr.bf16.mxu1 %v2112_v44  ;;  %v2192_v43 = vld [vmem:[%s3074_s0 + $0x214] ss:$12 sps:$4 sm:$0xff]  }
  0x6b   :  { %v2194_v44 = vld [vmem:[%s3074_s0 + $0x2a8] ss:$12 sps:$4 sm:$0xff]  }
  0x71   :  { %945 = vmatmul.mubr.bf16.gmra.mxu0 %v2114_v45  ;;  %1137 = vmatmul.mubr.bf16.gmra.mxu1 %v2115_v46  ;;  %v2195_v45 = vld [vmem:[%s3074_s0 + $0x210] ss:$12 sps:$4 sm:$0xff]   ;;  %v2196_v46 = vld [vmem:[%s3074_s0 + $0x2c0] ss:$12 sps:$4 sm:$0xff]  }
  0x72   :  { %952 = vmatprep.mubr.bf16.mxu0 %v2116_v47  ;;  %1144 = vmatprep.mubr.bf16.mxu1 %v2118_v48  ;;  %v2197_v47 = vld [vmem:[%s3074_s0 + $0x22c] ss:$12 sps:$4 sm:$0xff]  }
  0x73   :  { %v2199_v48 = vld [vmem:[%s3074_s0 + $0x2d8] ss:$12 sps:$4 sm:$0xff]  }
  0x79   :  { %953 = vmatmul.mubr.bf16.gmra.mxu0 %v2120_v49  ;;  %1145 = vmatmul.mubr.bf16.gmra.mxu1 %v2121_v50  ;;  %v2200_v49 = vld [vmem:[%s3074_s0 + $0x228] ss:$12 sps:$4 sm:$0xff]   ;;  %v2201_v50 = vld [vmem:[%s3074_s0 + $0x2f0] ss:$12 sps:$4 sm:$0xff]  }
  0x7a   :  { %960 = vmatprep.mubr.bf16.mxu0 %v2122_v51  ;;  %1959 = vmatprep.mubr.msk.bf16.mxu1 %vm767_vm0, %v2124_v52 }
  0x81   :  { %961 = vmatmul.mubr.bf16.gmra.mxu0 %v2125_v53  ;;  %1960 = vmatmul.mubr.msk.bf16.vlgmr.msra.gmra.mxu1 %vm767_vm0, %v2126_v54 }
  0x82   :  { %968 = vmatprep.mubr.bf16.mxu0 %v2127_v55  ;;  %1963 = vmatprep.mubr.msk.bf16.mxu1 %vm767_vm0, %v2129_v56 }
  0x89   :  { %969 = vmatmul.mubr.bf16.gmra.mxu0 %v2130_v57  ;;  %1964 = vmatmul.mubr.msk.bf16.gmra.mxu1 %vm767_vm0, %v2131_v58 }
  0x8a   :  { %976 = vmatprep.mubr.bf16.mxu0 %v2132_v59  ;;  %1967 = vmatprep.mubr.msk.bf16.mxu1 %vm767_vm0, %v2134_v60 }
  0x91   :  { %977 = vmatmul.mubr.bf16.gmra.mxu0 %v2135_v61  ;;  %1968 = vmatmul.mubr.msk.bf16.gmra.mxu1 %vm767_vm0, %v2136_v62 }
  0x92   :  { %984 = vmatprep.mubr.bf16.mxu0 %v2137_v63  ;;  %1971 = vmatprep.mubr.msk.bf16.mxu1 %vm767_vm0, %v2139_v0 }
  0x99   :  { %985 = vmatmul.mubr.bf16.gmra.mxu0 %v2140_v1  ;;  %1972 = vmatmul.mubr.msk.bf16.gmra.mxu1 %vm767_vm0, %v2141_v2 }
  0x9a   :  { %992 = vmatprep.mubr.bf16.mxu0 %v2142_v3  ;;  %1975 = vmatprep.mubr.msk.bf16.mxu1 %vm767_vm0, %v2144_v4 }
  0xa1   :  { %993 = vmatmul.mubr.bf16.gmra.mxu0 %v2145_v5  ;;  %1976 = vmatmul.mubr.msk.bf16.gmra.mxu1 %vm767_vm0, %v2146_v6 }
  0xa2   :  { %1000 = vmatprep.mubr.bf16.mxu0 %v2147_v7  ;;  %1979 = vmatprep.mubr.msk.bf16.mxu1 %vm767_vm0, %v2149_v8 }
  0xa9   :  { %1001 = vmatmul.mubr.bf16.gmra.mxu0 %v2150_v9  ;;  %1980 = vmatmul.mubr.msk.bf16.gmra.mxu1 %vm767_vm0, %v2151_v10 }
  0xaa   :  { %1008 = vmatprep.mubr.bf16.mxu0 %v2152_v11  ;;  %1983 = vmatprep.mubr.msk.bf16.mxu1 %vm767_vm0, %v2154_v12 }
  0xb1   :  { %1009 = vmatmul.mubr.bf16.gmra.mxu0 %v2155_v13  ;;  %1984 = vmatmul.mubr.msk.bf16.gmra.mxu1 %vm767_vm0, %v2156_v14 }
  0xb2   :  { %1016 = vmatprep.mubr.bf16.mxu0 %v2157_v15  ;;  %1987 = vmatprep.mubr.msk.bf16.mxu1 %vm767_vm0, %v2159_v16 }
  0xb9   :  { %1017 = vmatmul.mubr.bf16.gmra.mxu0 %v2160_v17  ;;  %1988 = vmatmul.mubr.msk.bf16.gmra.mxu1 %vm767_vm0, %v2161_v18 }
  0xba   :  { %1024 = vmatprep.mubr.bf16.mxu0 %v2162_v19  ;;  %1991 = vmatprep.mubr.msk.bf16.mxu1 %vm767_vm0, %v2164_v20 }
  0xc1   :  { %1025 = vmatmul.mubr.bf16.gmra.mxu0 %v2165_v21  ;;  %1992 = vmatmul.mubr.msk.bf16.gmra.mxu1 %vm767_vm0, %v2166_v22 }
  0xc2   :  { %1032 = vmatprep.mubr.bf16.mxu0 %v2167_v23  ;;  %1995 = vmatprep.mubr.msk.bf16.mxu1 %vm767_vm0, %v2169_v24 }
  0xc9   :  { %1033 = vmatmul.mubr.bf16.gmra.mxu0 %v2170_v25  ;;  %1996 = vmatmul.mubr.msk.bf16.gmra.mxu1 %vm767_vm0, %v2171_v26 }
  0xca   :  { %1040 = vmatprep.mubr.bf16.mxu0 %v2172_v27  ;;  %1999 = vmatprep.mubr.msk.bf16.mxu1 %vm767_vm0, %v2174_v28 }
  0xd1   :  { %1041 = vmatmul.mubr.bf16.gmra.mxu0 %v2175_v29  ;;  %2000 = vmatmul.mubr.msk.bf16.gmra.mxu1 %vm767_vm0, %v2176_v30 }
  0xd2   :  { %1048 = vmatprep.mubr.bf16.mxu0 %v2177_v31  ;;  %2003 = vmatprep.mubr.msk.bf16.mxu1 %vm767_vm0, %v2179_v32 }
  0xd9   :  { %1049 = vmatmul.mubr.bf16.gmra.mxu0 %v2180_v33  ;;  %2004 = vmatmul.mubr.msk.bf16.gmra.mxu1 %vm767_vm0, %v2181_v34 }
  0xda   :  { %1056 = vmatprep.mubr.bf16.mxu0 %v2182_v35  ;;  %2007 = vmatprep.mubr.msk.bf16.mxu1 %vm767_vm0, %v2184_v36 }
  0xe1   :  { %1057 = vmatmul.mubr.bf16.gmra.mxu0 %v2185_v37  ;;  %2008 = vmatmul.mubr.msk.bf16.gmra.mxu1 %vm767_vm0, %v2186_v38 }
  0xe2   :  { %1064 = vmatprep.mubr.bf16.mxu0 %v2187_v39  ;;  %2011 = vmatprep.mubr.msk.bf16.mxu1 %vm767_vm0, %v2189_v40 }
  0xe9   :  { %1065 = vmatmul.mubr.bf16.gmra.mxu0 %v2190_v41  ;;  %2012 = vmatmul.mubr.msk.bf16.gmra.mxu1 %vm767_vm0, %v2191_v42 }
  0xea   :  { %1072 = vmatprep.mubr.bf16.mxu0 %v2192_v43  ;;  %2015 = vmatprep.mubr.msk.bf16.mxu1 %vm767_vm0, %v2194_v44 }
  0xf1   :  { %1073 = vmatmul.mubr.bf16.gmra.mxu0 %v2195_v45  ;;  %2016 = vmatmul.mubr.msk.bf16.gmra.mxu1 %vm767_vm0, %v2196_v46 }
  0xf2   :  { %1080 = vmatprep.mubr.bf16.mxu0 %v2197_v47  ;;  %2019 = vmatprep.mubr.msk.bf16.mxu1 %vm767_vm0, %v2199_v48 }
  0xf9   :  { %1081 = vmatmul.mubr.bf16.gmra.mxu0 %v2200_v49  ;;  %2020 = vmatmul.mubr.msk.bf16.gmra.mxu1 %vm767_vm0, %v2201_v50 }
 0x101   :  { %v2661_v51 = vpop.f32.mrf.mxu0  ;;  %v2663_v52 = vpop.f32.mrf.mxu1 }
 0x103   :  { %v900_v53 = vpop.f32.mrf.mxu0  ;;  %v1092_v54 = vpop.f32.mrf.mxu1 }
 0x105   :  { %v2665_v55 = vpop.f32.mrf.mxu0  ;;  %v2667_v56 = vpop.f32.mrf.mxu1 }
 0x107   :  { %v903_v57 = vpop.f32.mrf.mxu0  ;;  %v1095_v58 = vpop.f32.mrf.mxu1 }
 0x109   :  { %v906_v59 = vpop.f32.mrf.mxu0  ;;  %v2669_v60 = vpop.f32.mrf.mxu1 }
 0x10b   :  { %v908_v61 = vpop.f32.mrf.mxu0  ;;  %v1100_v62 = vpop.f32.mrf.mxu1 }
 0x10d   :  { %v909_v63 = vpop.f32.mrf.mxu0  ;;  %v2671_v0 = vpop.f32.mrf.mxu1 }
 0x10f   :  { %v911_v1 = vpop.f32.mrf.mxu0  ;;  %v1103_v2 = vpop.f32.mrf.mxu1 }
 0x111   :  { %v2673_v3 = vpop.f32.mrf.mxu0  ;;  %v2675_v4 = vpop.f32.mrf.mxu1 }
 0x113   :  { %v916_v5 = vpop.f32.mrf.mxu0  ;;  %v1108_v6 = vpop.f32.mrf.mxu1 }
 0x115   :  { %v2677_v7 = vpop.f32.mrf.mxu0  ;;  %v2679_v8 = vpop.f32.mrf.mxu1 }
 0x117   :  { %v919_v9 = vpop.f32.mrf.mxu0  ;;  %v1111_v10 = vpop.f32.mrf.mxu1 }
 0x119   :  { %v922_v11 = vpop.f32.mrf.mxu0  ;;  %v2681_v12 = vpop.f32.mrf.mxu1 }
 0x11b   :  { %v924_v13 = vpop.f32.mrf.mxu0  ;;  %v1116_v14 = vpop.f32.mrf.mxu1 }
 0x11d   :  { %v925_v15 = vpop.f32.mrf.mxu0  ;;  %v2683_v16 = vpop.f32.mrf.mxu1 }
 0x11f   :  { %v927_v17 = vpop.f32.mrf.mxu0  ;;  %v1119_v18 = vpop.f32.mrf.mxu1 }
 0x121   :  { %v930_v19 = vpop.f32.mrf.mxu0  ;;  %v2685_v20 = vpop.f32.mrf.mxu1 }
 0x123   :  { %v932_v21 = vpop.f32.mrf.mxu0  ;;  %v1124_v22 = vpop.f32.mrf.mxu1 }
 0x125   :  { %v933_v23 = vpop.f32.mrf.mxu0  ;;  %v2687_v24 = vpop.f32.mrf.mxu1 }
 0x126   :  { %3090 = vst [vmem:[#allocation2_spill] sm:$0xff] %v2687_v24 }
 0x127   :  { %v935_v25 = vpop.f32.mrf.mxu0  ;;  %v1127_v26 = vpop.f32.mrf.mxu1 }
 0x129   :  { %v938_v27 = vpop.f32.mrf.mxu0  ;;  %v2689_v28 = vpop.f32.mrf.mxu1 }
 0x12b   :  { %v940_v29 = vpop.f32.mrf.mxu0  ;;  %v1132_v30 = vpop.f32.mrf.mxu1 }
 0x12d   :  { %v941_v31 = vpop.f32.mrf.mxu0  ;;  %v2691_v32 = vpop.f32.mrf.mxu1 }
 0x12f   :  { %v943_v33 = vpop.f32.mrf.mxu0  ;;  %v1135_v34 = vpop.f32.mrf.mxu1 }
 0x131   :  { %v946_v35 = vpop.f32.mrf.mxu0  ;;  %v2693_v36 = vpop.f32.mrf.mxu1 }
 0x132   :  { %3091 = vst [vmem:[#allocation3_spill] sm:$0xff] %v2693_v36 }
 0x133   :  { %v948_v37 = vpop.f32.mrf.mxu0  ;;  %v1140_v38 = vpop.f32.mrf.mxu1 }
 0x135   :  { %v949_v39 = vpop.f32.mrf.mxu0  ;;  %v2695_v40 = vpop.f32.mrf.mxu1 }
 0x136   :  { %3092 = vst [vmem:[#allocation4_spill] sm:$0xff] %v2695_v40 }
 0x137   :  { %v951_v41 = vpop.f32.mrf.mxu0  ;;  %v1143_v42 = vpop.f32.mrf.mxu1 }
 0x139   :  { %v954_v43 = vpop.f32.mrf.mxu0  ;;  %v2697_v44 = vpop.f32.mrf.mxu1 }
 0x13a   :  { %3093 = vst [vmem:[#allocation5_spill] sm:$0xff] %v2697_v44 }
 0x13b   :  { %v956_v45 = vpop.f32.mrf.mxu0  ;;  %v1148_v46 = vpop.f32.mrf.mxu1 }
 0x13d   :  { %v957_v47 = vpop.f32.mrf.mxu0  ;;  %v2699_v48 = vpop.f32.mrf.mxu1 }
 0x13e   :  { %3094 = vst [vmem:[#allocation6_spill] sm:$0xff] %v2699_v48 }
 0x13f   :  { %v959_v49 = vpop.f32.mrf.mxu0  ;;  %v1151_v50 = vpop.f32.mrf.mxu1 }
 0x141   :  { %v962_v53 = vpop.f32.mrf.mxu0  ;;  %v1961_v54 = vpop.f32.mrf.mxu1 }
 0x142   :  { %v2701_v57 = vadd.f32 %v1961_v54, %v906_v59 }
 0x143   :  { %v964_v58 = vpop.f32.mrf.mxu0  ;;  %v1187_v61 = vpop.f32.mrf.mxu1 }
 0x145   :  { %v965_v62 = vpop.f32.mrf.mxu0  ;;  %v1962_v1 = vpop.f32.mrf.mxu1 }
 0x146   :  { %v2703_v2 = vadd.f32 %v1962_v1, %v909_v63 }
 0x147   :  { %v967_v5 = vpop.f32.mrf.mxu0  ;;  %v1190_v6 = vpop.f32.mrf.mxu1 }
 0x149   :  { %v970_v9 = vpop.f32.mrf.mxu0  ;;  %v1965_v10 = vpop.f32.mrf.mxu1 }
 0x14a   :  { %v2705_v13 = vadd.f32 %v1965_v10, %v922_v11 }
 0x14b   :  { %v972_v14 = vpop.f32.mrf.mxu0  ;;  %v1203_v17 = vpop.f32.mrf.mxu1 }
 0x14c   :  { %v2708_v18 = vadd.f32 %v1203_v17, %v2673_v3 }
 0x14d   :  { %v973_v21 = vpop.f32.mrf.mxu0  ;;  %v1966_v59 = vpop.f32.mrf.mxu1 }
 0x14e   :  { %v2710_v22 = vadd.f32 %v1966_v59, %v925_v15 }
 0x14f   :  { %v975_v25 = vpop.f32.mrf.mxu0  ;;  %v1206_v26 = vpop.f32.mrf.mxu1 }
 0x150   :  { %v2713_v63 = vadd.f32 %v1206_v26, %v2677_v7 }
 0x151   :  { %v978_v29 = vpop.f32.mrf.mxu0  ;;  %v1969_v30 = vpop.f32.mrf.mxu1 }
 0x152   :  { %v2715_v33 = vadd.f32 %v1969_v30, %v938_v27 }
 0x153   :  { %v980_v11 = vpop.f32.mrf.mxu0  ;;  %v1219_v34 = vpop.f32.mrf.mxu1 }
 0x154   :  { %v2717_v37 = vadd.f32 %v1219_v34, %v930_v19 }
 0x155   :  { %v981_v38 = vpop.f32.mrf.mxu0  ;;  %v1970_v3 = vpop.f32.mrf.mxu1 }
 0x156   :  { %v2719_v41 = vadd.f32 %v1970_v3, %v941_v31  ;;  %v2745_v3 = vadd.f32 %v1190_v6, %v2665_v55 }
 0x157   :  { %v983_v42 = vpop.f32.mrf.mxu0  ;;  %v1222_v15 = vpop.f32.mrf.mxu1 }
 0x158   :  { %3095 = vst [vmem:[#allocation7_spill] sm:$0xff] %v2719_v41  ;;  %v2721_v45 = vadd.f32 %v1222_v15, %v933_v23 }
 0x159   :  { %v986_v46 = vpop.f32.mrf.mxu0  ;;  %v1973_v49 = vpop.f32.mrf.mxu1 }
 0x15a   :  { %3096 = vst [vmem:[#allocation8_spill] sm:$0xff] %v2721_v45  ;;  %v2723_v7 = vadd.f32 %v1973_v49, %v954_v43  ;;  %v2734_v43 = vadd.f32 %v1187_v61, %v2661_v51 }
 0x15b   :  { %v988_v50 = vpop.f32.mrf.mxu0  ;;  %v1235_v54 = vpop.f32.mrf.mxu1 }
 0x15c   :  { %3097 = vst [vmem:[#allocation9_spill] sm:$0xff] %v2723_v7  ;;  %v2725_v27 = vadd.f32 %v1235_v54, %v946_v35 }
 0x15d   :  { %v989_v58 = vpop.f32.mrf.mxu0  ;;  %v1974_v1 = vpop.f32.mrf.mxu1 }
 0x15e   :  { %3098 = vst [vmem:[#allocation10_spill] sm:$0xff] %v2725_v27  ;;  %v2727_v19 = vadd.f32 %v1974_v1, %v957_v47 }
 0x15f   :  { %v991_v5 = vpop.f32.mrf.mxu0  ;;  %v1238_v10 = vpop.f32.mrf.mxu1 }
 0x160   :  { %3099 = vst [vmem:[#allocation11_spill] sm:$0xff] %v2727_v19  ;;  %v2729_v31 = vadd.f32 %v1238_v10, %v949_v39 }
 0x161   :  { %v994_v14 = vpop.f32.mrf.mxu0  ;;  %v1977_v17 = vpop.f32.mrf.mxu1 }
 0x162   :  { %3100 = vst [vmem:[#allocation12_spill] sm:$0xff] %v2729_v31  ;;  %v2731_v23 = vadd.f32 %v1977_v17, %v970_v9 }
 0x163   :  { %v996_v59 = vpop.f32.mrf.mxu0  ;;  %v1251_v25 = vpop.f32.mrf.mxu1 }
 0x164   :  { %v2738_v26 = vadd.f32 %v1251_v25, %v962_v53 }
 0x165   :  { %v997_v47 = vpop.f32.mrf.mxu0  ;;  %v1978_v30 = vpop.f32.mrf.mxu1 }
 0x166   :  { %v2742_v11 = vadd.f32 %v1978_v30, %v973_v21 }
 0x167   :  { %v999_v34 = vpop.f32.mrf.mxu0  ;;  %v1254_v9 = vpop.f32.mrf.mxu1 }
 0x168   :  { %v2749_v61 = vadd.f32 %v1254_v9, %v965_v62 }
 0x169   :  { %v1002_v42 = vpop.f32.mrf.mxu0  ;;  %v1981_v53 = vpop.f32.mrf.mxu1 }
 0x16a   :  { %v2753_v49 = vadd.f32 %v1981_v53, %v986_v46 }
 0x16b   :  { %v1004_v50 = vpop.f32.mrf.mxu0  ;;  %v1267_v21 = vpop.f32.mrf.mxu1 }
 0x16c   :  { %v2757_v1 = vadd.f32 %v1267_v21, %v978_v29 }
 0x16d   :  { %v1005_v55 = vpop.f32.mrf.mxu0  ;;  %v1982_v6 = vpop.f32.mrf.mxu1 }
 0x16e   :  { %v2761_v5 = vadd.f32 %v1982_v6, %v989_v58 }
 0x16f   :  { %v1007_v10 = vpop.f32.mrf.mxu0  ;;  %v1270_v17 = vpop.f32.mrf.mxu1 }
 0x170   :  { %v2765_v59 = vadd.f32 %v1270_v17, %v981_v38 }
 0x171   :  { %v1010_v25 = vpop.f32.mrf.mxu0  ;;  %v1985_v30 = vpop.f32.mrf.mxu1 }
 0x172   :  { %v2769_v34 = vadd.f32 %v1985_v30, %v1002_v42 }
 0x173   :  { %v1012_v9 = vpop.f32.mrf.mxu0  ;;  %v1283_v53 = vpop.f32.mrf.mxu1 }
 0x174   :  { %v2773_v50 = vadd.f32 %v1283_v53, %v994_v14 }
 0x175   :  { %v1013_v21 = vpop.f32.mrf.mxu0  ;;  %v1986_v6 = vpop.f32.mrf.mxu1 }
 0x176   :  { %3101 = vst [vmem:[#allocation13_spill] sm:$0xff] %v2773_v50  ;;  %v2777_v10 = vadd.f32 %v1986_v6, %v1005_v55 }
 0x177   :  { %v1015_v17 = vpop.f32.mrf.mxu0  ;;  %v1286_v46 = vpop.f32.mrf.mxu1 }
 0x178   :  { %3102 = vst [vmem:[#allocation14_spill] sm:$0xff] %v2777_v10  ;;  %v2781_v30 = vadd.f32 %v1286_v46, %v997_v47 }
 0x179   :  { %v1018_v9 = vpop.f32.mrf.mxu0  ;;  %v1989_v29 = vpop.f32.mrf.mxu1 }
 0x17a   :  { %3103 = vst [vmem:[#allocation15_spill] sm:$0xff] %v2781_v30  ;;  %v2785_v53 = vadd.f32 %v1989_v29, %v1018_v9 }
 0x17b   :  { %v1020_v58 = vpop.f32.mrf.mxu0  ;;  %v1299_v62 = vpop.f32.mrf.mxu1 }
 0x17c   :  { %3104 = vst [vmem:[#allocation16_spill] sm:$0xff] %v2785_v53  ;;  %v2789_v6 = vadd.f32 %v1299_v62, %v1010_v25 }
 0x17d   :  { %v1021_v17 = vpop.f32.mrf.mxu0  ;;  %v1990_v38 = vpop.f32.mrf.mxu1 }
 0x17e   :  { %3105 = vst [vmem:[#allocation17_spill] sm:$0xff] %v2789_v6  ;;  %v2793_v46 = vadd.f32 %v1990_v38, %v1021_v17 }
 0x17f   :  { %v1023_v42 = vpop.f32.mrf.mxu0  ;;  %v1302_v54 = vpop.f32.mrf.mxu1 }
 0x180   :  { %3106 = vst [vmem:[#allocation18_spill] sm:$0xff] %v2793_v46  ;;  %v2797_v9 = vadd.f32 %v1302_v54, %v1013_v21 }
 0x181   :  { %v1026_v58 = vpop.f32.mrf.mxu0  ;;  %v1993_v14 = vpop.f32.mrf.mxu1 }
 0x182   :  { %3107 = vst [vmem:[#allocation19_spill] sm:$0xff] %v2797_v9 }
 0x183   :  { %v1028_v25 = vpop.f32.mrf.mxu0  ;;  %v1315_v55 = vpop.f32.mrf.mxu1 }
 0x184   :  { %v1316_v24 = vadd.f32 %v1315_v55, %v1026_v58 }
 0x185   :  { %v1029_v15 = vpop.f32.mrf.mxu0  ;;  %v1994_v51 = vpop.f32.mrf.mxu1 }
 0x187   :  { %v1031_v39 = vpop.f32.mrf.mxu0  ;;  %v1318_v47 = vpop.f32.mrf.mxu1 }
 0x189   :  { %v1034_v38 = vpop.f32.mrf.mxu0  ;;  %v1997_v17 = vpop.f32.mrf.mxu1 }
 0x18a   :  { %v1324_v44 = vadd.f32 %v1993_v14, %v1034_v38  ;;  %v3112_v14 = vmax.f32 %v2701_v57, %v2731_v23 }
 0x18b   :  { %v1036_v42 = vpop.f32.mrf.mxu0  ;;  %v1331_v35 = vpop.f32.mrf.mxu1 }
 0x18d   :  { %v1037_v40 = vpop.f32.mrf.mxu0  ;;  %v2801_v48 = vpop.f32.mrf.mxu1 }
 0x18f   :  { %v1039_v54 = vpop.f32.mrf.mxu0  ;;  %v1334_v21 = vpop.f32.mrf.mxu1 }
 0x191   :  { %v1042_v29 = vpop.f32.mrf.mxu0  ;;  %v2803_v46 = vpop.f32.mrf.mxu1 }
 0x193   :  { %v1044_v19 = vpop.f32.mrf.mxu0  ;;  %v2805_v62 = vpop.f32.mrf.mxu1 }
 0x195   :  { %v1045_v25 = vpop.f32.mrf.mxu0  ;;  %v2807_v9 = vpop.f32.mrf.mxu1 }
 0x197   :  { %v1047_v39 = vpop.f32.mrf.mxu0  ;;  %v2809_v31 = vpop.f32.mrf.mxu1 }
 0x199   :  { %v1050_v6 = vpop.f32.mrf.mxu0  ;;  %v2811_v42 = vpop.f32.mrf.mxu1 }
 0x19a   :  { %3108 = vst [vmem:[#allocation20_spill] sm:$0xff] %v2811_v42 }
 0x19b   :  { %v1052_v27 = vpop.f32.mrf.mxu0  ;;  %v2813_v53 = vpop.f32.mrf.mxu1 }
 0x19c   :  { %3109 = vst [vmem:[#allocation21_spill] sm:$0xff] %v2813_v53  ;;  %v2824_v27 = vld [vmem:[%s3075_s2] ss:$0 sm:$0xff] }
 0x19d   :  { %v1053_v54 = vpop.f32.mrf.mxu0  ;;  %v2815_v7 = vpop.f32.mrf.mxu1 }
 0x19e   :  { %3110 = vst [vmem:[#allocation22_spill] sm:$0xff] %v2815_v7 }
 0x19f   :  { %v1055_v36 = vpop.f32.mrf.mxu0  ;;  %v2817_v30 = vpop.f32.mrf.mxu1 }
 0x1a0   :  { %3111 = vst [vmem:[#allocation23_spill] sm:$0xff] %v2817_v30  ;;  %v1327_v30 = vadd.f32 %v1994_v51, %v1037_v40  ;;  %v1319_v40 = vadd.f32 %v1318_v47, %v1029_v15  ;;  %v1332_v47 = vadd.f32 %v1331_v35, %v1042_v29  ;;  %v3116_v35 = vmax.f32 %v2705_v13, %v2753_v49 }
 0x1a1   :  { %v1058_v19 = vpop.f32.mrf.mxu0  ;;  %v2009_v45 = vpop.f32.mrf.mxu1 }
 0x1a2   :  { %v1388_v10 = vadd.f32 %v2009_v45, %v2669_v60 }
 0x1a3   :  { %v1060_v39 = vpop.f32.mrf.mxu0  ;;  %v1379_v41 = vpop.f32.mrf.mxu1 }
 0x1a4   :  { %v1460_v50 = vmax.f32 %v1324_v44, %v1388_v10  ;;  %v1380_v42 = vadd.f32 %v1379_v41, %v2663_v52  ;;  %v3113_v41 = vmax.f32 %v2734_v43, %v2738_v26 }
 0x1a5   :  { %v2826_v7 = vpop.f32.mrf.mxu0  ;;  %v2010_v36 = vpop.f32.mrf.mxu1 }
 0x1a6   :  { %v1476_v38 = vmax.f32 %v3112_v14, %v1460_v50  ;;  %v1458_v60 = vmax.f32 %v1316_v24, %v1380_v42  ;;  %v1391_v45 = vadd.f32 %v2010_v36, %v2671_v0  ;;  %v3114_v0 = vmax.f32 %v2703_v2, %v2742_v11 }
 0x1a7   :  { %v1063_v55 = vpop.f32.mrf.mxu0  ;;  %v1382_v44 = vpop.f32.mrf.mxu1  ;;  %v1340_v50 = vadd.f32 %v1997_v17, %v1050_v6  ;;  %v3115_v14 = vmax.f32 %v2745_v3, %v2749_v61  ;;  %v1335_v17 = vadd.f32 %v1334_v21, %v1045_v25 }
 0x1a8   :  { %v2833_v52 = vadd.f32 %v2824_v27, %v1476_v38  ;;  %v1474_v10 = vmax.f32 %v3113_v41, %v1458_v60  ;;  %v1461_v58 = vmax.f32 %v1327_v30, %v1391_v45  ;;  %v1383_v39 = vadd.f32 %v1382_v44, %v2667_v56 }
 0x1a9   :  { %v1066_v51 = vpop.f32.mrf.mxu0  ;;  %v2013_v53 = vpop.f32.mrf.mxu1  ;;  %v1343_v45 = vadd.f32 %v2801_v48, %v1053_v54  ;;  %v3117_v54 = vmax.f32 %v2708_v18, %v2757_v1  ;;  %v3118_v18 = vmax.f32 %v2710_v22, %v2761_v5 }
 0x1aa   :  { %v1515_v57 = vmin.f32 %v2833_v52, 0.0  ;;  %v2841_v24 = vadd.f32 %v2824_v27, %v1474_v10  ;;  %v1477_v23 = vmax.f32 %v3114_v0, %v1461_v58  ;;  %v1459_v42 = vmax.f32 %v1319_v40, %v1383_v39 }
 0x1ab   :  { %v1404_v43 = vadd.f32 %v2013_v53, %v2681_v12  ;;  %v1068_v26 = vpop.f32.mrf.mxu0  ;;  %v1395_v30 = vpop.f32.mrf.mxu1  ;;  %v1348_v58 = vadd.f32 %v2805_v62, %v1058_v19  ;;  %v3119_v62 = vmax.f32 %v2713_v63, %v2765_v59  ;;  %vm1595_vm1 = vcmp.gt.f32.partialorder %v2833_v52, 0.0 }
 0x1ac   :  { %v1533_v36 = vmul.f32 1.442695, %v1515_v57  ;;  %v1513_v56 = vmin.f32 %v2841_v24, 0.0  ;;  %v2849_v15 = vadd.f32 %v2824_v27, %v1477_v23  ;;  %v1475_v38 = vmax.f32 %v3115_v14, %v1459_v42 }
 0x1ad   :  { %v1464_v60 = vmax.f32 %v1340_v50, %v1404_v43  ;;  %v1396_v2 = vadd.f32 %v1395_v30, %v2675_v4  ;;  %v1069_v11 = vpop.f32.mrf.mxu0  ;;  %v2014_v6 = vpop.f32.mrf.mxu1  ;;  %v1351_v14 = vadd.f32 %v2809_v31, %v2826_v7  ;;  %v3123_v7 = vld [vmem:[#allocation2_spill] sm:$0xff]  ;;  %vm1593_vm3 = vcmp.gt.f32.partialorder %v2841_v24, 0.0 }
 0x1ae   :  { %2202 = vpow2.f32 %v1533_v36  ;;  %v1529_v12 = vmul.f32 1.442695, %v1513_v56  ;;  %v1516_v53 = vmin.f32 %v2849_v15, 0.0  ;;  %v2858_v55 = vadd.f32 %v2824_v27, %v1475_v38 }
 0x1af   :  { %v1480_v3 = vmax.f32 %v3116_v35, %v1464_v60  ;;  %v1462_v61 = vmax.f32 %v1332_v47, %v1396_v2  ;;  %v1071_v29 = vpop.f32.mrf.mxu0  ;;  %v1398_v44 = vpop.f32.mrf.mxu1  ;;  %v1407_v21 = vadd.f32 %v2014_v6, %v2683_v16  ;;  %v3120_v2 = vmax.f32 %v2715_v33, %v2769_v34  ;;  %v3125_v34 = vld [vmem:[#allocation7_spill] sm:$0xff] }
 0x1b0   :  { %2204 = vpow2.f32 %v1529_v12  ;;  %v1535_v4 = vmul.f32 1.442695, %v1516_v53  ;;  %v1399_v25 = vadd.f32 %v1398_v44, %v2679_v8  ;;  %v1514_v41 = vmin.f32 %v2858_v55, 0.0 }
 0x1b1   :  { %v2867_v48 = vadd.f32 %v2824_v27, %v1480_v3  ;;  %v1478_v10 = vmax.f32 %v3117_v54, %v1462_v61  ;;  %v2872_v13 = vpop.f32.mrf.mxu0  ;;  %v2017_v49 = vpop.f32.mrf.mxu1  ;;  %v1465_v39 = vmax.f32 %v1343_v45, %v1407_v21  ;;  %v1356_v8 = vadd.f32 %v2803_v46, %v1066_v51  ;;  %v3124_v3 = vld [vmem:[#allocation20_spill] sm:$0xff] }
 0x1b2   :  { %2206 = vpow2.f32 %v1535_v4  ;;  %v1463_v40 = vmax.f32 %v1335_v17, %v1399_v25  ;;  %v1531_v16 = vmul.f32 1.442695, %v1514_v41  ;;  %v1420_v42 = vadd.f32 %v2017_v49, %v2689_v28  ;;  %v3128_v25 = vld [vmem:[#allocation5_spill] sm:$0xff] }
 0x1b3   :  { %v1519_v57 = vmin.f32 %v2867_v48, 0.0  ;;  %v2878_v0 = vadd.f32 %v2824_v27, %v1478_v10  ;;  %v1076_v23 = vpop.f32.mrf.mxu0  ;;  %v1411_v50 = vpop.f32.mrf.mxu1  ;;  %v1481_v1 = vmax.f32 %v3118_v18, %v1465_v39  ;;  %v1359_v28 = vadd.f32 %v2807_v9, %v1069_v11  ;;  %v3121_v9 = vld [vmem:[#allocation13_spill] sm:$0xff] }
 0x1b4   :  { %v1479_v19 = vmax.f32 %v3119_v62, %v1463_v40  ;;  %v1412_v43 = vadd.f32 %v1411_v50, %v2685_v20  ;;  %2208 = vpow2.f32 %v1531_v16  ;;  %v1468_v5 = vmax.f32 %v1356_v8, %v1420_v42  ;;  %v3129_v23 = vld [vmem:[#allocation21_spill] sm:$0xff] }
 0x1b5   :  { %v1541_v46 = vmul.f32 1.442695, %v1519_v57  ;;  %v1517_v51 = vmin.f32 %v2878_v0, 0.0  ;;  %v2889_v26 = vpop.f32.mrf.mxu0  ;;  %v2018_v30 = vpop.f32.mrf.mxu1  ;;  %v2892_v36 = vadd.f32 %v2824_v27, %v1481_v1  ;;  %v3122_v11 = vmax.f32 %v2717_v37, %v3121_v9  ;;  %v3126_v37 = vld [vmem:[#allocation14_spill] sm:$0xff] }
 0x1b6   :  { %v2895_v22 = vadd.f32 %v2824_v27, %v1479_v19  ;;  %v1466_v63 = vmax.f32 %v1348_v58, %v1412_v43  ;;  %v1423_v20 = vadd.f32 %v2018_v30, %v2691_v32  ;;  %v1484_v6 = vmax.f32 %v3120_v2, %v1468_v5  ;;  %v3130_v43 = vld [vmem:[#allocation8_spill] sm:$0xff] }
 0x1b7   :  { %2210 = vpow2.f32 %v1541_v46  ;;  %v1537_v59 = vmul.f32 1.442695, %v1517_v51  ;;  %v1079_v56 = vpop.f32.mrf.mxu0  ;;  %v1414_v47 = vpop.f32.mrf.mxu1  ;;  %v1520_v38 = vmin.f32 %v2892_v36, 0.0  ;;  %v3127_v4 = vmax.f32 %v3125_v34, %v3126_v37  ;;  %v3131_v46 = vld [vmem:[#allocation15_spill] sm:$0xff] }
 0x1b8   :  { %v1518_v60 = vmin.f32 %v2895_v22, 0.0  ;;  %v1482_v32 = vmax.f32 %v3122_v11, %v1466_v63  ;;  %v1469_v17 = vmax.f32 %v1359_v28, %v1423_v20  ;;  %v1415_v31 = vadd.f32 %v1414_v47, %v3123_v7 }
 0x1b9   :  { %2212 = vpow2.f32 %v1537_v59  ;;  %v1082_v12 = vpop.f32.mrf.mxu0  ;;  %v2021_v53 = vpop.f32.mrf.mxu1  ;;  %v1543_v45 = vmul.f32 1.442695, %v1520_v38  ;;  %v2913_v44 = vadd.f32 %v2824_v27, %v1484_v6  ;;  %vm1596_vm4 = vcmp.gt.f32.partialorder %v2849_v15, 0.0 }
 0x1ba   :  { %v1539_v35 = vmul.f32 1.442695, %v1518_v60  ;;  %v1372_v61 = vadd.f32 %v3124_v3, %v1082_v12  ;;  %v2916_v33 = vadd.f32 %v2824_v27, %v1482_v32  ;;  %v1485_v21 = vmax.f32 %v3127_v4, %v1469_v17 }
 0x1bb   :  { %v2203_v29 = vpop.eup %2202  ;;  %v1436_v41 = vadd.f32 %v2021_v53, %v3128_v25  ;;  %v1084_v54 = vpop.f32.mrf.mxu0  ;;  %2214 = vpow2.f32 %v1543_v45  ;;  %v1467_v49 = vmax.f32 %v1351_v14, %v1415_v31  ;;  %v1523_v39 = vmin.f32 %v2913_v44, 0.0  ;;  %v3133_v14 = vld [vmem:[#allocation3_spill] sm:$0xff]  ;;  %v3134_v45 = vld [vmem:[#allocation9_spill] sm:$0xff] }
 0x1bc   :  { %v1875_v10 = vadd.f32 -1.0, %v2203_v29  ;;  %2216 = vpow2.f32 %v1539_v35  ;;  %v1521_v40 = vmin.f32 %v2916_v33, 0.0  ;;  %vm1594_vm5 = vcmp.gt.f32.partialorder %v2858_v55, 0.0  ;;  %v1427_v1 = vpop.f32.mrf.mxu1  ;;  %v3135_v35 = vld [vmem:[#allocation16_spill] sm:$0xff] }
 0x1bd   :  { %v2205_v58 = vpop.eup %2204  ;;  %v1085_v16 = vpop.f32.mrf.mxu0  ;;  %v1364_v50 = vadd.f32 %v3129_v23, %v2872_v13  ;;  %v2930_v18 = vadd.f32 %v2824_v27, %v1485_v21  ;;  %v1549_v19 = vmul.f32 1.442695, %v1523_v39  ;;  %v3132_v51 = vmax.f32 %v3130_v43, %v3131_v46  ;;  %v3137_v21 = vld [vmem:[#allocation22_spill] sm:$0xff] }
 0x1be   :  { %v1579_v8 = vmul.f32 1.6732632, %v1875_v10  ;;  %v1873_v57 = vadd.f32 -1.0, %v2205_v58  ;;  %v1545_v42 = vmul.f32 1.442695, %v1521_v40  ;;  %v1472_v5 = vmax.f32 %v1372_v61, %v1436_v41  ;;  %v2022_v41 = vpop.f32.mrf.mxu1  ;;  %v3138_v40 = vld [vmem:[#allocation23_spill] sm:$0xff] }
 0x1bf   :  { %v2207_v62 = vpop.eup %2206  ;;  %v1483_v30 = vmax.f32 %v3132_v51, %v1467_v49  ;;  %v1087_v63 = vpop.f32.mrf.mxu0  ;;  %vm1599_vm6 = vcmp.gt.f32.partialorder %v2867_v48, 0.0  ;;  %v1524_v13 = vmin.f32 %v2930_v18, 0.0  ;;  %2218 = vpow2.f32 %v1549_v19 }
 0x1c0   :  { %v1611_v59 = vsel %vm1595_vm1, %v2833_v52, %v1579_v8  ;;  %v1577_v28 = vmul.f32 1.6732632, %v1873_v57  ;;  %v1876_v20 = vadd.f32 -1.0, %v2207_v62  ;;  %v1428_v38 = vadd.f32 %v1427_v1, %v3133_v14  ;;  %v3140_v1 = vld [vmem:[#allocation17_spill] sm:$0xff] }
 0x1c1   :  { %v1627_v56 = vmul.f32 1.050701, %v1611_v59  ;;  %v2941_v47 = vadd.f32 %v2824_v27, %v1483_v30  ;;  %v2209_v60 = vpop.eup %2208  ;;  %2220 = vpow2.f32 %v1545_v42  ;;  %v1551_v52 = vmul.f32 1.442695, %v1524_v13  ;;  %v3142_v42 = vld [vmem:[#allocation6_spill] sm:$0xff] }
 0x1c2   :  { %v1609_v2 = vsel %vm1593_vm3, %v2841_v24, %v1577_v28  ;;  %v1580_v6 = vmul.f32 1.6732632, %v1876_v20  ;;  %v1874_v32 = vadd.f32 -1.0, %v2209_v60  ;;  %vm1597_vm7 = vcmp.gt.f32.partialorder %v2878_v0, 0.0  ;;  %v1430_v20 = vpop.f32.mrf.mxu1  ;;  %v3143_v60 = vld [vmem:[#allocation11_spill] sm:$0xff] }
 0x1c3   :  { %v1907_v9 = vpack.c.bf16 %v1627_v56, %v1627_v56  ;;  %v1625_v11 = vmul.f32 1.050701, %v1609_v2  ;;  %v1522_v17 = vmin.f32 %v2941_v47, 0.0  ;;  %2222 = vpow2.f32 %v1551_v52  ;;  %v3144_v2 = vld [vmem:[#allocation18_spill] sm:$0xff] }
 0x1c4   :  { %v2211_v12 = vpop.eup %2210  ;;  %v1612_v53 = vsel %vm1596_vm4, %v2849_v15, %v1580_v6  ;;  %v3136_v7 = vmax.f32 %v3134_v45, %v3135_v35  ;;  %v1578_v61 = vmul.f32 1.6732632, %v1874_v32  ;;  %v1470_v4 = vmax.f32 %v1364_v50, %v1428_v38  ;;  %v3139_v50 = vld [vmem:[#allocation10_spill] sm:$0xff] }
 0x1c5   :  { %1708 = vst.msk [vmem:[%s3076_s3 + $0x8] sm:$0xf] %vm1705_vm2, %v1907_v9  ;;  %v1905_v31 = vpack.c.bf16 %v1625_v11, %v1625_v11  ;;  %v1628_v3 = vmul.f32 1.050701, %v1612_v53  ;;  %v1879_v29 = vadd.f32 -1.0, %v2211_v12  ;;  %v1375_v25 = vadd.f32 %v3137_v21, %v1085_v16 }
 0x1c6   :  { %v1488_v24 = vmax.f32 %v3136_v7, %v1472_v5  ;;  %v2213_v34 = vpop.eup %2212  ;;  %v1547_v37 = vmul.f32 1.442695, %v1522_v17  ;;  %v1610_v10 = vsel %vm1594_vm5, %v2858_v55, %v1578_v61  ;;  %v1367_v8 = vadd.f32 %v3138_v40, %v2889_v26  ;;  %v3146_v17 = vld [vmem:[#allocation4_spill] sm:$0xff] }
 0x1c7   :  { %1706 = vst.msk [vmem:[%s3076_s3] sm:$0xf] %vm1705_vm2, %v1905_v31  ;;  %v1908_v54 = vpack.c.bf16 %v1628_v3, %v1628_v3  ;;  %v1583_v49 = vmul.f32 1.6732632, %v1879_v29  ;;  %v1877_v58 = vadd.f32 -1.0, %v2213_v34  ;;  %v3141_v62 = vmax.f32 %v3139_v50, %v3140_v1 }
 0x1c8   :  { %v2960_v15 = vadd.f32 %v2824_v27, %v1488_v24  ;;  %v1626_v39 = vmul.f32 1.050701, %v1610_v10  ;;  %2224 = vpow2.f32 %v1547_v37  ;;  %v2215_v57 = vpop.eup %2214  ;;  %v1439_v26 = vadd.f32 %v2022_v41, %v3142_v42  ;;  %v3148_v10 = vld [vmem:[#allocation19_spill] sm:$0xff] }
 0x1c9   :  { %1709 = vst.msk [vmem:[%s3076_s3 + $0xc] sm:$0xf] %vm1705_vm2, %v1908_v54  ;;  %v1615_v23 = vsel %vm1599_vm6, %v2867_v48, %v1583_v49  ;;  %v1581_v55 = vmul.f32 1.6732632, %v1877_v58  ;;  %v1486_v19 = vmax.f32 %v3141_v62, %v1470_v4  ;;  %v2217_v43 = vpop.eup %2216  ;;  %v1880_v30 = vadd.f32 -1.0, %v2215_v57  ;;  %v3147_v54 = vld [vmem:[#allocation12_spill] sm:$0xff] }
 0x1ca   :  { %v1527_v16 = vmin.f32 %v2960_v15, 0.0  ;;  %v1906_v46 = vpack.c.bf16 %v1626_v39, %v1626_v39  ;;  %v1631_v51 = vmul.f32 1.050701, %v1615_v23  ;;  %v1878_v59 = vadd.f32 -1.0, %v2217_v43 }
 0x1cb   :  { %v1613_v63 = vsel %vm1597_vm7, %v2878_v0, %v1581_v55  ;;  %v2988_v28 = vadd.f32 %v2824_v27, %v1486_v19  ;;  %v1473_v48 = vmax.f32 %v1375_v25, %v1439_v26  ;;  %v1584_v14 = vmul.f32 1.6732632, %v1880_v30 }
 0x1cc   :  { %v1557_v5 = vmul.f32 1.442695, %v1527_v16  ;;  %1707 = vst.msk [vmem:[%s3076_s3 + $0x4] sm:$0xf] %vm1705_vm2, %v1906_v46  ;;  %v1911_v13 = vpack.c.bf16 %v1631_v51, %v1631_v51  ;;  %v1629_v56 = vmul.f32 1.050701, %v1613_v63  ;;  %v3145_v6 = vmax.f32 %v3143_v60, %v3144_v2  ;;  %v2219_v9 = vpop.eup %2218 }
 0x1cd   :  { %vm1600_vm8 = vcmp.gt.f32.partialorder %v2892_v36, 0.0  ;;  %v1582_v38 = vmul.f32 1.6732632, %v1878_v59  ;;  %v1525_v0 = vmin.f32 %v2988_v28, 0.0  ;;  %vm1598_vm9 = vcmp.gt.f32.partialorder %v2895_v22, 0.0 }
 0x1ce   :  { %2226 = vpow2.f32 %v1557_v5  ;;  %v1489_v52 = vmax.f32 %v3145_v6, %v1473_v48  ;;  %1712 = vst.msk [vmem:[%s3076_s3 + $0x18] sm:$0xf] %vm1705_vm2, %v1911_v13  ;;  %v1909_v11 = vpack.c.bf16 %v1629_v56, %v1629_v56  ;;  %v1616_v32 = vsel %vm1600_vm8, %v2892_v36, %v1584_v14  ;;  %v2221_v53 = vpop.eup %2220 }
 0x1cf   :  { %v1431_v12 = vadd.f32 %v1430_v20, %v3146_v17  ;;  %v1632_v45 = vmul.f32 1.050701, %v1616_v32  ;;  %v1614_v35 = vsel %vm1598_vm9, %v2895_v22, %v1582_v38  ;;  %v1883_v7 = vadd.f32 -1.0, %v2219_v9 }
 0x1d0   :  { %v1553_v24 = vmul.f32 1.442695, %v1525_v0  ;;  %1710 = vst.msk [vmem:[%s3076_s3 + $0x10] sm:$0xf] %vm1705_vm2, %v1909_v11  ;;  %v1630_v31 = vmul.f32 1.050701, %v1614_v35  ;;  %v3012_v61 = vadd.f32 %v2824_v27, %v1489_v52  ;;  %v2223_v29 = vpop.eup %2222  ;;  %v3149_v49 = vmax.f32 %v3147_v54, %v3148_v10 }
 0x1d1   :  { %v1881_v3 = vadd.f32 -1.0, %v2221_v53  ;;  %v1471_v36 = vmax.f32 %v1367_v8, %v1431_v12  ;;  %v1912_v34 = vpack.c.bf16 %v1632_v45, %v1632_v45  ;;  %v1587_v37 = vmul.f32 1.6732632, %v1883_v7 }
 0x1d2   :  { %vm1603_vm10 = vcmp.gt.f32.partialorder %v2913_v44, 0.0  ;;  %2228 = vpow2.f32 %v1553_v24  ;;  %v1910_v22 = vpack.c.bf16 %v1630_v31, %v1630_v31  ;;  %v1884_v21 = vadd.f32 -1.0, %v2223_v29 }
 0x1d3   :  { %v1585_v4 = vmul.f32 1.6732632, %v1881_v3  ;;  %v1528_v25 = vmin.f32 %v3012_v61, 0.0  ;;  %1713 = vst.msk [vmem:[%s3076_s3 + $0x1c] sm:$0xf] %vm1705_vm2, %v1912_v34  ;;  %v1619_v41 = vsel %vm1603_vm10, %v2913_v44, %v1587_v37  ;;  %vm1601_vm11 = vcmp.gt.f32.partialorder %v2916_v33, 0.0 }
 0x1d4   :  { %v1487_v58 = vmax.f32 %v3149_v49, %v1471_v36  ;;  %1711 = vst.msk [vmem:[%s3076_s3 + $0x14] sm:$0xf] %vm1705_vm2, %v1910_v22  ;;  %v1635_v39 = vmul.f32 1.050701, %v1619_v41  ;;  %v1588_v8 = vmul.f32 1.6732632, %v1884_v21 }
 0x1d5   :  { %v1617_v40 = vsel %vm1601_vm11, %v2916_v33, %v1585_v4  ;;  %v1559_v16 = vmul.f32 1.442695, %v1528_v25  ;;  %v2225_v57 = vpop.eup %2224  ;;  %vm1604_vm12 = vcmp.gt.f32.partialorder %v2930_v18, 0.0  ;;  %vm1602_vm13 = vcmp.gt.f32.partialorder %v2941_v47, 0.0 }
 0x1d6   :  { %v1633_v23 = vmul.f32 1.050701, %v1617_v40  ;;  %v1510_v44 = vadd.f32 %v2824_v27, %v1487_v58  ;;  %v1915_v55 = vpack.c.bf16 %v1635_v39, %v1635_v39  ;;  %v1620_v50 = vsel %vm1604_vm12, %v2930_v18, %v1588_v8 }
 0x1d7   :  { %v1882_v1 = vadd.f32 -1.0, %v2225_v57  ;;  %2230 = vpow2.f32 %v1559_v16  ;;  %v1636_v19 = vmul.f32 1.050701, %v1620_v50  ;;  %vm1607_vm14 = vcmp.gt.f32.partialorder %v2960_v15, 0.0 }
 0x1d8   :  { %v1913_v62 = vpack.c.bf16 %v1633_v23, %v1633_v23  ;;  %v1526_v42 = vmin.f32 %v1510_v44, 0.0  ;;  %1716 = vst.msk [vmem:[%s3076_s3 + $0x28] sm:$0xf] %vm1705_vm2, %v1915_v55  ;;  %vm1605_vm15 = vcmp.gt.f32.partialorder %v2988_v28, 0.0  ;;  %vm1608_vm0 = vcmp.gt.f32.partialorder %v3012_v61, 0.0 }
 0x1d9   :  { %v1586_v33 = vmul.f32 1.6732632, %v1882_v1  ;;  %v1916_v27 = vpack.c.bf16 %v1636_v19, %v1636_v19  ;;  %vm1606_vm1 = vcmp.gt.f32.partialorder %v1510_v44, 0.0 }
 0x1da   :  { %1714 = vst.msk [vmem:[%s3076_s3 + $0x20] sm:$0xf] %vm1705_vm2, %v1913_v62  ;;  %v1555_v18 = vmul.f32 1.442695, %v1526_v42 }
 0x1db   :  { %v2227_v26 = vpop.eup %2226  ;;  %v1618_v43 = vsel %vm1602_vm13, %v2941_v47, %v1586_v33  ;;  %1717 = vst.msk [vmem:[%s3076_s3 + $0x2c] sm:$0xf] %vm1705_vm2, %v1916_v27 }
 0x1dc   :  { %v1887_v46 = vadd.f32 -1.0, %v2227_v26  ;;  %v1634_v51 = vmul.f32 1.050701, %v1618_v43  ;;  %2232 = vpow2.f32 %v1555_v18 }
 0x1de   :  { %v1591_v30 = vmul.f32 1.6732632, %v1887_v46  ;;  %v1914_v5 = vpack.c.bf16 %v1634_v51, %v1634_v51 }
 0x1df   :  { %v2229_v63 = vpop.eup %2228 }
 0x1e0   :  { %v1623_v59 = vsel %vm1607_vm14, %v2960_v15, %v1591_v30  ;;  %1715 = vst.msk [vmem:[%s3076_s3 + $0x24] sm:$0xf] %vm1705_vm2, %v1914_v5  ;;  %v1885_v48 = vadd.f32 -1.0, %v2229_v63 }
 0x1e1   :  { %v1639_v47 = vmul.f32 1.050701, %v1623_v59 }
 0x1e2   :  { %v1589_v13 = vmul.f32 1.6732632, %v1885_v48 }
 0x1e3   :  { %v1919_v20 = vpack.c.bf16 %v1639_v47, %v1639_v47 }
 0x1e4   :  { %v2231_v56 = vpop.eup %2230  ;;  %v1621_v14 = vsel %vm1605_vm15, %v2988_v28, %v1589_v13 }
 0x1e5   :  { %1720 = vst.msk [vmem:[%s3076_s3 + $0x38] sm:$0xf] %vm1705_vm2, %v1919_v20  ;;  %v1637_v15 = vmul.f32 1.050701, %v1621_v14  ;;  %v1888_v38 = vadd.f32 -1.0, %v2231_v56 }
 0x1e7   :  { %v1917_v0 = vpack.c.bf16 %v1637_v15, %v1637_v15  ;;  %v1592_v60 = vmul.f32 1.6732632, %v1888_v38 }
 0x1e9   :  { %v2233_v2 = vpop.eup %2232  ;;  %1718 = vst.msk [vmem:[%s3076_s3 + $0x30] sm:$0xf] %vm1705_vm2, %v1917_v0  ;;  %v1624_v6 = vsel %vm1608_vm0, %v3012_v61, %v1592_v60 }
 0x1ea   :  { %v1640_v52 = vmul.f32 1.050701, %v1624_v6  ;;  %v1886_v9 = vadd.f32 -1.0, %v2233_v2 }
 0x1ec   :  { %v1920_v11 = vpack.c.bf16 %v1640_v52, %v1640_v52  ;;  %v1590_v32 = vmul.f32 1.6732632, %v1886_v9 }
 0x1ee   :  { %1721 = vst.msk [vmem:[%s3076_s3 + $0x3c] sm:$0xf] %vm1705_vm2, %v1920_v11  ;;  %v1622_v28 = vsel %vm1606_vm1, %v1510_v44, %v1590_v32 }
 0x1ef   :  { %v1638_v17 = vmul.f32 1.050701, %v1622_v28 }
 0x1f1   :  { %v1918_v12 = vpack.c.bf16 %v1638_v17, %v1638_v17 }
 0x1f3   :  { %1719 = vst.msk [vmem:[%s3076_s3 + $0x34] sm:$0xf] %vm1705_vm2, %v1918_v12 }

// kernel: cnnkan_forward.5
= control target key start
LH: loop header
LB: loop body
LE: loop exit
PB: predicated region body
PF: predicated region fallthrough
CT: control target
= control target key end

     0   :  { %v537_v36 = vlaneseq  ;;  %v7596_v37 = vmov 1966171168   ;;  %s10162_s0 = inlined_call_operand.vmem [shape: bf16[2,4096], index: 0, kind: input, shape index: {}]   ;;  %s10163_s1 = inlined_call_operand.vmem [shape: bf16[4096,256], index: 1, kind: input, shape index: {}]   ;;  %s10164_s2 = inlined_call_operand.vmem [shape: f32[1,256], index: 2, kind: input, shape index: {}]   ;;  %s10165_s3 = inlined_call_operand.vmem [shape: bf16[2304,128], index: 3, kind: input, shape index: {}]   ;;  %s10166_s4 = inlined_call_operand.hbm [shape: f32[2,128], index: 4, kind: output, shape index: {}]  }
   0x1   :  { %v6650_v0 = vld [vmem:[%s10163_s1 + $0x74] ss:$8 sps:$4 sm:$0xff]   ;;  %v6654_v2 = vld [vmem:[%s10163_s1 + $0x70] ss:$8 sps:$4 sm:$0xff]   ;;  %v6656_v4 = vld [vmem:[%s10163_s1 + $0x64] ss:$8 sps:$4 sm:$0xff]   ;;  %v553_v38 = vunpack.c.l.s4 %v7596_v37 }
   0x2   :  { %v6652_v1 = vld [vmem:[%s10163_s1 + $0x174] ss:$8 sps:$4 sm:$0xff]   ;;  %3339 = vmatprep.subr.bf16.mxu0 %v6650_v0  ;;  %v6655_v3 = vld [vmem:[%s10163_s1 + $0x170] ss:$8 sps:$4 sm:$0xff]   ;;  %v6658_v5 = vld [vmem:[%s10163_s1 + $0x164] ss:$8 sps:$4 sm:$0xff]  }
   0x3   :  { %3380 = vmatprep.subr.bf16.mxu1 %v6652_v1  ;;  %3340 = vmatpush1.bf16.msra.mxu0 %v6654_v2  ;;  %v6660_v6 = vld [vmem:[%s10163_s1 + $0x60] ss:$8 sps:$4 sm:$0xff]   ;;  %v6662_v8 = vld [vmem:[%s10163_s1 + $0x54] ss:$8 sps:$4 sm:$0xff]   ;;  %v6666_v10 = vld [vmem:[%s10163_s1 + $0x50] ss:$8 sps:$4 sm:$0xff]   ;;  %v554_v43 = vunpack.c.0.s8 %v553_v38 }
   0x4   :  { %3381 = vmatpush1.bf16.msra.mxu1 %v6655_v3  ;;  %3341 = vmatprep.subr.bf16.mxu0 %v6656_v4  ;;  %v6661_v7 = vld [vmem:[%s10163_s1 + $0x160] ss:$8 sps:$4 sm:$0xff]   ;;  %v6664_v9 = vld [vmem:[%s10163_s1 + $0x154] ss:$8 sps:$4 sm:$0xff]   ;;  %v6667_v11 = vld [vmem:[%s10163_s1 + $0x150] ss:$8 sps:$4 sm:$0xff]  }
   0x5   :  { %3382 = vmatprep.subr.bf16.mxu1 %v6658_v5  ;;  %v6668_v12 = vld [vmem:[%s10163_s1 + $0x44] ss:$8 sps:$4 sm:$0xff]   ;;  %v6672_v14 = vld [vmem:[%s10163_s1 + $0x40] ss:$8 sps:$4 sm:$0xff]   ;;  %v6674_v16 = vld [vmem:[%s10163_s1 + $0x34] ss:$8 sps:$4 sm:$0xff]  }
   0x6   :  { %v6670_v13 = vld [vmem:[%s10163_s1 + $0x144] ss:$8 sps:$4 sm:$0xff]   ;;  %v6673_v15 = vld [vmem:[%s10163_s1 + $0x140] ss:$8 sps:$4 sm:$0xff]   ;;  %v6676_v17 = vld [vmem:[%s10163_s1 + $0x134] ss:$8 sps:$4 sm:$0xff]  }
   0x7   :  { %3342 = vmatpush1.bf16.msra.mxu0 %v6660_v6  ;;  %v6678_v18 = vld [vmem:[%s10163_s1 + $0x30] ss:$8 sps:$4 sm:$0xff]   ;;  %v6680_v20 = vld [vmem:[%s10163_s1 + $0x24] ss:$8 sps:$4 sm:$0xff]   ;;  %v6684_v22 = vld [vmem:[%s10163_s1 + $0x20] ss:$8 sps:$4 sm:$0xff]  }
   0x8   :  { %3383 = vmatpush1.bf16.msra.mxu1 %v6661_v7  ;;  %3343 = vmatprep.subr.bf16.mxu0 %v6662_v8  ;;  %v6679_v19 = vld [vmem:[%s10163_s1 + $0x130] ss:$8 sps:$4 sm:$0xff]   ;;  %v6682_v21 = vld [vmem:[%s10163_s1 + $0x124] ss:$8 sps:$4 sm:$0xff]   ;;  %v6685_v23 = vld [vmem:[%s10163_s1 + $0x120] ss:$8 sps:$4 sm:$0xff]  }
   0x9   :  { %3384 = vmatprep.subr.bf16.mxu1 %v6664_v9  ;;  %v6686_v24 = vld [vmem:[%s10163_s1 + $0x14] ss:$8 sps:$4 sm:$0xff]   ;;  %v6690_v26 = vld [vmem:[%s10163_s1 + $0x10] ss:$8 sps:$4 sm:$0xff]   ;;  %v6692_v28 = vld [vmem:[%s10163_s1 + $0x4] ss:$8 sps:$4 sm:$0xff]  }
   0xa   :  { %v6688_v25 = vld [vmem:[%s10163_s1 + $0x114] ss:$8 sps:$4 sm:$0xff]   ;;  %v6691_v27 = vld [vmem:[%s10163_s1 + $0x110] ss:$8 sps:$4 sm:$0xff]   ;;  %v6694_v29 = vld [vmem:[%s10163_s1 + $0x104] ss:$8 sps:$4 sm:$0xff]  }
   0xb   :  { %3344 = vmatpush1.bf16.msra.mxu0 %v6666_v10  ;;  %v6696_v30 = vld [vmem:[%s10163_s1] ss:$8 sps:$4 sm:$0xff]   ;;  %v6698_v32 = vld [vmem:[%s10163_s1 + $0xf4] ss:$8 sps:$4 sm:$0xff]   ;;  %v6702_v34 = vld [vmem:[%s10163_s1 + $0xf0] ss:$8 sps:$4 sm:$0xff]  }
   0xc   :  { %3385 = vmatpush1.bf16.msra.mxu1 %v6667_v11  ;;  %3345 = vmatprep.subr.bf16.mxu0 %v6668_v12  ;;  %v6697_v31 = vld [vmem:[%s10163_s1 + $0x100] ss:$8 sps:$4 sm:$0xff]   ;;  %v6700_v33 = vld [vmem:[%s10163_s1 + $0x1f4] ss:$8 sps:$4 sm:$0xff]   ;;  %v6703_v35 = vld [vmem:[%s10163_s1 + $0x1f0] ss:$8 sps:$4 sm:$0xff]  }
   0xd   :  { %3386 = vmatprep.subr.bf16.mxu1 %v6670_v13  ;;  %v6704_v39 = vld [vmem:[%s10163_s1 + $0xe4] ss:$8 sps:$4 sm:$0xff]   ;;  %v6708_v41 = vld [vmem:[%s10163_s1 + $0xe0] ss:$8 sps:$4 sm:$0xff]   ;;  %v7740_v42 = vshrl.u32 %v537_v36, 7 }
   0xe   :  { %v6706_v40 = vld [vmem:[%s10163_s1 + $0x1e4] ss:$8 sps:$4 sm:$0xff]   ;;  %v6709_v44 = vld [vmem:[%s10163_s1 + $0x1e0] ss:$8 sps:$4 sm:$0xff]   ;;  %v6710_v45 = vld [vmem:[%s10163_s1 + $0xd4] ss:$8 sps:$4 sm:$0xff]  }
   0xf   :  { %3346 = vmatpush1.bf16.msra.mxu0 %v6672_v14  ;;  %v6712_v46 = vld [vmem:[%s10163_s1 + $0x1d4] ss:$8 sps:$4 sm:$0xff]   ;;  %v6714_v47 = vld [vmem:[%s10163_s1 + $0xd0] ss:$8 sps:$4 sm:$0xff]   ;;  %v7758_v49 = vsub.s32 %v554_v43, %v7740_v42  ;;  %v6716_v50 = vld [vmem:[%s10163_s1 + $0xc4] ss:$8 sps:$4 sm:$0xff]  }
  0x10   :  { %3387 = vmatpush1.bf16.msra.mxu1 %v6673_v15  ;;  %3347 = vmatprep.subr.bf16.mxu0 %v6674_v16  ;;  %v6715_v48 = vld [vmem:[%s10163_s1 + $0x1d0] ss:$8 sps:$4 sm:$0xff]   ;;  %v6718_v51 = vld [vmem:[%s10163_s1 + $0x1c4] ss:$8 sps:$4 sm:$0xff]   ;;  %v6720_v53 = vld [vmem:[%s10163_s1 + $0xc0] ss:$8 sps:$4 sm:$0xff]  }
  0x11   :  { %3388 = vmatprep.subr.bf16.mxu1 %v6676_v17  ;;  %v19_v52 = vld [vmem:[%s10162_s0] sm:$0xff]  ;;  %v6722_v56 = vld [vmem:[%s10163_s1 + $0xb4] ss:$8 sps:$4 sm:$0xff]   ;;  %v6726_v59 = vld [vmem:[%s10163_s1 + $0xb0] ss:$8 sps:$4 sm:$0xff]  }
  0x12   :  { %v558_v54 = vrot.slane %v19_v52, %v7758_v49  ;;  %v6721_v55 = vld [vmem:[%s10163_s1 + $0x1c0] ss:$8 sps:$4 sm:$0xff]   ;;  %v6724_v57 = vld [vmem:[%s10163_s1 + $0x1b4] ss:$8 sps:$4 sm:$0xff]   ;;  %v6727_v61 = vld [vmem:[%s10163_s1 + $0x1b0] ss:$8 sps:$4 sm:$0xff]   ;;  %v551_v1 = vcombine.high %v19_v52, %v19_v52 }
  0x13   :  { %3348 = vmatpush1.bf16.msra.mxu0 %v6678_v18  ;;  %v6728_v62 = vld [vmem:[%s10163_s1 + $0xa4] ss:$8 sps:$4 sm:$0xff]   ;;  %v6732_v2 = vld [vmem:[%s10163_s1 + $0xa0] ss:$8 sps:$4 sm:$0xff]   ;;  %v6734_v4 = vld [vmem:[%s10163_s1 + $0x94] ss:$8 sps:$4 sm:$0xff]  }
  0x14   :  { %3389 = vmatpush1.bf16.msra.mxu1 %v6679_v19  ;;  %3349 = vmatprep.subr.bf16.mxu0 %v6680_v20  ;;  %v566_v58 = vcombine.high %v558_v54, %v558_v54  ;;  %v6730_v63 = vld [vmem:[%s10163_s1 + $0x1a4] ss:$8 sps:$4 sm:$0xff]   ;;  %v6733_v3 = vld [vmem:[%s10163_s1 + $0x1a0] ss:$8 sps:$4 sm:$0xff]   ;;  %v6736_v5 = vld [vmem:[%s10163_s1 + $0x194] ss:$8 sps:$4 sm:$0xff]   ;;  %v7808_v6 = vrot.slane %v551_v1, %v7758_v49  ;;  %v574_v13 = vrot.slane %v558_v54, %v7758_v49 }
  0x15   :  { %3390 = vmatprep.subr.bf16.mxu1 %v6682_v21  ;;  %v6738_v7 = vld [vmem:[%s10163_s1 + $0x90] ss:$8 sps:$4 sm:$0xff]   ;;  %v6740_v9 = vld [vmem:[%s10163_s1 + $0x84] ss:$8 sps:$4 sm:$0xff]   ;;  %v6744_v12 = vld [vmem:[%s10163_s1 + $0x80] ss:$8 sps:$4 sm:$0xff]  }
  0x16   :  { %v588_v60 = vrot.slane %v566_v58, %v7758_v49  ;;  %v6739_v8 = vld [vmem:[%s10163_s1 + $0x190] ss:$8 sps:$4 sm:$0xff]   ;;  %v6742_v10 = vld [vmem:[%s10163_s1 + $0x184] ss:$8 sps:$4 sm:$0xff]   ;;  %v567_v11 = vcombine.high %v7808_v6, %v7808_v6  ;;  %v6745_v14 = vld [vmem:[%s10163_s1 + $0x180] ss:$8 sps:$4 sm:$0xff]   ;;  %v596_v18 = vcombine.high %v574_v13, %v574_v13 }
  0x17   :  { %3350 = vmatpush1.bf16.msra.mxu0 %v6684_v22  ;;  %v6749_v15 = vld [vmem:[%s10163_s1 + $0x274] ss:$8 sps:$4 sm:$0xff]   ;;  %v6747_v19 = vld [vmem:[%s10163_s1 + $0x270] ss:$8 sps:$4 sm:$0xff]   ;;  %v6755_v21 = vld [vmem:[%s10163_s1 + $0x264] ss:$8 sps:$4 sm:$0xff]  }
  0x18   :  { %3391 = vmatpush1.bf16.msra.mxu1 %v6685_v23  ;;  %3351 = vmatprep.subr.bf16.mxu0 %v6686_v24  ;;  %v598_v0 = vcombine.high %v588_v60, %v588_v60  ;;  %v6752_v16 = vld [vmem:[%s10163_s1 + $0x374] ss:$8 sps:$4 sm:$0xff]   ;;  %v595_v17 = vrot.slane %v567_v11, %v7758_v49  ;;  %v6750_v20 = vld [vmem:[%s10163_s1 + $0x370] ss:$8 sps:$4 sm:$0xff]   ;;  %v6758_v22 = vld [vmem:[%s10163_s1 + $0x364] ss:$8 sps:$4 sm:$0xff]  }
  0x19   :  { %3392 = vmatprep.subr.bf16.mxu1 %v6688_v25  ;;  %3371 = vmatprep.mubr.bf16.mxu0 %v588_v60  ;;  %v6753_v24 = vld [vmem:[%s10163_s1 + $0x260] ss:$8 sps:$4 sm:$0xff]   ;;  %v6771_v36 = vld [vmem:[%s10163_s1 + $0x230] ss:$8 sps:$4 sm:$0xff]   ;;  %v6779_v38 = vld [vmem:[%s10163_s1 + $0x224] ss:$8 sps:$4 sm:$0xff]  }
  0x1a   :  { %3412 = vmatprep.mubr.bf16.mxu1 %v598_v0  ;;  %v599_v23 = vcombine.high %v595_v17, %v595_v17  ;;  %v6756_v25 = vld [vmem:[%s10163_s1 + $0x360] ss:$8 sps:$4 sm:$0xff]   ;;  %v6774_v37 = vld [vmem:[%s10163_s1 + $0x330] ss:$8 sps:$4 sm:$0xff]   ;;  %v6785_v43 = vld [vmem:[%s10163_s1 + $0x214] ss:$8 sps:$4 sm:$0xff]  }
  0x1b   :  { %3352 = vmatpush1.bf16.msra.mxu0 %v6690_v26  ;;  %v6761_v26 = vld [vmem:[%s10163_s1 + $0x254] ss:$8 sps:$4 sm:$0xff]   ;;  %v6795_v54 = vld [vmem:[%s10163_s1 + $0x2f0] ss:$8 sps:$4 sm:$0xff]   ;;  %v6801_v58 = vld [vmem:[%s10163_s1 + $0x2e0] ss:$8 sps:$4 sm:$0xff]  }
  0x1c   :  { %3393 = vmatpush1.bf16.msra.mxu1 %v6691_v27  ;;  %3353 = vmatprep.subr.bf16.mxu0 %v6692_v28  ;;  %v6764_v27 = vld [vmem:[%s10163_s1 + $0x354] ss:$8 sps:$4 sm:$0xff]   ;;  %v6759_v28 = vld [vmem:[%s10163_s1 + $0x250] ss:$8 sps:$4 sm:$0xff]   ;;  %v6815_v0 = vld [vmem:[%s10163_s1 + $0x2c4] ss:$8 sps:$4 sm:$0xff]  }
  0x1d   :  { %3394 = vmatprep.subr.bf16.mxu1 %v6694_v29  ;;  %v6762_v29 = vld [vmem:[%s10163_s1 + $0x350] ss:$8 sps:$4 sm:$0xff]   ;;  %v6797_v52 = vld [vmem:[%s10163_s1 + $0x2f4] ss:$8 sps:$4 sm:$0xff]   ;;  %v6818_v1 = vld [vmem:[%s10163_s1 + $0x3c4] ss:$8 sps:$4 sm:$0xff]  }
  0x1e   :  { %v6809_v60 = vld [vmem:[%s10163_s1 + $0x2d4] ss:$8 sps:$4 sm:$0xff]   ;;  %v6825_v11 = vld [vmem:[%s10163_s1 + $0x2a0] ss:$8 sps:$4 sm:$0xff]  }
  0x1f   :  { %3354 = vmatpush1.bf16.msra.mxu0 %v6696_v30  ;;  %v6767_v30 = vld [vmem:[%s10163_s1 + $0x244] ss:$8 sps:$4 sm:$0xff]  }
  0x20   :  { %3395 = vmatpush1.bf16.msra.mxu1 %v6697_v31  ;;  %3355 = vmatprep.subr.bf16.mxu0 %v6698_v32  ;;  %v6770_v31 = vld [vmem:[%s10163_s1 + $0x344] ss:$8 sps:$4 sm:$0xff]   ;;  %v6765_v32 = vld [vmem:[%s10163_s1 + $0x240] ss:$8 sps:$4 sm:$0xff]  }
  0x21   :  { %3396 = vmatprep.subr.bf16.mxu1 %v6700_v33  ;;  %v6768_v33 = vld [vmem:[%s10163_s1 + $0x340] ss:$8 sps:$4 sm:$0xff]  }
  0x23   :  { %3356 = vmatpush2.bf16.msra.mxu0 %v6702_v34  ;;  %v6773_v34 = vld [vmem:[%s10163_s1 + $0x234] ss:$8 sps:$4 sm:$0xff]  }
  0x24   :  { %3397 = vmatpush2.bf16.msra.mxu1 %v6703_v35  ;;  %3357 = vmatprep.subr.bf16.mxu0 %v6704_v39  ;;  %v6776_v35 = vld [vmem:[%s10163_s1 + $0x334] ss:$8 sps:$4 sm:$0xff]   ;;  %v6782_v39 = vld [vmem:[%s10163_s1 + $0x324] ss:$8 sps:$4 sm:$0xff]  }
  0x25   :  { %3398 = vmatprep.subr.bf16.mxu1 %v6706_v40  ;;  %v6777_v40 = vld [vmem:[%s10163_s1 + $0x220] ss:$8 sps:$4 sm:$0xff]  }
  0x27   :  { %3358 = vmatpush2.bf16.msra.mxu0 %v6708_v41  ;;  %v6780_v41 = vld [vmem:[%s10163_s1 + $0x320] ss:$8 sps:$4 sm:$0xff]  }
  0x28   :  { %3399 = vmatpush2.bf16.msra.mxu1 %v6709_v44  ;;  %3359 = vmatprep.subr.bf16.mxu0 %v6710_v45  ;;  %v6788_v44 = vld [vmem:[%s10163_s1 + $0x314] ss:$8 sps:$4 sm:$0xff]   ;;  %v6783_v45 = vld [vmem:[%s10163_s1 + $0x210] ss:$8 sps:$4 sm:$0xff]  }
  0x29   :  { %3400 = vmatprep.subr.bf16.mxu1 %v6712_v46  ;;  %v6786_v46 = vld [vmem:[%s10163_s1 + $0x310] ss:$8 sps:$4 sm:$0xff]  }
  0x2b   :  { %3360 = vmatpush2.bf16.msra.mxu0 %v6714_v47  ;;  %v6791_v47 = vld [vmem:[%s10163_s1 + $0x204] ss:$8 sps:$4 sm:$0xff]  }
  0x2c   :  { %3401 = vmatpush2.bf16.msra.mxu1 %v6715_v48  ;;  %3361 = vmatprep.subr.bf16.mxu0 %v6716_v50  ;;  %v6794_v48 = vld [vmem:[%s10163_s1 + $0x304] ss:$8 sps:$4 sm:$0xff]   ;;  %v6789_v50 = vld [vmem:[%s10163_s1 + $0x200] ss:$8 sps:$4 sm:$0xff]  }
  0x2d   :  { %3402 = vmatprep.subr.bf16.mxu1 %v6718_v51  ;;  %v6792_v51 = vld [vmem:[%s10163_s1 + $0x300] ss:$8 sps:$4 sm:$0xff]  }
  0x2f   :  { %3362 = vmatpush2.bf16.msra.mxu0 %v6720_v53  ;;  %v6800_v53 = vld [vmem:[%s10163_s1 + $0x3f4] ss:$8 sps:$4 sm:$0xff]  }
  0x30   :  { %3403 = vmatpush2.bf16.msra.mxu1 %v6721_v55  ;;  %3363 = vmatprep.subr.bf16.mxu0 %v6722_v56  ;;  %v6798_v55 = vld [vmem:[%s10163_s1 + $0x3f0] ss:$8 sps:$4 sm:$0xff]   ;;  %v6803_v56 = vld [vmem:[%s10163_s1 + $0x2e4] ss:$8 sps:$4 sm:$0xff]  }
  0x31   :  { %3404 = vmatprep.subr.bf16.mxu1 %v6724_v57  ;;  %v6806_v57 = vld [vmem:[%s10163_s1 + $0x3e4] ss:$8 sps:$4 sm:$0xff]  }
  0x33   :  { %3364 = vmatpush2.bf16.msra.mxu0 %v6726_v59  ;;  %v6804_v59 = vld [vmem:[%s10163_s1 + $0x3e0] ss:$8 sps:$4 sm:$0xff]  }
  0x34   :  { %3405 = vmatpush2.bf16.msra.mxu1 %v6727_v61  ;;  %3365 = vmatprep.subr.bf16.mxu0 %v6728_v62  ;;  %v6812_v61 = vld [vmem:[%s10163_s1 + $0x3d4] ss:$8 sps:$4 sm:$0xff]   ;;  %v6807_v62 = vld [vmem:[%s10163_s1 + $0x2d0] ss:$8 sps:$4 sm:$0xff]  }
  0x35   :  { %3406 = vmatprep.subr.bf16.mxu1 %v6730_v63  ;;  %v6810_v63 = vld [vmem:[%s10163_s1 + $0x3d0] ss:$8 sps:$4 sm:$0xff]  }
  0x37   :  { %3366 = vmatpush2.bf16.msra.mxu0 %v6732_v2  ;;  %v6813_v2 = vld [vmem:[%s10163_s1 + $0x2c0] ss:$8 sps:$4 sm:$0xff]  }
  0x38   :  { %3407 = vmatpush2.bf16.msra.mxu1 %v6733_v3  ;;  %3367 = vmatprep.subr.bf16.mxu0 %v6734_v4  ;;  %v6816_v3 = vld [vmem:[%s10163_s1 + $0x3c0] ss:$8 sps:$4 sm:$0xff]   ;;  %v6821_v4 = vld [vmem:[%s10163_s1 + $0x2b4] ss:$8 sps:$4 sm:$0xff]  }
  0x39   :  { %3408 = vmatprep.subr.bf16.mxu1 %v6736_v5  ;;  %v6824_v5 = vld [vmem:[%s10163_s1 + $0x3b4] ss:$8 sps:$4 sm:$0xff]  }
  0x3b   :  { %3368 = vmatpush2.bf16.msra.mxu0 %v6738_v7  ;;  %v6819_v7 = vld [vmem:[%s10163_s1 + $0x2b0] ss:$8 sps:$4 sm:$0xff]  }
  0x3c   :  { %3409 = vmatpush2.bf16.msra.mxu1 %v6739_v8  ;;  %3369 = vmatprep.subr.bf16.mxu0 %v6740_v9  ;;  %v6822_v8 = vld [vmem:[%s10163_s1 + $0x3b0] ss:$8 sps:$4 sm:$0xff]   ;;  %v6827_v9 = vld [vmem:[%s10163_s1 + $0x2a4] ss:$8 sps:$4 sm:$0xff]  }
  0x3d   :  { %3410 = vmatprep.subr.bf16.mxu1 %v6742_v10  ;;  %v6830_v10 = vld [vmem:[%s10163_s1 + $0x3a4] ss:$8 sps:$4 sm:$0xff]  }
  0x3f   :  { %3370 = vmatpush2.bf16.msra.mxu0 %v6744_v12  ;;  %v6828_v12 = vld [vmem:[%s10163_s1 + $0x3a0] ss:$8 sps:$4 sm:$0xff]  }
  0x40   :  { %3411 = vmatpush2.bf16.msra.mxu1 %v6745_v14  ;;  %3421 = vmatprep.subr.bf16.mxu0 %v6749_v15  ;;  %v6836_v14 = vld [vmem:[%s10163_s1 + $0x394] ss:$8 sps:$4 sm:$0xff]   ;;  %v6831_v15 = vld [vmem:[%s10163_s1 + $0x290] ss:$8 sps:$4 sm:$0xff]  }
  0x41   :  { %3462 = vmatprep.subr.bf16.mxu1 %v6752_v16  ;;  %v6834_v16 = vld [vmem:[%s10163_s1 + $0x390] ss:$8 sps:$4 sm:$0xff]  }
  0x42   :  { %3372 = vmatmul.mubr.bf16.vlgmr.msra.gmra.mxu0 %v574_v13  ;;  %v6833_v13 = vld [vmem:[%s10163_s1 + $0x294] ss:$8 sps:$4 sm:$0xff]  }
  0x43   :  { %3413 = vmatmul.mubr.bf16.vlgmr.msra.gmra.mxu1 %v596_v18  ;;  %3422 = vmatpush1.bf16.msra.mxu0 %v6747_v19  ;;  %v6842_v18 = vld [vmem:[%s10163_s1 + $0x384] ss:$8 sps:$4 sm:$0xff]   ;;  %v6837_v19 = vld [vmem:[%s10163_s1 + $0x280] ss:$8 sps:$4 sm:$0xff]  }
  0x44   :  { %3463 = vmatpush1.bf16.msra.mxu1 %v6750_v20  ;;  %3423 = vmatprep.subr.bf16.mxu0 %v6755_v21  ;;  %v581_v20 = vrot.slane %v7808_v6, %v7758_v49  ;;  %v6840_v21 = vld [vmem:[%s10163_s1 + $0x380] ss:$8 sps:$4 sm:$0xff]   ;;  %v6843_v6 = vld [vmem:[%s10163_s1 + $0x470] ss:$8 sps:$4 sm:$0xff]  }
  0x45   :  { %3464 = vmatprep.subr.bf16.mxu1 %v6758_v22  ;;  %3453 = vmatprep.mubr.bf16.mxu0 %v595_v17  ;;  %v6839_v17 = vld [vmem:[%s10163_s1 + $0x284] ss:$8 sps:$4 sm:$0xff]   ;;  %v6845_v22 = vld [vmem:[%s10163_s1 + $0x474] ss:$8 sps:$4 sm:$0xff]  }
  0x46   :  { %3494 = vmatprep.mubr.bf16.mxu1 %v599_v23  ;;  %v6848_v23 = vld [vmem:[%s10163_s1 + $0x574] ss:$8 sps:$4 sm:$0xff]  }
  0x47   :  { %3424 = vmatpush1.bf16.msra.mxu0 %v6753_v24  ;;  %v597_v24 = vcombine.high %v581_v20, %v581_v20 }
  0x48   :  { %3465 = vmatpush1.bf16.msra.mxu1 %v6756_v25  ;;  %3425 = vmatprep.subr.bf16.mxu0 %v6761_v26  ;;  %v6846_v25 = vld [vmem:[%s10163_s1 + $0x570] ss:$8 sps:$4 sm:$0xff]   ;;  %v8041_v26 = vld [vmem:[%s10162_s0 + $0x8] sm:$0xff] }
  0x49   :  { %3466 = vmatprep.subr.bf16.mxu1 %v6764_v27  ;;  %v6851_v27 = vld [vmem:[%s10163_s1 + $0x464] ss:$8 sps:$4 sm:$0xff]  }
  0x4b   :  { %3426 = vmatpush1.bf16.msra.mxu0 %v6759_v28  ;;  %v6854_v28 = vld [vmem:[%s10163_s1 + $0x564] ss:$8 sps:$4 sm:$0xff]  }
  0x4c   :  { %3467 = vmatpush1.bf16.msra.mxu1 %v6762_v29  ;;  %3427 = vmatprep.subr.bf16.mxu0 %v6767_v30  ;;  %v8051_v29 = vrot.slane %v8041_v26, %v7758_v49 }
  0x4d   :  { %3468 = vmatprep.subr.bf16.mxu1 %v6770_v31  ;;  %v6849_v31 = vld [vmem:[%s10163_s1 + $0x460] ss:$8 sps:$4 sm:$0xff]  }
  0x4e   :  { %v615_v30 = vcombine.high %v8051_v29, %v8051_v29 }
  0x4f   :  { %3428 = vmatpush1.bf16.msra.mxu0 %v6765_v32  ;;  %v6852_v32 = vld [vmem:[%s10163_s1 + $0x560] ss:$8 sps:$4 sm:$0xff]  }
  0x50   :  { %3469 = vmatpush1.bf16.msra.mxu1 %v6768_v33  ;;  %3429 = vmatprep.subr.bf16.mxu0 %v6773_v34  ;;  %v6857_v33 = vld [vmem:[%s10163_s1 + $0x454] ss:$8 sps:$4 sm:$0xff]  }
  0x51   :  { %3470 = vmatprep.subr.bf16.mxu1 %v6776_v35  ;;  %v6860_v34 = vld [vmem:[%s10163_s1 + $0x554] ss:$8 sps:$4 sm:$0xff]   ;;  %v637_v35 = vrot.slane %v615_v30, %v7758_v49 }
  0x53   :  { %3430 = vmatpush1.bf16.msra.mxu0 %v6771_v36  ;;  %v647_v36 = vcombine.high %v637_v35, %v637_v35 }
  0x54   :  { %3471 = vmatpush1.bf16.msra.mxu1 %v6774_v37  ;;  %3431 = vmatprep.subr.bf16.mxu0 %v6779_v38  ;;  %v6855_v37 = vld [vmem:[%s10163_s1 + $0x450] ss:$8 sps:$4 sm:$0xff]  }
  0x55   :  { %3472 = vmatprep.subr.bf16.mxu1 %v6782_v39  ;;  %v6858_v38 = vld [vmem:[%s10163_s1 + $0x550] ss:$8 sps:$4 sm:$0xff]   ;;  %v6863_v39 = vld [vmem:[%s10163_s1 + $0x444] ss:$8 sps:$4 sm:$0xff]  }
  0x57   :  { %3432 = vmatpush1.bf16.msra.mxu0 %v6777_v40  ;;  %v6866_v40 = vld [vmem:[%s10163_s1 + $0x544] ss:$8 sps:$4 sm:$0xff]  }
  0x58   :  { %3473 = vmatpush1.bf16.msra.mxu1 %v6780_v41  ;;  %3433 = vmatprep.subr.bf16.mxu0 %v6785_v43  ;;  %v6861_v41 = vld [vmem:[%s10163_s1 + $0x440] ss:$8 sps:$4 sm:$0xff]  }
  0x59   :  { %3474 = vmatprep.subr.bf16.mxu1 %v6788_v44  ;;  %v6864_v43 = vld [vmem:[%s10163_s1 + $0x540] ss:$8 sps:$4 sm:$0xff]   ;;  %v6869_v44 = vld [vmem:[%s10163_s1 + $0x434] ss:$8 sps:$4 sm:$0xff]  }
  0x5b   :  { %3434 = vmatpush1.bf16.msra.mxu0 %v6783_v45  ;;  %v6872_v45 = vld [vmem:[%s10163_s1 + $0x534] ss:$8 sps:$4 sm:$0xff]  }
  0x5c   :  { %3475 = vmatpush1.bf16.msra.mxu1 %v6786_v46  ;;  %3435 = vmatprep.subr.bf16.mxu0 %v6791_v47  ;;  %v6867_v46 = vld [vmem:[%s10163_s1 + $0x430] ss:$8 sps:$4 sm:$0xff]  }
  0x5d   :  { %3476 = vmatprep.subr.bf16.mxu1 %v6794_v48  ;;  %v6870_v47 = vld [vmem:[%s10163_s1 + $0x530] ss:$8 sps:$4 sm:$0xff]   ;;  %v6875_v48 = vld [vmem:[%s10163_s1 + $0x424] ss:$8 sps:$4 sm:$0xff]  }
  0x5f   :  { %3436 = vmatpush1.bf16.msra.mxu0 %v6789_v50  ;;  %v6878_v50 = vld [vmem:[%s10163_s1 + $0x524] ss:$8 sps:$4 sm:$0xff]  }
  0x60   :  { %3477 = vmatpush1.bf16.msra.mxu1 %v6792_v51  ;;  %3437 = vmatprep.subr.bf16.mxu0 %v6797_v52  ;;  %v6873_v51 = vld [vmem:[%s10163_s1 + $0x420] ss:$8 sps:$4 sm:$0xff]  }
  0x61   :  { %3478 = vmatprep.subr.bf16.mxu1 %v6800_v53  ;;  %v6876_v52 = vld [vmem:[%s10163_s1 + $0x520] ss:$8 sps:$4 sm:$0xff]   ;;  %v6881_v53 = vld [vmem:[%s10163_s1 + $0x414] ss:$8 sps:$4 sm:$0xff]  }
  0x63   :  { %3438 = vmatpush2.bf16.msra.mxu0 %v6795_v54  ;;  %v6884_v54 = vld [vmem:[%s10163_s1 + $0x514] ss:$8 sps:$4 sm:$0xff]  }
  0x64   :  { %3479 = vmatpush2.bf16.msra.mxu1 %v6798_v55  ;;  %3439 = vmatprep.subr.bf16.mxu0 %v6803_v56  ;;  %v6879_v55 = vld [vmem:[%s10163_s1 + $0x410] ss:$8 sps:$4 sm:$0xff]  }
  0x65   :  { %3480 = vmatprep.subr.bf16.mxu1 %v6806_v57  ;;  %v6882_v56 = vld [vmem:[%s10163_s1 + $0x510] ss:$8 sps:$4 sm:$0xff]   ;;  %v6887_v57 = vld [vmem:[%s10163_s1 + $0x404] ss:$8 sps:$4 sm:$0xff]  }
  0x67   :  { %3440 = vmatpush2.bf16.msra.mxu0 %v6801_v58  ;;  %v6890_v58 = vld [vmem:[%s10163_s1 + $0x504] ss:$8 sps:$4 sm:$0xff]  }
  0x68   :  { %3481 = vmatpush2.bf16.msra.mxu1 %v6804_v59  ;;  %3441 = vmatprep.subr.bf16.mxu0 %v6809_v60  ;;  %v6885_v59 = vld [vmem:[%s10163_s1 + $0x400] ss:$8 sps:$4 sm:$0xff]  }
  0x69   :  { %3482 = vmatprep.subr.bf16.mxu1 %v6812_v61  ;;  %v6888_v60 = vld [vmem:[%s10163_s1 + $0x500] ss:$8 sps:$4 sm:$0xff]   ;;  %v6893_v61 = vld [vmem:[%s10163_s1 + $0x4f4] ss:$8 sps:$4 sm:$0xff]  }
  0x6b   :  { %3442 = vmatpush2.bf16.msra.mxu0 %v6807_v62  ;;  %v6896_v62 = vld [vmem:[%s10163_s1 + $0x5f4] ss:$8 sps:$4 sm:$0xff]  }
  0x6c   :  { %3483 = vmatpush2.bf16.msra.mxu1 %v6810_v63  ;;  %3443 = vmatprep.subr.bf16.mxu0 %v6815_v0  ;;  %v6891_v63 = vld [vmem:[%s10163_s1 + $0x4f0] ss:$8 sps:$4 sm:$0xff]  }
  0x6d   :  { %3484 = vmatprep.subr.bf16.mxu1 %v6818_v1  ;;  %v6894_v0 = vld [vmem:[%s10163_s1 + $0x5f0] ss:$8 sps:$4 sm:$0xff]   ;;  %v6899_v1 = vld [vmem:[%s10163_s1 + $0x4e4] ss:$8 sps:$4 sm:$0xff]  }
  0x6f   :  { %3444 = vmatpush2.bf16.msra.mxu0 %v6813_v2  ;;  %v6902_v2 = vld [vmem:[%s10163_s1 + $0x5e4] ss:$8 sps:$4 sm:$0xff]  }
  0x70   :  { %3485 = vmatpush2.bf16.msra.mxu1 %v6816_v3  ;;  %3445 = vmatprep.subr.bf16.mxu0 %v6821_v4  ;;  %v6897_v3 = vld [vmem:[%s10163_s1 + $0x4e0] ss:$8 sps:$4 sm:$0xff]  }
  0x71   :  { %3486 = vmatprep.subr.bf16.mxu1 %v6824_v5  ;;  %v6900_v4 = vld [vmem:[%s10163_s1 + $0x5e0] ss:$8 sps:$4 sm:$0xff]   ;;  %v6905_v5 = vld [vmem:[%s10163_s1 + $0x4d4] ss:$8 sps:$4 sm:$0xff]  }
  0x73   :  { %3446 = vmatpush2.bf16.msra.mxu0 %v6819_v7  ;;  %v6908_v7 = vld [vmem:[%s10163_s1 + $0x5d4] ss:$8 sps:$4 sm:$0xff]  }
  0x74   :  { %3487 = vmatpush2.bf16.msra.mxu1 %v6822_v8  ;;  %3447 = vmatprep.subr.bf16.mxu0 %v6827_v9  ;;  %v6903_v8 = vld [vmem:[%s10163_s1 + $0x4d0] ss:$8 sps:$4 sm:$0xff]  }
  0x75   :  { %3488 = vmatprep.subr.bf16.mxu1 %v6830_v10  ;;  %v6906_v9 = vld [vmem:[%s10163_s1 + $0x5d0] ss:$8 sps:$4 sm:$0xff]   ;;  %v6911_v10 = vld [vmem:[%s10163_s1 + $0x4c4] ss:$8 sps:$4 sm:$0xff]  }
  0x77   :  { %3448 = vmatpush2.bf16.msra.mxu0 %v6825_v11  ;;  %v6914_v11 = vld [vmem:[%s10163_s1 + $0x5c4] ss:$8 sps:$4 sm:$0xff]  }
  0x78   :  { %3489 = vmatpush2.bf16.msra.mxu1 %v6828_v12  ;;  %3449 = vmatprep.subr.bf16.mxu0 %v6833_v13  ;;  %v6909_v12 = vld [vmem:[%s10163_s1 + $0x4c0] ss:$8 sps:$4 sm:$0xff]  }
  0x79   :  { %3490 = vmatprep.subr.bf16.mxu1 %v6836_v14  ;;  %v6912_v13 = vld [vmem:[%s10163_s1 + $0x5c0] ss:$8 sps:$4 sm:$0xff]   ;;  %v6917_v14 = vld [vmem:[%s10163_s1 + $0x4b4] ss:$8 sps:$4 sm:$0xff]  }
  0x7b   :  { %3450 = vmatpush2.bf16.msra.mxu0 %v6831_v15  ;;  %v6920_v15 = vld [vmem:[%s10163_s1 + $0x5b4] ss:$8 sps:$4 sm:$0xff]  }
  0x7c   :  { %3491 = vmatpush2.bf16.msra.mxu1 %v6834_v16  ;;  %3451 = vmatprep.subr.bf16.mxu0 %v6839_v17  ;;  %v6915_v16 = vld [vmem:[%s10163_s1 + $0x4b0] ss:$8 sps:$4 sm:$0xff]  }
  0x7d   :  { %3492 = vmatprep.subr.bf16.mxu1 %v6842_v18  ;;  %v6918_v17 = vld [vmem:[%s10163_s1 + $0x5b0] ss:$8 sps:$4 sm:$0xff]   ;;  %v6923_v18 = vld [vmem:[%s10163_s1 + $0x4a4] ss:$8 sps:$4 sm:$0xff]  }
  0x7f   :  { %3452 = vmatpush2.bf16.msra.mxu0 %v6837_v19  ;;  %v6926_v19 = vld [vmem:[%s10163_s1 + $0x5a4] ss:$8 sps:$4 sm:$0xff]  }
  0x80   :  { %3493 = vmatpush2.bf16.msra.mxu1 %v6840_v21  ;;  %3503 = vmatprep.subr.bf16.mxu0 %v6845_v22  ;;  %v6921_v21 = vld [vmem:[%s10163_s1 + $0x4a0] ss:$8 sps:$4 sm:$0xff]  }
  0x81   :  { %3544 = vmatprep.subr.bf16.mxu1 %v6848_v23  ;;  %v6924_v22 = vld [vmem:[%s10163_s1 + $0x5a0] ss:$8 sps:$4 sm:$0xff]   ;;  %v6929_v23 = vld [vmem:[%s10163_s1 + $0x494] ss:$8 sps:$4 sm:$0xff]  }
  0x82   :  { %3454 = vmatmul.mubr.bf16.vlgmr.msra.gmra.mxu0 %v581_v20  ;;  %v600_v20 = vcombine.high %v8041_v26, %v8041_v26  ;;  %v6930_v26 = vld [vmem:[%s10163_s1 + $0x590] ss:$8 sps:$4 sm:$0xff]  }
  0x83   :  { %3495 = vmatmul.mubr.bf16.vlgmr.msra.gmra.mxu1 %v597_v24  ;;  %3504 = vmatpush1.bf16.msra.mxu0 %v6843_v6  ;;  %v6932_v24 = vld [vmem:[%s10163_s1 + $0x594] ss:$8 sps:$4 sm:$0xff]  }
  0x84   :  { %3545 = vmatpush1.bf16.msra.mxu1 %v6846_v25  ;;  %3505 = vmatprep.subr.bf16.mxu0 %v6851_v27  ;;  %v8215_v6 = vrot.slane %v600_v20, %v7758_v49  ;;  %v6927_v25 = vld [vmem:[%s10163_s1 + $0x490] ss:$8 sps:$4 sm:$0xff]   ;;  %v6935_v27 = vld [vmem:[%s10163_s1 + $0x484] ss:$8 sps:$4 sm:$0xff]  }
  0x85   :  { %3546 = vmatprep.subr.bf16.mxu1 %v6854_v28  ;;  %3535 = vmatprep.mubr.bf16.mxu0 %v637_v35  ;;  %v6938_v28 = vld [vmem:[%s10163_s1 + $0x584] ss:$8 sps:$4 sm:$0xff]   ;;  %v6944_v35 = vld [vmem:[%s10163_s1 + $0x774] ss:$8 sps:$4 sm:$0xff]  }
  0x86   :  { %3576 = vmatprep.mubr.bf16.mxu1 %v647_v36  ;;  %v616_v30 = vcombine.high %v8215_v6, %v8215_v6  ;;  %v7010_v20 = vld [vmem:[%s10163_s1 + $0x7c4] ss:$8 sps:$4 sm:$0xff]  }
  0x87   :  { %3506 = vmatpush1.bf16.msra.mxu0 %v6849_v31  ;;  %v6933_v31 = vld [vmem:[%s10163_s1 + $0x480] ss:$8 sps:$4 sm:$0xff]  }
  0x88   :  { %3547 = vmatpush1.bf16.msra.mxu1 %v6852_v32  ;;  %3507 = vmatprep.subr.bf16.mxu0 %v6857_v33  ;;  %v623_v32 = vrot.slane %v8051_v29, %v7758_v49  ;;  %v6936_v33 = vld [vmem:[%s10163_s1 + $0x580] ss:$8 sps:$4 sm:$0xff]   ;;  %v644_v36 = vrot.slane %v616_v30, %v7758_v49  ;;  %v6939_v29 = vld [vmem:[%s10163_s1 + $0x670] ss:$8 sps:$4 sm:$0xff]  }
  0x89   :  { %3548 = vmatprep.subr.bf16.mxu1 %v6860_v34  ;;  %v6941_v34 = vld [vmem:[%s10163_s1 + $0x674] ss:$8 sps:$4 sm:$0xff]   ;;  %v7017_v30 = vld [vmem:[%s10163_s1 + $0x6a0] ss:$8 sps:$4 sm:$0xff]  }
  0x8b   :  { %3508 = vmatpush1.bf16.msra.mxu0 %v6855_v37  ;;  %v645_v37 = vcombine.high %v623_v32, %v623_v32 }
  0x8c   :  { %3549 = vmatpush1.bf16.msra.mxu1 %v6858_v38  ;;  %3509 = vmatprep.subr.bf16.mxu0 %v6863_v39  ;;  %v6942_v38 = vld [vmem:[%s10163_s1 + $0x770] ss:$8 sps:$4 sm:$0xff]   ;;  %v6947_v39 = vld [vmem:[%s10163_s1 + $0x664] ss:$8 sps:$4 sm:$0xff]  }
  0x8d   :  { %3550 = vmatprep.subr.bf16.mxu1 %v6866_v40  ;;  %v6950_v40 = vld [vmem:[%s10163_s1 + $0x764] ss:$8 sps:$4 sm:$0xff]  }
  0x8f   :  { %3510 = vmatpush1.bf16.msra.mxu0 %v6861_v41  ;;  %v648_v41 = vcombine.high %v644_v36, %v644_v36 }
  0x90   :  { %3551 = vmatpush1.bf16.msra.mxu1 %v6864_v43  ;;  %3511 = vmatprep.subr.bf16.mxu0 %v6869_v44  ;;  %v6945_v43 = vld [vmem:[%s10163_s1 + $0x660] ss:$8 sps:$4 sm:$0xff]  }
  0x91   :  { %3552 = vmatprep.subr.bf16.mxu1 %v6872_v45  ;;  %v6948_v44 = vld [vmem:[%s10163_s1 + $0x760] ss:$8 sps:$4 sm:$0xff]   ;;  %v6953_v45 = vld [vmem:[%s10163_s1 + $0x654] ss:$8 sps:$4 sm:$0xff]  }
  0x93   :  { %3512 = vmatpush1.bf16.msra.mxu0 %v6867_v46  ;;  %v6956_v46 = vld [vmem:[%s10163_s1 + $0x754] ss:$8 sps:$4 sm:$0xff]  }
  0x94   :  { %3553 = vmatpush1.bf16.msra.mxu1 %v6870_v47  ;;  %3513 = vmatprep.subr.bf16.mxu0 %v6875_v48  ;;  %v6951_v47 = vld [vmem:[%s10163_s1 + $0x650] ss:$8 sps:$4 sm:$0xff]  }
  0x95   :  { %3554 = vmatprep.subr.bf16.mxu1 %v6878_v50  ;;  %v6954_v48 = vld [vmem:[%s10163_s1 + $0x750] ss:$8 sps:$4 sm:$0xff]   ;;  %v6959_v50 = vld [vmem:[%s10163_s1 + $0x644] ss:$8 sps:$4 sm:$0xff]  }
  0x97   :  { %3514 = vmatpush1.bf16.msra.mxu0 %v6873_v51  ;;  %v6962_v51 = vld [vmem:[%s10163_s1 + $0x744] ss:$8 sps:$4 sm:$0xff]  }
  0x98   :  { %3555 = vmatpush1.bf16.msra.mxu1 %v6876_v52  ;;  %3515 = vmatprep.subr.bf16.mxu0 %v6881_v53  ;;  %v6957_v52 = vld [vmem:[%s10163_s1 + $0x640] ss:$8 sps:$4 sm:$0xff]  }
  0x99   :  { %3556 = vmatprep.subr.bf16.mxu1 %v6884_v54  ;;  %v6960_v53 = vld [vmem:[%s10163_s1 + $0x740] ss:$8 sps:$4 sm:$0xff]   ;;  %v6965_v54 = vld [vmem:[%s10163_s1 + $0x634] ss:$8 sps:$4 sm:$0xff]  }
  0x9b   :  { %3516 = vmatpush1.bf16.msra.mxu0 %v6879_v55  ;;  %v6968_v55 = vld [vmem:[%s10163_s1 + $0x734] ss:$8 sps:$4 sm:$0xff]  }
  0x9c   :  { %3557 = vmatpush1.bf16.msra.mxu1 %v6882_v56  ;;  %3517 = vmatprep.subr.bf16.mxu0 %v6887_v57  ;;  %v6963_v56 = vld [vmem:[%s10163_s1 + $0x630] ss:$8 sps:$4 sm:$0xff]  }
  0x9d   :  { %3558 = vmatprep.subr.bf16.mxu1 %v6890_v58  ;;  %v6966_v57 = vld [vmem:[%s10163_s1 + $0x730] ss:$8 sps:$4 sm:$0xff]   ;;  %v6971_v58 = vld [vmem:[%s10163_s1 + $0x624] ss:$8 sps:$4 sm:$0xff]  }
  0x9f   :  { %3518 = vmatpush1.bf16.msra.mxu0 %v6885_v59  ;;  %v6974_v59 = vld [vmem:[%s10163_s1 + $0x724] ss:$8 sps:$4 sm:$0xff]  }
  0xa0   :  { %3559 = vmatpush1.bf16.msra.mxu1 %v6888_v60  ;;  %3519 = vmatprep.subr.bf16.mxu0 %v6893_v61  ;;  %v6969_v60 = vld [vmem:[%s10163_s1 + $0x620] ss:$8 sps:$4 sm:$0xff]  }
  0xa1   :  { %3560 = vmatprep.subr.bf16.mxu1 %v6896_v62  ;;  %v6972_v61 = vld [vmem:[%s10163_s1 + $0x720] ss:$8 sps:$4 sm:$0xff]   ;;  %v6977_v62 = vld [vmem:[%s10163_s1 + $0x614] ss:$8 sps:$4 sm:$0xff]  }
  0xa3   :  { %3520 = vmatpush2.bf16.msra.mxu0 %v6891_v63  ;;  %v6980_v63 = vld [vmem:[%s10163_s1 + $0x714] ss:$8 sps:$4 sm:$0xff]  }
  0xa4   :  { %3561 = vmatpush2.bf16.msra.mxu1 %v6894_v0  ;;  %3521 = vmatprep.subr.bf16.mxu0 %v6899_v1  ;;  %v6975_v0 = vld [vmem:[%s10163_s1 + $0x610] ss:$8 sps:$4 sm:$0xff]  }
  0xa5   :  { %3562 = vmatprep.subr.bf16.mxu1 %v6902_v2  ;;  %v6978_v1 = vld [vmem:[%s10163_s1 + $0x710] ss:$8 sps:$4 sm:$0xff]   ;;  %v6983_v2 = vld [vmem:[%s10163_s1 + $0x604] ss:$8 sps:$4 sm:$0xff]  }
  0xa7   :  { %3522 = vmatpush2.bf16.msra.mxu0 %v6897_v3  ;;  %v6986_v3 = vld [vmem:[%s10163_s1 + $0x704] ss:$8 sps:$4 sm:$0xff]  }
  0xa8   :  { %3563 = vmatpush2.bf16.msra.mxu1 %v6900_v4  ;;  %3523 = vmatprep.subr.bf16.mxu0 %v6905_v5  ;;  %v6981_v4 = vld [vmem:[%s10163_s1 + $0x600] ss:$8 sps:$4 sm:$0xff]  }
  0xa9   :  { %3564 = vmatprep.subr.bf16.mxu1 %v6908_v7  ;;  %v6984_v5 = vld [vmem:[%s10163_s1 + $0x700] ss:$8 sps:$4 sm:$0xff]   ;;  %v6989_v7 = vld [vmem:[%s10163_s1 + $0x6f4] ss:$8 sps:$4 sm:$0xff]  }
  0xab   :  { %3524 = vmatpush2.bf16.msra.mxu0 %v6903_v8  ;;  %v6992_v8 = vld [vmem:[%s10163_s1 + $0x7f4] ss:$8 sps:$4 sm:$0xff]  }
  0xac   :  { %3565 = vmatpush2.bf16.msra.mxu1 %v6906_v9  ;;  %3525 = vmatprep.subr.bf16.mxu0 %v6911_v10  ;;  %v6987_v9 = vld [vmem:[%s10163_s1 + $0x6f0] ss:$8 sps:$4 sm:$0xff]  }
  0xad   :  { %3566 = vmatprep.subr.bf16.mxu1 %v6914_v11  ;;  %v6990_v10 = vld [vmem:[%s10163_s1 + $0x7f0] ss:$8 sps:$4 sm:$0xff]   ;;  %v6995_v11 = vld [vmem:[%s10163_s1 + $0x6e4] ss:$8 sps:$4 sm:$0xff]  }
  0xaf   :  { %3526 = vmatpush2.bf16.msra.mxu0 %v6909_v12  ;;  %v6998_v12 = vld [vmem:[%s10163_s1 + $0x7e4] ss:$8 sps:$4 sm:$0xff]  }
  0xb0   :  { %3567 = vmatpush2.bf16.msra.mxu1 %v6912_v13  ;;  %3527 = vmatprep.subr.bf16.mxu0 %v6917_v14  ;;  %v6993_v13 = vld [vmem:[%s10163_s1 + $0x6e0] ss:$8 sps:$4 sm:$0xff]  }
  0xb1   :  { %3568 = vmatprep.subr.bf16.mxu1 %v6920_v15  ;;  %v6996_v14 = vld [vmem:[%s10163_s1 + $0x7e0] ss:$8 sps:$4 sm:$0xff]   ;;  %v7001_v15 = vld [vmem:[%s10163_s1 + $0x6d4] ss:$8 sps:$4 sm:$0xff]  }
  0xb3   :  { %3528 = vmatpush2.bf16.msra.mxu0 %v6915_v16  ;;  %v7004_v16 = vld [vmem:[%s10163_s1 + $0x7d4] ss:$8 sps:$4 sm:$0xff]  }
  0xb4   :  { %3569 = vmatpush2.bf16.msra.mxu1 %v6918_v17  ;;  %3529 = vmatprep.subr.bf16.mxu0 %v6923_v18  ;;  %v6999_v17 = vld [vmem:[%s10163_s1 + $0x6d0] ss:$8 sps:$4 sm:$0xff]  }
  0xb5   :  { %3570 = vmatprep.subr.bf16.mxu1 %v6926_v19  ;;  %v7002_v18 = vld [vmem:[%s10163_s1 + $0x7d0] ss:$8 sps:$4 sm:$0xff]   ;;  %v7007_v19 = vld [vmem:[%s10163_s1 + $0x6c4] ss:$8 sps:$4 sm:$0xff]  }
  0xb7   :  { %3530 = vmatpush2.bf16.msra.mxu0 %v6921_v21  ;;  %v7005_v21 = vld [vmem:[%s10163_s1 + $0x6c0] ss:$8 sps:$4 sm:$0xff]  }
  0xb8   :  { %3571 = vmatpush2.bf16.msra.mxu1 %v6924_v22  ;;  %3531 = vmatprep.subr.bf16.mxu0 %v6929_v23  ;;  %v7008_v22 = vld [vmem:[%s10163_s1 + $0x7c0] ss:$8 sps:$4 sm:$0xff]   ;;  %v7013_v23 = vld [vmem:[%s10163_s1 + $0x6b4] ss:$8 sps:$4 sm:$0xff]  }
  0xb9   :  { %3572 = vmatprep.subr.bf16.mxu1 %v6932_v24  ;;  %v7016_v24 = vld [vmem:[%s10163_s1 + $0x7b4] ss:$8 sps:$4 sm:$0xff]  }
  0xbb   :  { %3532 = vmatpush2.bf16.msra.mxu0 %v6927_v25  ;;  %v7011_v25 = vld [vmem:[%s10163_s1 + $0x6b0] ss:$8 sps:$4 sm:$0xff]  }
  0xbc   :  { %3573 = vmatpush2.bf16.msra.mxu1 %v6930_v26  ;;  %3533 = vmatprep.subr.bf16.mxu0 %v6935_v27  ;;  %v7014_v26 = vld [vmem:[%s10163_s1 + $0x7b0] ss:$8 sps:$4 sm:$0xff]   ;;  %v7019_v27 = vld [vmem:[%s10163_s1 + $0x6a4] ss:$8 sps:$4 sm:$0xff]  }
  0xbd   :  { %3574 = vmatprep.subr.bf16.mxu1 %v6938_v28  ;;  %v7022_v28 = vld [vmem:[%s10163_s1 + $0x7a4] ss:$8 sps:$4 sm:$0xff]  }
  0xbf   :  { %3534 = vmatpush2.bf16.msra.mxu0 %v6933_v31  ;;  %v7020_v31 = vld [vmem:[%s10163_s1 + $0x7a0] ss:$8 sps:$4 sm:$0xff]  }
  0xc0   :  { %3575 = vmatpush2.bf16.msra.mxu1 %v6936_v33  ;;  %3585 = vmatprep.subr.bf16.mxu0 %v6941_v34  ;;  %v7025_v33 = vld [vmem:[%s10163_s1 + $0x694] ss:$8 sps:$4 sm:$0xff]  }
  0xc1   :  { %3626 = vmatprep.subr.bf16.mxu1 %v6944_v35  ;;  %v7028_v34 = vld [vmem:[%s10163_s1 + $0x794] ss:$8 sps:$4 sm:$0xff]  }
  0xc2   :  { %3536 = vmatmul.mubr.bf16.vlgmr.msra.gmra.mxu0 %v623_v32  ;;  %v8411_v32 = vld [vmem:[%s10162_s0 + $0x10] sm:$0xff] }
  0xc3   :  { %3577 = vmatmul.mubr.bf16.vlgmr.msra.gmra.mxu1 %v645_v37  ;;  %3586 = vmatpush1.bf16.msra.mxu0 %v6939_v29  ;;  %v8421_v35 = vrot.slane %v8411_v32, %v7758_v49  ;;  %v7026_v37 = vld [vmem:[%s10163_s1 + $0x790] ss:$8 sps:$4 sm:$0xff]   ;;  %v7031_v29 = vld [vmem:[%s10163_s1 + $0x684] ss:$8 sps:$4 sm:$0xff]  }
  0xc4   :  { %3627 = vmatpush1.bf16.msra.mxu1 %v6942_v38  ;;  %3587 = vmatprep.subr.bf16.mxu0 %v6947_v39  ;;  %v7034_v38 = vld [vmem:[%s10163_s1 + $0x784] ss:$8 sps:$4 sm:$0xff]   ;;  %v7029_v39 = vld [vmem:[%s10163_s1 + $0x680] ss:$8 sps:$4 sm:$0xff]  }
  0xc5   :  { %3628 = vmatprep.subr.bf16.mxu1 %v6950_v40  ;;  %3617 = vmatprep.mubr.bf16.mxu0 %v644_v36  ;;  %v7023_v36 = vld [vmem:[%s10163_s1 + $0x690] ss:$8 sps:$4 sm:$0xff]   ;;  %v664_v40 = vcombine.high %v8421_v35, %v8421_v35 }
  0xc6   :  { %3658 = vmatprep.mubr.bf16.mxu1 %v648_v41  ;;  %v7032_v41 = vld [vmem:[%s10163_s1 + $0x780] ss:$8 sps:$4 sm:$0xff]  }
  0xc7   :  { %3588 = vmatpush1.bf16.msra.mxu0 %v6945_v43  ;;  %v535_v43 = vld [vmem:[%s10164_s2] sm:$0x3] }
  0xc8   :  { %3629 = vmatpush1.bf16.msra.mxu1 %v6948_v44  ;;  %3589 = vmatprep.subr.bf16.mxu0 %v6953_v45  ;;  %v630_v44 = vrot.slane %v8215_v6, %v7758_v49  ;;  %v539_v45 = vsub.s32 0, %v7740_v42  ;;  %v7036_v6 = vld [vmem:[%s10163_s1 + $0x870] ss:$8 sps:$4 sm:$0xff]  }
  0xc9   :  { %3630 = vmatprep.subr.bf16.mxu1 %v6956_v46  ;;  %v7038_v46 = vld [vmem:[%s10163_s1 + $0x874] ss:$8 sps:$4 sm:$0xff]  }
  0xcb   :  { %3590 = vmatpush1.bf16.msra.mxu0 %v6951_v47  ;;  %v7041_v47 = vld [vmem:[%s10163_s1 + $0x974] ss:$8 sps:$4 sm:$0xff]  }
  0xcc   :  { %3631 = vmatpush1.bf16.msra.mxu1 %v6954_v48  ;;  %3591 = vmatprep.subr.bf16.mxu0 %v6959_v50  ;;  %v543_v48 = vsub.s32 1, %v7740_v42  ;;  %v686_v50 = vrot.slane %v664_v40, %v7758_v49  ;;  %v7047_v42 = vld [vmem:[%s10163_s1 + $0x964] ss:$8 sps:$4 sm:$0xff]   ;;  %v7090_v40 = vld [vmem:[%s10163_s1 + $0x8e0] ss:$8 sps:$4 sm:$0xff]  }
  0xcd   :  { %3632 = vmatprep.subr.bf16.mxu1 %v6962_v51  ;;  %v646_v51 = vcombine.high %v630_v44, %v630_v44 }
  0xcf   :  { %3592 = vmatpush1.bf16.msra.mxu0 %v6957_v52  ;;  %v7039_v52 = vld [vmem:[%s10163_s1 + $0x970] ss:$8 sps:$4 sm:$0xff]  }
  0xd0   :  { %3633 = vmatpush1.bf16.msra.mxu1 %v6960_v53  ;;  %3593 = vmatprep.subr.bf16.mxu0 %v6965_v54  ;;  %v540_v53 = vrot.slane %v535_v43, %v539_v45  ;;  %v7044_v54 = vld [vmem:[%s10163_s1 + $0x864] ss:$8 sps:$4 sm:$0xff]   ;;  %v7096_v45 = vld [vmem:[%s10163_s1 + $0x8d0] ss:$8 sps:$4 sm:$0xff]  }
  0xd1   :  { %3634 = vmatprep.subr.bf16.mxu1 %v6968_v55  ;;  %v544_v55 = vrot.slane %v535_v43, %v543_v48  ;;  %v7098_v43 = vld [vmem:[%s10163_s1 + $0x8d4] ss:$8 sps:$4 sm:$0xff]   ;;  %v7107_v48 = vld [vmem:[%s10163_s1 + $0x9c4] ss:$8 sps:$4 sm:$0xff]  }
  0xd3   :  { %3594 = vmatpush1.bf16.msra.mxu0 %v6963_v56  ;;  %v696_v56 = vcombine.high %v686_v50, %v686_v50 }
  0xd4   :  { %3635 = vmatpush1.bf16.msra.mxu1 %v6966_v57  ;;  %3595 = vmatprep.subr.bf16.mxu0 %v6971_v58 }
  0xd5   :  { %3636 = vmatprep.subr.bf16.mxu1 %v6974_v59  ;;  %v7042_v59 = vld [vmem:[%s10163_s1 + $0x860] ss:$8 sps:$4 sm:$0xff]  }
  0xd7   :  { %3596 = vmatpush1.bf16.msra.mxu0 %v6969_v60  ;;  %v7045_v60 = vld [vmem:[%s10163_s1 + $0x960] ss:$8 sps:$4 sm:$0xff]  }
  0xd8   :  { %3637 = vmatpush1.bf16.msra.mxu1 %v6972_v61  ;;  %3597 = vmatprep.subr.bf16.mxu0 %v6977_v62 }
  0xd9   :  { %3638 = vmatprep.subr.bf16.mxu1 %v6980_v63 }
  0xdb   :  { %3598 = vmatpush1.bf16.msra.mxu0 %v6975_v0  ;;  %v7050_v0 = vld [vmem:[%s10163_s1 + $0x854] ss:$8 sps:$4 sm:$0xff]  }
  0xdc   :  { %3639 = vmatpush1.bf16.msra.mxu1 %v6978_v1  ;;  %3599 = vmatprep.subr.bf16.mxu0 %v6983_v2  ;;  %v7053_v1 = vld [vmem:[%s10163_s1 + $0x954] ss:$8 sps:$4 sm:$0xff]  }
  0xdd   :  { %3640 = vmatprep.subr.bf16.mxu1 %v6986_v3 }
  0xdf   :  { %3600 = vmatpush1.bf16.msra.mxu0 %v6981_v4  ;;  %v7048_v4 = vld [vmem:[%s10163_s1 + $0x850] ss:$8 sps:$4 sm:$0xff]  }
  0xe0   :  { %3641 = vmatpush1.bf16.msra.mxu1 %v6984_v5  ;;  %3601 = vmatprep.subr.bf16.mxu0 %v6989_v7  ;;  %v7051_v5 = vld [vmem:[%s10163_s1 + $0x950] ss:$8 sps:$4 sm:$0xff]  }
  0xe1   :  { %3642 = vmatprep.subr.bf16.mxu1 %v6992_v8 }
  0xe3   :  { %3602 = vmatpush2.bf16.msra.mxu0 %v6987_v9 }
  0xe4   :  { %3643 = vmatpush2.bf16.msra.mxu1 %v6990_v10  ;;  %3603 = vmatprep.subr.bf16.mxu0 %v6995_v11 }
  0xe5   :  { %3644 = vmatprep.subr.bf16.mxu1 %v6998_v12  ;;  %v7056_v12 = vld [vmem:[%s10163_s1 + $0x844] ss:$8 sps:$4 sm:$0xff]  }
  0xe7   :  { %3604 = vmatpush2.bf16.msra.mxu0 %v6993_v13  ;;  %v7059_v13 = vld [vmem:[%s10163_s1 + $0x944] ss:$8 sps:$4 sm:$0xff]  }
  0xe8   :  { %3645 = vmatpush2.bf16.msra.mxu1 %v6996_v14  ;;  %3605 = vmatprep.subr.bf16.mxu0 %v7001_v15  ;;  %v7054_v14 = vld [vmem:[%s10163_s1 + $0x840] ss:$8 sps:$4 sm:$0xff]  }
  0xe9   :  { %3646 = vmatprep.subr.bf16.mxu1 %v7004_v16  ;;  %v7057_v15 = vld [vmem:[%s10163_s1 + $0x940] ss:$8 sps:$4 sm:$0xff]   ;;  %v7062_v16 = vld [vmem:[%s10163_s1 + $0x834] ss:$8 sps:$4 sm:$0xff]  }
  0xeb   :  { %3606 = vmatpush2.bf16.msra.mxu0 %v6999_v17  ;;  %v7065_v17 = vld [vmem:[%s10163_s1 + $0x934] ss:$8 sps:$4 sm:$0xff]  }
  0xec   :  { %3647 = vmatpush2.bf16.msra.mxu1 %v7002_v18  ;;  %3607 = vmatprep.subr.bf16.mxu0 %v7007_v19  ;;  %v7060_v18 = vld [vmem:[%s10163_s1 + $0x830] ss:$8 sps:$4 sm:$0xff]  }
  0xed   :  { %3648 = vmatprep.subr.bf16.mxu1 %v7010_v20  ;;  %v7063_v19 = vld [vmem:[%s10163_s1 + $0x930] ss:$8 sps:$4 sm:$0xff]   ;;  %v7068_v20 = vld [vmem:[%s10163_s1 + $0x824] ss:$8 sps:$4 sm:$0xff]  }
  0xef   :  { %3608 = vmatpush2.bf16.msra.mxu0 %v7005_v21  ;;  %v7071_v21 = vld [vmem:[%s10163_s1 + $0x924] ss:$8 sps:$4 sm:$0xff]  }
  0xf0   :  { %3649 = vmatpush2.bf16.msra.mxu1 %v7008_v22  ;;  %3609 = vmatprep.subr.bf16.mxu0 %v7013_v23  ;;  %v7066_v22 = vld [vmem:[%s10163_s1 + $0x820] ss:$8 sps:$4 sm:$0xff]  }
  0xf1   :  { %3650 = vmatprep.subr.bf16.mxu1 %v7016_v24  ;;  %v7069_v23 = vld [vmem:[%s10163_s1 + $0x920] ss:$8 sps:$4 sm:$0xff]   ;;  %v7074_v24 = vld [vmem:[%s10163_s1 + $0x814] ss:$8 sps:$4 sm:$0xff]  }
  0xf3   :  { %3610 = vmatpush2.bf16.msra.mxu0 %v7011_v25  ;;  %v7077_v25 = vld [vmem:[%s10163_s1 + $0x914] ss:$8 sps:$4 sm:$0xff]  }
  0xf4   :  { %3651 = vmatpush2.bf16.msra.mxu1 %v7014_v26  ;;  %3611 = vmatprep.subr.bf16.mxu0 %v7019_v27  ;;  %v7072_v26 = vld [vmem:[%s10163_s1 + $0x810] ss:$8 sps:$4 sm:$0xff]  }
  0xf5   :  { %3652 = vmatprep.subr.bf16.mxu1 %v7022_v28  ;;  %v7075_v27 = vld [vmem:[%s10163_s1 + $0x910] ss:$8 sps:$4 sm:$0xff]   ;;  %v7080_v28 = vld [vmem:[%s10163_s1 + $0x804] ss:$8 sps:$4 sm:$0xff]  }
  0xf7   :  { %3612 = vmatpush2.bf16.msra.mxu0 %v7017_v30  ;;  %v7083_v30 = vld [vmem:[%s10163_s1 + $0x904] ss:$8 sps:$4 sm:$0xff]  }
  0xf8   :  { %3653 = vmatpush2.bf16.msra.mxu1 %v7020_v31  ;;  %3613 = vmatprep.subr.bf16.mxu0 %v7025_v33  ;;  %v7078_v31 = vld [vmem:[%s10163_s1 + $0x800] ss:$8 sps:$4 sm:$0xff]  }
  0xf9   :  { %3654 = vmatprep.subr.bf16.mxu1 %v7028_v34  ;;  %v7081_v33 = vld [vmem:[%s10163_s1 + $0x900] ss:$8 sps:$4 sm:$0xff]   ;;  %v7086_v34 = vld [vmem:[%s10163_s1 + $0x8f4] ss:$8 sps:$4 sm:$0xff]  }
  0xfb   :  { %3614 = vmatpush2.bf16.msra.mxu0 %v7023_v36  ;;  %v7089_v36 = vld [vmem:[%s10163_s1 + $0x9f4] ss:$8 sps:$4 sm:$0xff]  }
  0xfc   :  { %3655 = vmatpush2.bf16.msra.mxu1 %v7026_v37  ;;  %3615 = vmatprep.subr.bf16.mxu0 %v7031_v29  ;;  %v7084_v37 = vld [vmem:[%s10163_s1 + $0x8f0] ss:$8 sps:$4 sm:$0xff]  }
  0xfd   :  { %3656 = vmatprep.subr.bf16.mxu1 %v7034_v38  ;;  %v7087_v29 = vld [vmem:[%s10163_s1 + $0x9f0] ss:$8 sps:$4 sm:$0xff]   ;;  %v7092_v38 = vld [vmem:[%s10163_s1 + $0x8e4] ss:$8 sps:$4 sm:$0xff]  }
  0xff   :  { %3616 = vmatpush2.bf16.msra.mxu0 %v7029_v39  ;;  %v7095_v39 = vld [vmem:[%s10163_s1 + $0x9e4] ss:$8 sps:$4 sm:$0xff]  }
 0x100   :  { %3657 = vmatpush2.bf16.msra.mxu1 %v7032_v41  ;;  %3667 = vmatprep.subr.bf16.mxu0 %v7038_v46  ;;  %v7093_v41 = vld [vmem:[%s10163_s1 + $0x9e0] ss:$8 sps:$4 sm:$0xff]   ;;  %v7099_v46 = vld [vmem:[%s10163_s1 + $0x9d0] ss:$8 sps:$4 sm:$0xff]  }
 0x101   :  { %3708 = vmatprep.subr.bf16.mxu1 %v7041_v47  ;;  %v7104_v47 = vld [vmem:[%s10163_s1 + $0x8c4] ss:$8 sps:$4 sm:$0xff]  }
 0x102   :  { %v3373_v57 = vpop.f32.mrf.mxu0  ;;  %3618 = vmatmul.mubr.bf16.vlgmr.msra.gmra.mxu0 %v630_v44  ;;  %v7101_v44 = vld [vmem:[%s10163_s1 + $0x9d4] ss:$8 sps:$4 sm:$0xff]  }
 0x103   :  { %v3414_v58 = vpop.f32.mrf.mxu1  ;;  %3659 = vmatmul.mubr.bf16.vlgmr.msra.gmra.mxu1 %v646_v51  ;;  %v3374_v61 = vadd.f32 %v3373_v57, %v540_v53  ;;  %3668 = vmatpush1.bf16.msra.mxu0 %v7036_v6  ;;  %v7105_v51 = vld [vmem:[%s10163_s1 + $0x9c0] ss:$8 sps:$4 sm:$0xff]   ;;  %v7110_v6 = vld [vmem:[%s10163_s1 + $0x8b4] ss:$8 sps:$4 sm:$0xff]   ;;  %v7108_v53 = vld [vmem:[%s10163_s1 + $0x8b0] ss:$8 sps:$4 sm:$0xff]  }
 0x104   :  { %3709 = vmatpush1.bf16.msra.mxu1 %v7039_v52  ;;  %v3375_v62 = vpop.f32.mrf.mxu0  ;;  %3669 = vmatprep.subr.bf16.mxu0 %v7044_v54  ;;  %v7113_v52 = vld [vmem:[%s10163_s1 + $0x9b4] ss:$8 sps:$4 sm:$0xff]   ;;  %v7111_v54 = vld [vmem:[%s10163_s1 + $0x9b0] ss:$8 sps:$4 sm:$0xff]   ;;  %v7114_v57 = vld [vmem:[%s10163_s1 + $0x8a0] ss:$8 sps:$4 sm:$0xff]  }
 0x105   :  { %v3416_v63 = vpop.f32.mrf.mxu1  ;;  %3710 = vmatprep.subr.bf16.mxu1 %v7047_v42  ;;  %v8481_v2 = vadd.f32 %v3414_v58, %v3374_v61  ;;  %v3376_v3 = vadd.f32 %v3375_v62, %v544_v55  ;;  %3699 = vmatprep.mubr.bf16.mxu0 %v686_v50  ;;  %v7102_v50 = vld [vmem:[%s10163_s1 + $0x8c0] ss:$8 sps:$4 sm:$0xff]   ;;  %v7116_v42 = vld [vmem:[%s10163_s1 + $0x8a4] ss:$8 sps:$4 sm:$0xff]   ;;  %v7120_v61 = vld [vmem:[%s10163_s1 + $0x890] ss:$8 sps:$4 sm:$0xff]  }
 0x106   :  { %3740 = vmatprep.mubr.bf16.mxu1 %v696_v56  ;;  %v3377_v7 = vpop.f32.mrf.mxu0  ;;  %v7119_v55 = vld [vmem:[%s10163_s1 + $0x9a4] ss:$8 sps:$4 sm:$0xff]   ;;  %v649_v56 = vcombine.high %v8411_v32, %v8411_v32  ;;  %v7117_v58 = vld [vmem:[%s10163_s1 + $0x9a0] ss:$8 sps:$4 sm:$0xff]   ;;  %v7125_v32 = vld [vmem:[%s10163_s1 + $0x994] ss:$8 sps:$4 sm:$0xff]  }
 0x107   :  { %v3418_v8 = vpop.f32.mrf.mxu1  ;;  %v8489_v9 = vadd.f32 %v3416_v63, %v3376_v3  ;;  %3670 = vmatpush1.bf16.msra.mxu0 %v7042_v59  ;;  %v7122_v59 = vld [vmem:[%s10163_s1 + $0x894] ss:$8 sps:$4 sm:$0xff]   ;;  %v7123_v62 = vld [vmem:[%s10163_s1 + $0x990] ss:$8 sps:$4 sm:$0xff]   ;;  %v7128_v63 = vld [vmem:[%s10163_s1 + $0x884] ss:$8 sps:$4 sm:$0xff]   ;;  %v672_v3 = vrot.slane %v8421_v35, %v7758_v49 }
 0x108   :  { %3711 = vmatpush1.bf16.msra.mxu1 %v7045_v60  ;;  %v3378_v10 = vpop.f32.mrf.mxu0  ;;  %3671 = vmatprep.subr.bf16.mxu0 %v7050_v0  ;;  %v8632_v60 = vrot.slane %v649_v56, %v7758_v49  ;;  %v7131_v0 = vld [vmem:[%s10163_s1 + $0x984] ss:$8 sps:$4 sm:$0xff]   ;;  %v7134_v7 = vld [vmem:[%s10163_s1 + $0xa74] ss:$8 sps:$4 sm:$0xff]   ;;  %v7132_v8 = vld [vmem:[%s10163_s1 + $0xa70] ss:$8 sps:$4 sm:$0xff]  }
 0x109   :  { %v3419_v11 = vpop.f32.mrf.mxu1  ;;  %3712 = vmatprep.subr.bf16.mxu1 %v7053_v1  ;;  %v7137_v35 = vld [vmem:[%s10163_s1 + $0xb74] ss:$8 sps:$4 sm:$0xff]   ;;  %v7135_v10 = vld [vmem:[%s10163_s1 + $0xb70] ss:$8 sps:$4 sm:$0xff]  }
 0x10a   :  { %v665_v1 = vcombine.high %v8632_v60, %v8632_v60  ;;  %v7180_v56 = vld [vmem:[%s10163_s1 + $0xaf0] ss:$8 sps:$4 sm:$0xff]  }
 0x10b   :  { %3672 = vmatpush1.bf16.msra.mxu0 %v7048_v4  ;;  %v7126_v4 = vld [vmem:[%s10163_s1 + $0x880] ss:$8 sps:$4 sm:$0xff]  }
 0x10c   :  { %3713 = vmatpush1.bf16.msra.mxu1 %v7051_v5  ;;  %3673 = vmatprep.subr.bf16.mxu0 %v7056_v12  ;;  %v7129_v5 = vld [vmem:[%s10163_s1 + $0x980] ss:$8 sps:$4 sm:$0xff]   ;;  %v693_v11 = vrot.slane %v665_v1, %v7758_v49  ;;  %v694_v12 = vcombine.high %v672_v3, %v672_v3  ;;  %v7195_v1 = vld [vmem:[%s10163_s1 + $0xbd0] ss:$8 sps:$4 sm:$0xff]  }
 0x10d   :  { %3714 = vmatprep.subr.bf16.mxu1 %v7059_v13  ;;  %v7140_v13 = vld [vmem:[%s10163_s1 + $0xa64] ss:$8 sps:$4 sm:$0xff]  }
 0x10f   :  { %3674 = vmatpush1.bf16.msra.mxu0 %v7054_v14  ;;  %v7143_v14 = vld [vmem:[%s10163_s1 + $0xb64] ss:$8 sps:$4 sm:$0xff]  }
 0x110   :  { %3715 = vmatpush1.bf16.msra.mxu1 %v7057_v15  ;;  %3675 = vmatprep.subr.bf16.mxu0 %v7062_v16  ;;  %v7138_v15 = vld [vmem:[%s10163_s1 + $0xa60] ss:$8 sps:$4 sm:$0xff]  }
 0x111   :  { %3716 = vmatprep.subr.bf16.mxu1 %v7065_v17  ;;  %v7141_v16 = vld [vmem:[%s10163_s1 + $0xb60] ss:$8 sps:$4 sm:$0xff]   ;;  %v697_v17 = vcombine.high %v693_v11, %v693_v11 }
 0x113   :  { %3676 = vmatpush1.bf16.msra.mxu0 %v7060_v18 }
 0x114   :  { %3717 = vmatpush1.bf16.msra.mxu1 %v7063_v19  ;;  %3677 = vmatprep.subr.bf16.mxu0 %v7068_v20 }
 0x115   :  { %3718 = vmatprep.subr.bf16.mxu1 %v7071_v21 }
 0x117   :  { %3678 = vmatpush1.bf16.msra.mxu0 %v7066_v22 }
 0x118   :  { %3719 = vmatpush1.bf16.msra.mxu1 %v7069_v23  ;;  %3679 = vmatprep.subr.bf16.mxu0 %v7074_v24  ;;  %v7146_v23 = vld [vmem:[%s10163_s1 + $0xa54] ss:$8 sps:$4 sm:$0xff]  }
 0x119   :  { %3720 = vmatprep.subr.bf16.mxu1 %v7077_v25  ;;  %v7149_v24 = vld [vmem:[%s10163_s1 + $0xb54] ss:$8 sps:$4 sm:$0xff]  }
 0x11b   :  { %3680 = vmatpush1.bf16.msra.mxu0 %v7072_v26 }
 0x11c   :  { %3721 = vmatpush1.bf16.msra.mxu1 %v7075_v27  ;;  %3681 = vmatprep.subr.bf16.mxu0 %v7080_v28  ;;  %v7147_v27 = vld [vmem:[%s10163_s1 + $0xb50] ss:$8 sps:$4 sm:$0xff]  }
 0x11d   :  { %3722 = vmatprep.subr.bf16.mxu1 %v7083_v30 }
 0x11f   :  { %3682 = vmatpush1.bf16.msra.mxu0 %v7078_v31 }
 0x120   :  { %3723 = vmatpush1.bf16.msra.mxu1 %v7081_v33  ;;  %3683 = vmatprep.subr.bf16.mxu0 %v7086_v34 }
 0x121   :  { %3724 = vmatprep.subr.bf16.mxu1 %v7089_v36  ;;  %v7155_v36 = vld [vmem:[%s10163_s1 + $0xb44] ss:$8 sps:$4 sm:$0xff]  }
 0x123   :  { %3684 = vmatpush2.bf16.msra.mxu0 %v7084_v37  ;;  %v7150_v37 = vld [vmem:[%s10163_s1 + $0xa40] ss:$8 sps:$4 sm:$0xff]  }
 0x124   :  { %3725 = vmatpush2.bf16.msra.mxu1 %v7087_v29  ;;  %3685 = vmatprep.subr.bf16.mxu0 %v7092_v38  ;;  %v7153_v29 = vld [vmem:[%s10163_s1 + $0xb40] ss:$8 sps:$4 sm:$0xff]   ;;  %v7158_v38 = vld [vmem:[%s10163_s1 + $0xa34] ss:$8 sps:$4 sm:$0xff]  }
 0x125   :  { %3726 = vmatprep.subr.bf16.mxu1 %v7095_v39  ;;  %v7161_v39 = vld [vmem:[%s10163_s1 + $0xb34] ss:$8 sps:$4 sm:$0xff]  }
 0x127   :  { %3686 = vmatpush2.bf16.msra.mxu0 %v7090_v40  ;;  %v7156_v40 = vld [vmem:[%s10163_s1 + $0xa30] ss:$8 sps:$4 sm:$0xff]  }
 0x128   :  { %3727 = vmatpush2.bf16.msra.mxu1 %v7093_v41  ;;  %3687 = vmatprep.subr.bf16.mxu0 %v7098_v43  ;;  %v7159_v41 = vld [vmem:[%s10163_s1 + $0xb30] ss:$8 sps:$4 sm:$0xff]   ;;  %v7164_v43 = vld [vmem:[%s10163_s1 + $0xa24] ss:$8 sps:$4 sm:$0xff]  }
 0x129   :  { %3728 = vmatprep.subr.bf16.mxu1 %v7101_v44  ;;  %v7167_v44 = vld [vmem:[%s10163_s1 + $0xb24] ss:$8 sps:$4 sm:$0xff]  }
 0x12b   :  { %3688 = vmatpush2.bf16.msra.mxu0 %v7096_v45  ;;  %v7162_v45 = vld [vmem:[%s10163_s1 + $0xa20] ss:$8 sps:$4 sm:$0xff]  }
 0x12c   :  { %3729 = vmatpush2.bf16.msra.mxu1 %v7099_v46  ;;  %3689 = vmatprep.subr.bf16.mxu0 %v7104_v47  ;;  %v7165_v46 = vld [vmem:[%s10163_s1 + $0xb20] ss:$8 sps:$4 sm:$0xff]   ;;  %v7170_v47 = vld [vmem:[%s10163_s1 + $0xa14] ss:$8 sps:$4 sm:$0xff]  }
 0x12d   :  { %3730 = vmatprep.subr.bf16.mxu1 %v7107_v48  ;;  %v7173_v48 = vld [vmem:[%s10163_s1 + $0xb14] ss:$8 sps:$4 sm:$0xff]  }
 0x12f   :  { %3690 = vmatpush2.bf16.msra.mxu0 %v7102_v50  ;;  %v7168_v50 = vld [vmem:[%s10163_s1 + $0xa10] ss:$8 sps:$4 sm:$0xff]  }
 0x130   :  { %3731 = vmatpush2.bf16.msra.mxu1 %v7105_v51  ;;  %3691 = vmatprep.subr.bf16.mxu0 %v7110_v6  ;;  %v7171_v51 = vld [vmem:[%s10163_s1 + $0xb10] ss:$8 sps:$4 sm:$0xff]   ;;  %v7176_v6 = vld [vmem:[%s10163_s1 + $0xa04] ss:$8 sps:$4 sm:$0xff]  }
 0x131   :  { %3732 = vmatprep.subr.bf16.mxu1 %v7113_v52  ;;  %v7179_v52 = vld [vmem:[%s10163_s1 + $0xb04] ss:$8 sps:$4 sm:$0xff]  }
 0x133   :  { %3692 = vmatpush2.bf16.msra.mxu0 %v7108_v53  ;;  %v7174_v53 = vld [vmem:[%s10163_s1 + $0xa00] ss:$8 sps:$4 sm:$0xff]  }
 0x134   :  { %3733 = vmatpush2.bf16.msra.mxu1 %v7111_v54  ;;  %3693 = vmatprep.subr.bf16.mxu0 %v7116_v42  ;;  %v7177_v54 = vld [vmem:[%s10163_s1 + $0xb00] ss:$8 sps:$4 sm:$0xff]   ;;  %v7182_v42 = vld [vmem:[%s10163_s1 + $0xaf4] ss:$8 sps:$4 sm:$0xff]  }
 0x135   :  { %3734 = vmatprep.subr.bf16.mxu1 %v7119_v55  ;;  %v7185_v55 = vld [vmem:[%s10163_s1 + $0xbf4] ss:$8 sps:$4 sm:$0xff]  }
 0x137   :  { %3694 = vmatpush2.bf16.msra.mxu0 %v7114_v57  ;;  %v7183_v57 = vld [vmem:[%s10163_s1 + $0xbf0] ss:$8 sps:$4 sm:$0xff]  }
 0x138   :  { %3735 = vmatpush2.bf16.msra.mxu1 %v7117_v58  ;;  %3695 = vmatprep.subr.bf16.mxu0 %v7122_v59  ;;  %v7188_v58 = vld [vmem:[%s10163_s1 + $0xae4] ss:$8 sps:$4 sm:$0xff]  }
 0x139   :  { %3736 = vmatprep.subr.bf16.mxu1 %v7125_v32  ;;  %v7191_v59 = vld [vmem:[%s10163_s1 + $0xbe4] ss:$8 sps:$4 sm:$0xff]   ;;  %v7186_v32 = vld [vmem:[%s10163_s1 + $0xae0] ss:$8 sps:$4 sm:$0xff]  }
 0x13b   :  { %3696 = vmatpush2.bf16.msra.mxu0 %v7120_v61  ;;  %v7189_v61 = vld [vmem:[%s10163_s1 + $0xbe0] ss:$8 sps:$4 sm:$0xff]  }
 0x13c   :  { %3737 = vmatpush2.bf16.msra.mxu1 %v7123_v62  ;;  %3697 = vmatprep.subr.bf16.mxu0 %v7128_v63  ;;  %v7194_v62 = vld [vmem:[%s10163_s1 + $0xad4] ss:$8 sps:$4 sm:$0xff]  }
 0x13d   :  { %3738 = vmatprep.subr.bf16.mxu1 %v7131_v0  ;;  %v7197_v63 = vld [vmem:[%s10163_s1 + $0xbd4] ss:$8 sps:$4 sm:$0xff]   ;;  %v7192_v0 = vld [vmem:[%s10163_s1 + $0xad0] ss:$8 sps:$4 sm:$0xff]  }
 0x13f   :  { %3698 = vmatpush2.bf16.msra.mxu0 %v7126_v4  ;;  %v7203_v4 = vld [vmem:[%s10163_s1 + $0xbc4] ss:$8 sps:$4 sm:$0xff]  }
 0x140   :  { %3739 = vmatpush2.bf16.msra.mxu1 %v7129_v5  ;;  %3749 = vmatprep.subr.bf16.mxu0 %v7134_v7  ;;  %v7198_v5 = vld [vmem:[%s10163_s1 + $0xac0] ss:$8 sps:$4 sm:$0xff]  }
 0x141   :  { %3790 = vmatprep.subr.bf16.mxu1 %v7137_v35  ;;  %v7201_v7 = vld [vmem:[%s10163_s1 + $0xbc0] ss:$8 sps:$4 sm:$0xff]   ;;  %v7206_v35 = vld [vmem:[%s10163_s1 + $0xab4] ss:$8 sps:$4 sm:$0xff]  }
 0x142   :  { %v3455_v18 = vpop.f32.mrf.mxu0  ;;  %3700 = vmatmul.mubr.bf16.vlgmr.msra.gmra.mxu0 %v672_v3  ;;  %v7200_v3 = vld [vmem:[%s10163_s1 + $0xac4] ss:$8 sps:$4 sm:$0xff]  }
 0x143   :  { %v3496_v19 = vpop.f32.mrf.mxu1  ;;  %3741 = vmatmul.mubr.bf16.vlgmr.msra.gmra.mxu1 %v694_v12  ;;  %v3456_v20 = vadd.f32 %v3455_v18, %v8481_v2  ;;  %3750 = vmatpush1.bf16.msra.mxu0 %v7132_v8  ;;  %v7144_v2 = vld [vmem:[%s10163_s1 + $0xa50] ss:$8 sps:$4 sm:$0xff]   ;;  %v7209_v8 = vld [vmem:[%s10163_s1 + $0xbb4] ss:$8 sps:$4 sm:$0xff]   ;;  %v7212_v12 = vld [vmem:[%s10163_s1 + $0xaa4] ss:$8 sps:$4 sm:$0xff]  }
 0x144   :  { %3791 = vmatpush1.bf16.msra.mxu1 %v7135_v10  ;;  %v3457_v21 = vpop.f32.mrf.mxu0  ;;  %3751 = vmatprep.subr.bf16.mxu0 %v7140_v13  ;;  %v7204_v10 = vld [vmem:[%s10163_s1 + $0xab0] ss:$8 sps:$4 sm:$0xff]   ;;  %v7215_v13 = vld [vmem:[%s10163_s1 + $0xba4] ss:$8 sps:$4 sm:$0xff]   ;;  %v7221_v18 = vld [vmem:[%s10163_s1 + $0xb94] ss:$8 sps:$4 sm:$0xff]  }
 0x145   :  { %v3498_v22 = vpop.f32.mrf.mxu1  ;;  %3792 = vmatprep.subr.bf16.mxu1 %v7143_v14  ;;  %v8688_v25 = vadd.f32 %v3496_v19, %v3456_v20  ;;  %v3458_v26 = vadd.f32 %v3457_v21, %v8489_v9  ;;  %3781 = vmatprep.mubr.bf16.mxu0 %v693_v11  ;;  %v7152_v9 = vld [vmem:[%s10163_s1 + $0xa44] ss:$8 sps:$4 sm:$0xff]   ;;  %v7207_v11 = vld [vmem:[%s10163_s1 + $0xbb0] ss:$8 sps:$4 sm:$0xff]  }
 0x146   :  { %3822 = vmatprep.mubr.bf16.mxu1 %v697_v17  ;;  %v3459_v28 = vpop.f32.mrf.mxu0  ;;  %v8828_v14 = vld [vmem:[%s10162_s0 + $0x18] sm:$0xff] }
 0x147   :  { %v3500_v30 = vpop.f32.mrf.mxu1  ;;  %v8697_v31 = vadd.f32 %v3498_v22, %v3458_v26  ;;  %3752 = vmatpush1.bf16.msra.mxu0 %v7138_v15  ;;  %v7210_v15 = vld [vmem:[%s10163_s1 + $0xaa0] ss:$8 sps:$4 sm:$0xff]   ;;  %v7218_v17 = vld [vmem:[%s10163_s1 + $0xa94] ss:$8 sps:$4 sm:$0xff]   ;;  %v8844_v19 = vrot.slane %v8828_v14, %v7758_v49  ;;  %v7216_v20 = vld [vmem:[%s10163_s1 + $0xa90] ss:$8 sps:$4 sm:$0xff]   ;;  %v679_v26 = vrot.slane %v8632_v60, %v7758_v49 }
 0x148   :  { %3793 = vmatpush1.bf16.msra.mxu1 %v7141_v16  ;;  %v3460_v33 = vpop.f32.mrf.mxu0  ;;  %3753 = vmatprep.subr.bf16.mxu0 %v7146_v23  ;;  %v7213_v16 = vld [vmem:[%s10163_s1 + $0xba0] ss:$8 sps:$4 sm:$0xff]   ;;  %v7219_v21 = vld [vmem:[%s10163_s1 + $0xb90] ss:$8 sps:$4 sm:$0xff]   ;;  %v7224_v22 = vld [vmem:[%s10163_s1 + $0xa84] ss:$8 sps:$4 sm:$0xff]  }
 0x149   :  { %v3501_v34 = vpop.f32.mrf.mxu1  ;;  %3794 = vmatprep.subr.bf16.mxu1 %v7149_v24  ;;  %v7227_v23 = vld [vmem:[%s10163_s1 + $0xb84] ss:$8 sps:$4 sm:$0xff]   ;;  %v713_v24 = vcombine.high %v8844_v19, %v8844_v19  ;;  %v7231_v28 = vld [vmem:[%s10163_s1 + $0xc74] ss:$8 sps:$4 sm:$0xff]   ;;  %v7229_v30 = vld [vmem:[%s10163_s1 + $0xc70] ss:$8 sps:$4 sm:$0xff]  }
 0x14a   :  { %v7234_v60 = vld [vmem:[%s10163_s1 + $0xd74] ss:$8 sps:$4 sm:$0xff]   ;;  %v7232_v33 = vld [vmem:[%s10163_s1 + $0xd70] ss:$8 sps:$4 sm:$0xff]  }
 0x14b   :  { %3754 = vmatpush1.bf16.msra.mxu0 %v7144_v2  ;;  %v7222_v2 = vld [vmem:[%s10163_s1 + $0xa80] ss:$8 sps:$4 sm:$0xff]   ;;  %v735_v34 = vrot.slane %v713_v24, %v7758_v49  ;;  %v7289_v24 = vld [vmem:[%s10163_s1 + $0xcd0] ss:$8 sps:$4 sm:$0xff]  }
 0x14c   :  { %3795 = vmatpush1.bf16.msra.mxu1 %v7147_v27  ;;  %3755 = vmatprep.subr.bf16.mxu0 %v7152_v9  ;;  %v7225_v27 = vld [vmem:[%s10163_s1 + $0xb80] ss:$8 sps:$4 sm:$0xff]   ;;  %v695_v9 = vcombine.high %v679_v26, %v679_v26 }
 0x14d   :  { %3796 = vmatprep.subr.bf16.mxu1 %v7155_v36  ;;  %v7237_v36 = vld [vmem:[%s10163_s1 + $0xc64] ss:$8 sps:$4 sm:$0xff]  }
 0x14f   :  { %3756 = vmatpush1.bf16.msra.mxu0 %v7150_v37  ;;  %v7240_v37 = vld [vmem:[%s10163_s1 + $0xd64] ss:$8 sps:$4 sm:$0xff]  }
 0x150   :  { %3797 = vmatpush1.bf16.msra.mxu1 %v7153_v29  ;;  %3757 = vmatprep.subr.bf16.mxu0 %v7158_v38  ;;  %v7235_v29 = vld [vmem:[%s10163_s1 + $0xc60] ss:$8 sps:$4 sm:$0xff]  }
 0x151   :  { %3798 = vmatprep.subr.bf16.mxu1 %v7161_v39  ;;  %v7238_v38 = vld [vmem:[%s10163_s1 + $0xd60] ss:$8 sps:$4 sm:$0xff]   ;;  %v745_v39 = vcombine.high %v735_v34, %v735_v34 }
 0x153   :  { %3758 = vmatpush1.bf16.msra.mxu0 %v7156_v40 }
 0x154   :  { %3799 = vmatpush1.bf16.msra.mxu1 %v7159_v41  ;;  %3759 = vmatprep.subr.bf16.mxu0 %v7164_v43  ;;  %v7243_v43 = vld [vmem:[%s10163_s1 + $0xc54] ss:$8 sps:$4 sm:$0xff]  }
 0x155   :  { %3800 = vmatprep.subr.bf16.mxu1 %v7167_v44  ;;  %v7246_v44 = vld [vmem:[%s10163_s1 + $0xd54] ss:$8 sps:$4 sm:$0xff]  }
 0x157   :  { %3760 = vmatpush1.bf16.msra.mxu0 %v7162_v45 }
 0x158   :  { %3801 = vmatpush1.bf16.msra.mxu1 %v7165_v46  ;;  %3761 = vmatprep.subr.bf16.mxu0 %v7170_v47 }
 0x159   :  { %3802 = vmatprep.subr.bf16.mxu1 %v7173_v48 }
 0x15b   :  { %3762 = vmatpush1.bf16.msra.mxu0 %v7168_v50 }
 0x15c   :  { %3803 = vmatpush1.bf16.msra.mxu1 %v7171_v51  ;;  %3763 = vmatprep.subr.bf16.mxu0 %v7176_v6  ;;  %v7241_v51 = vld [vmem:[%s10163_s1 + $0xc50] ss:$8 sps:$4 sm:$0xff]  }
 0x15d   :  { %3804 = vmatprep.subr.bf16.mxu1 %v7179_v52  ;;  %v7244_v6 = vld [vmem:[%s10163_s1 + $0xd50] ss:$8 sps:$4 sm:$0xff]  }
 0x15f   :  { %3764 = vmatpush1.bf16.msra.mxu0 %v7174_v53  ;;  %v7249_v53 = vld [vmem:[%s10163_s1 + $0xc44] ss:$8 sps:$4 sm:$0xff]  }
 0x160   :  { %3805 = vmatpush1.bf16.msra.mxu1 %v7177_v54  ;;  %3765 = vmatprep.subr.bf16.mxu0 %v7182_v42 }
 0x161   :  { %3806 = vmatprep.subr.bf16.mxu1 %v7185_v55 }
 0x163   :  { %3766 = vmatpush2.bf16.msra.mxu0 %v7180_v56  ;;  %v7247_v56 = vld [vmem:[%s10163_s1 + $0xc40] ss:$8 sps:$4 sm:$0xff]  }
 0x164   :  { %3807 = vmatpush2.bf16.msra.mxu1 %v7183_v57  ;;  %3767 = vmatprep.subr.bf16.mxu0 %v7188_v58  ;;  %v7250_v57 = vld [vmem:[%s10163_s1 + $0xd40] ss:$8 sps:$4 sm:$0xff]   ;;  %v7255_v58 = vld [vmem:[%s10163_s1 + $0xc34] ss:$8 sps:$4 sm:$0xff]  }
 0x165   :  { %3808 = vmatprep.subr.bf16.mxu1 %v7191_v59  ;;  %v7258_v59 = vld [vmem:[%s10163_s1 + $0xd34] ss:$8 sps:$4 sm:$0xff]  }
 0x167   :  { %3768 = vmatpush2.bf16.msra.mxu0 %v7186_v32  ;;  %v7253_v32 = vld [vmem:[%s10163_s1 + $0xc30] ss:$8 sps:$4 sm:$0xff]  }
 0x168   :  { %3809 = vmatpush2.bf16.msra.mxu1 %v7189_v61  ;;  %3769 = vmatprep.subr.bf16.mxu0 %v7194_v62  ;;  %v7256_v61 = vld [vmem:[%s10163_s1 + $0xd30] ss:$8 sps:$4 sm:$0xff]   ;;  %v7261_v62 = vld [vmem:[%s10163_s1 + $0xc24] ss:$8 sps:$4 sm:$0xff]  }
 0x169   :  { %3810 = vmatprep.subr.bf16.mxu1 %v7197_v63  ;;  %v7264_v63 = vld [vmem:[%s10163_s1 + $0xd24] ss:$8 sps:$4 sm:$0xff]  }
 0x16b   :  { %3770 = vmatpush2.bf16.msra.mxu0 %v7192_v0  ;;  %v7259_v0 = vld [vmem:[%s10163_s1 + $0xc20] ss:$8 sps:$4 sm:$0xff]  }
 0x16c   :  { %3811 = vmatpush2.bf16.msra.mxu1 %v7195_v1  ;;  %3771 = vmatprep.subr.bf16.mxu0 %v7200_v3  ;;  %v7262_v1 = vld [vmem:[%s10163_s1 + $0xd20] ss:$8 sps:$4 sm:$0xff]   ;;  %v7267_v3 = vld [vmem:[%s10163_s1 + $0xc14] ss:$8 sps:$4 sm:$0xff]  }
 0x16d   :  { %3812 = vmatprep.subr.bf16.mxu1 %v7203_v4  ;;  %v7270_v4 = vld [vmem:[%s10163_s1 + $0xd14] ss:$8 sps:$4 sm:$0xff]  }
 0x16f   :  { %3772 = vmatpush2.bf16.msra.mxu0 %v7198_v5  ;;  %v7265_v5 = vld [vmem:[%s10163_s1 + $0xc10] ss:$8 sps:$4 sm:$0xff]  }
 0x170   :  { %3813 = vmatpush2.bf16.msra.mxu1 %v7201_v7  ;;  %3773 = vmatprep.subr.bf16.mxu0 %v7206_v35  ;;  %v7268_v7 = vld [vmem:[%s10163_s1 + $0xd10] ss:$8 sps:$4 sm:$0xff]   ;;  %v7273_v35 = vld [vmem:[%s10163_s1 + $0xc04] ss:$8 sps:$4 sm:$0xff]  }
 0x171   :  { %3814 = vmatprep.subr.bf16.mxu1 %v7209_v8  ;;  %v7276_v8 = vld [vmem:[%s10163_s1 + $0xd04] ss:$8 sps:$4 sm:$0xff]  }
 0x173   :  { %3774 = vmatpush2.bf16.msra.mxu0 %v7204_v10  ;;  %v7271_v10 = vld [vmem:[%s10163_s1 + $0xc00] ss:$8 sps:$4 sm:$0xff]  }
 0x174   :  { %3815 = vmatpush2.bf16.msra.mxu1 %v7207_v11  ;;  %3775 = vmatprep.subr.bf16.mxu0 %v7212_v12  ;;  %v7274_v11 = vld [vmem:[%s10163_s1 + $0xd00] ss:$8 sps:$4 sm:$0xff]   ;;  %v7279_v12 = vld [vmem:[%s10163_s1 + $0xcf4] ss:$8 sps:$4 sm:$0xff]  }
 0x175   :  { %3816 = vmatprep.subr.bf16.mxu1 %v7215_v13  ;;  %v7282_v13 = vld [vmem:[%s10163_s1 + $0xdf4] ss:$8 sps:$4 sm:$0xff]  }
 0x177   :  { %3776 = vmatpush2.bf16.msra.mxu0 %v7210_v15  ;;  %v7277_v15 = vld [vmem:[%s10163_s1 + $0xcf0] ss:$8 sps:$4 sm:$0xff]  }
 0x178   :  { %3817 = vmatpush2.bf16.msra.mxu1 %v7213_v16  ;;  %3777 = vmatprep.subr.bf16.mxu0 %v7218_v17  ;;  %v7280_v16 = vld [vmem:[%s10163_s1 + $0xdf0] ss:$8 sps:$4 sm:$0xff]   ;;  %v7285_v17 = vld [vmem:[%s10163_s1 + $0xce4] ss:$8 sps:$4 sm:$0xff]  }
 0x179   :  { %3818 = vmatprep.subr.bf16.mxu1 %v7221_v18  ;;  %v7288_v18 = vld [vmem:[%s10163_s1 + $0xde4] ss:$8 sps:$4 sm:$0xff]  }
 0x17b   :  { %3778 = vmatpush2.bf16.msra.mxu0 %v7216_v20  ;;  %v7283_v20 = vld [vmem:[%s10163_s1 + $0xce0] ss:$8 sps:$4 sm:$0xff]  }
 0x17c   :  { %3819 = vmatpush2.bf16.msra.mxu1 %v7219_v21  ;;  %3779 = vmatprep.subr.bf16.mxu0 %v7224_v22  ;;  %v7286_v21 = vld [vmem:[%s10163_s1 + $0xde0] ss:$8 sps:$4 sm:$0xff]   ;;  %v7291_v22 = vld [vmem:[%s10163_s1 + $0xcd4] ss:$8 sps:$4 sm:$0xff]  }
 0x17d   :  { %3820 = vmatprep.subr.bf16.mxu1 %v7227_v23  ;;  %v7294_v23 = vld [vmem:[%s10163_s1 + $0xdd4] ss:$8 sps:$4 sm:$0xff]  }
 0x17f   :  { %3780 = vmatpush2.bf16.msra.mxu0 %v7222_v2  ;;  %v7297_v2 = vld [vmem:[%s10163_s1 + $0xcc4] ss:$8 sps:$4 sm:$0xff]  }
 0x180   :  { %3821 = vmatpush2.bf16.msra.mxu1 %v7225_v27  ;;  %3831 = vmatprep.subr.bf16.mxu0 %v7231_v28  ;;  %v7300_v27 = vld [vmem:[%s10163_s1 + $0xdc4] ss:$8 sps:$4 sm:$0xff]   ;;  %v7295_v28 = vld [vmem:[%s10163_s1 + $0xcc0] ss:$8 sps:$4 sm:$0xff]  }
 0x181   :  { %3872 = vmatprep.subr.bf16.mxu1 %v7234_v60  ;;  %v7298_v60 = vld [vmem:[%s10163_s1 + $0xdc0] ss:$8 sps:$4 sm:$0xff]  }
 0x182   :  { %v3537_v40 = vpop.f32.mrf.mxu0  ;;  %3782 = vmatmul.mubr.bf16.vlgmr.msra.gmra.mxu0 %v679_v26  ;;  %v7292_v26 = vld [vmem:[%s10163_s1 + $0xdd0] ss:$8 sps:$4 sm:$0xff]  }
 0x183   :  { %v3578_v41 = vpop.f32.mrf.mxu1  ;;  %3823 = vmatmul.mubr.bf16.vlgmr.msra.gmra.mxu1 %v695_v9  ;;  %v3538_v45 = vadd.f32 %v3537_v40, %v8688_v25  ;;  %3832 = vmatpush1.bf16.msra.mxu0 %v7229_v30  ;;  %v7303_v30 = vld [vmem:[%s10163_s1 + $0xcb4] ss:$8 sps:$4 sm:$0xff]   ;;  %v7304_v9 = vld [vmem:[%s10163_s1 + $0xdb0] ss:$8 sps:$4 sm:$0xff]  }
 0x184   :  { %3873 = vmatpush1.bf16.msra.mxu1 %v7232_v33  ;;  %v3539_v46 = vpop.f32.mrf.mxu0  ;;  %3833 = vmatprep.subr.bf16.mxu0 %v7237_v36  ;;  %v7306_v33 = vld [vmem:[%s10163_s1 + $0xdb4] ss:$8 sps:$4 sm:$0xff]   ;;  %v7309_v36 = vld [vmem:[%s10163_s1 + $0xca4] ss:$8 sps:$4 sm:$0xff]  }
 0x185   :  { %v3580_v47 = vpop.f32.mrf.mxu1  ;;  %3874 = vmatprep.subr.bf16.mxu1 %v7240_v37  ;;  %v8900_v48 = vadd.f32 %v3578_v41, %v3538_v45  ;;  %v3540_v50 = vadd.f32 %v3539_v46, %v8697_v31  ;;  %3863 = vmatprep.mubr.bf16.mxu0 %v735_v34  ;;  %v7252_v31 = vld [vmem:[%s10163_s1 + $0xd44] ss:$8 sps:$4 sm:$0xff]   ;;  %v7301_v34 = vld [vmem:[%s10163_s1 + $0xcb0] ss:$8 sps:$4 sm:$0xff]   ;;  %v7315_v40 = vld [vmem:[%s10163_s1 + $0xc94] ss:$8 sps:$4 sm:$0xff]  }
 0x186   :  { %3904 = vmatprep.mubr.bf16.mxu1 %v745_v39  ;;  %v3541_v25 = vpop.f32.mrf.mxu0  ;;  %v7312_v37 = vld [vmem:[%s10163_s1 + $0xda4] ss:$8 sps:$4 sm:$0xff]   ;;  %v698_v39 = vcombine.high %v8828_v14, %v8828_v14  ;;  %v7318_v41 = vld [vmem:[%s10163_s1 + $0xd94] ss:$8 sps:$4 sm:$0xff]  }
 0x187   :  { %v3582_v52 = vpop.f32.mrf.mxu1  ;;  %v8915_v54 = vadd.f32 %v3580_v47, %v3540_v50  ;;  %3834 = vmatpush1.bf16.msra.mxu0 %v7235_v29  ;;  %v7307_v29 = vld [vmem:[%s10163_s1 + $0xca0] ss:$8 sps:$4 sm:$0xff]  }
 0x188   :  { %3875 = vmatpush1.bf16.msra.mxu1 %v7238_v38  ;;  %v3542_v42 = vpop.f32.mrf.mxu0  ;;  %3835 = vmatprep.subr.bf16.mxu0 %v7243_v43  ;;  %v7310_v38 = vld [vmem:[%s10163_s1 + $0xda0] ss:$8 sps:$4 sm:$0xff]   ;;  %v9052_v43 = vrot.slane %v698_v39, %v7758_v49 }
 0x189   :  { %v3583_v55 = vpop.f32.mrf.mxu1  ;;  %3876 = vmatprep.subr.bf16.mxu1 %v7246_v44 }
 0x18b   :  { %3836 = vmatpush1.bf16.msra.mxu0 %v7241_v51 }
 0x18c   :  { %3877 = vmatpush1.bf16.msra.mxu1 %v7244_v6  ;;  %3837 = vmatprep.subr.bf16.mxu0 %v7249_v53 }
 0x18d   :  { %3878 = vmatprep.subr.bf16.mxu1 %v7252_v31 }
 0x18f   :  { %3838 = vmatpush1.bf16.msra.mxu0 %v7247_v56 }
 0x190   :  { %3879 = vmatpush1.bf16.msra.mxu1 %v7250_v57  ;;  %3839 = vmatprep.subr.bf16.mxu0 %v7255_v58 }
 0x191   :  { %3880 = vmatprep.subr.bf16.mxu1 %v7258_v59 }
 0x193   :  { %3840 = vmatpush1.bf16.msra.mxu0 %v7253_v32 }
 0x194   :  { %3881 = vmatpush1.bf16.msra.mxu1 %v7256_v61  ;;  %3841 = vmatprep.subr.bf16.mxu0 %v7261_v62 }
 0x195   :  { %3882 = vmatprep.subr.bf16.mxu1 %v7264_v63 }
 0x197   :  { %3842 = vmatpush1.bf16.msra.mxu0 %v7259_v0 }
 0x198   :  { %3883 = vmatpush1.bf16.msra.mxu1 %v7262_v1  ;;  %3843 = vmatprep.subr.bf16.mxu0 %v7267_v3 }
 0x199   :  { %3884 = vmatprep.subr.bf16.mxu1 %v7270_v4 }
 0x19b   :  { %3844 = vmatpush1.bf16.msra.mxu0 %v7265_v5 }
 0x19c   :  { %3885 = vmatpush1.bf16.msra.mxu1 %v7268_v7  ;;  %3845 = vmatprep.subr.bf16.mxu0 %v7273_v35 }
 0x19d   :  { %3886 = vmatprep.subr.bf16.mxu1 %v7276_v8 }
 0x19f   :  { %3846 = vmatpush1.bf16.msra.mxu0 %v7271_v10 }
 0x1a0   :  { %3887 = vmatpush1.bf16.msra.mxu1 %v7274_v11  ;;  %3847 = vmatprep.subr.bf16.mxu0 %v7279_v12 }
 0x1a1   :  { %3888 = vmatprep.subr.bf16.mxu1 %v7282_v13 }
 0x1a3   :  { %3848 = vmatpush2.bf16.msra.mxu0 %v7277_v15 }
 0x1a4   :  { %3889 = vmatpush2.bf16.msra.mxu1 %v7280_v16  ;;  %3849 = vmatprep.subr.bf16.mxu0 %v7285_v17 }
 0x1a5   :  { %3890 = vmatprep.subr.bf16.mxu1 %v7288_v18 }
 0x1a7   :  { %3850 = vmatpush2.bf16.msra.mxu0 %v7283_v20 }
 0x1a8   :  { %3891 = vmatpush2.bf16.msra.mxu1 %v7286_v21  ;;  %3851 = vmatprep.subr.bf16.mxu0 %v7291_v22 }
 0x1a9   :  { %3892 = vmatprep.subr.bf16.mxu1 %v7294_v23 }
 0x1ab   :  { %3852 = vmatpush2.bf16.msra.mxu0 %v7289_v24 }
 0x1ac   :  { %3893 = vmatpush2.bf16.msra.mxu1 %v7292_v26  ;;  %3853 = vmatprep.subr.bf16.mxu0 %v7297_v2 }
 0x1ad   :  { %3894 = vmatprep.subr.bf16.mxu1 %v7300_v27 }
 0x1af   :  { %3854 = vmatpush2.bf16.msra.mxu0 %v7295_v28 }
 0x1b0   :  { %3895 = vmatpush2.bf16.msra.mxu1 %v7298_v60  ;;  %3855 = vmatprep.subr.bf16.mxu0 %v7303_v30 }
 0x1b1   :  { %3896 = vmatprep.subr.bf16.mxu1 %v7306_v33 }
 0x1b3   :  { %3856 = vmatpush2.bf16.msra.mxu0 %v7301_v34 }
 0x1b4   :  { %3897 = vmatpush2.bf16.msra.mxu1 %v7304_v9  ;;  %3857 = vmatprep.subr.bf16.mxu0 %v7309_v36 }
 0x1b5   :  { %3898 = vmatprep.subr.bf16.mxu1 %v7312_v37 }
 0x1b6   :  { %9 = vsyncpa [#allocation3], 0  ;;  %v7313_v14 = vld [vmem:[%s10163_s1 + $0xc90] ss:$8 sps:$4 sm:$0xff]   ;;  %v7321_v45 = vld [vmem:[%s10163_s1 + $0xc84] ss:$8 sps:$4 sm:$0xff]   ;;  %v714_v47 = vcombine.high %v9052_v43, %v9052_v43  ;;  %v721_v50 = vrot.slane %v8844_v19, %v7758_v49 }
 0x1b7   :  { %3858 = vmatpush2.bf16.msra.mxu0 %v7307_v29  ;;  %v7316_v44 = vld [vmem:[%s10163_s1 + $0xd90] ss:$8 sps:$4 sm:$0xff]   ;;  %v7324_v46 = vld [vmem:[%s10163_s1 + $0xd84] ss:$8 sps:$4 sm:$0xff]   ;;  %v7319_v51 = vld [vmem:[%s10163_s1 + $0xc80] ss:$8 sps:$4 sm:$0xff]  }
 0x1b8   :  { %3899 = vmatpush2.bf16.msra.mxu1 %v7310_v38  ;;  %3859 = vmatprep.subr.bf16.mxu0 %v7315_v40  ;;  %v7322_v6 = vld [vmem:[%s10163_s1 + $0xd80] ss:$8 sps:$4 sm:$0xff]   ;;  %v7327_v25 = vld [vmem:[%s10163_s1 + $0xe74] ss:$8 sps:$4 sm:$0xff]   ;;  %v742_v52 = vrot.slane %v714_v47, %v7758_v49  ;;  %v743_v53 = vcombine.high %v721_v50, %v721_v50  ;;  %v7325_v31 = vld [vmem:[%s10163_s1 + $0xe70] ss:$8 sps:$4 sm:$0xff]  }
 0x1b9   :  { %3900 = vmatprep.subr.bf16.mxu1 %v7318_v41  ;;  %v7330_v19 = vld [vmem:[%s10163_s1 + $0xf74] ss:$8 sps:$4 sm:$0xff]   ;;  %v7328_v42 = vld [vmem:[%s10163_s1 + $0xf70] ss:$8 sps:$4 sm:$0xff]   ;;  %v7333_v55 = vld [vmem:[%s10163_s1 + $0xe64] ss:$8 sps:$4 sm:$0xff]  }
 0x1ba   :  { %v7336_v56 = vld [vmem:[%s10163_s1 + $0xf64] ss:$8 sps:$4 sm:$0xff]   ;;  %v746_v57 = vcombine.high %v742_v52, %v742_v52  ;;  %v7331_v61 = vld [vmem:[%s10163_s1 + $0xe60] ss:$8 sps:$4 sm:$0xff]   ;;  %v7339_v1 = vld [vmem:[%s10163_s1 + $0xe54] ss:$8 sps:$4 sm:$0xff]  }
 0x1bb   :  { %3860 = vmatpush2.bf16.msra.mxu0 %v7313_v14  ;;  %v7334_v62 = vld [vmem:[%s10163_s1 + $0xf60] ss:$8 sps:$4 sm:$0xff]   ;;  %v7337_v8 = vld [vmem:[%s10163_s1 + $0xe50] ss:$8 sps:$4 sm:$0xff]   ;;  %v7348_v13 = vld [vmem:[%s10163_s1 + $0xf44] ss:$8 sps:$4 sm:$0xff]  }
 0x1bc   :  { %3901 = vmatpush2.bf16.msra.mxu1 %v7316_v44  ;;  %3861 = vmatprep.subr.bf16.mxu0 %v7321_v45  ;;  %v7340_v10 = vld [vmem:[%s10163_s1 + $0xf50] ss:$8 sps:$4 sm:$0xff]   ;;  %v7343_v15 = vld [vmem:[%s10163_s1 + $0xe40] ss:$8 sps:$4 sm:$0xff]   ;;  %v7351_v17 = vld [vmem:[%s10163_s1 + $0xe34] ss:$8 sps:$4 sm:$0xff]  }
 0x1bd   :  { %3902 = vmatprep.subr.bf16.mxu1 %v7324_v46  ;;  %v7346_v16 = vld [vmem:[%s10163_s1 + $0xf40] ss:$8 sps:$4 sm:$0xff]   ;;  %v7354_v18 = vld [vmem:[%s10163_s1 + $0xf34] ss:$8 sps:$4 sm:$0xff]   ;;  %v7349_v20 = vld [vmem:[%s10163_s1 + $0xe30] ss:$8 sps:$4 sm:$0xff]  }
 0x1be   :  { %v7352_v21 = vld [vmem:[%s10163_s1 + $0xf30] ss:$8 sps:$4 sm:$0xff]   ;;  %v7357_v22 = vld [vmem:[%s10163_s1 + $0xe24] ss:$8 sps:$4 sm:$0xff]   ;;  %v7355_v24 = vld [vmem:[%s10163_s1 + $0xe20] ss:$8 sps:$4 sm:$0xff]  }
 0x1bf   :  { %3862 = vmatpush2.bf16.msra.mxu0 %v7319_v51  ;;  %v7360_v23 = vld [vmem:[%s10163_s1 + $0xf24] ss:$8 sps:$4 sm:$0xff]   ;;  %v7358_v26 = vld [vmem:[%s10163_s1 + $0xf20] ss:$8 sps:$4 sm:$0xff]   ;;  %v7363_v2 = vld [vmem:[%s10163_s1 + $0xe14] ss:$8 sps:$4 sm:$0xff]  }
 0x1c0   :  { %3903 = vmatpush2.bf16.msra.mxu1 %v7322_v6  ;;  %3913 = vmatprep.subr.bf16.mxu0 %v7327_v25  ;;  %v7366_v27 = vld [vmem:[%s10163_s1 + $0xf14] ss:$8 sps:$4 sm:$0xff]   ;;  %v7361_v28 = vld [vmem:[%s10163_s1 + $0xe10] ss:$8 sps:$4 sm:$0xff]   ;;  %v7369_v30 = vld [vmem:[%s10163_s1 + $0xe04] ss:$8 sps:$4 sm:$0xff]  }
 0x1c1   :  { %3954 = vmatprep.subr.bf16.mxu1 %v7330_v19  ;;  %v7364_v60 = vld [vmem:[%s10163_s1 + $0xf10] ss:$8 sps:$4 sm:$0xff]   ;;  %v7372_v33 = vld [vmem:[%s10163_s1 + $0xf04] ss:$8 sps:$4 sm:$0xff]   ;;  %v7367_v34 = vld [vmem:[%s10163_s1 + $0xe00] ss:$8 sps:$4 sm:$0xff]  }
 0x1c2   :  { %v3619_v58 = vpop.f32.mrf.mxu0  ;;  %3864 = vmatmul.mubr.bf16.vlgmr.msra.gmra.mxu0 %v721_v50  ;;  %v7370_v9 = vld [vmem:[%s10163_s1 + $0xf00] ss:$8 sps:$4 sm:$0xff]   ;;  %v7375_v36 = vld [vmem:[%s10163_s1 + $0xef4] ss:$8 sps:$4 sm:$0xff]   ;;  %v7373_v29 = vld [vmem:[%s10163_s1 + $0xef0] ss:$8 sps:$4 sm:$0xff]  }
 0x1c3   :  { %v3660_v59 = vpop.f32.mrf.mxu1  ;;  %3905 = vmatmul.mubr.bf16.vlgmr.msra.gmra.mxu1 %v743_v53  ;;  %v3620_v32 = vadd.f32 %v3619_v58, %v8900_v48  ;;  %3914 = vmatpush1.bf16.msra.mxu0 %v7325_v31  ;;  %v7342_v48 = vld [vmem:[%s10163_s1 + $0xf54] ss:$8 sps:$4 sm:$0xff]   ;;  %v7376_v38 = vld [vmem:[%s10163_s1 + $0xff0] ss:$8 sps:$4 sm:$0xff]   ;;  %v7381_v39 = vld [vmem:[%s10163_s1 + $0xee4] ss:$8 sps:$4 sm:$0xff]  }
 0x1c4   :  { %3955 = vmatpush1.bf16.msra.mxu1 %v7328_v42  ;;  %v3621_v63 = vpop.f32.mrf.mxu0  ;;  %3915 = vmatprep.subr.bf16.mxu0 %v7333_v55  ;;  %v7378_v37 = vld [vmem:[%s10163_s1 + $0xff4] ss:$8 sps:$4 sm:$0xff]   ;;  %v7384_v40 = vld [vmem:[%s10163_s1 + $0xfe4] ss:$8 sps:$4 sm:$0xff]   ;;  %v7379_v41 = vld [vmem:[%s10163_s1 + $0xee0] ss:$8 sps:$4 sm:$0xff]  }
 0x1c5   :  { %v3662_v0 = vpop.f32.mrf.mxu1  ;;  %3956 = vmatprep.subr.bf16.mxu1 %v7336_v56  ;;  %v9108_v3 = vadd.f32 %v3660_v59, %v3620_v32  ;;  %v3622_v4 = vadd.f32 %v3621_v63, %v8915_v54  ;;  %3945 = vmatprep.mubr.bf16.mxu0 %v742_v52  ;;  %v7345_v54 = vld [vmem:[%s10163_s1 + $0xe44] ss:$8 sps:$4 sm:$0xff]   ;;  %v7382_v14 = vld [vmem:[%s10163_s1 + $0xfe0] ss:$8 sps:$4 sm:$0xff]   ;;  %v7387_v44 = vld [vmem:[%s10163_s1 + $0xed4] ss:$8 sps:$4 sm:$0xff]  }
 0x1c6   :  { %3986 = vmatprep.mubr.bf16.mxu1 %v746_v57  ;;  %v3623_v5 = vpop.f32.mrf.mxu0  ;;  %v7390_v45 = vld [vmem:[%s10163_s1 + $0xfd4] ss:$8 sps:$4 sm:$0xff]   ;;  %v7385_v46 = vld [vmem:[%s10163_s1 + $0xed0] ss:$8 sps:$4 sm:$0xff]   ;;  %v7393_v50 = vld [vmem:[%s10163_s1 + $0xec4] ss:$8 sps:$4 sm:$0xff]  }
 0x1c7   :  { %v3664_v7 = vpop.f32.mrf.mxu1  ;;  %v9111_v35 = vadd.f32 %v3662_v0, %v3622_v4  ;;  %3916 = vmatpush1.bf16.msra.mxu0 %v7331_v61  ;;  %v7388_v47 = vld [vmem:[%s10163_s1 + $0xfd0] ss:$8 sps:$4 sm:$0xff]   ;;  %v7396_v51 = vld [vmem:[%s10163_s1 + $0xfc4] ss:$8 sps:$4 sm:$0xff]   ;;  %v7391_v6 = vld [vmem:[%s10163_s1 + $0xec0] ss:$8 sps:$4 sm:$0xff]   ;;  %v728_v0 = vrot.slane %v9052_v43, %v7758_v49 }
 0x1c8   :  { %3957 = vmatpush1.bf16.msra.mxu1 %v7334_v62  ;;  %v3624_v11 = vpop.f32.mrf.mxu0  ;;  %3917 = vmatprep.subr.bf16.mxu0 %v7339_v1  ;;  %v7394_v25 = vld [vmem:[%s10163_s1 + $0xfc0] ss:$8 sps:$4 sm:$0xff]   ;;  %v7399_v19 = vld [vmem:[%s10163_s1 + $0xeb4] ss:$8 sps:$4 sm:$0xff]   ;;  %v7397_v53 = vld [vmem:[%s10163_s1 + $0xeb0] ss:$8 sps:$4 sm:$0xff]  }
 0x1c9   :  { %v3665_v12 = vpop.f32.mrf.mxu1  ;;  %3958 = vmatprep.subr.bf16.mxu1 %v7342_v48  ;;  %v7402_v52 = vld [vmem:[%s10163_s1 + $0xfb4] ss:$8 sps:$4 sm:$0xff]   ;;  %v7400_v31 = vld [vmem:[%s10163_s1 + $0xfb0] ss:$8 sps:$4 sm:$0xff]   ;;  %v7405_v42 = vld [vmem:[%s10163_s1 + $0xea4] ss:$8 sps:$4 sm:$0xff]   ;;  %v744_v4 = vcombine.high %v728_v0, %v728_v0 }
 0x1ca   :  { %v7408_v55 = vld [vmem:[%s10163_s1 + $0xfa4] ss:$8 sps:$4 sm:$0xff]   ;;  %v7403_v56 = vld [vmem:[%s10163_s1 + $0xea0] ss:$8 sps:$4 sm:$0xff]   ;;  %v7411_v58 = vld [vmem:[%s10163_s1 + $0xe94] ss:$8 sps:$4 sm:$0xff]  }
 0x1cb   :  { %3918 = vmatpush1.bf16.msra.mxu0 %v7337_v8  ;;  %v7406_v57 = vld [vmem:[%s10163_s1 + $0xfa0] ss:$8 sps:$4 sm:$0xff]   ;;  %v7414_v59 = vld [vmem:[%s10163_s1 + $0xf94] ss:$8 sps:$4 sm:$0xff]   ;;  %v7409_v32 = vld [vmem:[%s10163_s1 + $0xe90] ss:$8 sps:$4 sm:$0xff]  }
 0x1cc   :  { %3959 = vmatpush1.bf16.msra.mxu1 %v7340_v10  ;;  %3919 = vmatprep.subr.bf16.mxu0 %v7345_v54  ;;  %v7412_v61 = vld [vmem:[%s10163_s1 + $0xf90] ss:$8 sps:$4 sm:$0xff]   ;;  %v7417_v62 = vld [vmem:[%s10163_s1 + $0xe84] ss:$8 sps:$4 sm:$0xff]   ;;  %v7415_v1 = vld [vmem:[%s10163_s1 + $0xe80] ss:$8 sps:$4 sm:$0xff]  }
 0x1cd   :  { %3960 = vmatprep.subr.bf16.mxu1 %v7348_v13  ;;  %v7420_v63 = vld [vmem:[%s10163_s1 + $0xf84] ss:$8 sps:$4 sm:$0xff]   ;;  %v7418_v48 = vld [vmem:[%s10163_s1 + $0xf80] ss:$8 sps:$4 sm:$0xff]  }
 0x1cf   :  { %3920 = vmatpush1.bf16.msra.mxu0 %v7343_v15 }
 0x1d0   :  { %3961 = vmatpush1.bf16.msra.mxu1 %v7346_v16  ;;  %3921 = vmatprep.subr.bf16.mxu0 %v7351_v17 }
 0x1d1   :  { %3962 = vmatprep.subr.bf16.mxu1 %v7354_v18 }
 0x1d3   :  { %3922 = vmatpush1.bf16.msra.mxu0 %v7349_v20 }
 0x1d4   :  { %3963 = vmatpush1.bf16.msra.mxu1 %v7352_v21  ;;  %3923 = vmatprep.subr.bf16.mxu0 %v7357_v22 }
 0x1d5   :  { %3964 = vmatprep.subr.bf16.mxu1 %v7360_v23 }
 0x1d7   :  { %3924 = vmatpush1.bf16.msra.mxu0 %v7355_v24 }
 0x1d8   :  { %3965 = vmatpush1.bf16.msra.mxu1 %v7358_v26  ;;  %3925 = vmatprep.subr.bf16.mxu0 %v7363_v2 }
 0x1d9   :  { %3966 = vmatprep.subr.bf16.mxu1 %v7366_v27 }
 0x1db   :  { %3926 = vmatpush1.bf16.msra.mxu0 %v7361_v28 }
 0x1dc   :  { %3967 = vmatpush1.bf16.msra.mxu1 %v7364_v60  ;;  %3927 = vmatprep.subr.bf16.mxu0 %v7369_v30  ;;  %v7423_v60 = vld [vmem:[%s10165_s3 + $0x78] sm:$0xff]  }
 0x1dd   :  { %3968 = vmatprep.subr.bf16.mxu1 %v7372_v33  ;;  %v7424_v30 = vld [vmem:[%s10165_s3 + $0xb8] sm:$0xff]  }
 0x1de   :  { %v7425_v33 = vld [vmem:[%s10165_s3 + $0x38] sm:$0xff]  }
 0x1df   :  { %3928 = vmatpush1.bf16.msra.mxu0 %v7367_v34  ;;  %v7426_v34 = vld [vmem:[%s10165_s3 + $0xf0] sm:$0xff]  }
 0x1e0   :  { %3969 = vmatpush1.bf16.msra.mxu1 %v7370_v9  ;;  %3929 = vmatprep.subr.bf16.mxu0 %v7375_v36  ;;  %v7427_v9 = vld [vmem:[%s10165_s3 + $0x70] sm:$0xff]  }
 0x1e1   :  { %3970 = vmatprep.subr.bf16.mxu1 %v7378_v37  ;;  %v7428_v36 = vld [vmem:[%s10165_s3 + $0xb0] sm:$0xff]  }
 0x1e2   :  { %v7429_v37 = vld [vmem:[%s10165_s3 + $0x30] sm:$0xff]  }
 0x1e3   :  { %3930 = vmatpush2.bf16.msra.mxu0 %v7373_v29  ;;  %v7430_v29 = vld [vmem:[%s10165_s3 + $0xe8] sm:$0xff]  }
 0x1e4   :  { %3971 = vmatpush2.bf16.msra.mxu1 %v7376_v38  ;;  %3931 = vmatprep.subr.bf16.mxu0 %v7381_v39  ;;  %v7431_v38 = vld [vmem:[%s10165_s3 + $0x68] sm:$0xff]  }
 0x1e5   :  { %3972 = vmatprep.subr.bf16.mxu1 %v7384_v40  ;;  %v7432_v39 = vld [vmem:[%s10165_s3 + $0xa8] sm:$0xff]  }
 0x1e6   :  { %v7433_v40 = vld [vmem:[%s10165_s3 + $0x28] sm:$0xff]  }
 0x1e7   :  { %3932 = vmatpush2.bf16.msra.mxu0 %v7379_v41  ;;  %v7434_v41 = vld [vmem:[%s10165_s3 + $0xe0] sm:$0xff]  }
 0x1e8   :  { %3973 = vmatpush2.bf16.msra.mxu1 %v7382_v14  ;;  %3933 = vmatprep.subr.bf16.mxu0 %v7387_v44  ;;  %v7435_v14 = vld [vmem:[%s10165_s3 + $0x60] sm:$0xff]  }
 0x1e9   :  { %3974 = vmatprep.subr.bf16.mxu1 %v7390_v45  ;;  %v7436_v44 = vld [vmem:[%s10165_s3 + $0xa0] sm:$0xff]  }
 0x1ea   :  { %v7437_v45 = vld [vmem:[%s10165_s3 + $0x20] sm:$0xff]  }
 0x1eb   :  { %3934 = vmatpush2.bf16.msra.mxu0 %v7385_v46  ;;  %v7438_v46 = vld [vmem:[%s10165_s3 + $0xd8] sm:$0xff]  }
 0x1ec   :  { %3975 = vmatpush2.bf16.msra.mxu1 %v7388_v47  ;;  %3935 = vmatprep.subr.bf16.mxu0 %v7393_v50  ;;  %v7439_v47 = vld [vmem:[%s10165_s3 + $0x58] sm:$0xff]  }
 0x1ed   :  { %3976 = vmatprep.subr.bf16.mxu1 %v7396_v51  ;;  %v7440_v50 = vld [vmem:[%s10165_s3 + $0x98] sm:$0xff]  }
 0x1ee   :  { %v7441_v51 = vld [vmem:[%s10165_s3 + $0x18] sm:$0xff]  }
 0x1ef   :  { %3936 = vmatpush2.bf16.msra.mxu0 %v7391_v6  ;;  %v7442_v6 = vld [vmem:[%s10165_s3 + $0xd0] sm:$0xff]  }
 0x1f0   :  { %3977 = vmatpush2.bf16.msra.mxu1 %v7394_v25  ;;  %3937 = vmatprep.subr.bf16.mxu0 %v7399_v19  ;;  %v7443_v25 = vld [vmem:[%s10165_s3 + $0x50] sm:$0xff]  }
 0x1f1   :  { %3978 = vmatprep.subr.bf16.mxu1 %v7402_v52  ;;  %v7444_v19 = vld [vmem:[%s10165_s3 + $0x90] sm:$0xff]  }
 0x1f2   :  { %v7445_v52 = vld [vmem:[%s10165_s3 + $0x10] sm:$0xff]  }
 0x1f3   :  { %3938 = vmatpush2.bf16.msra.mxu0 %v7397_v53  ;;  %v7446_v53 = vld [vmem:[%s10165_s3 + $0xc8] sm:$0xff]  }
 0x1f4   :  { %3979 = vmatpush2.bf16.msra.mxu1 %v7400_v31  ;;  %3939 = vmatprep.subr.bf16.mxu0 %v7405_v42  ;;  %v7447_v31 = vld [vmem:[%s10165_s3 + $0x48] sm:$0xff]  }
 0x1f5   :  { %3980 = vmatprep.subr.bf16.mxu1 %v7408_v55  ;;  %v7448_v42 = vld [vmem:[%s10165_s3 + $0x88] sm:$0xff]  }
 0x1f6   :  { %v7449_v55 = vld [vmem:[%s10165_s3 + $0x8] sm:$0xff]  }
 0x1f7   :  { %3940 = vmatpush2.bf16.msra.mxu0 %v7403_v56  ;;  %v7450_v56 = vld [vmem:[%s10165_s3 + $0xc0] sm:$0xff]  }
 0x1f8   :  { %3981 = vmatpush2.bf16.msra.mxu1 %v7406_v57  ;;  %3941 = vmatprep.subr.bf16.mxu0 %v7411_v58  ;;  %v7451_v57 = vld [vmem:[%s10165_s3 + $0x40] sm:$0xff]  }
 0x1f9   :  { %3982 = vmatprep.subr.bf16.mxu1 %v7414_v59  ;;  %v7452_v58 = vld [vmem:[%s10165_s3 + $0x80] sm:$0xff]  }
 0x1fa   :  { %v7453_v59 = vld [vmem:[%s10165_s3] sm:$0xff]  }
 0x1fb   :  { %3942 = vmatpush2.bf16.msra.mxu0 %v7409_v32  ;;  %v7454_v32 = vld [vmem:[%s10165_s3 + $0x1f8] sm:$0xff]  }
 0x1fc   :  { %3983 = vmatpush2.bf16.msra.mxu1 %v7412_v61  ;;  %3943 = vmatprep.subr.bf16.mxu0 %v7417_v62  ;;  %v7455_v61 = vld [vmem:[%s10165_s3 + $0x178] sm:$0xff]  }
 0x1fd   :  { %3984 = vmatprep.subr.bf16.mxu1 %v7420_v63 }
 0x1ff   :  { %3944 = vmatpush2.bf16.msra.mxu0 %v7415_v1 }
 0x200   :  { %3985 = vmatpush2.bf16.msra.mxu1 %v7418_v48  ;;  %6446 = vmatprep.subr.bf16.mxu0 %v7423_v60 }
 0x202   :  { %v3701_v5 = vpop.f32.mrf.mxu0  ;;  %3946 = vmatmul.mubr.bf16.vlgmr.msra.gmra.mxu0 %v728_v0 }
 0x203   :  { %v3742_v7 = vpop.f32.mrf.mxu1  ;;  %3987 = vmatmul.mubr.bf16.vlgmr.msra.gmra.mxu1 %v744_v4  ;;  %v3702_v49 = vadd.f32 %v3701_v5, %v9108_v3  ;;  %6447 = vmatpush3.bf16.msra.mxu0 %v7425_v33 }
 0x204   :  { %v3703_v43 = vpop.f32.mrf.mxu0  ;;  %6448 = vmatprep.subr.bf16.mxu0 %v7427_v9 }
 0x205   :  { %v3744_v8 = vpop.f32.mrf.mxu1  ;;  %v3743_v10 = vadd.f32 %v3742_v7, %v3702_v49  ;;  %v3704_v11 = vadd.f32 %v3703_v43, %v9111_v35  ;;  %v7422_v35 = vld [vmem:[%s10165_s3 + $0xf8] sm:$0xff]  }
 0x206   :  { %v3705_v12 = vpop.f32.mrf.mxu0  ;;  %6468 = vmatprep.subr.bf16.mxu1 %v7422_v35 }
 0x207   :  { %v3746_v54 = vpop.f32.mrf.mxu1  ;;  %v3745_v13 = vadd.f32 %v3744_v8, %v3704_v11  ;;  %6469 = vmatpush3.bf16.msra.mxu1 %v7424_v30  ;;  %6449 = vmatpush3.bf16.msra.mxu0 %v7429_v37 }
 0x208   :  { %v3706_v15 = vpop.f32.mrf.mxu0  ;;  %6470 = vmatprep.subr.bf16.mxu1 %v7426_v34  ;;  %6450 = vmatprep.subr.bf16.mxu0 %v7431_v38 }
 0x209   :  { %v3747_v16 = vpop.f32.mrf.mxu1 }
 0x20b   :  { %6471 = vmatpush3.bf16.msra.mxu1 %v7428_v36  ;;  %6451 = vmatpush3.bf16.msra.mxu0 %v7433_v40 }
 0x20c   :  { %6472 = vmatprep.subr.bf16.mxu1 %v7430_v29  ;;  %6452 = vmatprep.subr.bf16.mxu0 %v7435_v14 }
 0x20f   :  { %6473 = vmatpush3.bf16.msra.mxu1 %v7432_v39  ;;  %6453 = vmatpush3.bf16.msra.mxu0 %v7437_v45 }
 0x210   :  { %6474 = vmatprep.subr.bf16.mxu1 %v7434_v41  ;;  %6454 = vmatprep.subr.bf16.mxu0 %v7439_v47 }
 0x213   :  { %6475 = vmatpush3.bf16.msra.mxu1 %v7436_v44  ;;  %6455 = vmatpush3.bf16.msra.mxu0 %v7441_v51 }
 0x214   :  { %6476 = vmatprep.subr.bf16.mxu1 %v7438_v46  ;;  %6456 = vmatprep.subr.bf16.mxu0 %v7443_v25 }
 0x217   :  { %6477 = vmatpush3.bf16.msra.mxu1 %v7440_v50  ;;  %6457 = vmatpush3.bf16.msra.mxu0 %v7445_v52 }
 0x218   :  { %6478 = vmatprep.subr.bf16.mxu1 %v7442_v6  ;;  %6458 = vmatprep.subr.bf16.mxu0 %v7447_v31 }
 0x21b   :  { %6479 = vmatpush3.bf16.msra.mxu1 %v7444_v19  ;;  %6459 = vmatpush3.bf16.msra.mxu0 %v7449_v55 }
 0x21c   :  { %6480 = vmatprep.subr.bf16.mxu1 %v7446_v53  ;;  %6460 = vmatprep.subr.bf16.mxu0 %v7451_v57 }
 0x21f   :  { %6481 = vmatpush3.bf16.msra.mxu1 %v7448_v42  ;;  %6461 = vmatpush3.bf16.msra.mxu0 %v7453_v59 }
 0x220   :  { %6482 = vmatprep.subr.bf16.mxu1 %v7450_v56  ;;  %6490 = vmatprep.subr.bf16.mxu0 %v7455_v61 }
 0x223   :  { %6483 = vmatpush3.bf16.msra.mxu1 %v7452_v58 }
 0x224   :  { %6512 = vmatprep.subr.bf16.mxu1 %v7454_v32 }
 0x242   :  { %v3783_v17 = vpop.f32.mrf.mxu0 }
 0x243   :  { %v3824_v18 = vpop.f32.mrf.mxu1  ;;  %v3784_v20 = vadd.f32 %v3783_v17, %v3743_v10 }
 0x244   :  { %v3785_v21 = vpop.f32.mrf.mxu0 }
 0x245   :  { %v3826_v22 = vpop.f32.mrf.mxu1  ;;  %v9279_v23 = vadd.f32 %v3824_v18, %v3784_v20  ;;  %v3786_v24 = vadd.f32 %v3785_v21, %v3745_v13 }
 0x246   :  { %v3787_v26 = vpop.f32.mrf.mxu0 }
 0x247   :  { %v3828_v3 = vpop.f32.mrf.mxu1  ;;  %v9281_v2 = vadd.f32 %v3826_v22, %v3786_v24 }
 0x248   :  { %v3788_v27 = vpop.f32.mrf.mxu0 }
 0x249   :  { %v3829_v28 = vpop.f32.mrf.mxu1 }
 0x282   :  { %v3865_v62 = vpop.f32.mrf.mxu0 }
 0x283   :  { %v3906_v63 = vpop.f32.mrf.mxu1  ;;  %v3866_v0 = vadd.f32 %v3865_v62, %v9279_v23 }
 0x284   :  { %v3867_v1 = vpop.f32.mrf.mxu0 }
 0x285   :  { %v3908_v48 = vpop.f32.mrf.mxu1  ;;  %v3907_v4 = vadd.f32 %v3906_v63, %v3866_v0  ;;  %v3868_v8 = vadd.f32 %v3867_v1, %v9281_v2 }
 0x286   :  { %v3869_v5 = vpop.f32.mrf.mxu0 }
 0x287   :  { %v3910_v7 = vpop.f32.mrf.mxu1  ;;  %v3909_v12 = vadd.f32 %v3908_v48, %v3868_v8 }
 0x288   :  { %v3870_v49 = vpop.f32.mrf.mxu0 }
 0x289   :  { %v3911_v43 = vpop.f32.mrf.mxu1 }
 0x28a   :  { %v7480_v43 = vld [vmem:[%s10165_s3 + $0x188] sm:$0xff]  }
 0x2c2   :  { %v3947_v10 = vpop.f32.mrf.mxu0 }
 0x2c3   :  { %v3988_v11 = vpop.f32.mrf.mxu1  ;;  %v3948_v54 = vadd.f32 %v3947_v10, %v3907_v4 }
 0x2c4   :  { %v3949_v13 = vpop.f32.mrf.mxu0 }
 0x2c5   :  { %v3990_v15 = vpop.f32.mrf.mxu1  ;;  %v9387_v16 = vadd.f32 %v3988_v11, %v3948_v54  ;;  %v3950_v17 = vadd.f32 %v3949_v13, %v3909_v12  ;;  %v10174_v54 = vmov 0 }
 0x2c6   :  { %v3951_v18 = vpop.f32.mrf.mxu0 }
 0x2c7   :  { %v3992_v20 = vpop.f32.mrf.mxu1  ;;  %v6298_v21 = vmul.f32 -1.442695, %v9387_v16  ;;  %v6300_v22 = vadd.f32 2.2, %v9387_v16  ;;  %v9391_v23 = vadd.f32 %v3990_v15, %v3950_v17 }
 0x2c8   :  { %v3952_v24 = vpop.f32.mrf.mxu0 }
 0x2c9   :  { %v3993_v26 = vpop.f32.mrf.mxu1  ;;  %7566 = vpow2.f32 %v6298_v21  ;;  %v4011_v3 = vmul.f32 2.5, %v6300_v22  ;;  %v6299_v2 = vmul.f32 -1.442695, %v9391_v23  ;;  %v6301_v27 = vadd.f32 2.2, %v9391_v23 }
 0x2ca   :  { %v7460_v26 = vld [vmem:[%s10165_s3 + $0x1b0] sm:$0xff]  }
 0x2cb   :  { %v4019_v28 = vmax.f32 %v4011_v3, 0.0  ;;  %7568 = vpow2.f32 %v6299_v2  ;;  %v4012_v35 = vmul.f32 2.5, %v6301_v27  ;;  %vm4013_vm0 = vcmp.ge.f32.partialorder %v4011_v3, 0.0 }
 0x2cc   :  { %vm4015_vm1 = vcmp.lt.f32.partialorder %v4011_v3, 11.0 }
 0x2cd   :  { %v4021_v60 = vmin.f32 %v4019_v28, 11.0  ;;  %v4020_v30 = vmax.f32 %v4012_v35, 0.0  ;;  %vm4014_vm2 = vcmp.ge.f32.partialorder %v4012_v35, 0.0  ;;  %vm4016_vm3 = vcmp.lt.f32.partialorder %v4012_v35, 11.0  ;;  %vm9399_vm4 = vmand %vm4013_vm0, %vm4015_vm1  ;;  %v7484_v28 = vld [vmem:[%s10165_s3 + $0x180] sm:$0xff]  }
 0x2ce   :  { %vm9409_vm5 = vmand %vm4014_vm2, %vm4016_vm3 }
 0x2cf   :  { %v4023_v33 = vfloor.f32 %v4021_v60  ;;  %v4022_v34 = vmin.f32 %v4020_v30, 11.0  ;;  %v7487_v30 = vld [vmem:[%s10165_s3 + $0x278] sm:$0xff]  }
 0x2d1   :  { %v4025_v9 = vmin.f32 %v4023_v33, 10.0  ;;  %v4024_v36 = vfloor.f32 %v4022_v34 }
 0x2d3   :  { %v4027_v37 = vsub.f32 %v4021_v60, %v4025_v9  ;;  %v4026_v29 = vmin.f32 %v4024_v36, 10.0  ;;  %v6644_v45 = vtrunc.f32 %v4025_v9 }
 0x2d5   :  { %v4031_v38 = vmul.f32 %v4027_v37, %v4027_v37  ;;  %v4035_v39 = vsub.f32 1.0, %v4027_v37  ;;  %v4028_v41 = vsub.f32 %v4022_v34, %v4026_v29  ;;  %v6646_v14 = vtrunc.f32 %v4026_v29 }
 0x2d6   :  { %v7567_v40 = vpop.eup %7566  ;;  %v4059_v32 = vmul.f32 3.0, %v4027_v37  ;;  %v9403_v48 = vcvt.f32.s32 %v6644_v45 }
 0x2d7   :  { %v4001_v44 = vadd.f32 1.0, %v7567_v40  ;;  %v4033_v46 = vmul.f32 %v4031_v38, %v4027_v37  ;;  %v4037_v47 = vmul.f32 %v4035_v39, %v4035_v39  ;;  %v4045_v51 = vmul.f32 6.0, %v4031_v38 }
 0x2d8   :  { %v7569_v50 = vpop.eup %7568  ;;  %v4055_v6 = vmul.f32 3.0, %v4031_v38  ;;  %v4032_v25 = vmul.f32 %v4028_v41, %v4028_v41  ;;  %v4036_v19 = vsub.f32 1.0, %v4028_v41  ;;  %v9395_v31 = vcvt.f32.s32 %v6646_v14 }
 0x2d9   :  { %7570 = vrcp.f32 %v4001_v44  ;;  %v4043_v52 = vmul.f32 3.0, %v4033_v46  ;;  %v4053_v53 = vmul.f32 -3.0, %v4033_v46  ;;  %v4039_v42 = vmul.f32 %v4037_v47, %v4035_v39  ;;  %v7489_v47 = vld [vmem:[%s10165_s3 + $0x238] sm:$0xff]  }
 0x2da   :  { %v4002_v55 = vadd.f32 1.0, %v7569_v50  ;;  %v4034_v56 = vmul.f32 %v4032_v25, %v4028_v41  ;;  %v4038_v57 = vmul.f32 %v4036_v19, %v4036_v19  ;;  %v4046_v61 = vmul.f32 6.0, %v4032_v25 }
 0x2db   :  { %v4047_v58 = vsub.f32 %v4043_v52, %v4045_v51  ;;  %v4057_v59 = vadd.f32 %v4055_v6, %v4053_v53  ;;  %v4056_v7 = vmul.f32 3.0, %v4032_v25  ;;  %v9405_v49 = vmul.f32 0.16666667, %v4039_v42 }
 0x2dc   :  { %7572 = vrcp.f32 %v4002_v55  ;;  %v4040_v62 = vmul.f32 %v4038_v57, %v4036_v19  ;;  %v4044_v63 = vmul.f32 3.0, %v4034_v56  ;;  %v4054_v0 = vmul.f32 -3.0, %v4034_v56 }
 0x2dd   :  { %v4049_v4 = vadd.f32 4.0, %v4047_v58  ;;  %v4061_v5 = vadd.f32 %v4059_v32, %v4057_v59  ;;  %vm4070_vm6 = vcmp.eq.s32.totalorder %v9395_v31, 3  ;;  %v4060_v12 = vmul.f32 3.0, %v4028_v41 }
 0x2de   :  { %v4048_v8 = vsub.f32 %v4044_v63, %v4046_v61  ;;  %v4058_v11 = vadd.f32 %v4056_v7, %v4054_v0  ;;  %vm9416_vm7 = vmand %vm4070_vm6, %vm9409_vm5  ;;  %vm4078_vm8 = vcmp.eq.s32.totalorder %v9395_v31, 2  ;;  %v9421_v13 = vmul.f32 0.16666667, %v4040_v62  ;;  %v7456_v0 = vld [vmem:[%s10165_s3 + $0x1b8] sm:$0xff]  }
 0x2df   :  { %v4063_v10 = vadd.f32 1.0, %v4061_v5  ;;  %v10175_v54 = vsel %vm9416_vm7, 4294967295, %v10174_v54  ;;  %vm9425_vm9 = vmand %vm4078_vm8, %vm9409_vm5  ;;  %vm4086_vm10 = vcmp.eq.s32.totalorder %v9395_v31, 1  ;;  %vm4094_vm11 = vcmp.eq.s32.totalorder %v9395_v31, 0 }
 0x2e0   :  { %v4050_v15 = vadd.f32 4.0, %v4048_v8  ;;  %v9431_v18 = vmul.f32 0.16666667, %v4049_v4  ;;  %v4062_v20 = vadd.f32 %v4060_v12, %v4058_v11  ;;  %vm9435_vm12 = vmand %vm4086_vm10, %vm9409_vm5  ;;  %vm4069_vm13 = vcmp.eq.s32.totalorder %v9403_v48, 3  ;;  %v7457_v4 = vld [vmem:[%s10165_s3 + $0x138] sm:$0xff]   ;;  %v7458_v11 = vld [vmem:[%s10165_s3 + $0x1f0] sm:$0xff]  }
 0x2e1   :  { %vm4077_vm14 = vcmp.eq.s32.totalorder %v9403_v48, 2  ;;  %v9441_v22 = vmul.f32 0.16666667, %v4063_v10  ;;  %vm9447_vm15 = vmand %vm4094_vm11, %vm9409_vm5  ;;  %vm4085_vm0 = vcmp.eq.s32.totalorder %v9403_v48, 1  ;;  %v9452_v3 = vmul.f32 0.16666667, %v4033_v46 }
 0x2e2   :  { %v9443_v24 = vmul.f32 0.16666667, %v4050_v15  ;;  %v4064_v2 = vadd.f32 1.0, %v4062_v20  ;;  %v9454_v27 = vmul.f32 0.16666667, %v4034_v56  ;;  %vm9458_vm1 = vmand %vm4069_vm13, %vm9399_vm4  ;;  %vm4093_vm2 = vcmp.eq.s32.totalorder %v9403_v48, 0 }
 0x2e3   :  { %v4074_v35 = vsel %vm9416_vm7, %v9421_v13, 0.0  ;;  %vm9471_vm3 = vmand %vm4077_vm14, %vm9399_vm4  ;;  %vm4102_vm6 = vcmp.eq.s32.totalorder %v9395_v31, 4  ;;  %vm4122_vm8 = vcmp.eq.s32.totalorder %v9395_v31, 5  ;;  %v4073_v9 = vsel %vm9458_vm1, %v9405_v49, 0.0  ;;  %v7459_v15 = vld [vmem:[%s10165_s3 + $0x170] sm:$0xff]  }
 0x2e4   :  { %v4082_v60 = vsel %vm9425_vm9, %v9443_v24, 0.0  ;;  %v9477_v33 = vmul.f32 0.16666667, %v4064_v2  ;;  %v4081_v36 = vsel %vm9471_vm3, %v9431_v18, 0.0  ;;  %vm9489_vm10 = vmand %vm4085_vm0, %vm9399_vm4  ;;  %v10186_v37 = vmov 0  ;;  %v7461_v2 = vld [vmem:[%s10165_s3 + $0x130] sm:$0xff]  }
 0x2e5   :  { %v4084_v34 = vadd.f32 %v4082_v60, %v4074_v35  ;;  %v10187_v37 = vsel %vm9489_vm10, 4294967295, %v10186_v37  ;;  %v4083_v38 = vadd.f32 %v4081_v36, %v4073_v9  ;;  %v4089_v39 = vsel %vm9489_vm10, %v9441_v22, 0.0  ;;  %vm9498_vm11 = vmand %vm4093_vm2, %vm9399_vm4  ;;  %v7462_v60 = vld [vmem:[%s10165_s3 + $0x1e8] sm:$0xff]  }
 0x2e6   :  { %v7571_v29 = vpop.eup %7570  ;;  %v4110_v41 = vsel %vm9416_vm7, %v9443_v24, 0.0  ;;  %v4090_v44 = vsel %vm9435_vm12, %v9477_v33, 0.0  ;;  %v4098_v45 = vsel %vm9447_vm15, %v9454_v27, 0.0  ;;  %v4097_v46 = vsel %vm9498_vm11, %v9452_v3, 0.0  ;;  %vm9519_vm13 = vmand %vm4102_vm6, %vm9409_vm5 }
 0x2e7   :  { %v4007_v14 = vmul.f32 %v7571_v29, %v9387_v16  ;;  %v4092_v16 = vadd.f32 %v4090_v44, %v4084_v34  ;;  %v4091_v50 = vadd.f32 %v4089_v39, %v4083_v38  ;;  %vm9527_vm14 = vmand %vm4122_vm8, %vm9409_vm5  ;;  %v4130_v6 = vsel %vm9519_vm13, %v9443_v24, 0.0  ;;  %v7463_v34 = vld [vmem:[%s10165_s3 + $0x168] sm:$0xff]  }
 0x2e8   :  { %v4106_v25 = vsel %vm9519_vm13, %v9421_v13, 0.0  ;;  %v4126_v52 = vsel %vm9527_vm14, %v9421_v13, 0.0  ;;  %v4134_v53 = vsel %vm9416_vm7, %v9477_v33, 0.0  ;;  %v4114_v55 = vsel %vm9425_vm9, %v9477_v33, 0.0 }
 0x2e9   :  { %v7573_v19 = vpop.eup %7572  ;;  %v4112_v42 = vadd.f32 %v4110_v41, %v4106_v25  ;;  %v4100_v56 = vadd.f32 %v4098_v45, %v4092_v16  ;;  %v4099_v58 = vadd.f32 %v4097_v46, %v4091_v50  ;;  %v4132_v59 = vadd.f32 %v4130_v6, %v4126_v52  ;;  %v7464_v41 = vld [vmem:[%s10165_s3 + $0x1a8] sm:$0xff]   ;;  %v7466_v16 = vld [vmem:[%s10165_s3 + $0x1e0] sm:$0xff]  }
 0x2ea   :  { %v4008_v57 = vmul.f32 %v7573_v19, %v9391_v23  ;;  %v4118_v61 = vsel %vm9435_vm12, %v9454_v27, 0.0  ;;  %vm4101_vm15 = vcmp.eq.s32.totalorder %v9403_v48, 4  ;;  %v4241_v23 = vpack.c.bf16 %v4007_v14, %v4007_v14  ;;  %v7465_v14 = vld [vmem:[%s10165_s3 + $0x128] sm:$0xff]   ;;  %v7467_v50 = vld [vmem:[%s10165_s3 + $0x160] sm:$0xff]  }
 0x2eb   :  { %v4116_v32 = vadd.f32 %v4114_v55, %v4112_v42  ;;  %v4244_v62 = vpack.c.bf16 %v4100_v56, %v4100_v56  ;;  %v4136_v5 = vadd.f32 %v4134_v53, %v4132_v59  ;;  %v4243_v7 = vpack.c.bf16 %v4099_v58, %v4099_v58  ;;  %v7478_v45 = vld [vmem:[%s10165_s3 + $0x1c8] sm:$0xff]  }
 0x2ec   :  { %v4242_v63 = vpack.c.bf16 %v4008_v57, %v4008_v57  ;;  %v4138_v8 = vsel %vm9425_vm9, %v9454_v27, 0.0  ;;  %vm4121_vm12 = vcmp.eq.s32.totalorder %v9403_v48, 5  ;;  %vm9569_vm9 = vmand %vm4101_vm15, %vm9399_vm4  ;;  %v4109_v36 = vsel %vm9458_vm1, %v9431_v18, 0.0 }
 0x2ed   :  { %v4120_v10 = vadd.f32 %v4118_v61, %v4116_v32  ;;  %5483 = vmatprep.mubr.bf16.mxu1 %v4244_v62  ;;  %v4140_v12 = vadd.f32 %v4138_v8, %v4136_v5  ;;  %v4129_v35 = vsel %vm9569_vm9, %v9431_v18, 0.0  ;;  %vm9592_vm0 = vmand %vm4121_vm12, %vm9399_vm4  ;;  %v4133_v38 = vsel %vm9458_vm1, %v9441_v22, 0.0  ;;  %v7471_v8 = vld [vmem:[%s10165_s3 + $0x158] sm:$0xff]  }
 0x2ee   :  { %5443 = vmatprep.mubr.bf16.mxu0 %v4242_v63  ;;  %5484 = vmatmul.mubr.bf16.vlgmr.msra.gmra.mxu1 %v4243_v7  ;;  %v4125_v29 = vsel %vm9592_vm0, %v9405_v49, 0.0  ;;  %v4105_v40 = vsel %vm9569_vm9, %v9405_v49, 0.0  ;;  %vm4142_vm2 = vcmp.eq.s32.totalorder %v9395_v31, 6  ;;  %vm4141_vm6 = vcmp.eq.s32.totalorder %v9403_v48, 6  ;;  %v7470_v7 = vld [vmem:[%s10165_s3 + $0x1d8] sm:$0xff]  }
 0x2ef   :  { %5444 = vmatmul.mubr.bf16.vlgmr.msra.gmra.mxu0 %v4241_v23  ;;  %v4246_v20 = vpack.c.bf16 %v4120_v10, %v4120_v10  ;;  %6513 = vmatpush3.bf16.msra.mxu1 %v7456_v0  ;;  %v4248_v21 = vpack.c.bf16 %v4140_v12, %v4140_v12  ;;  %v9605_v39 = vadd.f32 %v4129_v35, %v4125_v29  ;;  %vm4162_vm8 = vcmp.eq.s32.totalorder %v9395_v31, 7  ;;  %vm9623_vm11 = vmand %vm4141_vm6, %vm9399_vm4  ;;  %v7468_v0 = vld [vmem:[%s10165_s3 + $0x1a0] sm:$0xff]  }
 0x2f0   :  { %6491 = vmatpush3.bf16.msra.mxu0 %v7457_v4  ;;  %6514 = vmatprep.subr.bf16.mxu1 %v7458_v11  ;;  %v9618_v44 = vadd.f32 %v4109_v36, %v4105_v40  ;;  %vm4161_vm15 = vcmp.eq.s32.totalorder %v9403_v48, 7  ;;  %v4173_v46 = vsel %vm9592_vm0, %v9441_v22, 0.0  ;;  %v4113_v6 = vsel %vm9471_vm3, %v9441_v22, 0.0  ;;  %vm9659_vm6 = vmand %vm4142_vm2, %vm9409_vm5  ;;  %v7469_v4 = vld [vmem:[%s10165_s3 + $0x120] sm:$0xff]   ;;  %v7472_v40 = vld [vmem:[%s10165_s3 + $0x198] sm:$0xff]  }
 0x2f1   :  { %5523 = vmatprep.mubr.bf16.mxu0 %v4246_v20  ;;  %5563 = vmatprep.mubr.bf16.mxu1 %v4248_v21  ;;  %vm9642_vm12 = vmand %vm4161_vm15, %vm9399_vm4  ;;  %v4169_v19 = vsel %vm9623_vm11, %v9431_v18, 0.0  ;;  %v4177_v52 = vsel %vm9569_vm9, %v9452_v3, 0.0  ;;  %v4145_v53 = vsel %vm9623_vm11, %v9405_v49, 0.0  ;;  %v4174_v55 = vsel %vm9527_vm14, %v9477_v33, 0.0 }
 0x2f2   :  { %6492 = vmatprep.subr.bf16.mxu0 %v7459_v15  ;;  %v4165_v56 = vsel %vm9642_vm12, %v9405_v49, 0.0  ;;  %v4149_v57 = vsel %vm9592_vm0, %v9431_v18, 0.0  ;;  %v4153_v58 = vsel %vm9569_vm9, %v9441_v22, 0.0  ;;  %vm9679_vm2 = vmand %vm4162_vm8, %vm9409_vm5  ;;  %v4170_v32 = vsel %vm9659_vm6, %v9443_v24, 0.0  ;;  %v7482_v15 = vld [vmem:[%s10165_s3 + $0x1c0] sm:$0xff]  }
 0x2f3   :  { %6515 = vmatpush3.bf16.msra.mxu1 %v7460_v26  ;;  %v4171_v61 = vadd.f32 %v4169_v19, %v4165_v56  ;;  %v4151_v62 = vadd.f32 %v4149_v57, %v4145_v53  ;;  %v4157_v63 = vsel %vm9458_vm1, %v9452_v3, 0.0  ;;  %v4146_v5 = vsel %vm9659_vm6, %v9421_v13, 0.0  ;;  %v7488_v56 = vld [vmem:[%s10165_s3 + $0x2b8] sm:$0xff]  }
 0x2f4   :  { %6493 = vmatpush3.bf16.msra.mxu0 %v7461_v2  ;;  %6516 = vmatprep.subr.bf16.mxu1 %v7462_v60  ;;  %vm4182_vm9 = vcmp.eq.s32.totalorder %v9395_v31, 8  ;;  %vm4202_vm8 = vcmp.eq.s32.totalorder %v9395_v31, 9  ;;  %v4214_v23 = vsel %vm9679_vm2, %v9477_v33, 0.0  ;;  %v4150_v10 = vsel %vm9527_vm14, %v9443_v24, 0.0 }
 0x2f5   :  { %6494 = vmatprep.subr.bf16.mxu0 %v7463_v34  ;;  %v4175_v11 = vadd.f32 %v4173_v46, %v4171_v61  ;;  %v4155_v12 = vadd.f32 %v4153_v58, %v4151_v62  ;;  %vm9714_vm15 = vmand %vm4182_vm9, %vm9409_vm5  ;;  %v4218_v20 = vsel %vm9659_vm6, %v9454_v27, 0.0  ;;  %v4190_v2 = vsel %vm9679_vm2, %v9443_v24, 0.0 }
 0x2f6   :  { %vm9723_vm7 = vmand %vm4202_vm8, %vm9409_vm5  ;;  %v4210_v21 = vsel %vm9714_vm15, %v9443_v24, 0.0  ;;  %v4186_v26 = vsel %vm9714_vm15, %v9421_v13, 0.0  ;;  %v4194_v35 = vsel %vm9659_vm6, %v9477_v33, 0.0  ;;  %v4198_v46 = vsel %vm9527_vm14, %v9454_v27, 0.0 }
 0x2f7   :  { %6517 = vmatpush3.bf16.msra.mxu1 %v7464_v41  ;;  %v9739_v60 = vadd.f32 %v4177_v52, %v4175_v11  ;;  %v9741_v34 = vadd.f32 %v4157_v63, %v4155_v12  ;;  %v4206_v36 = vsel %vm9723_vm7, %v9421_v13, 0.0  ;;  %v4192_v29 = vadd.f32 %v4190_v2, %v4186_v26  ;;  %v7473_v41 = vld [vmem:[%s10165_s3 + $0x118] sm:$0xff]   ;;  %v7479_v2 = vld [vmem:[%s10165_s3 + $0x148] sm:$0xff]  }
 0x2f8   :  { %6495 = vmatpush3.bf16.msra.mxu0 %v7465_v14  ;;  %6518 = vmatprep.subr.bf16.mxu1 %v7466_v16  ;;  %v4212_v14 = vadd.f32 %v4210_v21, %v4206_v36  ;;  %vm4181_vm9 = vcmp.eq.s32.totalorder %v9403_v48, 8  ;;  %vm4201_vm8 = vcmp.eq.s32.totalorder %v9403_v48, 9  ;;  %v7474_v16 = vld [vmem:[%s10165_s3 + $0x1d0] sm:$0xff]   ;;  %v4166_v19 = vsel %vm9679_vm2, %v9421_v13, 0.0 }
 0x2f9   :  { %6496 = vmatprep.subr.bf16.mxu0 %v7467_v50  ;;  %v7475_v50 = vld [vmem:[%s10165_s3 + $0x150] sm:$0xff]   ;;  %v4152_v52 = vadd.f32 %v4150_v10, %v4146_v5  ;;  %v4196_v53 = vadd.f32 %v4194_v35, %v4192_v29  ;;  %vm9768_vm10 = vmand %vm4181_vm9, %vm9399_vm4  ;;  %v4213_v57 = vsel %vm9642_vm12, %v9441_v22, 0.0  ;;  %v4217_v63 = vsel %vm9623_vm11, %v9452_v3, 0.0 }
 0x2fa   :  { %v4216_v58 = vadd.f32 %v4214_v23, %v4212_v14  ;;  %vm9777_vm14 = vmand %vm4201_vm8, %vm9399_vm4  ;;  %v4209_v62 = vsel %vm9768_vm10, %v9431_v18, 0.0  ;;  %v4189_v23 = vsel %vm9642_vm12, %v9431_v18, 0.0  ;;  %v7477_v10 = vld [vmem:[%s10165_s3 + $0x110] sm:$0xff]   ;;  %v4197_v26 = vsel %vm9592_vm0, %v9452_v3, 0.0 }
 0x2fb   :  { %6519 = vmatpush3.bf16.msra.mxu1 %v7468_v0  ;;  %v4185_v0 = vsel %vm9768_vm10, %v9405_v49, 0.0  ;;  %v4205_v5 = vsel %vm9777_vm14, %v9405_v49, 0.0  ;;  %v4230_v9 = vsel %vm9723_vm7, %v9443_v24, 0.0  ;;  %v4234_v35 = vsel %vm9714_vm15, %v9477_v33, 0.0 }
 0x2fc   :  { %6497 = vmatpush3.bf16.msra.mxu0 %v7469_v4  ;;  %6520 = vmatprep.subr.bf16.mxu1 %v7470_v7  ;;  %v9790_v4 = vadd.f32 %v4198_v46, %v4196_v53  ;;  %v4193_v7 = vsel %vm9623_vm11, %v9441_v22, 0.0  ;;  %v9807_v11 = vadd.f32 %v4218_v20, %v4216_v58  ;;  %v4211_v12 = vadd.f32 %v4209_v62, %v4205_v5  ;;  %v7494_v5 = vld [vmem:[%s10165_s3 + $0x2e8] sm:$0xff]  }
 0x2fd   :  { %6498 = vmatprep.subr.bf16.mxu0 %v7471_v8  ;;  %v7476_v8 = vld [vmem:[%s10165_s3 + $0x190] sm:$0xff]   ;;  %v4191_v21 = vadd.f32 %v4189_v23, %v4185_v0  ;;  %v4154_v20 = vsel %vm9519_vm13, %v9477_v33, 0.0  ;;  %vm4222_vm11 = vcmp.eq.s32.totalorder %v9395_v31, 10  ;;  %v4172_v36 = vadd.f32 %v4170_v32, %v4166_v19  ;;  %v7495_v23 = vld [vmem:[%s10165_s3 + $0x268] sm:$0xff]  }
 0x2fe   :  { %v4215_v29 = vadd.f32 %v4213_v57, %v4211_v12  ;;  %vm4224_vm0 = vmand %vm4222_vm11, %vm9409_vm5  ;;  %v4238_v31 = vsel %vm9679_vm2, %v9454_v27, 0.0  ;;  %vm4221_vm7 = vcmp.eq.s32.totalorder %v9403_v48, 10  ;;  %v4229_v42 = vsel %vm9777_vm14, %v9431_v18, 0.0  ;;  %v7493_v0 = vld [vmem:[%s10165_s3 + $0x230] sm:$0xff]   ;;  %v7499_v12 = vld [vmem:[%s10165_s3 + $0x260] sm:$0xff]  }
 0x2ff   :  { %6521 = vmatpush3.bf16.msra.mxu1 %v7472_v40  ;;  %v4195_v40 = vadd.f32 %v4193_v7, %v4191_v21  ;;  %v4226_v17 = vsel %vm4224_vm0, %v9421_v13, 0.0  ;;  %v4233_v24 = vsel %vm9768_vm10, %v9441_v22, 0.0  ;;  %v7481_v13 = vld [vmem:[%s10165_s3 + $0x108] sm:$0xff]   ;;  %vm4223_vm5 = vmand %vm4221_vm7, %vm9399_vm4  ;;  %v4237_v18 = vsel %vm9642_vm12, %v9452_v3, 0.0  ;;  %v7485_v22 = vld [vmem:[%s10165_s3 + $0x100] sm:$0xff]  }
 0x300   :  { %6499 = vmatpush3.bf16.msra.mxu0 %v7473_v41  ;;  %6522 = vmatprep.subr.bf16.mxu1 %v7474_v16  ;;  %v9851_v59 = vadd.f32 %v4217_v63, %v4215_v29  ;;  %v4232_v32 = vadd.f32 %v4230_v9, %v4226_v17  ;;  %v7483_v41 = vld [vmem:[%s10165_s3 + $0x140] sm:$0xff]   ;;  %v4135_v1 = vadd.f32 %v4133_v38, %v9605_v39  ;;  %v4225_v14 = vsel %vm4223_vm5, %v9405_v49, 0.0  ;;  %v7492_v63 = vld [vmem:[%s10165_s3 + $0x2b0] sm:$0xff]   ;;  %v7496_v7 = vld [vmem:[%s10165_s3 + $0x2a8] sm:$0xff]  }
 0x301   :  { %6500 = vmatprep.subr.bf16.mxu0 %v7475_v50  ;;  %v9853_v48 = vadd.f32 %v4197_v26, %v4195_v40  ;;  %v4115_v25 = vadd.f32 %v4113_v6, %v9618_v44  ;;  %v4176_v46 = vadd.f32 %v4174_v55, %v4172_v36  ;;  %v4231_v50 = vadd.f32 %v4229_v42, %v4225_v14  ;;  %v7486_v44 = vld [vmem:[%s10165_s3 + $0x2f8] sm:$0xff]   ;;  %v7500_v21 = vld [vmem:[%s10165_s3 + $0x2a0] sm:$0xff]   ;;  %v7507_v36 = vld [vmem:[%s10165_s3 + $0x250] sm:$0xff]  }
 0x302   :  { %v4236_v16 = vadd.f32 %v4234_v35, %v4232_v32  ;;  %v4156_v19 = vadd.f32 %v4154_v20, %v4152_v52  ;;  %v4137_v49 = vsel %vm9471_vm3, %v9452_v3, 0.0  ;;  %vm10215_vm1 = vnez %v10187_v37  ;;  %v7501_v26 = vld [vmem:[%s10165_s3 + $0x220] sm:$0xff]   ;;  %v7504_v20 = vld [vmem:[%s10165_s3 + $0x298] sm:$0xff]   ;;  %v7506_v35 = vld [vmem:[%s10165_s3 + $0x2d0] sm:$0xff]  }
 0x303   :  { %6523 = vmatpush3.bf16.msra.mxu1 %v7476_v8  ;;  %v4117_v33 = vsel %vm10215_vm1, %v9452_v3, 0.0  ;;  %v4235_v38 = vadd.f32 %v4233_v24, %v4231_v50  ;;  %v4139_v39 = vadd.f32 %v4137_v49, %v4135_v1  ;;  %v4178_v37 = vsel %vm9519_vm13, %v9454_v27, 0.0  ;;  %v7497_v8 = vld [vmem:[%s10165_s3 + $0x228] sm:$0xff]   ;;  %v7505_v9 = vld [vmem:[%s10165_s3 + $0x218] sm:$0xff]   ;;  %v7508_v29 = vld [vmem:[%s10165_s3 + $0x290] sm:$0xff]  }
 0x304   :  { %6501 = vmatpush3.bf16.msra.mxu0 %v7477_v10  ;;  %6524 = vmatprep.subr.bf16.mxu1 %v7478_v45  ;;  %v9893_v51 = vadd.f32 %v4238_v31, %v4236_v16  ;;  %v4119_v6 = vadd.f32 %v4117_v33, %v4115_v25  ;;  %v4180_v3 = vadd.f32 %v4178_v37, %v4176_v46  ;;  %v7498_v10 = vld [vmem:[%s10165_s3 + $0x2e0] sm:$0xff]   ;;  %v7502_v45 = vld [vmem:[%s10165_s3 + $0x2d8] sm:$0xff]   ;;  %v7509_v40 = vld [vmem:[%s10165_s3 + $0x210] sm:$0xff]  }
 0x305   :  { %6502 = vmatprep.subr.bf16.mxu0 %v7479_v2  ;;  %vm10216_vm3 = vnez %v10175_v54  ;;  %v9907_v52 = vadd.f32 %v4237_v18, %v4235_v38  ;;  %v4247_v57 = vpack.c.bf16 %v4139_v39, %v4139_v39  ;;  %v7490_v54 = vld [vmem:[%s10165_s3 + $0x2f0] sm:$0xff]   ;;  %v7503_v2 = vld [vmem:[%s10165_s3 + $0x258] sm:$0xff]   ;;  %v7510_v31 = vld [vmem:[%s10165_s3 + $0x2c8] sm:$0xff]   ;;  %v4251_v25 = vpack.c.bf16 %v9739_v60, %v9739_v60 }
 0x306   :  { %v4158_v55 = vsel %vm10216_vm3, %v9454_v27, 0.0  ;;  %v4245_v58 = vpack.c.bf16 %v4119_v6, %v4119_v6  ;;  %v4252_v61 = vpack.c.bf16 %v4180_v3, %v4180_v3  ;;  %v7491_v27 = vld [vmem:[%s10165_s3 + $0x270] sm:$0xff]   ;;  %v7511_v17 = vld [vmem:[%s10165_s3 + $0x248] sm:$0xff]   ;;  %v7516_v32 = vld [vmem:[%s10165_s3 + $0x280] sm:$0xff]   ;;  %v4249_v46 = vpack.c.bf16 %v9741_v34, %v9741_v34 }
 0x307   :  { %6525 = vmatpush3.bf16.msra.mxu1 %v7480_v43  ;;  %v4160_v53 = vadd.f32 %v4158_v55, %v4156_v19  ;;  %v7512_v42 = vld [vmem:[%s10165_s3 + $0x288] sm:$0xff]   ;;  %v7514_v43 = vld [vmem:[%s10165_s3 + $0x2c0] sm:$0xff]   ;;  %v7520_v1 = vld [vmem:[%s10165_s3 + $0x3b8] sm:$0xff]   ;;  %v4256_v50 = vpack.c.bf16 %v9807_v11, %v9807_v11  ;;  %v4254_v19 = vpack.c.bf16 %v9790_v4, %v9790_v4 }
 0x308   :  { %6503 = vmatpush3.bf16.msra.mxu0 %v7481_v13  ;;  %6526 = vmatprep.subr.bf16.mxu1 %v7482_v15  ;;  %v7513_v24 = vld [vmem:[%s10165_s3 + $0x208] sm:$0xff]   ;;  %v7515_v13 = vld [vmem:[%s10165_s3 + $0x240] sm:$0xff]   ;;  %v7518_v15 = vld [vmem:[%s10165_s3 + $0x3f8] sm:$0xff]  }
 0x309   :  { %6504 = vmatprep.subr.bf16.mxu0 %v7483_v41  ;;  %v4250_v62 = vpack.c.bf16 %v4160_v53, %v4160_v53  ;;  %v7517_v18 = vld [vmem:[%s10165_s3 + $0x200] sm:$0xff]   ;;  %v7519_v41 = vld [vmem:[%s10165_s3 + $0x378] sm:$0xff]   ;;  %v7522_v16 = vld [vmem:[%s10165_s3 + $0x3f0] sm:$0xff]  }
 0x30a   :  { %v7521_v14 = vld [vmem:[%s10165_s3 + $0x338] sm:$0xff]   ;;  %v7523_v60 = vld [vmem:[%s10165_s3 + $0x370] sm:$0xff]   ;;  %v7526_v11 = vld [vmem:[%s10165_s3 + $0x3e8] sm:$0xff]  }
 0x30b   :  { %6527 = vmatpush3.bf16.msra.mxu1 %v7484_v28  ;;  %v7524_v34 = vld [vmem:[%s10165_s3 + $0x3b0] sm:$0xff]   ;;  %v7527_v4 = vld [vmem:[%s10165_s3 + $0x368] sm:$0xff]   ;;  %v7530_v33 = vld [vmem:[%s10165_s3 + $0x3e0] sm:$0xff]  }
 0x30c   :  { %6505 = vmatpush3.bf16.msra.mxu0 %v7485_v22  ;;  %6556 = vmatprep.subr.bf16.mxu1 %v7486_v44  ;;  %v7525_v28 = vld [vmem:[%s10165_s3 + $0x330] sm:$0xff]   ;;  %v7528_v22 = vld [vmem:[%s10165_s3 + $0x3a8] sm:$0xff]   ;;  %v7531_v38 = vld [vmem:[%s10165_s3 + $0x360] sm:$0xff]  }
 0x30d   :  { %6534 = vmatprep.subr.bf16.mxu0 %v7487_v30  ;;  %v7529_v49 = vld [vmem:[%s10165_s3 + $0x328] sm:$0xff]   ;;  %v7532_v39 = vld [vmem:[%s10165_s3 + $0x3a0] sm:$0xff]   ;;  %v7534_v6 = vld [vmem:[%s10165_s3 + $0x3d8] sm:$0xff]  }
 0x30e   :  { %5564 = vmatmul.mubr.bf16.vlgmr.msra.gmra.mxu1 %v4247_v57  ;;  %v7533_v44 = vld [vmem:[%s10165_s3 + $0x320] sm:$0xff]   ;;  %v7535_v30 = vld [vmem:[%s10165_s3 + $0x358] sm:$0xff]   ;;  %v7538_v55 = vld [vmem:[%s10165_s3 + $0x3d0] sm:$0xff]  }
 0x30f   :  { %5524 = vmatmul.mubr.bf16.vlgmr.msra.gmra.mxu0 %v4245_v58  ;;  %6557 = vmatpush3.bf16.msra.mxu1 %v7488_v56  ;;  %v7536_v37 = vld [vmem:[%s10165_s3 + $0x398] sm:$0xff]   ;;  %v7539_v53 = vld [vmem:[%s10165_s3 + $0x350] sm:$0xff]   ;;  %v7542_v58 = vld [vmem:[%s10165_s3 + $0x3c8] sm:$0xff]  }
 0x310   :  { %5643 = vmatprep.mubr.bf16.mxu1 %v4252_v61  ;;  %6535 = vmatpush3.bf16.msra.mxu0 %v7489_v47  ;;  %v7537_v3 = vld [vmem:[%s10165_s3 + $0x318] sm:$0xff]   ;;  %v7540_v56 = vld [vmem:[%s10165_s3 + $0x390] sm:$0xff]   ;;  %v7543_v47 = vld [vmem:[%s10165_s3 + $0x348] sm:$0xff]  }
 0x311   :  { %5603 = vmatprep.mubr.bf16.mxu0 %v4250_v62  ;;  %6558 = vmatprep.subr.bf16.mxu1 %v7490_v54  ;;  %v7541_v57 = vld [vmem:[%s10165_s3 + $0x310] sm:$0xff]   ;;  %v7544_v61 = vld [vmem:[%s10165_s3 + $0x388] sm:$0xff]   ;;  %v7547_v62 = vld [vmem:[%s10165_s3 + $0x340] sm:$0xff]  }
 0x312   :  { %6536 = vmatprep.subr.bf16.mxu0 %v7491_v27  ;;  %v7545_v54 = vld [vmem:[%s10165_s3 + $0x308] sm:$0xff]   ;;  %v7546_v27 = vld [vmem:[%s10165_s3 + $0x3c0] sm:$0xff]  }
 0x313   :  { %6559 = vmatpush3.bf16.msra.mxu1 %v7492_v63  ;;  %v7548_v63 = vld [vmem:[%s10165_s3 + $0x380] sm:$0xff]  }
 0x314   :  { %6537 = vmatpush3.bf16.msra.mxu0 %v7493_v0  ;;  %6560 = vmatprep.subr.bf16.mxu1 %v7494_v5  ;;  %v7549_v0 = vld [vmem:[%s10165_s3 + $0x300] sm:$0xff]   ;;  %v7550_v5 = vld [vmem:[%s10165_s3 + $0x478] sm:$0xff]  }
 0x315   :  { %6538 = vmatprep.subr.bf16.mxu0 %v7495_v23  ;;  %v4255_v23 = vpack.c.bf16 %v9851_v59, %v9851_v59  ;;  %v7553_v59 = vld [vmem:[%s10165_s3 + $0x430] sm:$0xff]  }
 0x317   :  { %6561 = vmatpush3.bf16.msra.mxu1 %v7496_v7  ;;  %v7551_v7 = vld [vmem:[%s10165_s3 + $0x438] sm:$0xff]  }
 0x318   :  { %6539 = vmatpush3.bf16.msra.mxu0 %v7497_v8  ;;  %6562 = vmatprep.subr.bf16.mxu1 %v7498_v10  ;;  %v4253_v8 = vpack.c.bf16 %v9853_v48, %v9853_v48  ;;  %v7552_v10 = vld [vmem:[%s10165_s3 + $0x470] sm:$0xff]   ;;  %v7554_v48 = vld [vmem:[%s10165_s3 + $0x468] sm:$0xff]  }
 0x319   :  { %6540 = vmatprep.subr.bf16.mxu0 %v7499_v12  ;;  %v4258_v12 = vpack.c.bf16 %v9893_v51, %v9893_v51  ;;  %v7556_v51 = vld [vmem:[%s10165_s3 + $0x460] sm:$0xff]  }
 0x31b   :  { %6563 = vmatpush3.bf16.msra.mxu1 %v7500_v21  ;;  %v7555_v21 = vld [vmem:[%s10165_s3 + $0x428] sm:$0xff]  }
 0x31c   :  { %6541 = vmatpush3.bf16.msra.mxu0 %v7501_v26  ;;  %6564 = vmatprep.subr.bf16.mxu1 %v7502_v45  ;;  %v7557_v26 = vld [vmem:[%s10165_s3 + $0x420] sm:$0xff]   ;;  %v7558_v45 = vld [vmem:[%s10165_s3 + $0x458] sm:$0xff]  }
 0x31d   :  { %6542 = vmatprep.subr.bf16.mxu0 %v7503_v2  ;;  %v7559_v2 = vld [vmem:[%s10165_s3 + $0x418] sm:$0xff]  }
 0x31f   :  { %6565 = vmatpush3.bf16.msra.mxu1 %v7504_v20  ;;  %v7560_v20 = vld [vmem:[%s10165_s3 + $0x450] sm:$0xff]  }
 0x320   :  { %6543 = vmatpush3.bf16.msra.mxu0 %v7505_v9  ;;  %6566 = vmatprep.subr.bf16.mxu1 %v7506_v35  ;;  %v7561_v9 = vld [vmem:[%s10165_s3 + $0x410] sm:$0xff]   ;;  %v7562_v35 = vld [vmem:[%s10165_s3 + $0x448] sm:$0xff]  }
 0x321   :  { %6544 = vmatprep.subr.bf16.mxu0 %v7507_v36  ;;  %v7563_v36 = vld [vmem:[%s10165_s3 + $0x408] sm:$0xff]  }
 0x323   :  { %6567 = vmatpush3.bf16.msra.mxu1 %v7508_v29  ;;  %v7564_v29 = vld [vmem:[%s10165_s3 + $0x440] sm:$0xff]  }
 0x324   :  { %6545 = vmatpush3.bf16.msra.mxu0 %v7509_v40  ;;  %6568 = vmatprep.subr.bf16.mxu1 %v7510_v31  ;;  %v7565_v40 = vld [vmem:[%s10165_s3 + $0x400] sm:$0xff]   ;;  %v4257_v31 = vpack.c.bf16 %v9907_v52, %v9907_v52  ;;  %s7597_s3 = smov [#allocation2]  }
 0x325   :  { %6546 = vmatprep.subr.bf16.mxu0 %v7511_v17  ;;  %s5778_s30 = sshll.u32 %s7597_s3, 4  ;;  %s5779_s30 = int_to_ptr.vmem [resolvable:$true] %s5778_s30 }
 0x326   :  { %s7574_s5 = scalar_lea.vmem %s5779_s30, 32  ;;  %p7579_p1 = scmp.lt.s32.totalorder %s5779_s30, %s5779_s30 }
 0x327   :  { %6569 = vmatpush3.bf16.msra.mxu1 %v7512_v42  ;;  %p7575_p0 = scmp.ne.s32.totalorder %s5779_s30, %s7574_s5  ;;  %p7580_p2 = scmp.lt.s32.totalorder %s7574_s5, %s7574_s5 }
 0x328   :  { %6547 = vmatpush3.bf16.msra.mxu0 %v7513_v24  ;;  %6570 = vmatprep.subr.bf16.mxu1 %v7514_v43 }
 0x329   :  { %6548 = vmatprep.subr.bf16.mxu0 %v7515_v13  ;;  %p7581_p3 = por %p7580_p2, %p7579_p1 }
 0x32b   :  { %6571 = vmatpush3.bf16.msra.mxu1 %v7516_v32  ;;  %p7582_p4 = pnand %p7581_p3, %p7575_p0 }
 0x32c   :  { %6549 = vmatpush3.bf16.msra.mxu0 %v7517_v18  ;;  %6600 = vmatprep.subr.bf16.mxu1 %v7518_v15 }
 0x32d   :  { %6578 = vmatprep.subr.bf16.mxu0 %v7519_v41 }
 0x32e   :  { %5644 = vmatmul.mubr.bf16.vlgmr.msra.gmra.mxu1 %v4251_v25 }
 0x32f   :  { %5604 = vmatmul.mubr.bf16.vlgmr.msra.gmra.mxu0 %v4249_v46  ;;  %6601 = vmatpush3.bf16.msra.mxu1 %v7520_v1 }
 0x330   :  { %5723 = vmatprep.mubr.bf16.mxu1 %v4256_v50  ;;  %6579 = vmatpush3.bf16.msra.mxu0 %v7521_v14 }
 0x331   :  { %5683 = vmatprep.mubr.bf16.mxu0 %v4254_v19  ;;  %6602 = vmatprep.subr.bf16.mxu1 %v7522_v16 }
 0x332   :  { %6580 = vmatprep.subr.bf16.mxu0 %v7523_v60 }
 0x333   :  { %6603 = vmatpush3.bf16.msra.mxu1 %v7524_v34 }
 0x334   :  { %6581 = vmatpush3.bf16.msra.mxu0 %v7525_v28  ;;  %6604 = vmatprep.subr.bf16.mxu1 %v7526_v11 }
 0x335   :  { %6582 = vmatprep.subr.bf16.mxu0 %v7527_v4 }
 0x337   :  { %6605 = vmatpush3.bf16.msra.mxu1 %v7528_v22 }
 0x338   :  { %6583 = vmatpush3.bf16.msra.mxu0 %v7529_v49  ;;  %6606 = vmatprep.subr.bf16.mxu1 %v7530_v33 }
 0x339   :  { %6584 = vmatprep.subr.bf16.mxu0 %v7531_v38 }
 0x33b   :  { %6607 = vmatpush3.bf16.msra.mxu1 %v7532_v39 }
 0x33c   :  { %6585 = vmatpush3.bf16.msra.mxu0 %v7533_v44  ;;  %6608 = vmatprep.subr.bf16.mxu1 %v7534_v6 }
 0x33d   :  { %6586 = vmatprep.subr.bf16.mxu0 %v7535_v30 }
 0x33f   :  { %6609 = vmatpush3.bf16.msra.mxu1 %v7536_v37 }
 0x340   :  { %6587 = vmatpush3.bf16.msra.mxu0 %v7537_v3  ;;  %6610 = vmatprep.subr.bf16.mxu1 %v7538_v55 }
 0x341   :  { %6588 = vmatprep.subr.bf16.mxu0 %v7539_v53 }
 0x343   :  { %6611 = vmatpush3.bf16.msra.mxu1 %v7540_v56 }
 0x344   :  { %6589 = vmatpush3.bf16.msra.mxu0 %v7541_v57  ;;  %6612 = vmatprep.subr.bf16.mxu1 %v7542_v58 }
 0x345   :  { %6590 = vmatprep.subr.bf16.mxu0 %v7543_v47 }
 0x347   :  { %6613 = vmatpush3.bf16.msra.mxu1 %v7544_v61 }
 0x348   :  { %6591 = vmatpush3.bf16.msra.mxu0 %v7545_v54  ;;  %6614 = vmatprep.subr.bf16.mxu1 %v7546_v27 }
 0x349   :  { %6592 = vmatprep.subr.bf16.mxu0 %v7547_v62 }
 0x34b   :  { %6615 = vmatpush3.bf16.msra.mxu1 %v7548_v63 }
 0x34c   :  { %6593 = vmatpush3.bf16.msra.mxu0 %v7549_v0 }
 0x34d   :  { %6622 = vmatprep.subr.bf16.mxu0 %v7550_v5 }
 0x34e   :  { %5724 = vmatmul.mubr.bf16.vlgmr.msra.gmra.mxu1 %v4255_v23 }
 0x34f   :  { %5684 = vmatmul.mubr.bf16.vlgmr.msra.gmra.mxu0 %v4253_v8 }
 0x350   :  { %6623 = vmatpush3.bf16.msra.mxu0 %v7551_v7  ;;  %5763 = vmatprep.mubr.bf16.mxu0 %v4258_v12 }
 0x351   :  { %6624 = vmatprep.subr.bf16.mxu0 %v7552_v10 }
 0x354   :  { %6625 = vmatpush3.bf16.msra.mxu0 %v7553_v59 }
 0x355   :  { %6626 = vmatprep.subr.bf16.mxu0 %v7554_v48 }
 0x358   :  { %6627 = vmatpush3.bf16.msra.mxu0 %v7555_v21 }
 0x359   :  { %6628 = vmatprep.subr.bf16.mxu0 %v7556_v51 }
 0x35c   :  { %6629 = vmatpush3.bf16.msra.mxu0 %v7557_v26 }
 0x35d   :  { %6630 = vmatprep.subr.bf16.mxu0 %v7558_v45 }
 0x360   :  { %6631 = vmatpush3.bf16.msra.mxu0 %v7559_v2 }
 0x361   :  { %6632 = vmatprep.subr.bf16.mxu0 %v7560_v20 }
 0x364   :  { %6633 = vmatpush3.bf16.msra.mxu0 %v7561_v9 }
 0x365   :  { %6634 = vmatprep.subr.bf16.mxu0 %v7562_v35 }
 0x368   :  { %6635 = vmatpush3.bf16.msra.mxu0 %v7563_v36 }
 0x369   :  { %6636 = vmatprep.subr.bf16.mxu0 %v7564_v29 }
 0x36c   :  { %6637 = vmatpush3.bf16.msra.mxu0 %v7565_v40 }
 0x36f   :  { %5764 = vmatmul.mubr.bf16.vlgmr.msra.gmra.mxu0 %v4257_v31 }
 0x3ae   :  { %v6484_v17 = vpop.f32.mrf.mxu1 }
 0x3af   :  { %v6462_v42 = vpop.f32.mrf.mxu0 }
 0x3b0   :  { %v6485_v24 = vpop.f32.mrf.mxu1 }
 0x3b1   :  { %v6463_v43 = vpop.f32.mrf.mxu0  ;;  %v6486_v13 = vadd.f32 %v6485_v24, %v6484_v17 }
 0x3b2   :  { %v6464_v32 = vadd.f32 %v6463_v43, %v6462_v42  ;;  %v6487_v18 = vpop.f32.mrf.mxu1 }
 0x3b3   :  { %v6465_v15 = vpop.f32.mrf.mxu0 }
 0x3b4   :  { %v5486_v41 = vadd.f32 %v6486_v13, %v6464_v32  ;;  %v6488_v1 = vpop.f32.mrf.mxu1 }
 0x3b5   :  { %v6466_v25 = vpop.f32.mrf.mxu0 }
 0x3ce   :  { %v6528_v14 = vpop.f32.mrf.mxu1 }
 0x3cf   :  { %v6506_v46 = vpop.f32.mrf.mxu0 }
 0x3d0   :  { %v6529_v16 = vpop.f32.mrf.mxu1 }
 0x3d1   :  { %v6507_v50 = vpop.f32.mrf.mxu0  ;;  %v6530_v60 = vadd.f32 %v6529_v16, %v6528_v14 }
 0x3d2   :  { %v6508_v19 = vadd.f32 %v6507_v50, %v6506_v46  ;;  %v6531_v34 = vpop.f32.mrf.mxu1 }
 0x3d3   :  { %v6509_v52 = vpop.f32.mrf.mxu0 }
 0x3d4   :  { %v5526_v28 = vadd.f32 %v6508_v19, %v5486_v41  ;;  %v6532_v11 = vpop.f32.mrf.mxu1 }
 0x3d5   :  { %v6510_v4 = vpop.f32.mrf.mxu0 }
 0x3d6   :  { %v5566_v22 = vadd.f32 %v6530_v60, %v5526_v28 }
 0x3ee   :  { %v6572_v49 = vpop.f32.mrf.mxu1 }
 0x3ef   :  { %v6550_v33 = vpop.f32.mrf.mxu0 }
 0x3f0   :  { %v6573_v38 = vpop.f32.mrf.mxu1 }
 0x3f1   :  { %v6551_v39 = vpop.f32.mrf.mxu0  ;;  %v6574_v62 = vadd.f32 %v6573_v38, %v6572_v49 }
 0x3f2   :  { %v6575_v44 = vpop.f32.mrf.mxu1  ;;  %v6552_v54 = vadd.f32 %v6551_v39, %v6550_v33 }
 0x3f3   :  { %v6553_v6 = vpop.f32.mrf.mxu0 }
 0x3f4   :  { %v6576_v30 = vpop.f32.mrf.mxu1  ;;  %v5606_v27 = vadd.f32 %v6552_v54, %v5566_v22 }
 0x3f5   :  { %v6554_v37 = vpop.f32.mrf.mxu0 }
 0x3f6   :  { %v5646_v0 = vadd.f32 %v6574_v62, %v5606_v27 }
 0x40e   :  { %v6616_v3 = vpop.f32.mrf.mxu1 }
 0x40f   :  { %v6594_v55 = vpop.f32.mrf.mxu0 }
 0x410   :  { %v6617_v53 = vpop.f32.mrf.mxu1 }
 0x411   :  { %v6595_v56 = vpop.f32.mrf.mxu0  ;;  %v6618_v7 = vadd.f32 %v6617_v53, %v6616_v3 }
 0x412   :  { %v6619_v57 = vpop.f32.mrf.mxu1  ;;  %v6596_v63 = vadd.f32 %v6595_v56, %v6594_v55 }
 0x413   :  { %v6597_v58 = vpop.f32.mrf.mxu0 }
 0x414   :  { %v6620_v47 = vpop.f32.mrf.mxu1  ;;  %v5686_v5 = vadd.f32 %v6596_v63, %v5646_v0 }
 0x415   :  { %v6598_v61 = vpop.f32.mrf.mxu0 }
 0x416   :  { %v5726_v12 = vadd.f32 %v6618_v7, %v5686_v5 }
 0x42f   :  { %v6638_v23 = vpop.f32.mrf.mxu0 }
 0x431   :  { %v6639_v8 = vpop.f32.mrf.mxu0 }
 0x432   :  { %v6640_v10 = vadd.f32 %v6639_v8, %v6638_v23 }
 0x433   :  { %v6641_v59 = vpop.f32.mrf.mxu0 }
 0x434   :  { %v5766_v48 = vadd.f32 %v6640_v10, %v5726_v12 }
 0x435   :  { %v6642_v21 = vpop.f32.mrf.mxu0 }
 0x436   :  { %5771 = vst [vmem:[#allocation2] sm:$0x3] %v5766_v48 }
 0x437   :  { %7585 = shalt.err (!%p7582_p4)
}
 0x438   :  { %5781 = dma.vmem_to_hbm [thread:$0]  %s5779_s30, 32, %s10166_s4, [#allocation3]  }
 0x439   :  { %7594 = dma.done.wait [#allocation3], 32  }
 0x43a   :  { %7595 = vsyncadd [#allocation3], 4294967264 }
 0x43b   :  { %5785 = vsyncpa [#allocation3], 1 }

</bundles_post_ra>
